<compile_context>
chip_gen: v6e
topology: v6e:2x2x1
jax: 0.10.0
libtpu: 0.0.40
codegen_flags: <defaults>
</compile_context>

<pallas_src>
import jax
import jax.numpy as jnp
from jax.experimental import pallas as pl
from jax.experimental.pallas import tpu as pltpu  # noqa: F401  (kept for TPU-specific tuning)

C_IN, C_MID, C_OUT = 192, 56, 336
BN_EPS = 1e-5


def _fused_kernel(x_ref, w1_ref, g1_ref, w2_ref, g2_ref, b2_ref, o_ref):
    # x_ref: (C_IN, M) f32 ; w1_ref: (C_MID, C_IN) bf16 ; w2_ref: (C_OUT, C_MID) bf16
    # g1_ref: (C_MID, 1) f32 ; g2_ref/b2_ref: (C_OUT, 1) f32 ; o_ref: (C_OUT, M) f32
    m = x_ref.shape[-1]          # static block size (N*H*W)
    inv_m = 1.0 / m

    # conv2d33 (1x1) == channel-mixing matmul. Cast activations to bf16 in VMEM
    # (no extra HBM traffic) so the MXU runs its native bf16 path; accumulate f32.
    x = x_ref[...].astype(jnp.bfloat16)
    y1 = jnp.dot(w1_ref[...], x, preferred_element_type=jnp.float32)      # (C_MID, M)

    # batchnorm2d19 (training -> biased batch stats over N*H*W == lane axis),
    # single pass: var = E[y^2] - mean^2.
    mean1 = jnp.sum(y1, axis=-1, keepdims=True) * inv_m                   # (C_MID, 1)
    var1 = jnp.sum(y1 * y1, axis=-1, keepdims=True) * inv_m - mean1 * mean1
    d1 = g1_ref[...] * jax.lax.rsqrt(var1 + BN_EPS)                       # (C_MID, 1)
    # BN1's additive shift (beta1 - mean1*d1) is constant across the pixel axis;
    # the following 1x1 conv turns it into a per-output-channel constant which
    # BN2's mean subtraction removes exactly -> safe to drop (output unchanged).
    y1s = (y1 * d1).astype(jnp.bfloat16)                                  # (C_MID, M)

    # conv2d34 (1x1)
    y2 = jnp.dot(w2_ref[...], y1s, preferred_element_type=jnp.float32)    # (C_OUT, M)

    # batchnorm2d20
    mean2 = jnp.sum(y2, axis=-1, keepdims=True) * inv_m                   # (C_OUT, 1)
    var2 = jnp.sum(y2 * y2, axis=-1, keepdims=True) * inv_m - mean2 * mean2
    d2 = g2_ref[...] * jax.lax.rsqrt(var2 + BN_EPS)                       # (C_OUT, 1)
    o_ref[...] = ((y2 - mean2) * d2 + b2_ref[...]).astype(o_ref.dtype)


def fused_conv_bn_conv_bn(x_nchw, w1, g1, b1, w2, g2, b2):
    """x_nchw: (N, 192, H, W) f32; weights in PyTorch layout. Returns (N, 336, H, W) f32.

    Note: b1 (BN1 beta) provably does not affect the forward output — it becomes a
    per-output-channel constant after conv2d34 and is removed by BN2's centering —
    so it is accepted for interface parity but unused.
    """
    N, C, H, W = x_nchw.shape
    assert C == C_IN, (C, C_IN)
    M = N * H * W

    # Channels-first 2-D view. For N == 1 this is a free reshape of NCHW
    # (no transpose); channel dims (192/56/336) are all multiples of 8 so the
    # sublane axis is clean, and M sits on the lane axis (lane-dense output).
    if N == 1:
        x2d = x_nchw.reshape(C_IN, M)
    else:
        # TODO(synk): N > 1 still needs one small batch transpose to reach (C, N*H*W).
        x2d = jnp.transpose(x_nchw.reshape(N, C_IN, H * W), (1, 0, 2)).reshape(C_IN, M)

    # PyTorch (C_out, C_in, 1, 1) -> (C_out, C_in); bf16 for the MXU (tiny arrays).
    w1m = w1.reshape(C_MID, C_IN).astype(jnp.bfloat16)
    w2m = w2.reshape(C_OUT, C_MID).astype(jnp.bfloat16)
    g1c = g1.reshape(C_MID, 1)
    g2c = g2.reshape(C_OUT, 1)
    b2c = b2.reshape(C_OUT, 1)
    del b1  # cancels exactly through BN2's mean subtraction (see kernel comment)

    full = lambda shape: pl.BlockSpec(shape, lambda: (0,) * len(shape))

    cost = pl.CostEstimate(
        flops=2 * M * (C_IN * C_MID + C_MID * C_OUT),
        transcendentals=C_MID + C_OUT,
        bytes_accessed=4 * M * (C_IN + C_OUT)
        + 2 * (C_IN * C_MID + C_MID * C_OUT)
        + 4 * (C_MID + 2 * C_OUT),
    )

    # Whole problem (M = 784 pixels, < 4 MiB working set) fits VMEM easily:
    # run gridless on one TensorCore and leave the default VMEM limit alone.
    # TODO(synk): for much larger M, tile the pixel axis on a "parallel" grid
    # with partial-sum + finalize BN so v7x's 2 TCs / 32 MiB scoped VMEM are used.
    out2d = pl.pallas_call(
        _fused_kernel,
        out_shape=jax.ShapeDtypeStruct((C_OUT, M), jnp.float32),
        grid=(),
        in_specs=[
            full((C_IN, M)),
            full((C_MID, C_IN)),
            full((C_MID, 1)),
            full((C_OUT, C_MID)),
            full((C_OUT, 1)),
            full((C_OUT, 1)),
        ],
        out_specs=full((C_OUT, M)),
        cost_estimate=cost,
    )(x2d, w1m, g1c, w2m, g2c, b2c)

    # (C_OUT, M) -> NCHW (free reshape for N == 1).
    if N == 1:
        return out2d.reshape(1, C_OUT, H, W)
    return jnp.transpose(out2d.reshape(C_OUT, N, H * W), (1, 0, 2)).reshape(N, C_OUT, H, W)


if __name__ == "__main__":
    key = jax.random.PRNGKey(0)
    kx, k1, k2, kg1, kb1, kg2, kb2 = jax.random.split(key, 7)

    # Input consistent with the module: [1, 192, 28, 28]
    x = jax.random.normal(kx, (1, C_IN, 28, 28), dtype=jnp.float32)

    # Deterministic synthetic parameters (PyTorch layouts)
    w1 = jax.random.normal(k1, (C_MID, C_IN, 1, 1), dtype=jnp.float32) * 0.05
    w2 = jax.random.normal(k2, (C_OUT, C_MID, 1, 1), dtype=jnp.float32) * 0.05
    g1 = 1.0 + 0.1 * jax.random.normal(kg1, (C_MID,), dtype=jnp.float32)
    b1 = 0.1 * jax.random.normal(kb1, (C_MID,), dtype=jnp.float32)
    g2 = 1.0 + 0.1 * jax.random.normal(kg2, (C_OUT,), dtype=jnp.float32)
    b2 = 0.1 * jax.random.normal(kb2, (C_OUT,), dtype=jnp.float32)

    out = fused_conv_bn_conv_bn(x, w1, g1, b1, w2, g2, b2)
    jax.block_until_ready(out)
    assert out.shape == (1, C_OUT, 28, 28), out.shape
    print("KERNEL_OK")
</pallas_src>

<mosaic_0001>
module attributes {stable_mosaic.version = 11 : i64} {
  func.func @_fused_kernel(%arg0: memref<192x784xf32, #tpu.memory_space<vmem>>, %arg1: memref<56x192xbf16, #tpu.memory_space<vmem>>, %arg2: memref<56x1xf32, #tpu.memory_space<vmem>>, %arg3: memref<336x56xbf16, #tpu.memory_space<vmem>>, %arg4: memref<336x1xf32, #tpu.memory_space<vmem>>, %arg5: memref<336x1xf32, #tpu.memory_space<vmem>>, %arg6: memref<336x784xf32, #tpu.memory_space<vmem>>) attributes {dimension_semantics = [], scalar_prefetch = 0 : i64, scratch_operands = 0 : i64, tpu.core_type = #tpu.core_type<tc>} {
    %c0 = arith.constant 0 : index
    %c0_0 = arith.constant 0 : index
    %0 = vector.load %arg0[%c0, %c0_0] : memref<192x784xf32, #tpu.memory_space<vmem>>, vector<192x784xf32>
    %1 = arith.truncf %0 : vector<192x784xf32> to vector<192x784xbf16>
    %c0_1 = arith.constant 0 : index
    %c0_2 = arith.constant 0 : index
    %2 = vector.load %arg1[%c0_1, %c0_2] : memref<56x192xbf16, #tpu.memory_space<vmem>>, vector<56x192xbf16>
    %cst = arith.constant dense<0.000000e+00> : vector<56x784xf32>
    %3 = tpu.matmul %2, %1, %cst {dimension_numbers = #tpu.dot_dimension_numbers<[1], [0], [0], [1], [0, 0, 1, 1], [], []>} : vector<56x192xbf16>, vector<192x784xbf16>, vector<56x784xf32> -> vector<56x784xf32>
    %cst_3 = arith.constant dense<0.000000e+00> : vector<56xf32>
    %4 = vector.multi_reduction <add>, %3, %cst_3 [1] : vector<56x784xf32> to vector<56xf32>
    %5 = vector.shape_cast %4 : vector<56xf32> to vector<56x1xf32>
    %cst_4 = arith.constant 0.00127551018 : f32
    %6 = vector.broadcast %cst_4 : f32 to vector<56x1xf32>
    %7 = arith.mulf %5, %6 : vector<56x1xf32>
    %8 = arith.mulf %3, %3 : vector<56x784xf32>
    %cst_5 = arith.constant dense<0.000000e+00> : vector<56xf32>
    %9 = vector.multi_reduction <add>, %8, %cst_5 [1] : vector<56x784xf32> to vector<56xf32>
    %10 = vector.shape_cast %9 : vector<56xf32> to vector<56x1xf32>
    %cst_6 = arith.constant 0.00127551018 : f32
    %11 = vector.broadcast %cst_6 : f32 to vector<56x1xf32>
    %12 = arith.mulf %10, %11 : vector<56x1xf32>
    %13 = arith.mulf %7, %7 : vector<56x1xf32>
    %14 = arith.subf %12, %13 : vector<56x1xf32>
    %c0_7 = arith.constant 0 : index
    %c0_8 = arith.constant 0 : index
    %15 = vector.load %arg2[%c0_7, %c0_8] : memref<56x1xf32, #tpu.memory_space<vmem>>, vector<56x1xf32>
    %cst_9 = arith.constant 9.99999974E-6 : f32
    %16 = vector.broadcast %cst_9 : f32 to vector<56x1xf32>
    %17 = arith.addf %14, %16 : vector<56x1xf32>
    %18 = math.rsqrt %17 : vector<56x1xf32>
    %19 = arith.mulf %15, %18 : vector<56x1xf32>
    %20 = vector.broadcast %19 : vector<56x1xf32> to vector<56x784xf32>
    %21 = arith.mulf %3, %20 : vector<56x784xf32>
    %22 = arith.truncf %21 : vector<56x784xf32> to vector<56x784xbf16>
    %c0_10 = arith.constant 0 : index
    %c0_11 = arith.constant 0 : index
    %23 = vector.load %arg3[%c0_10, %c0_11] : memref<336x56xbf16, #tpu.memory_space<vmem>>, vector<336x56xbf16>
    %cst_12 = arith.constant dense<0.000000e+00> : vector<336x784xf32>
    %24 = tpu.matmul %23, %22, %cst_12 {dimension_numbers = #tpu.dot_dimension_numbers<[1], [0], [0], [1], [0, 0, 1, 1], [], []>} : vector<336x56xbf16>, vector<56x784xbf16>, vector<336x784xf32> -> vector<336x784xf32>
    %cst_13 = arith.constant dense<0.000000e+00> : vector<336xf32>
    %25 = vector.multi_reduction <add>, %24, %cst_13 [1] : vector<336x784xf32> to vector<336xf32>
    %26 = vector.shape_cast %25 : vector<336xf32> to vector<336x1xf32>
    %cst_14 = arith.constant 0.00127551018 : f32
    %27 = vector.broadcast %cst_14 : f32 to vector<336x1xf32>
    %28 = arith.mulf %26, %27 : vector<336x1xf32>
    %29 = arith.mulf %24, %24 : vector<336x784xf32>
    %cst_15 = arith.constant dense<0.000000e+00> : vector<336xf32>
    %30 = vector.multi_reduction <add>, %29, %cst_15 [1] : vector<336x784xf32> to vector<336xf32>
    %31 = vector.shape_cast %30 : vector<336xf32> to vector<336x1xf32>
    %cst_16 = arith.constant 0.00127551018 : f32
    %32 = vector.broadcast %cst_16 : f32 to vector<336x1xf32>
    %33 = arith.mulf %31, %32 : vector<336x1xf32>
    %34 = arith.mulf %28, %28 : vector<336x1xf32>
    %35 = arith.subf %33, %34 : vector<336x1xf32>
    %c0_17 = arith.constant 0 : index
    %c0_18 = arith.constant 0 : index
    %36 = vector.load %arg4[%c0_17, %c0_18] : memref<336x1xf32, #tpu.memory_space<vmem>>, vector<336x1xf32>
    %cst_19 = arith.constant 9.99999974E-6 : f32
    %37 = vector.broadcast %cst_19 : f32 to vector<336x1xf32>
    %38 = arith.addf %35, %37 : vector<336x1xf32>
    %39 = math.rsqrt %38 : vector<336x1xf32>
    %40 = arith.mulf %36, %39 : vector<336x1xf32>
    %41 = vector.broadcast %28 : vector<336x1xf32> to vector<336x784xf32>
    %42 = arith.subf %24, %41 : vector<336x784xf32>
    %43 = vector.broadcast %40 : vector<336x1xf32> to vector<336x784xf32>
    %44 = arith.mulf %42, %43 : vector<336x784xf32>
    %c0_20 = arith.constant 0 : index
    %c0_21 = arith.constant 0 : index
    %45 = vector.load %arg5[%c0_20, %c0_21] : memref<336x1xf32, #tpu.memory_space<vmem>>, vector<336x1xf32>
    %46 = vector.broadcast %45 : vector<336x1xf32> to vector<336x784xf32>
    %47 = arith.addf %44, %46 : vector<336x784xf32>
    %c0_22 = arith.constant 0 : index
    %c0_23 = arith.constant 0 : index
    %48 = vector.load %arg6[%c0_22, %c0_23] : memref<336x784xf32, #tpu.memory_space<vmem>>, vector<336x784xf32>
    tpu.vector_store %arg6[%c0_22, %c0_23], %47 {strides = array<i32>} : memref<336x784xf32, #tpu.memory_space<vmem>>, vector<336x784xf32>,
    return
  }
}

</mosaic_0001>

<bundles_post_ra>
// kernel: tpu_custom_call.1
= control target key start
LH: loop header
LB: loop body
LE: loop exit
PB: predicated region body
PF: predicated region fallthrough
CT: control target
= control target key end

     0   :  { %11 = vsyncpa [#allocation3], 0  ;;  %s10610_s0 = inlined_call_operand.hbm [shape: f32[192,784], index: 0, kind: input, shape index: {}]   ;;  %s10611_s1 = inlined_call_operand.hbm [shape: bf16[56,192], index: 1, kind: input, shape index: {}]   ;;  %s10612_s2 = inlined_call_operand.vmem [shape: f32[56,1], index: 2, kind: input, shape index: {}]   ;;  %s10613_s3 = inlined_call_operand.vmem [shape: bf16[336,56], index: 3, kind: input, shape index: {}]   ;;  %s10614_s4 = inlined_call_operand.vmem [shape: f32[336,1], index: 4, kind: input, shape index: {}]   ;;  %s10615_s5 = inlined_call_operand.vmem [shape: f32[336,1], index: 5, kind: input, shape index: {}]   ;;  %s10616_s6 = inlined_call_operand.hbm [shape: f32[336,784], index: 6, kind: output, shape index: {}]  }
   0x1   :  { %12 = vsyncpa [#allocation6], 0 }
   0x2   :  { %13 = vsyncpa [#allocation4], 0  ;;  %s5641_s21 = smov [#allocation2]  }
   0x3   :  { %s19_s22 = sshll.u32 %s5641_s21, 4  ;;  %s20_s22 = int_to_ptr.vmem [resolvable:$true] %s19_s22 }
   0x4   :  { %s5583_s23 = scalar_lea.vmem %s20_s22, 21504  ;;  %p5588_p1 = scmp.lt.s32.totalorder %s20_s22, %s20_s22 }
   0x5   :  { %p5584_p0 = scmp.ne.s32.totalorder %s20_s22, %s5583_s23  ;;  %p5589_p2 = scmp.lt.s32.totalorder %s5583_s23, %s5583_s23 }
   0x7   :  { %p5590_p3 = por %p5589_p2, %p5588_p1 }
   0x9   :  { %p5591_p4 = pnand %p5590_p3, %p5584_p0 }
   0xb   :  { %5594 = shalt.err (!%p5591_p4)
}
   0xc   :  { %s5642_s24 = smov 896   ;;  %s5643_s25 = smov 56  }
   0xd   :  { %25 = dma.hbm_to_vmem [thread:$0]  %s10610_s0, 21504, %s20_s22, [#allocation3], %s5642_s24, %s5642_s24, %s5643_s25  }
   0xe   :  { %s5644_s28 = smov [#allocation5]  }
   0xf   :  { %s31_s29 = sshll.u32 %s5644_s28, 4  ;;  %s32_s29 = int_to_ptr.vmem [resolvable:$true] %s31_s29 }
  0x10   :  { %s5603_s30 = scalar_lea.vmem %s32_s29, 896  ;;  %p5608_p6 = scmp.lt.s32.totalorder %s32_s29, %s32_s29 }
  0x11   :  { %p5604_p5 = scmp.ne.s32.totalorder %s32_s29, %s5603_s30  ;;  %p5609_p7 = scmp.lt.s32.totalorder %s5603_s30, %s5603_s30 }
  0x13   :  { %p5610_p8 = por %p5609_p7, %p5608_p6 }
  0x15   :  { %p5611_p9 = pnand %p5610_p8, %p5604_p5 }
  0x17   :  { %5614 = shalt.err (!%p5611_p9)
}
  0x18   :  { %s5645_s7 = smov 128   ;;  %s5646_s8 = smov 8  }
  0x19   :  { %37 = dma.hbm_to_vmem [thread:$0]  %s10611_s1, 896, %s32_s29, [#allocation6], %s5645_s7, %s5645_s7, %s5646_s8  }
  0x1a   :  { %5635 = dma.done.wait [#allocation3], 21504  }
  0x1b   :  { %5636 = vsyncadd [#allocation3], 4294945792 }
  0x1c   :  { %5637 = dma.done.wait [#allocation6], 896  }
  0x1d   :  { %5638 = vsyncadd [#allocation6], 4294966400  ;;  %v10617_v0 = vmov 0   ;;  %v152_v1 = vld [vmem:[#allocation2 + $0x318] sm:$0xff]  ;;  %v159_v2 = vld [vmem:[#allocation2 + $0x350] sm:$0xff]  ;;  %vm345_vm0 = vcmask 523264  }
  0x1e   :  { %5444 = vset.pattern.permute.xlu1 %v10617_v0  ;;  %5443 = vset.pattern.permute.xlu0 %v10617_v0  ;;  %v154_v3 = vld [vmem:[#allocation2 + $0x328] sm:$0xff]  ;;  %v271_v4 = vpack.c.bf16 %v159_v2, %v152_v1  ;;  %v161_v5 = vld [vmem:[#allocation2 + $0x360] sm:$0xff]  ;;  %v151_v6 = vld [vmem:[#allocation2 + $0x310] sm:$0xff]  ;;  %vm640_vm1 = vcmask 130048   ;;  %vm1190_vm2 = vcmask 1043456   ;;  %vm1126_vm3 = vcmask 457728  }
  0x1f   :  { %v158_v7 = vld [vmem:[#allocation2 + $0x348] sm:$0xff]  ;;  %v273_v8 = vpack.c.bf16 %v161_v5, %v154_v3  ;;  %v153_v10 = vld [vmem:[#allocation2 + $0x320] sm:$0xff]  ;;  %v160_v11 = vld [vmem:[#allocation2 + $0x358] sm:$0xff]  ;;  %vm5649_vm4 = vmmov 0  }
  0x20   :  { %v270_v9 = vpack.c.bf16 %v158_v7, %v151_v6  ;;  %v138_v12 = vld [vmem:[#allocation2 + $0x2a8] sm:$0xff]  ;;  %358 = vmatprep.subr.bf16.mxu0 %v271_v4  ;;  %v272_v13 = vpack.c.bf16 %v160_v11, %v153_v10  ;;  %v145_v14 = vld [vmem:[#allocation2 + $0x2e0] sm:$0xff]  ;;  %v140_v15 = vld [vmem:[#allocation2 + $0x2b8] sm:$0xff] }
  0x21   :  { %v147_v16 = vld [vmem:[#allocation2 + $0x2f0] sm:$0xff]  ;;  %429 = vmatprep.subr.bf16.mxu1 %v273_v8  ;;  %v264_v17 = vpack.c.bf16 %v145_v14, %v138_v12  ;;  %v137_v19 = vld [vmem:[#allocation2 + $0x2a0] sm:$0xff]  ;;  %v144_v20 = vld [vmem:[#allocation2 + $0x2d8] sm:$0xff] }
  0x22   :  { %359 = vmatpush1.bf16.msra.mxu0 %v270_v9  ;;  %v266_v18 = vpack.c.bf16 %v147_v16, %v140_v15  ;;  %v139_v21 = vld [vmem:[#allocation2 + $0x2b0] sm:$0xff]  ;;  %430 = vmatpush1.bf16.msra.mxu1 %v272_v13  ;;  %v263_v22 = vpack.c.bf16 %v144_v20, %v137_v19  ;;  %v146_v23 = vld [vmem:[#allocation2 + $0x2e8] sm:$0xff]  ;;  %v124_v24 = vld [vmem:[#allocation2 + $0x238] sm:$0xff] }
  0x23   :  { %v131_v25 = vld [vmem:[#allocation2 + $0x270] sm:$0xff]  ;;  %360 = vmatprep.subr.bf16.mxu0 %v264_v17  ;;  %v265_v26 = vpack.c.bf16 %v146_v23, %v139_v21  ;;  %v126_v28 = vld [vmem:[#allocation2 + $0x248] sm:$0xff]  ;;  %v133_v29 = vld [vmem:[#allocation2 + $0x280] sm:$0xff] }
  0x24   :  { %431 = vmatprep.subr.bf16.mxu1 %v266_v18  ;;  %v257_v27 = vpack.c.bf16 %v131_v25, %v124_v24  ;;  %v123_v30 = vld [vmem:[#allocation2 + $0x230] sm:$0xff]  ;;  %v259_v31 = vpack.c.bf16 %v133_v29, %v126_v28  ;;  %v130_v32 = vld [vmem:[#allocation2 + $0x268] sm:$0xff]  ;;  %v125_v33 = vld [vmem:[#allocation2 + $0x240] sm:$0xff] }
  0x25   :  { %v132_v34 = vld [vmem:[#allocation2 + $0x278] sm:$0xff]  ;;  %v256_v35 = vpack.c.bf16 %v130_v32, %v123_v30  ;;  %v110_v36 = vld [vmem:[#allocation2 + $0x1c8] sm:$0xff]  ;;  %v117_v37 = vld [vmem:[#allocation2 + $0x200] sm:$0xff] }
  0x26   :  { %361 = vmatpush1.bf16.msra.mxu0 %v263_v22  ;;  %v112_v38 = vld [vmem:[#allocation2 + $0x1d8] sm:$0xff]  ;;  %432 = vmatpush1.bf16.msra.mxu1 %v265_v26  ;;  %v258_v39 = vpack.c.bf16 %v132_v34, %v125_v33  ;;  %v250_v40 = vpack.c.bf16 %v117_v37, %v110_v36  ;;  %v119_v41 = vld [vmem:[#allocation2 + $0x210] sm:$0xff]  ;;  %v109_v42 = vld [vmem:[#allocation2 + $0x1c0] sm:$0xff] }
  0x27   :  { %362 = vmatprep.subr.bf16.mxu0 %v257_v27  ;;  %v116_v43 = vld [vmem:[#allocation2 + $0x1f8] sm:$0xff]  ;;  %433 = vmatprep.subr.bf16.mxu1 %v259_v31  ;;  %v252_v44 = vpack.c.bf16 %v119_v41, %v112_v38  ;;  %v111_v45 = vld [vmem:[#allocation2 + $0x1d0] sm:$0xff]  ;;  %v118_v46 = vld [vmem:[#allocation2 + $0x208] sm:$0xff] }
  0x28   :  { %v96_v47 = vld [vmem:[#allocation2 + $0x158] sm:$0xff]  ;;  %v103_v48 = vld [vmem:[#allocation2 + $0x190] sm:$0xff]  ;;  %v98_v49 = vld [vmem:[#allocation2 + $0x168] sm:$0xff]  ;;  %v249_v51 = vpack.c.bf16 %v116_v43, %v109_v42  ;;  %v251_v52 = vpack.c.bf16 %v118_v46, %v111_v45 }
  0x29   :  { %v105_v50 = vld [vmem:[#allocation2 + $0x1a0] sm:$0xff]  ;;  %v243_v53 = vpack.c.bf16 %v103_v48, %v96_v47  ;;  %v95_v54 = vld [vmem:[#allocation2 + $0x150] sm:$0xff]  ;;  %v102_v55 = vld [vmem:[#allocation2 + $0x188] sm:$0xff] }
  0x2a   :  { %363 = vmatpush1.bf16.msra.mxu0 %v256_v35  ;;  %434 = vmatpush1.bf16.msra.mxu1 %v258_v39  ;;  %v97_v56 = vld [vmem:[#allocation2 + $0x160] sm:$0xff]  ;;  %v245_v57 = vpack.c.bf16 %v105_v50, %v98_v49  ;;  %v104_v58 = vld [vmem:[#allocation2 + $0x198] sm:$0xff]  ;;  %v82_v59 = vld [vmem:[#allocation2 + $0xe8] sm:$0xff]  ;;  %v242_v63 = vpack.c.bf16 %v102_v55, %v95_v54 }
  0x2b   :  { %364 = vmatprep.subr.bf16.mxu0 %v250_v40  ;;  %435 = vmatprep.subr.bf16.mxu1 %v252_v44  ;;  %v89_v60 = vld [vmem:[#allocation2 + $0x120] sm:$0xff]  ;;  %v84_v61 = vld [vmem:[#allocation2 + $0xf8] sm:$0xff]  ;;  %v91_v62 = vld [vmem:[#allocation2 + $0x130] sm:$0xff]  ;;  %v244_v1 = vpack.c.bf16 %v104_v58, %v97_v56 }
  0x2c   :  { %v236_v2 = vpack.c.bf16 %v89_v60, %v82_v59  ;;  %v81_v3 = vld [vmem:[#allocation2 + $0xe0] sm:$0xff]  ;;  %v88_v4 = vld [vmem:[#allocation2 + $0x118] sm:$0xff]  ;;  %v83_v5 = vld [vmem:[#allocation2 + $0xf0] sm:$0xff]  ;;  %v238_v6 = vpack.c.bf16 %v91_v62, %v84_v61 }
  0x2d   :  { %v90_v7 = vld [vmem:[#allocation2 + $0x128] sm:$0xff]  ;;  %v68_v8 = vld [vmem:[#allocation2 + $0x78] sm:$0xff]  ;;  %v75_v9 = vld [vmem:[#allocation2 + $0xb0] sm:$0xff]  ;;  %v235_v12 = vpack.c.bf16 %v88_v4, %v81_v3 }
  0x2e   :  { %365 = vmatpush1.bf16.msra.mxu0 %v249_v51  ;;  %436 = vmatpush1.bf16.msra.mxu1 %v251_v52  ;;  %v70_v10 = vld [vmem:[#allocation2 + $0x88] sm:$0xff]  ;;  %v77_v11 = vld [vmem:[#allocation2 + $0xc0] sm:$0xff]  ;;  %v237_v13 = vpack.c.bf16 %v90_v7, %v83_v5  ;;  %v229_v14 = vpack.c.bf16 %v75_v9, %v68_v8  ;;  %v67_v15 = vld [vmem:[#allocation2 + $0x70] sm:$0xff] }
  0x2f   :  { %366 = vmatprep.subr.bf16.mxu0 %v243_v53  ;;  %437 = vmatprep.subr.bf16.mxu1 %v245_v57  ;;  %v74_v16 = vld [vmem:[#allocation2 + $0xa8] sm:$0xff]  ;;  %v69_v17 = vld [vmem:[#allocation2 + $0x80] sm:$0xff]  ;;  %v231_v18 = vpack.c.bf16 %v77_v11, %v70_v10  ;;  %v76_v19 = vld [vmem:[#allocation2 + $0xb8] sm:$0xff] }
  0x30   :  { %v54_v20 = vld [vmem:[#allocation2 + $0x8] sm:$0xff]  ;;  %v61_v21 = vld [vmem:[#allocation2 + $0x40] sm:$0xff]  ;;  %v56_v22 = vld [vmem:[#allocation2 + $0x18] sm:$0xff]  ;;  %v228_v24 = vpack.c.bf16 %v74_v16, %v67_v15  ;;  %v230_v25 = vpack.c.bf16 %v76_v19, %v69_v17 }
  0x31   :  { %v63_v23 = vld [vmem:[#allocation2 + $0x50] sm:$0xff]  ;;  %v222_v26 = vpack.c.bf16 %v61_v21, %v54_v20  ;;  %v53_v27 = vld [vmem:[#allocation2] sm:$0xff]  ;;  %v60_v28 = vld [vmem:[#allocation2 + $0x38] sm:$0xff] }
  0x32   :  { %367 = vmatpush1.bf16.msra.mxu0 %v242_v63  ;;  %438 = vmatpush1.bf16.msra.mxu1 %v244_v1  ;;  %v55_v29 = vld [vmem:[#allocation2 + $0x10] sm:$0xff]  ;;  %v224_v30 = vpack.c.bf16 %v63_v23, %v56_v22  ;;  %v62_v31 = vld [vmem:[#allocation2 + $0x48] sm:$0xff]  ;;  %v208_v32 = vld [vmem:[#allocation2 + $0x4d8] sm:$0xff]  ;;  %v221_v36 = vpack.c.bf16 %v60_v28, %v53_v27 }
  0x33   :  { %368 = vmatprep.subr.bf16.mxu0 %v236_v2  ;;  %439 = vmatprep.subr.bf16.mxu1 %v238_v6  ;;  %v215_v33 = vld [vmem:[#allocation2 + $0x510] sm:$0xff]  ;;  %v210_v34 = vld [vmem:[#allocation2 + $0x4e8] sm:$0xff]  ;;  %v217_v35 = vld [vmem:[#allocation2 + $0x520] sm:$0xff]  ;;  %v223_v37 = vpack.c.bf16 %v62_v31, %v55_v29 }
  0x34   :  { %v299_v38 = vpack.c.bf16 %v215_v33, %v208_v32  ;;  %v207_v39 = vld [vmem:[#allocation2 + $0x4d0] sm:$0xff]  ;;  %v214_v40 = vld [vmem:[#allocation2 + $0x508] sm:$0xff]  ;;  %v209_v41 = vld [vmem:[#allocation2 + $0x4e0] sm:$0xff]  ;;  %v301_v42 = vpack.c.bf16 %v217_v35, %v210_v34 }
  0x35   :  { %v216_v43 = vld [vmem:[#allocation2 + $0x518] sm:$0xff]  ;;  %v194_v44 = vld [vmem:[#allocation2 + $0x468] sm:$0xff]  ;;  %v201_v45 = vld [vmem:[#allocation2 + $0x4a0] sm:$0xff]  ;;  %v298_v48 = vpack.c.bf16 %v214_v40, %v207_v39 }
  0x36   :  { %369 = vmatpush1.bf16.msra.mxu0 %v235_v12  ;;  %440 = vmatpush1.bf16.msra.mxu1 %v237_v13  ;;  %v196_v46 = vld [vmem:[#allocation2 + $0x478] sm:$0xff]  ;;  %v203_v47 = vld [vmem:[#allocation2 + $0x4b0] sm:$0xff]  ;;  %v5697_v49 = vld [vmem:[#allocation5 + $0x4] ss:$8 sps:$4 sm:$0xff]   ;;  %v300_v50 = vpack.c.bf16 %v216_v43, %v209_v41  ;;  %v292_v51 = vpack.c.bf16 %v201_v45, %v194_v44 }
  0x37   :  { %370 = vmatprep.subr.bf16.mxu0 %v229_v14  ;;  %441 = vmatprep.subr.bf16.mxu1 %v231_v18  ;;  %v193_v52 = vld [vmem:[#allocation2 + $0x460] sm:$0xff]  ;;  %v200_v53 = vld [vmem:[#allocation2 + $0x498] sm:$0xff]  ;;  %v195_v54 = vld [vmem:[#allocation2 + $0x470] sm:$0xff]  ;;  %v294_v55 = vpack.c.bf16 %v203_v47, %v196_v46 }
  0x38   :  { %v202_v56 = vld [vmem:[#allocation2 + $0x4a8] sm:$0xff]  ;;  %v180_v57 = vld [vmem:[#allocation2 + $0x3f8] sm:$0xff]  ;;  %v187_v58 = vld [vmem:[#allocation2 + $0x430] sm:$0xff]  ;;  %5192 = vmatprep.mubr.msk.bf16.mxu0 %vm345_vm0, %v5697_v49  ;;  %5196 = vmatprep.mubr.msk.bf16.mxu1 %vm345_vm0, %v5697_v49  ;;  %v291_v61 = vpack.c.bf16 %v200_v53, %v193_v52 }
  0x39   :  { %v182_v59 = vld [vmem:[#allocation2 + $0x408] sm:$0xff]  ;;  %v189_v60 = vld [vmem:[#allocation2 + $0x440] sm:$0xff]  ;;  %v293_v62 = vpack.c.bf16 %v202_v56, %v195_v54  ;;  %v285_v63 = vpack.c.bf16 %v187_v58, %v180_v57  ;;  %v179_v1 = vld [vmem:[#allocation2 + $0x3f0] sm:$0xff] }
  0x3a   :  { %371 = vmatpush1.bf16.msra.mxu0 %v228_v24  ;;  %442 = vmatpush1.bf16.msra.mxu1 %v230_v25  ;;  %v186_v2 = vld [vmem:[#allocation2 + $0x428] sm:$0xff]  ;;  %v181_v3 = vld [vmem:[#allocation2 + $0x400] sm:$0xff]  ;;  %v287_v4 = vpack.c.bf16 %v189_v60, %v182_v59  ;;  %v188_v5 = vld [vmem:[#allocation2 + $0x438] sm:$0xff] }
  0x3b   :  { %372 = vmatprep.subr.bf16.mxu0 %v222_v26  ;;  %443 = vmatprep.subr.bf16.mxu1 %v224_v30  ;;  %v166_v6 = vld [vmem:[#allocation2 + $0x388] sm:$0xff]  ;;  %v173_v7 = vld [vmem:[#allocation2 + $0x3c0] sm:$0xff]  ;;  %v168_v8 = vld [vmem:[#allocation2 + $0x398] sm:$0xff]  ;;  %v284_v10 = vpack.c.bf16 %v186_v2, %v179_v1  ;;  %v286_v13 = vpack.c.bf16 %v188_v5, %v181_v3 }
  0x3c   :  { %v175_v9 = vld [vmem:[#allocation2 + $0x3d0] sm:$0xff]  ;;  %v165_v11 = vld [vmem:[#allocation2 + $0x380] sm:$0xff]  ;;  %v172_v12 = vld [vmem:[#allocation2 + $0x3b8] sm:$0xff]  ;;  %v278_v14 = vpack.c.bf16 %v173_v7, %v166_v6 }
  0x3d   :  { %v167_v15 = vld [vmem:[#allocation2 + $0x390] sm:$0xff]  ;;  %v280_v16 = vpack.c.bf16 %v175_v9, %v168_v8  ;;  %v174_v17 = vld [vmem:[#allocation2 + $0x3c8] sm:$0xff]  ;;  %v156_v18 = vld [vmem:[#allocation2 + $0x338] sm:$0xff]  ;;  %v277_v20 = vpack.c.bf16 %v172_v12, %v165_v11 }
  0x3e   :  { %373 = vmatpush1.bf16.msra.mxu0 %v221_v36  ;;  %444 = vmatpush1.bf16.msra.mxu1 %v223_v37  ;;  %v163_v19 = vld [vmem:[#allocation2 + $0x370] sm:$0xff]  ;;  %v279_v22 = vpack.c.bf16 %v174_v17, %v167_v15  ;;  %v162_v24 = vld [vmem:[#allocation2 + $0x368] sm:$0xff]  ;;  %v157_v25 = vld [vmem:[#allocation2 + $0x340] sm:$0xff] }
  0x3f   :  { %382 = vmatprep.subr.bf16.mxu0 %v299_v38  ;;  %453 = vmatprep.subr.bf16.mxu1 %v301_v42  ;;  %v155_v21 = vld [vmem:[#allocation2 + $0x330] sm:$0xff]  ;;  %v275_v23 = vpack.c.bf16 %v163_v19, %v156_v18  ;;  %v164_v26 = vld [vmem:[#allocation2 + $0x378] sm:$0xff]  ;;  %v142_v27 = vld [vmem:[#allocation2 + $0x2c8] sm:$0xff] }
  0x40   :  { %v149_v28 = vld [vmem:[#allocation2 + $0x300] sm:$0xff]  ;;  %v274_v30 = vpack.c.bf16 %v162_v24, %v155_v21  ;;  %v276_v32 = vpack.c.bf16 %v164_v26, %v157_v25  ;;  %v148_v34 = vld [vmem:[#allocation2 + $0x2f8] sm:$0xff]  ;;  %v143_v35 = vld [vmem:[#allocation2 + $0x2d0] sm:$0xff] }
  0x41   :  { %v5703_v29 = vld [vmem:[#allocation5] ss:$8 sps:$4 sm:$0xff]   ;;  %v268_v33 = vpack.c.bf16 %v149_v28, %v142_v27  ;;  %v128_v37 = vld [vmem:[#allocation2 + $0x258] sm:$0xff]  ;;  %v135_v38 = vld [vmem:[#allocation2 + $0x290] sm:$0xff] }
  0x42   :  { %383 = vmatpush2.bf16.msra.mxu0 %v298_v48  ;;  %454 = vmatpush2.bf16.msra.mxu1 %v300_v50  ;;  %v141_v31 = vld [vmem:[#allocation2 + $0x2c0] sm:$0xff]  ;;  %v150_v36 = vld [vmem:[#allocation2 + $0x308] sm:$0xff]  ;;  %v5706_v39 = vld [vmem:[#allocation5 + $0x14] ss:$8 sps:$4 sm:$0xff]   ;;  %v261_v42 = vpack.c.bf16 %v135_v38, %v128_v37 }
  0x43   :  { %384 = vmatprep.subr.bf16.mxu0 %v292_v51  ;;  %455 = vmatprep.subr.bf16.mxu1 %v294_v55  ;;  %v267_v40 = vpack.c.bf16 %v148_v34, %v141_v31  ;;  %v269_v41 = vpack.c.bf16 %v150_v36, %v143_v35  ;;  %v127_v43 = vld [vmem:[#allocation2 + $0x250] sm:$0xff]  ;;  %v134_v44 = vld [vmem:[#allocation2 + $0x288] sm:$0xff]  ;;  %v129_v45 = vld [vmem:[#allocation2 + $0x260] sm:$0xff] }
  0x44   :  { %v136_v46 = vld [vmem:[#allocation2 + $0x298] sm:$0xff]  ;;  %v114_v47 = vld [vmem:[#allocation2 + $0x1e8] sm:$0xff]  ;;  %v121_v48 = vld [vmem:[#allocation2 + $0x220] sm:$0xff]  ;;  %v260_v51 = vpack.c.bf16 %v134_v44, %v127_v43 }
  0x45   :  { %v5713_v50 = vld [vmem:[#allocation5 + $0x10] ss:$8 sps:$4 sm:$0xff]   ;;  %v113_v52 = vld [vmem:[#allocation2 + $0x1e0] sm:$0xff]  ;;  %v262_v53 = vpack.c.bf16 %v136_v46, %v129_v45  ;;  %v254_v54 = vpack.c.bf16 %v121_v48, %v114_v47  ;;  %v122_v57 = vld [vmem:[#allocation2 + $0x228] sm:$0xff] }
  0x46   :  { %385 = vmatpush2.bf16.msra.mxu0 %v291_v61  ;;  %456 = vmatpush2.bf16.msra.mxu1 %v293_v62  ;;  %v120_v55 = vld [vmem:[#allocation2 + $0x218] sm:$0xff]  ;;  %v115_v56 = vld [vmem:[#allocation2 + $0x1f0] sm:$0xff]  ;;  %v5718_v60 = vld [vmem:[#allocation5 + $0x24] ss:$8 sps:$4 sm:$0xff]  }
  0x47   :  { %386 = vmatprep.subr.bf16.mxu0 %v285_v63  ;;  %457 = vmatprep.subr.bf16.mxu1 %v287_v4  ;;  %v100_v58 = vld [vmem:[#allocation2 + $0x178] sm:$0xff]  ;;  %v107_v59 = vld [vmem:[#allocation2 + $0x1b0] sm:$0xff]  ;;  %v106_v62 = vld [vmem:[#allocation2 + $0x1a8] sm:$0xff]  ;;  %v253_v63 = vpack.c.bf16 %v120_v55, %v113_v52  ;;  %v255_v5 = vpack.c.bf16 %v122_v57, %v115_v56 }
  0x48   :  { %v99_v61 = vld [vmem:[#allocation2 + $0x170] sm:$0xff]  ;;  %v101_v1 = vld [vmem:[#allocation2 + $0x180] sm:$0xff]  ;;  %v108_v2 = vld [vmem:[#allocation2 + $0x1b8] sm:$0xff]  ;;  %v247_v6 = vpack.c.bf16 %v107_v59, %v100_v58 }
  0x49   :  { %v86_v3 = vld [vmem:[#allocation2 + $0x108] sm:$0xff]  ;;  %v93_v4 = vld [vmem:[#allocation2 + $0x140] sm:$0xff]  ;;  %v311_v8 = vld [vmem:[#allocation5 + $0x30] sm:$0xff]  ;;  %v246_v11 = vpack.c.bf16 %v106_v62, %v99_v61 }
  0x4a   :  { %387 = vmatpush2.bf16.msra.mxu0 %v284_v10  ;;  %458 = vmatpush2.bf16.msra.mxu1 %v286_v13  ;;  %v5722_v7 = vld [vmem:[#allocation5 + $0x20] ss:$8 sps:$4 sm:$0xff]   ;;  %v92_v10 = vld [vmem:[#allocation2 + $0x138] sm:$0xff]  ;;  %v87_v12 = vld [vmem:[#allocation2 + $0x110] sm:$0xff]  ;;  %v240_v17 = vpack.c.bf16 %v93_v4, %v86_v3  ;;  %v5730_v18 = vcombine.high %v311_v8, %v311_v8  ;;  %v5737_v31 = vcombine.low %v311_v8, %v311_v8 }
  0x4b   :  { %388 = vmatprep.subr.bf16.mxu0 %v278_v14  ;;  %459 = vmatprep.subr.bf16.mxu1 %v280_v16  ;;  %v85_v9 = vld [vmem:[#allocation2 + $0x100] sm:$0xff]  ;;  %v94_v13 = vld [vmem:[#allocation2 + $0x148] sm:$0xff]  ;;  %v72_v14 = vld [vmem:[#allocation2 + $0x98] sm:$0xff]  ;;  %v248_v16 = vpack.c.bf16 %v108_v2, %v101_v1 }
  0x4c   :  { %v79_v15 = vld [vmem:[#allocation2 + $0xd0] sm:$0xff]  ;;  %v239_v21 = vpack.c.bf16 %v92_v10, %v85_v9  ;;  %v58_v24 = vld [vmem:[#allocation2 + $0x28] sm:$0xff]  ;;  %v65_v25 = vld [vmem:[#allocation2 + $0x60] sm:$0xff]  ;;  %v241_v26 = vpack.c.bf16 %v94_v13, %v87_v12 }
  0x4d   :  { %v71_v19 = vld [vmem:[#allocation2 + $0x90] sm:$0xff]  ;;  %v233_v27 = vpack.c.bf16 %v79_v15, %v72_v14  ;;  %v57_v28 = vld [vmem:[#allocation2 + $0x20] sm:$0xff]  ;;  %v66_v34 = vld [vmem:[#allocation2 + $0x68] sm:$0xff]  ;;  %v226_v36 = vpack.c.bf16 %v65_v25, %v58_v24 }
  0x4e   :  { %389 = vmatpush2.bf16.msra.mxu0 %v277_v20  ;;  %460 = vmatpush2.bf16.msra.mxu1 %v279_v22  ;;  %v78_v20 = vld [vmem:[#allocation2 + $0xc8] sm:$0xff]  ;;  %v73_v22 = vld [vmem:[#allocation2 + $0xa0] sm:$0xff]  ;;  %v212_v37 = vld [vmem:[#allocation2 + $0x4f8] sm:$0xff] }
  0x4f   :  { %500 = vmatprep.subr.bf16.mxu0 %v275_v23  ;;  %571 = vmatprep.subr.bf16.mxu1 %v10617_v0  ;;  %v80_v23 = vld [vmem:[#allocation2 + $0xd8] sm:$0xff]  ;;  %v219_v38 = vld [vmem:[#allocation2 + $0x530] sm:$0xff]  ;;  %v218_v44 = vld [vmem:[#allocation2 + $0x528] sm:$0xff] }
  0x50   :  { %v234_v35 = vpack.c.bf16 %v80_v23, %v73_v22  ;;  %v211_v43 = vld [vmem:[#allocation2 + $0x4f0] sm:$0xff]  ;;  %v213_v45 = vld [vmem:[#allocation2 + $0x500] sm:$0xff]  ;;  %v220_v46 = vld [vmem:[#allocation2 + $0x538] sm:$0xff] }
  0x51   :  { %391 = vmatmul.mubr.bf16.vlgmr.msra.gmra.mxu0 %v5703_v29  ;;  %462 = vmatmul.mubr.bf16.vlgmr.msra.gmra.mxu1 %v5703_v29  ;;  %v198_v47 = vld [vmem:[#allocation2 + $0x488] sm:$0xff]  ;;  %v205_v48 = vld [vmem:[#allocation2 + $0x4c0] sm:$0xff]  ;;  %v304_v52 = vpack.c.bf16 %v220_v46, %v213_v45  ;;  %v204_v55 = vld [vmem:[#allocation2 + $0x4b8] sm:$0xff] }
  0x52   :  { %501 = vmatpush1.bf16.msra.mxu0 %v274_v30  ;;  %572 = vmatpush1.bf16.msra.mxu1 %v276_v32  ;;  %v64_v30 = vld [vmem:[#allocation2 + $0x58] sm:$0xff]  ;;  %v232_v32 = vpack.c.bf16 %v78_v20, %v71_v19  ;;  %v199_v56 = vld [vmem:[#allocation2 + $0x490] sm:$0xff]  ;;  %v206_v57 = vld [vmem:[#allocation2 + $0x4c8] sm:$0xff] }
  0x53   :  { %502 = vmatprep.subr.bf16.mxu0 %v268_v33  ;;  %573 = vmatprep.subr.bf16.mxu1 %v10617_v0  ;;  %v59_v33 = vld [vmem:[#allocation2 + $0x30] sm:$0xff]  ;;  %v184_v58 = vld [vmem:[#allocation2 + $0x418] sm:$0xff]  ;;  %v297_v62 = vpack.c.bf16 %v206_v57, %v199_v56  ;;  %v190_v1 = vld [vmem:[#allocation2 + $0x448] sm:$0xff] }
  0x54   :  { %5193 = vmatprep.mubr.msk.bf16.mxu0 %vm345_vm0, %v5706_v39  ;;  %5197 = vmatprep.mubr.msk.bf16.mxu1 %vm345_vm0, %v5706_v39  ;;  %v191_v59 = vld [vmem:[#allocation2 + $0x450] sm:$0xff]  ;;  %v185_v2 = vld [vmem:[#allocation2 + $0x420] sm:$0xff]  ;;  %v192_v3 = vld [vmem:[#allocation2 + $0x458] sm:$0xff] }
  0x55   :  { %v170_v4 = vld [vmem:[#allocation2 + $0x3a8] sm:$0xff]  ;;  %v290_v8 = vpack.c.bf16 %v192_v3, %v185_v2  ;;  %v169_v10 = vld [vmem:[#allocation2 + $0x3a0] sm:$0xff]  ;;  %v171_v12 = vld [vmem:[#allocation2 + $0x3b0] sm:$0xff] }
  0x56   :  { %503 = vmatpush1.bf16.msra.mxu0 %v267_v40  ;;  %574 = vmatpush1.bf16.msra.mxu1 %v269_v41  ;;  %v225_v40 = vpack.c.bf16 %v64_v30, %v57_v28  ;;  %v227_v41 = vpack.c.bf16 %v66_v34, %v59_v33  ;;  %v178_v13 = vld [vmem:[#allocation2 + $0x3e8] sm:$0xff] }
  0x57   :  { %504 = vmatprep.subr.bf16.mxu0 %v261_v42  ;;  %575 = vmatprep.subr.bf16.mxu1 %v10617_v0  ;;  %v303_v42 = vpack.c.bf16 %v219_v38, %v212_v37  ;;  %v283_v15 = vpack.c.bf16 %v178_v13, %v171_v12 }
  0x59   :  { %401 = vmatmul.mubr.bf16.gmra.mxu0 %v5713_v50  ;;  %472 = vmatmul.mubr.bf16.gmra.mxu1 %v5713_v50 }
  0x5a   :  { %505 = vmatpush1.bf16.msra.mxu0 %v260_v51  ;;  %576 = vmatpush1.bf16.msra.mxu1 %v262_v53  ;;  %v302_v51 = vpack.c.bf16 %v218_v44, %v211_v43  ;;  %v296_v53 = vpack.c.bf16 %v205_v48, %v198_v47 }
  0x5b   :  { %506 = vmatprep.subr.bf16.mxu0 %v254_v54  ;;  %577 = vmatprep.subr.bf16.mxu1 %v10617_v0  ;;  %v197_v54 = vld [vmem:[#allocation2 + $0x480] sm:$0xff] }
  0x5c   :  { %5194 = vmatprep.mubr.msk.bf16.mxu0 %vm345_vm0, %v5718_v60  ;;  %5198 = vmatprep.mubr.msk.bf16.mxu1 %vm345_vm0, %v5718_v60  ;;  %v295_v61 = vpack.c.bf16 %v204_v55, %v197_v54 }
  0x5e   :  { %507 = vmatpush1.bf16.msra.mxu0 %v253_v63  ;;  %578 = vmatpush1.bf16.msra.mxu1 %v255_v5  ;;  %v183_v63 = vld [vmem:[#allocation2 + $0x410] sm:$0xff]  ;;  %v177_v5 = vld [vmem:[#allocation2 + $0x3e0] sm:$0xff] }
  0x5f   :  { %508 = vmatprep.subr.bf16.mxu0 %v247_v6  ;;  %579 = vmatprep.subr.bf16.mxu1 %v10617_v0  ;;  %v288_v6 = vpack.c.bf16 %v190_v1, %v183_v63  ;;  %v282_v9 = vpack.c.bf16 %v177_v5, %v170_v4 }
  0x61   :  { %411 = vmatmul.mubr.bf16.gmra.mxu0 %v5722_v7  ;;  %482 = vmatmul.mubr.bf16.gmra.mxu1 %v5722_v7 }
  0x62   :  { %509 = vmatpush1.bf16.msra.mxu0 %v246_v11  ;;  %580 = vmatpush1.bf16.msra.mxu1 %v248_v16  ;;  %v176_v11 = vld [vmem:[#allocation2 + $0x3d8] sm:$0xff] }
  0x63   :  { %510 = vmatprep.subr.bf16.mxu0 %v240_v17  ;;  %581 = vmatprep.subr.bf16.mxu1 %v10617_v0  ;;  %v281_v14 = vpack.c.bf16 %v176_v11, %v169_v10 }
  0x64   :  { %5195 = vmatprep.mubr.msk.bf16.mxu0 %vm345_vm0, %v5730_v18  ;;  %5199 = vmatprep.mubr.msk.bf16.mxu1 %vm345_vm0, %v5730_v18 }
  0x66   :  { %511 = vmatpush1.bf16.msra.mxu0 %v239_v21  ;;  %582 = vmatpush1.bf16.msra.mxu1 %v241_v26 }
  0x67   :  { %512 = vmatprep.subr.bf16.mxu0 %v233_v27  ;;  %583 = vmatprep.subr.bf16.mxu1 %v10617_v0 }
  0x69   :  { %421 = vmatmul.mubr.bf16.gmra.mxu0 %v5737_v31  ;;  %492 = vmatmul.mubr.bf16.gmra.mxu1 %v5737_v31 }
  0x6a   :  { %513 = vmatpush1.bf16.msra.mxu0 %v232_v32  ;;  %584 = vmatpush1.bf16.msra.mxu1 %v234_v35 }
  0x6b   :  { %514 = vmatprep.subr.bf16.mxu0 %v226_v36  ;;  %585 = vmatprep.subr.bf16.mxu1 %v10617_v0 }
  0x6c   :  { %5200 = vmatprep.mubr.msk.bf16.mxu0 %vm345_vm0, %v5697_v49  ;;  %5204 = vmatprep.mubr.msk.bf16.mxu1 %vm345_vm0, %v5697_v49  ;;  %v289_v49 = vpack.c.bf16 %v191_v59, %v184_v58 }
  0x6e   :  { %515 = vmatpush1.bf16.msra.mxu0 %v225_v40  ;;  %586 = vmatpush1.bf16.msra.mxu1 %v227_v41 }
  0x6f   :  { %524 = vmatprep.subr.bf16.mxu0 %v303_v42  ;;  %595 = vmatprep.subr.bf16.mxu1 %v10617_v0 }
  0x72   :  { %525 = vmatpush2.bf16.msra.mxu0 %v302_v51  ;;  %596 = vmatpush2.bf16.msra.mxu1 %v304_v52 }
  0x73   :  { %526 = vmatprep.subr.bf16.mxu0 %v296_v53  ;;  %597 = vmatprep.subr.bf16.mxu1 %v10617_v0 }
  0x76   :  { %527 = vmatpush2.bf16.msra.mxu0 %v295_v61  ;;  %598 = vmatpush2.bf16.msra.mxu1 %v297_v62 }
  0x77   :  { %528 = vmatprep.subr.bf16.mxu0 %v289_v49  ;;  %599 = vmatprep.subr.bf16.mxu1 %v10617_v0 }
  0x7a   :  { %529 = vmatpush2.bf16.msra.mxu0 %v288_v6  ;;  %600 = vmatpush2.bf16.msra.mxu1 %v290_v8 }
  0x7b   :  { %530 = vmatprep.subr.bf16.mxu0 %v282_v9  ;;  %601 = vmatprep.subr.bf16.mxu1 %v10617_v0 }
  0x7e   :  { %531 = vmatpush2.bf16.msra.mxu0 %v281_v14  ;;  %602 = vmatpush2.bf16.msra.mxu1 %v283_v15 }
  0x81   :  { %533 = vmatmul.mubr.bf16.vlgmr.msra.gmra.mxu0 %v5703_v29  ;;  %604 = vmatmul.mubr.bf16.vlgmr.msra.gmra.mxu1 %v5703_v29 }
  0x82   :  { %5201 = vmatprep.mubr.msk.bf16.mxu0 %vm345_vm0, %v5706_v39  ;;  %5205 = vmatprep.mubr.msk.bf16.mxu1 %vm345_vm0, %v5706_v39 }
  0x89   :  { %543 = vmatmul.mubr.bf16.gmra.mxu0 %v5713_v50  ;;  %612 = vmatmul.mubr.bf16.gmra.mxu1 %v5713_v50 }
  0x8a   :  { %5202 = vmatprep.mubr.msk.bf16.mxu0 %vm345_vm0, %v5718_v60  ;;  %5206 = vmatprep.mubr.msk.bf16.mxu1 %vm345_vm0, %v5718_v60 }
  0x91   :  { %553 = vmatmul.mubr.bf16.gmra.mxu0 %v5722_v7  ;;  %620 = vmatmul.mubr.bf16.gmra.mxu1 %v5722_v7 }
  0x92   :  { %5203 = vmatprep.mubr.msk.bf16.mxu0 %vm345_vm0, %v5730_v18  ;;  %5207 = vmatprep.mubr.msk.bf16.mxu1 %vm345_vm0, %v5730_v18 }
  0x99   :  { %563 = vmatmul.mubr.bf16.gmra.mxu0 %v5737_v31  ;;  %628 = vmatmul.mubr.bf16.gmra.mxu1 %v5737_v31 }
  0x9a   :  { %1244 = vmatprep.mubr.bf16.mxu0 %v10617_v0  ;;  %1487 = vmatprep.mubr.bf16.mxu1 %v10617_v0 }
 0x111   :  { %v5775_v29 = vpop.f32.mrf.mxu0  ;;  %v5777_v39 = vpop.f32.mrf.mxu1 }
 0x112   :  { %11266 = vst [vmem:[#allocation11_spill] sm:$0xff] %v5775_v29  ;;  %11267 = vst [vmem:[#allocation12_spill] sm:$0xff] %v5777_v39  ;;  %v706_v47 = vmul.f32 %v5775_v29, %v5775_v29  ;;  %v5852_v57 = vmul.f32 %v5777_v39, %v5777_v39 }
 0x113   :  { %v5779_v50 = vpop.f32.mrf.mxu0  ;;  %v5781_v60 = vpop.f32.mrf.mxu1 }
 0x114   :  { %11268 = vst [vmem:[#allocation13_spill] sm:$0xff] %v5779_v50  ;;  %v635_v45 = vadd.f32 %v5779_v50, %v5775_v29  ;;  %v707_v48 = vmul.f32 %v5779_v50, %v5779_v50 }
 0x115   :  { %v5783_v7 = vpop.f32.mrf.mxu0  ;;  %v5785_v16 = vpop.f32.mrf.mxu1 }
 0x116   :  { %11269 = vst [vmem:[#allocation14_spill] sm:$0xff] %v5783_v7  ;;  %11270 = vst [vmem:[#allocation15_spill] sm:$0xff] %v5785_v16  ;;  %v636_v52 = vadd.f32 %v635_v45, %v5777_v39  ;;  %v713_v58 = vmul.f32 %v5783_v7, %v5783_v7  ;;  %v5859_v49 = vadd.f32 %v707_v48, %v706_v47 }
 0x117   :  { %v5787_v17 = vpop.f32.mrf.mxu0  ;;  %v5789_v18 = vpop.f32.mrf.mxu1  ;;  %v715_v63 = vmul.f32 %v5785_v16, %v5785_v16 }
 0x118   :  { %11271 = vst [vmem:[#allocation16_spill] sm:$0xff] %v5787_v17  ;;  %11272 = vst [vmem:[#allocation17_spill] sm:$0xff] %v5789_v18  ;;  %v645_v53 = vadd.f32 %v5787_v17, %v5783_v7  ;;  %v714_v54 = vmul.f32 %v5787_v17, %v5787_v17  ;;  %v5870_v4 = vadd.f32 %v636_v52, %v5781_v60 }
 0x119   :  { %v5791_v19 = vpop.f32.mrf.mxu0  ;;  %v5793_v20 = vpop.f32.mrf.mxu1  ;;  %v5874_v6 = vmul.f32 %v5789_v18, %v5789_v18 }
 0x11a   :  { %v764_v5 = vadd.f32 %v714_v54, %v713_v58  ;;  %v646_v8 = vadd.f32 %v645_v53, %v5785_v16  ;;  %v720_v10 = vmul.f32 %v5791_v19, %v5791_v19  ;;  %v5885_v12 = vmul.f32 %v5793_v20, %v5793_v20 }
 0x11b   :  { %v5795_v21 = vpop.f32.mrf.mxu0  ;;  %v5797_v22 = vpop.f32.mrf.mxu1 }
 0x11c   :  { %v654_v46 = vadd.f32 %v5795_v21, %v5791_v19  ;;  %v721_v15 = vmul.f32 %v5795_v21, %v5795_v21  ;;  %v5908_v54 = vadd.f32 %v646_v8, %v5789_v18 }
 0x11d   :  { %v5799_v23 = vpop.f32.mrf.mxu0  ;;  %v5801_v24 = vpop.f32.mrf.mxu1 }
 0x11e   :  { %11273 = vst [vmem:[#allocation18_spill] sm:$0xff] %v5799_v23  ;;  %11274 = vst [vmem:[#allocation19_spill] sm:$0xff] %v5801_v24  ;;  %v655_v59 = vadd.f32 %v654_v46, %v5793_v20  ;;  %v727_v11 = vmul.f32 %v5799_v23, %v5799_v23  ;;  %v729_v53 = vmul.f32 %v5801_v24, %v5801_v24 }
 0x11f   :  { %v5803_v25 = vpop.f32.mrf.mxu0  ;;  %v5805_v26 = vpop.f32.mrf.mxu1  ;;  %v773_v39 = vadd.f32 %v721_v15, %v720_v10 }
 0x120   :  { %11275 = vst [vmem:[#allocation20_spill] sm:$0xff] %v5803_v25  ;;  %11276 = vst [vmem:[#allocation21_spill] sm:$0xff] %v5805_v26  ;;  %v663_v61 = vadd.f32 %v5803_v25, %v5799_v23  ;;  %v728_v13 = vmul.f32 %v5803_v25, %v5803_v25 }
 0x121   :  { %v5807_v27 = vpop.f32.mrf.mxu0  ;;  %v5809_v28 = vpop.f32.mrf.mxu1 }
 0x122   :  { %v734_v1 = vmul.f32 %v5807_v27, %v5807_v27  ;;  %v736_v47 = vmul.f32 %v5809_v28, %v5809_v28 }
 0x123   :  { %v5811_v30 = vpop.f32.mrf.mxu0  ;;  %v5813_v31 = vpop.f32.mrf.mxu1 }
 0x124   :  { %v735_v2 = vmul.f32 %v5811_v30, %v5811_v30 }
 0x125   :  { %v5815_v32 = vpop.f32.mrf.mxu0  ;;  %v5817_v33 = vpop.f32.mrf.mxu1 }
 0x126   :  { %v791_v45 = vadd.f32 %v735_v2, %v734_v1  ;;  %v741_v46 = vmul.f32 %v5815_v32, %v5815_v32  ;;  %v743_v7 = vmul.f32 %v5817_v33, %v5817_v33 }
 0x127   :  { %v5819_v34 = vpop.f32.mrf.mxu0  ;;  %v5821_v35 = vpop.f32.mrf.mxu1 }
 0x128   :  { %v742_v48 = vmul.f32 %v5819_v34, %v5819_v34  ;;  %v744_v23 = vmul.f32 %v5821_v35, %v5821_v35 }
 0x129   :  { %v5823_v36 = vpop.f32.mrf.mxu0  ;;  %v5825_v37 = vpop.f32.mrf.mxu1 }
 0x12a   :  { %v748_v1 = vmul.f32 %v5823_v36, %v5823_v36  ;;  %v800_v18 = vadd.f32 %v742_v48, %v741_v46  ;;  %v750_v46 = vmul.f32 %v5825_v37, %v5825_v37 }
 0x12b   :  { %v5827_v38 = vpop.f32.mrf.mxu0  ;;  %v5829_v40 = vpop.f32.mrf.mxu1 }
 0x12c   :  { %v749_v2 = vmul.f32 %v5827_v38, %v5827_v38 }
 0x12d   :  { %v426_v41 = vpop.f32.mrf.mxu0  ;;  %v497_v42 = vpop.f32.mrf.mxu1 }
 0x12e   :  { %v656_v41 = vadd.f32 %v655_v59, %v5797_v22  ;;  %v664_v42 = vadd.f32 %v663_v61, %v5801_v24  ;;  %v5913_v61 = vadd.f32 %v764_v5, %v715_v63  ;;  %v809_v29 = vadd.f32 %v749_v2, %v748_v1 }
 0x12f   :  { %v427_v43 = vpop.f32.mrf.mxu0  ;;  %v498_v44 = vpop.f32.mrf.mxu1  ;;  %v801_v24 = vadd.f32 %v800_v18, %v743_v7 }
 0x130   :  { %v672_v43 = vadd.f32 %v5811_v30, %v5807_v27  ;;  %v665_v63 = vadd.f32 %v664_v42, %v5805_v26  ;;  %v810_v18 = vadd.f32 %v809_v29, %v750_v46  ;;  %v774_v29 = vadd.f32 %v773_v39, %v5885_v12 }
 0x132   :  { %v673_v8 = vadd.f32 %v672_v43, %v5809_v28  ;;  %v5936_v43 = vmul.f32 %v5797_v22, %v5797_v22 }
 0x134   :  { %v674_v48 = vadd.f32 %v673_v8, %v5813_v31 }
 0x141   :  { %v5839_v51 = vpop.f32.mrf.mxu0  ;;  %v5846_v55 = vpop.f32.mrf.mxu1 }
 0x143   :  { %v5848_v56 = vpop.f32.mrf.mxu0  ;;  %v607_v62 = vpop.f32.mrf.mxu1 }
 0x144   :  { %v782_v62 = vadd.f32 %v728_v13, %v727_v11  ;;  %v792_v11 = vadd.f32 %v791_v45, %v736_v47  ;;  %v737_v13 = vmul.f32 %v5813_v31, %v5813_v31  ;;  %v730_v45 = vmul.f32 %v5805_v26, %v5805_v26 }
 0x145   :  { %v5867_v3 = vpop.f32.mrf.mxu0  ;;  %v5877_v9 = vpop.f32.mrf.mxu1  ;;  %v690_v47 = vadd.f32 %v5827_v38, %v5823_v36 }
 0x146   :  { %11277 = vst [vmem:[#allocation22_spill] sm:$0xff] %v5867_v3  ;;  %v783_v15 = vadd.f32 %v782_v62, %v729_v53  ;;  %v751_v53 = vmul.f32 %v5829_v40, %v5829_v40 }
 0x147   :  { %v5889_v14 = vpop.f32.mrf.mxu0  ;;  %v610_v44 = vpop.f32.mrf.mxu1  ;;  %v691_v7 = vadd.f32 %v690_v47, %v5825_v37 }
 0x148   :  { %v811_v39 = vadd.f32 %v810_v18, %v751_v53 }
 0x149   :  { %v5903_v52 = vpop.f32.mrf.mxu0  ;;  %v5911_v59 = vpop.f32.mrf.mxu1 }
 0x14a   :  { %11278 = vst [vmem:[#allocation23_spill] sm:$0xff] %v5903_v52  ;;  %v657_v58 = vadd.f32 %v656_v41, %v5903_v52  ;;  %v659_v0 = vsel %vm640_vm1, %v5911_v59, 0.0  ;;  %v681_v41 = vadd.f32 %v5819_v34, %v5815_v32  ;;  %v724_v12 = vmul.f32 %v5903_v52, %v5903_v52 }
 0x14b   :  { %v5919_v44 = vpop.f32.mrf.mxu0  ;;  %v615_v16 = vpop.f32.mrf.mxu1 }
 0x14c   :  { %v658_v5 = vadd.f32 %v657_v58, %v5919_v44 }
 0x14d   :  { %v5932_v17 = vpop.f32.mrf.mxu0  ;;  %v5939_v42 = vpop.f32.mrf.mxu1 }
 0x14e   :  { %11279 = vst [vmem:[#allocation24_spill] sm:$0xff] %v5932_v17  ;;  %v666_v16 = vadd.f32 %v665_v63, %v5932_v17  ;;  %v660_v58 = vadd.f32 %v659_v0, %v658_v5  ;;  %v682_v63 = vadd.f32 %v681_v41, %v5817_v33  ;;  %v793_v5 = vadd.f32 %v792_v11, %v737_v13 }
 0x14f   :  { %v5947_v10 = vpop.f32.mrf.mxu0  ;;  %v618_v50 = vpop.f32.mrf.mxu1  ;;  %v668_v2 = vsel %vm640_vm1, %v5939_v42, 0.0  ;;  %v731_v47 = vmul.f32 %v5932_v17, %v5932_v17  ;;  %v784_v17 = vadd.f32 %v783_v15, %v730_v45 }
 0x150   :  { %11280 = vst [vmem:[#allocation25_spill] sm:$0xff] %v5947_v10  ;;  %661 = vadd.xlane.f32.xlu0 %v660_v58  ;;  %v667_v0 = vadd.f32 %v666_v16, %v5947_v10  ;;  %v732_v45 = vmul.f32 %v5947_v10, %v5947_v10 }
 0x151   :  { %v5954_v1 = vpop.f32.mrf.mxu0  ;;  %v5963_v8 = vpop.f32.mrf.mxu1  ;;  %v785_v15 = vadd.f32 %v784_v17, %v731_v47  ;;  %v717_v47 = vmul.f32 %v5867_v3, %v5867_v3 }
 0x152   :  { %11281 = vst [vmem:[#allocation26_spill] sm:$0xff] %v5954_v1  ;;  %v675_v62 = vadd.f32 %v674_v48, %v5954_v1  ;;  %v738_v50 = vmul.f32 %v5954_v1, %v5954_v1  ;;  %11282 = vst [vmem:[#allocation27_spill] sm:$0xff] %v5963_v8  ;;  %v669_v41 = vadd.f32 %v668_v2, %v667_v0  ;;  %v677_v16 = vsel %vm640_vm1, %v5963_v8, 0.0 }
 0x153   :  { %v740_v11 = vmul.f32 %v5963_v8, %v5963_v8  ;;  %v5968_v13 = vpop.f32.mrf.mxu0  ;;  %v623_v48 = vpop.f32.mrf.mxu1  ;;  %v683_v1 = vadd.f32 %v682_v63, %v5821_v35  ;;  %v802_v8 = vadd.f32 %v801_v24, %v744_v23  ;;  %v786_v52 = vadd.f32 %v785_v15, %v732_v45 }
 0x154   :  { %v739_v58 = vmul.f32 %v5968_v13, %v5968_v13  ;;  %670 = vadd.xlane.f32.xlu1 %v669_v41  ;;  %v676_v0 = vadd.f32 %v675_v62, %v5968_v13  ;;  %v794_v2 = vadd.f32 %v793_v5, %v738_v50  ;;  %v692_v5 = vadd.f32 %v691_v7, %v5829_v40 }
 0x155   :  { %v5979_v46 = vpop.f32.mrf.mxu0  ;;  %v796_v26 = vsel %vm640_vm1, %v740_v11, 0.0  ;;  %v5985_v48 = vpop.f32.mrf.mxu1  ;;  %v766_v45 = vadd.f32 %v5913_v61, %v5874_v6  ;;  %v710_v15 = vmul.f32 %v5839_v51, %v5839_v51  ;;  %v711_v6 = vmul.f32 %v5848_v56, %v5848_v56 }
 0x156   :  { %11283 = vst [vmem:[#allocation28_spill] sm:$0xff] %v5979_v46  ;;  %v684_v25 = vadd.f32 %v683_v1, %v5979_v46  ;;  %v745_v41 = vmul.f32 %v5979_v46, %v5979_v46  ;;  %v678_v63 = vadd.f32 %v677_v16, %v676_v0  ;;  %v795_v62 = vadd.f32 %v794_v2, %v739_v58 }
 0x157   :  { %v5990_v50 = vpop.f32.mrf.mxu0  ;;  %v626_v11 = vpop.f32.mrf.mxu1  ;;  %v747_v16 = vmul.f32 %v5985_v48, %v5985_v48  ;;  %v686_v53 = vsel %vm640_vm1, %v5985_v48, 0.0  ;;  %v775_v0 = vadd.f32 %v774_v29, %v5936_v43  ;;  %v648_v2 = vadd.f32 %v5908_v54, %v5867_v3 }
 0x158   :  { %679 = vadd.xlane.f32.xlu1 %v678_v63  ;;  %v797_v23 = vadd.f32 %v796_v26, %v795_v62  ;;  %v685_v24 = vadd.f32 %v684_v25, %v5990_v50  ;;  %v746_v1 = vmul.f32 %v5990_v50, %v5990_v50  ;;  %v803_v46 = vadd.f32 %v802_v8, %v745_v41 }
 0x159   :  { %v5997_v7 = vpop.f32.mrf.mxu0  ;;  %v6006_v18 = vpop.f32.mrf.mxu1  ;;  %v725_v54 = vmul.f32 %v5919_v44, %v5919_v44  ;;  %v719_v61 = vmul.f32 %v5877_v9, %v5877_v9 }
 0x15a   :  { %v693_v26 = vadd.f32 %v692_v5, %v5997_v7  ;;  %v752_v25 = vmul.f32 %v5997_v7, %v5997_v7  ;;  %798 = vadd.xlane.f32.xlu0 %v797_v23  ;;  %v687_v8 = vadd.f32 %v686_v53, %v685_v24  ;;  %v804_v58 = vadd.f32 %v803_v46, %v746_v1 }
 0x15b   :  { %v754_v41 = vmul.f32 %v6006_v18, %v6006_v18  ;;  %v6013_v63 = vpop.f32.mrf.mxu0  ;;  %v695_v17 = vsel %vm640_vm1, %v6006_v18, 0.0  ;;  %v631_v46 = vpop.f32.mrf.mxu1  ;;  %v733_v5 = vmul.f32 %v5939_v42, %v5939_v42  ;;  %v805_v23 = vsel %vm640_vm1, %v747_v16, 0.0 }
 0x15c   :  { %v753_v62 = vmul.f32 %v6013_v63, %v6013_v63  ;;  %688 = vadd.xlane.f32.xlu1 %v687_v8  ;;  %v694_v43 = vadd.f32 %v693_v26, %v6013_v63  ;;  %v812_v29 = vadd.f32 %v811_v39, %v752_v25  ;;  %v776_v24 = vadd.f32 %v775_v0, %v724_v12 }
 0x15d   :  { %v568_v11 = vpop.f32.mrf.mxu0  ;;  %v632_v1 = vpop.f32.mrf.mxu1  ;;  %v806_v53 = vadd.f32 %v805_v23, %v804_v58  ;;  %v709_v8 = vmul.f32 %v5781_v60, %v5781_v60  ;;  %v726_v39 = vmul.f32 %v5911_v59, %v5911_v59  ;;  %v814_v25 = vsel %vm640_vm1, %v754_v41, 0.0 }
 0x15e   :  { %v696_v3 = vadd.f32 %v695_v17, %v694_v43  ;;  %v813_v10 = vadd.f32 %v812_v29, %v753_v62  ;;  %v756_v46 = vadd.f32 %v5859_v49, %v5852_v57  ;;  %v638_v12 = vadd.f32 %v5870_v4, %v5839_v51 }
 0x15f   :  { %v569_v26 = vpop.f32.mrf.mxu0  ;;  %v633_v16 = vpop.f32.mrf.mxu1  ;;  %v787_v58 = vsel %vm640_vm1, %v733_v5, 0.0  ;;  %v649_v0 = vadd.f32 %v648_v2, %v5889_v14  ;;  %v718_v41 = vmul.f32 %v5889_v14, %v5889_v14  ;;  %v777_v17 = vadd.f32 %v776_v24, %v725_v54 }
 0x160   :  { %807 = vadd.xlane.f32.xlu1 %v806_v53  ;;  %697 = vadd.xlane.f32.xlu0 %v696_v3  ;;  %v788_v57 = vadd.f32 %v787_v58, %v786_v52  ;;  %v815_v49 = vadd.f32 %v814_v25, %v813_v10  ;;  %v767_v4 = vadd.f32 %v766_v45, %v717_v47  ;;  %v778_v62 = vsel %vm640_vm1, %v726_v39, 0.0 }
 0x161   :  { %v757_v3 = vadd.f32 %v756_v46, %v709_v8  ;;  %v650_v2 = vsel %vm640_vm1, %v5877_v9, 0.0  ;;  %v639_v43 = vadd.f32 %v638_v12, %v5848_v56  ;;  %v779_v10 = vadd.f32 %v778_v62, %v777_v17 }
 0x162   :  { %v651_v52 = vadd.f32 %v650_v2, %v649_v0  ;;  %v768_v29 = vadd.f32 %v767_v4, %v718_v41  ;;  %v712_v54 = vmul.f32 %v5846_v55, %v5846_v55  ;;  %v641_v5 = vsel %vm640_vm1, %v5846_v55, 0.0 }
 0x163   :  { %v758_v47 = vadd.f32 %v757_v3, %v710_v15  ;;  %v769_v11 = vsel %vm640_vm1, %v719_v61, 0.0  ;;  %v642_v24 = vadd.f32 %v641_v5, %v639_v43 }
 0x164   :  { %789 = vadd.xlane.f32.xlu1 %v788_v57  ;;  %816 = vadd.xlane.f32.xlu0 %v815_v49  ;;  %v770_v23 = vadd.f32 %v769_v11, %v768_v29  ;;  %v760_v53 = vsel %vm640_vm1, %v712_v54, 0.0 }
 0x165   :  { %v759_v1 = vadd.f32 %v758_v47, %v711_v6 }
 0x167   :  { %v761_v8 = vadd.f32 %v760_v53, %v759_v1 }
 0x168   :  { %652 = vadd.xlane.f32.xlu1 %v651_v52  ;;  %780 = vadd.xlane.f32.xlu0 %v779_v10 }
 0x16c   :  { %771 = vadd.xlane.f32.xlu1 %v770_v23  ;;  %643 = vadd.xlane.f32.xlu0 %v642_v24 }
 0x170   :  { %762 = vadd.xlane.f32.xlu0 %v761_v8 }
 0x1d9   :  { %v662_v26 = vpop.xlane.xlu0 %661 }
 0x1da   :  { %v701_v29 = vmul.f32 0.0012755102, %v662_v26 }
 0x1dc   :  { %v827_v1 = vmul.f32 %v701_v29, %v701_v29 }
 0x1dd   :  { %v671_v39 = vpop.xlane.xlu1 %670 }
 0x1de   :  { %v702_v6 = vmul.f32 0.0012755102, %v671_v39 }
 0x1e0   :  { %v828_v5 = vmul.f32 %v702_v6, %v702_v6 }
 0x1e1   :  { %v680_v25 = vpop.xlane.xlu1 %679 }
 0x1e2   :  { %v703_v46 = vmul.f32 0.0012755102, %v680_v25 }
 0x1e3   :  { %v799_v12 = vpop.xlane.xlu0 %798 }
 0x1e4   :  { %v829_v16 = vmul.f32 %v703_v46, %v703_v46  ;;  %v822_v45 = vmul.f32 0.0012755102, %v799_v12 }
 0x1e5   :  { %v689_v15 = vpop.xlane.xlu1 %688 }
 0x1e6   :  { %v836_v58 = vsub.f32 %v822_v45, %v829_v16  ;;  %v704_v0 = vmul.f32 0.0012755102, %v689_v15  ;;  %v843_v16 = vld [vmem:[%s10612_s2 + $0x20] sm:$0xff] }
 0x1e8   :  { %v850_v41 = vadd.f32 1e-05, %v836_v58  ;;  %v830_v17 = vmul.f32 %v704_v0, %v704_v0 }
 0x1e9   :  { %v808_v57 = vpop.xlane.xlu1 %807  ;;  %v698_v49 = vpop.xlane.xlu0 %697 }
 0x1ea   :  { %5477 = vrsqrt.f32 %v850_v41  ;;  %v823_v4 = vmul.f32 0.0012755102, %v808_v57  ;;  %v705_v62 = vmul.f32 0.0012755102, %v698_v49 }
 0x1ec   :  { %v837_v3 = vsub.f32 %v823_v4, %v830_v17  ;;  %v831_v52 = vmul.f32 %v705_v62, %v705_v62 }
 0x1ed   :  { %v790_v61 = vpop.xlane.xlu1 %789  ;;  %v817_v2 = vpop.xlane.xlu0 %816 }
 0x1ee   :  { %v851_v43 = vadd.f32 1e-05, %v837_v3  ;;  %v824_v10 = vmul.f32 0.0012755102, %v817_v2  ;;  %v821_v47 = vmul.f32 0.0012755102, %v790_v61 }
 0x1ef   :  { %v844_v3 = vld [vmem:[%s10612_s2 + $0x28] sm:$0xff] }
 0x1f0   :  { %5479 = vrsqrt.f32 %v851_v43  ;;  %v838_v54 = vsub.f32 %v824_v10, %v831_v52  ;;  %v835_v53 = vsub.f32 %v821_v47, %v828_v5  ;;  %v845_v10 = vld [vmem:[%s10612_s2 + $0x30] sm:$0xff] }
 0x1f1   :  { %v653_v11 = vpop.xlane.xlu1 %652  ;;  %v781_v23 = vpop.xlane.xlu0 %780 }
 0x1f2   :  { %v852_v24 = vadd.f32 1e-05, %v838_v54  ;;  %v820_v8 = vmul.f32 0.0012755102, %v781_v23  ;;  %v700_v25 = vmul.f32 0.0012755102, %v653_v11 }
 0x1f3   :  { %v849_v15 = vadd.f32 1e-05, %v835_v53  ;;  %v841_v54 = vld [vmem:[%s10612_s2 + $0x10] sm:$0xff]  ;;  %v4326_v11 = vld [vmem:[%s10615_s5] sm:$0xff] }
 0x1f4   :  { %5481 = vrsqrt.f32 %v852_v24  ;;  %v834_v46 = vsub.f32 %v820_v8, %v827_v1  ;;  %v826_v57 = vmul.f32 %v700_v25, %v700_v25  ;;  %v842_v1 = vld [vmem:[%s10612_s2 + $0x18] sm:$0xff]  ;;  %v4328_v53 = vld [vmem:[%s10615_s5 + $0x10] sm:$0xff]  ;;  %v839_v25 = vld [vmem:[%s10612_s2] sm:$0xff] }
 0x1f5   :  { %v772_v39 = vpop.xlane.xlu1 %771  ;;  %v644_v12 = vpop.xlane.xlu0 %643 }
 0x1f6   :  { %v699_v26 = vmul.f32 0.0012755102, %v644_v12  ;;  %v848_v58 = vadd.f32 1e-05, %v834_v46  ;;  %v819_v0 = vmul.f32 0.0012755102, %v772_v39 }
 0x1f7   :  { %v5478_v45 = vpop.eup %5477  ;;  %v4330_v39 = vld [vmem:[%s10615_s5 + $0x20] sm:$0xff] }
 0x1f8   :  { %v864_v41 = vmul.f32 %v5478_v45, %v843_v16  ;;  %5483 = vrsqrt.f32 %v848_v58  ;;  %v825_v17 = vmul.f32 %v699_v26, %v699_v26  ;;  %v833_v62 = vsub.f32 %v819_v0, %v826_v57  ;;  %v840_v26 = vld [vmem:[%s10612_s2 + $0x8] sm:$0xff]  ;;  %v4332_v45 = vld [vmem:[%s10615_s5 + $0x30] sm:$0xff]  ;;  %v4334_v58 = vld [vmem:[%s10615_s5 + $0x40] sm:$0xff] }
 0x1f9   :  { %v763_v49 = vpop.xlane.xlu0 %762  ;;  %5485 = vrsqrt.f32 %v849_v15  ;;  %v4327_v0 = vld [vmem:[%s10615_s5 + $0x8] sm:$0xff]  ;;  %v4329_v57 = vld [vmem:[%s10615_s5 + $0x18] sm:$0xff] }
 0x1fa   :  { %v818_v4 = vmul.f32 0.0012755102, %v763_v49  ;;  %889 = vperm.xlu1 %5444, %v864_v41   ;;  %v847_v52 = vadd.f32 1e-05, %v833_v62  ;;  %v4336_v41 = vld [vmem:[%s10615_s5 + $0x50] sm:$0xff]  ;;  %v4338_v49 = vld [vmem:[%s10615_s5 + $0x60] sm:$0xff] }
 0x1fb   :  { %v4333_v62 = vld [vmem:[%s10615_s5 + $0x38] sm:$0xff] }
 0x1fc   :  { %v832_v6 = vsub.f32 %v818_v4, %v825_v17  ;;  %v4331_v17 = vld [vmem:[%s10615_s5 + $0x28] sm:$0xff]  ;;  %v4340_v4 = vld [vmem:[%s10615_s5 + $0x70] sm:$0xff] }
 0x1fd   :  { %v5480_v61 = vpop.eup %5479 }
 0x1fe   :  { %v846_v2 = vadd.f32 1e-05, %v832_v6  ;;  %v865_v43 = vmul.f32 %v5480_v61, %v844_v3  ;;  %v4342_v3 = vld [vmem:[%s10615_s5 + $0x80] sm:$0xff]  ;;  %v4335_v6 = vld [vmem:[%s10615_s5 + $0x48] sm:$0xff]  ;;  %v4344_v61 = vld [vmem:[%s10615_s5 + $0x90] sm:$0xff] }
 0x200   :  { %5487 = vrsqrt.f32 %v846_v2  ;;  %894 = vperm.xlu1 %5444, %v865_v43   ;;  %v4337_v2 = vld [vmem:[%s10615_s5 + $0x58] sm:$0xff]  ;;  %v4346_v43 = vld [vmem:[%s10615_s5 + $0xa0] sm:$0xff] }
 0x201   :  { %v5482_v29 = vpop.eup %5481  ;;  %5489 = vrsqrt.f32 %v847_v52  ;;  %v4339_v52 = vld [vmem:[%s10615_s5 + $0x68] sm:$0xff] }
 0x202   :  { %v866_v47 = vmul.f32 %v5482_v29, %v845_v10  ;;  %v4348_v10 = vld [vmem:[%s10615_s5 + $0xb0] sm:$0xff]  ;;  %v4341_v29 = vld [vmem:[%s10615_s5 + $0x78] sm:$0xff] }
 0x204   :  { %899 = vperm.xlu0 %5443, %v866_v47   ;;  %v4350_v47 = vld [vmem:[%s10615_s5 + $0xc0] sm:$0xff] }
 0x205   :  { %v5484_v5 = vpop.eup %5483 }
 0x206   :  { %v862_v23 = vmul.f32 %v5484_v5, %v841_v54  ;;  %v5486_v24 = vpop.eup %5485  ;;  %v4343_v54 = vld [vmem:[%s10615_s5 + $0x88] sm:$0xff]  ;;  %v4352_v5 = vld [vmem:[%s10615_s5 + $0xd0] sm:$0xff] }
 0x207   :  { %v863_v8 = vmul.f32 %v5486_v24, %v842_v1  ;;  %v4347_v24 = vld [vmem:[%s10615_s5 + $0xa8] sm:$0xff]  ;;  %v4356_v1 = vld [vmem:[%s10615_s5 + $0xf0] sm:$0xff] }
 0x208   :  { %4370 = vperm.xlu0 %5443, %v4326_v11   ;;  %879 = vperm.xlu1 %5444, %v862_v23   ;;  %v4345_v11 = vld [vmem:[%s10615_s5 + $0x98] sm:$0xff]  ;;  %v4354_v23 = vld [vmem:[%s10615_s5 + $0xe0] sm:$0xff] }
 0x20c   :  { %4380 = vperm.xlu0 %5443, %v4328_v53   ;;  %884 = vperm.xlu1 %5444, %v863_v8   ;;  %v4349_v53 = vld [vmem:[%s10615_s5 + $0xb8] sm:$0xff]  ;;  %v4358_v8 = vld [vmem:[%s10615_s5 + $0x100] sm:$0xff] }
 0x20d   :  { %v5488_v46 = vpop.eup %5487 }
 0x20e   :  { %v860_v12 = vmul.f32 %v5488_v46, %v839_v25  ;;  %v5490_v16 = vpop.eup %5489  ;;  %v4351_v25 = vld [vmem:[%s10615_s5 + $0xc8] sm:$0xff]  ;;  %v4360_v46 = vld [vmem:[%s10615_s5 + $0x110] sm:$0xff] }
 0x20f   :  { %v861_v15 = vmul.f32 %v5490_v16, %v840_v26  ;;  %v4355_v16 = vld [vmem:[%s10615_s5 + $0xe8] sm:$0xff]  ;;  %v4364_v26 = vld [vmem:[%s10615_s5 + $0x130] sm:$0xff] }
 0x210   :  { %4390 = vperm.xlu0 %5443, %v4330_v39   ;;  %869 = vperm.xlu1 %5444, %v860_v12   ;;  %v4353_v39 = vld [vmem:[%s10615_s5 + $0xd8] sm:$0xff]  ;;  %v4362_v12 = vld [vmem:[%s10615_s5 + $0x120] sm:$0xff] }
 0x214   :  { %4400 = vperm.xlu0 %5443, %v4332_v45   ;;  %874 = vperm.xlu1 %5444, %v861_v15   ;;  %v4357_v45 = vld [vmem:[%s10615_s5 + $0xf8] sm:$0xff]  ;;  %v4359_v15 = vld [vmem:[%s10615_s5 + $0x108] sm:$0xff] }
 0x218   :  { %4410 = vperm.xlu0 %5443, %v4334_v58   ;;  %4375 = vperm.xlu1 %5444, %v4327_v0   ;;  %v4361_v58 = vld [vmem:[%s10615_s5 + $0x118] sm:$0xff]  ;;  %v4363_v0 = vld [vmem:[%s10615_s5 + $0x128] sm:$0xff] }
 0x21c   :  { %4420 = vperm.xlu0 %5443, %v4336_v41   ;;  %4385 = vperm.xlu1 %5444, %v4329_v57   ;;  %v4365_v41 = vld [vmem:[%s10615_s5 + $0x138] sm:$0xff] }
 0x220   :  { %4430 = vperm.xlu0 %5443, %v4338_v49   ;;  %4395 = vperm.xlu1 %5444, %v4331_v17  }
 0x224   :  { %4440 = vperm.xlu0 %5443, %v4340_v4   ;;  %4405 = vperm.xlu1 %5444, %v4333_v62  }
 0x228   :  { %4450 = vperm.xlu0 %5443, %v4342_v3   ;;  %4415 = vperm.xlu1 %5444, %v4335_v6  }
 0x22c   :  { %4460 = vperm.xlu0 %5443, %v4344_v61   ;;  %4425 = vperm.xlu1 %5444, %v4337_v2  }
 0x230   :  { %4470 = vperm.xlu0 %5443, %v4346_v43   ;;  %4435 = vperm.xlu1 %5444, %v4339_v52  }
 0x234   :  { %4480 = vperm.xlu0 %5443, %v4348_v10   ;;  %4445 = vperm.xlu1 %5444, %v4341_v29  }
 0x238   :  { %4490 = vperm.xlu0 %5443, %v4350_v47   ;;  %4455 = vperm.xlu1 %5444, %v4343_v54  }
 0x23c   :  { %4500 = vperm.xlu0 %5443, %v4352_v5   ;;  %4465 = vperm.xlu1 %5444, %v4345_v11  }
 0x240   :  { %4510 = vperm.xlu0 %5443, %v4354_v23   ;;  %4475 = vperm.xlu1 %5444, %v4347_v24  }
 0x244   :  { %4520 = vperm.xlu0 %5443, %v4356_v1   ;;  %4485 = vperm.xlu1 %5444, %v4349_v53   ;;  %v11284_v1 = vld [vmem:[#allocation20_spill] sm:$0xff] }
 0x248   :  { %4530 = vperm.xlu0 %5443, %v4358_v8   ;;  %4495 = vperm.xlu1 %5444, %v4351_v25   ;;  %v11285_v8 = vld [vmem:[#allocation21_spill] sm:$0xff] }
 0x24c   :  { %4540 = vperm.xlu0 %5443, %v4360_v46   ;;  %4505 = vperm.xlu1 %5444, %v4353_v39   ;;  %v11286_v46 = vld [vmem:[#allocation18_spill] sm:$0xff] }
 0x250   :  { %4550 = vperm.xlu0 %5443, %v4362_v12   ;;  %4515 = vperm.xlu1 %5444, %v4355_v16   ;;  %v11287_v12 = vld [vmem:[#allocation19_spill] sm:$0xff] }
 0x254   :  { %4560 = vperm.xlu0 %5443, %v4364_v26   ;;  %4525 = vperm.xlu1 %5444, %v4357_v45  }
 0x258   :  { %4535 = vperm.xlu1 %5444, %v4359_v15  }
 0x25c   :  { %4545 = vperm.xlu1 %5444, %v4361_v58  }
 0x260   :  { %4555 = vperm.xlu1 %5444, %v4363_v0  }
 0x264   :  { %4565 = vperm.xlu1 %5444, %v4365_v41   ;;  %v11288_v41 = vld [vmem:[#allocation13_spill] sm:$0xff] }
 0x275   :  { %v6199_v57 = vpop.permute.xlu1 %889 }
 0x276   :  { %v931_v43 = vmul.f32 %v6199_v57, %v5811_v30  ;;  %v933_v52 = vmul.f32 %v6199_v57, %v5813_v31  ;;  %v932_v30 = vmul.f32 %v6199_v57, %v5809_v28 }
 0x27b   :  { %v6201_v49 = vpop.permute.xlu1 %894 }
 0x27c   :  { %v938_v4 = vmul.f32 %v6201_v49, %v5819_v34  ;;  %v940_v62 = vmul.f32 %v6201_v49, %v5821_v35  ;;  %v937_v34 = vmul.f32 %v6201_v49, %v5815_v32  ;;  %v939_v35 = vmul.f32 %v6201_v49, %v5817_v33 }
 0x27e   :  { %v966_v33 = vpack.c.bf16 %v938_v4, %v931_v43  ;;  %v967_v5 = vpack.c.bf16 %v939_v35, %v932_v30  ;;  %v11291_v43 = vld [vmem:[#allocation16_spill] sm:$0xff]  ;;  %v6269_v30 = vld [vmem:[%s10613_s3] sm:$0xff]  }
 0x27f   :  { %v900_v17 = vpop.permute.xlu0 %899 }
 0x280   :  { %v945_v3 = vmul.f32 %v900_v17, %v5827_v38  ;;  %v947_v6 = vmul.f32 %v900_v17, %v5829_v40  ;;  %v944_v61 = vmul.f32 %v900_v17, %v5823_v36  ;;  %v946_v2 = vmul.f32 %v900_v17, %v5825_v37 }
 0x281   :  { %v930_v36 = vmul.f32 %v6199_v57, %v5807_v27  ;;  %v968_v37 = vpack.c.bf16 %v940_v62, %v933_v52  ;;  %v948_v15 = vmul.f32 %v900_v17, %v5997_v7  ;;  %v950_v58 = vmul.f32 %v900_v17, %v6006_v18  ;;  %v11293_v7 = vld [vmem:[#allocation14_spill] sm:$0xff]  ;;  %v11294_v18 = vld [vmem:[#allocation15_spill] sm:$0xff] }
 0x282   :  { %v973_v10 = vpack.c.bf16 %v945_v3, %v945_v3  ;;  %v975_v38 = vpack.c.bf16 %v947_v6, %v947_v6  ;;  %v972_v29 = vpack.c.bf16 %v944_v61, %v944_v61  ;;  %v974_v40 = vpack.c.bf16 %v946_v2, %v946_v2  ;;  %v11289_v3 = vld [vmem:[#allocation11_spill] sm:$0xff]  ;;  %v11290_v61 = vld [vmem:[#allocation12_spill] sm:$0xff] }
 0x283   :  { %v6219_v47 = vpop.permute.xlu1 %879  ;;  %v965_v54 = vpack.c.bf16 %v937_v34, %v930_v36 }
 0x284   :  { %5229 = vmatprep.subr.msk.bf16.mxu0 %vm1190_vm2, %v973_v10  ;;  %5251 = vmatprep.subr.msk.bf16.mxu1 %vm1190_vm2, %v975_v38  ;;  %v1192_v31 = vsel %vm1190_vm2, %v972_v29, 0  ;;  %v1198_v32 = vsel %vm1190_vm2, %v974_v40, 0  ;;  %v917_v28 = vmul.f32 %v6219_v47, %v5795_v21  ;;  %v919_v11 = vmul.f32 %v6219_v47, %v5797_v22 }
 0x285   :  { %1221 = vmatpush1.bf16.msra.mxu0 %v1192_v31  ;;  %1464 = vmatpush1.bf16.msra.mxu1 %v1198_v32  ;;  %v916_v23 = vmul.f32 %v6219_v47, %v5791_v19  ;;  %v918_v24 = vmul.f32 %v6219_v47, %v5793_v20  ;;  %v949_v20 = vmul.f32 %v900_v17, %v6013_v63  ;;  %v11292_v63 = vld [vmem:[#allocation17_spill] sm:$0xff] }
 0x286   :  { %1222 = vmatprep.subr.bf16.mxu0 %v966_v33  ;;  %1465 = vmatprep.subr.bf16.mxu1 %v968_v37  ;;  %v976_v31 = vpack.c.bf16 %v948_v15, %v948_v15  ;;  %v978_v32 = vpack.c.bf16 %v950_v58, %v950_v58  ;;  %v10637_v33 = vmov 0.0   ;;  %v11295_v37 = vld [vmem:[#allocation28_spill] sm:$0xff]  ;;  %v11302_v58 = vld [vmem:[#allocation22_spill] sm:$0xff] }
 0x287   :  { %v6229_v27 = vpop.permute.xlu1 %884  ;;  %v977_v36 = vpack.c.bf16 %v949_v20, %v949_v20  ;;  %v922_v20 = vmul.f32 %v6219_v47, %v5911_v59 }
 0x288   :  { %v924_v53 = vmul.f32 %v6229_v27, %v11284_v1  ;;  %v926_v25 = vmul.f32 %v6229_v27, %v11285_v8  ;;  %v923_v39 = vmul.f32 %v6229_v27, %v11286_v46  ;;  %v925_v21 = vmul.f32 %v6229_v27, %v11287_v12  ;;  %v11297_v1 = vld [vmem:[#allocation25_spill] sm:$0xff]  ;;  %v11298_v8 = vld [vmem:[#allocation27_spill] sm:$0xff]  ;;  %v11300_v12 = vld [vmem:[#allocation24_spill] sm:$0xff] }
 0x289   :  { %1223 = vmatpush1.bf16.msra.mxu0 %v965_v54  ;;  %1466 = vmatpush1.bf16.msra.mxu1 %v967_v5  ;;  %v941_v54 = vmul.f32 %v6201_v49, %v11295_v37  ;;  %v11296_v5 = vld [vmem:[#allocation26_spill] sm:$0xff] }
 0x28a   :  { %v959_v22 = vpack.c.bf16 %v924_v53, %v917_v28  ;;  %v961_v16 = vpack.c.bf16 %v926_v25, %v919_v11  ;;  %v958_v19 = vpack.c.bf16 %v923_v39, %v916_v23  ;;  %v960_v26 = vpack.c.bf16 %v925_v21, %v918_v24 }
 0x28b   :  { %v6247_v45 = vpop.permute.xlu1 %869  ;;  %v934_v28 = vmul.f32 %v6199_v57, %v11296_v5  ;;  %v943_v11 = vmul.f32 %v6201_v49, %v5985_v48  ;;  %v1204_v23 = vsel %vm1190_vm2, %v976_v31, 0  ;;  %v1210_v24 = vsel %vm1190_vm2, %v978_v32, 0 }
 0x28c   :  { %1224 = vmatprep.subr.bf16.mxu0 %v959_v22  ;;  %1467 = vmatprep.subr.bf16.mxu1 %v961_v16  ;;  %v903_v4 = vmul.f32 %v6247_v45, %v11288_v41  ;;  %v905_v62 = vmul.f32 %v6247_v45, %v5781_v60  ;;  %v902_v6 = vmul.f32 %v6247_v45, %v11289_v3  ;;  %v11299_v39 = vmov 0   ;;  %v6384_v3 = vld [vmem:[%s10613_s3 + $0x38] sm:$0xff]  }
 0x28d   :  { %1225 = vmatpush1.bf16.msra.mxu0 %v958_v19  ;;  %1468 = vmatpush1.bf16.msra.mxu1 %v960_v26  ;;  %v904_v2 = vmul.f32 %v6247_v45, %v11290_v61  ;;  %v942_v60 = vmul.f32 %v6201_v49, %v5990_v50  ;;  %v935_v50 = vmul.f32 %v6199_v57, %v5968_v13  ;;  %v6406_v61 = vld [vmem:[%s10613_s3 + $0x48] sm:$0xff]  }
 0x28e   :  { %v928_v53 = vmul.f32 %v6229_v27, %v11297_v1  ;;  %v936_v25 = vmul.f32 %v6199_v57, %v11298_v8  ;;  %v969_v48 = vpack.c.bf16 %v941_v54, %v934_v28  ;;  %v921_v49 = vmul.f32 %v6219_v47, %v5919_v44  ;;  %v6303_v57 = vld [vmem:[%s10613_s3 + $0x8] sm:$0xff]  }
 0x28f   :  { %v875_v0 = vpop.permute.xlu1 %874  ;;  %v970_v13 = vpack.c.bf16 %v942_v60, %v935_v50  ;;  %v927_v21 = vmul.f32 %v6229_v27, %v11300_v12  ;;  %v929_v22 = vmul.f32 %v6229_v27, %v5939_v42  ;;  %v11301_v44 = vld [vmem:[#allocation23_spill] sm:$0xff]  ;;  %v907_v42 = vmul.f32 %v6247_v45, %v5848_v56 }
 0x290   :  { %v910_v52 = vmul.f32 %v875_v0, %v11291_v43  ;;  %v912_v34 = vmul.f32 %v875_v0, %v11292_v63  ;;  %v909_v35 = vmul.f32 %v875_v0, %v11293_v7  ;;  %v911_v17 = vmul.f32 %v875_v0, %v11294_v18  ;;  %v6428_v43 = vld [vmem:[%s10613_s3 + $0x58] sm:$0xff]   ;;  %v6450_v63 = vld [vmem:[%s10613_s3 + $0x68] sm:$0xff]  }
 0x291   :  { %v971_v46 = vpack.c.bf16 %v943_v11, %v936_v25  ;;  %v963_v16 = vpack.c.bf16 %v928_v53, %v921_v49  ;;  %v914_v19 = vmul.f32 %v875_v0, %v5889_v14  ;;  %v920_v26 = vmul.f32 %v6219_v47, %v11301_v44  ;;  %v6472_v7 = vld [vmem:[%s10613_s3 + $0x78] sm:$0xff]   ;;  %v6494_v18 = vld [vmem:[%s10613_s3 + $0x88] sm:$0xff]  }
 0x292   :  { %v952_v10 = vpack.c.bf16 %v910_v52, %v903_v4  ;;  %v954_v38 = vpack.c.bf16 %v912_v34, %v905_v62  ;;  %v951_v29 = vpack.c.bf16 %v909_v35, %v902_v6  ;;  %v953_v40 = vpack.c.bf16 %v911_v17, %v904_v2  ;;  %v6373_v62 = vld [vmem:[%s10613_s3 + $0x30] sm:$0xff]   ;;  %v6395_v6 = vld [vmem:[%s10613_s3 + $0x40] sm:$0xff]  }
 0x293   :  { %v962_v27 = vpack.c.bf16 %v927_v21, %v920_v26  ;;  %v964_v15 = vpack.c.bf16 %v929_v22, %v922_v20  ;;  %v913_v41 = vmul.f32 %v875_v0, %v11302_v58  ;;  %v915_v14 = vmul.f32 %v875_v0, %v5877_v9  ;;  %v6329_v0 = vld [vmem:[%s10613_s3 + $0x10] sm:$0xff]   ;;  %v6439_v52 = vld [vmem:[%s10613_s3 + $0x60] sm:$0xff]  }
 0x294   :  { %1226 = vmatprep.subr.bf16.mxu0 %v952_v10  ;;  %1469 = vmatprep.subr.bf16.mxu1 %v954_v38  ;;  %v956_v4 = vpack.c.bf16 %v914_v19, %v907_v42  ;;  %v906_v59 = vmul.f32 %v6247_v45, %v5839_v51  ;;  %v908_v56 = vmul.f32 %v6247_v45, %v5846_v55  ;;  %v6340_v51 = vld [vmem:[%s10613_s3 + $0x18] sm:$0xff]   ;;  %v6351_v55 = vld [vmem:[%s10613_s3 + $0x20] sm:$0xff]   ;;  %v6362_v45 = vld [vmem:[%s10613_s3 + $0x28] sm:$0xff]  }
 0x295   :  { %1227 = vmatpush1.bf16.msra.mxu0 %v951_v29  ;;  %1470 = vmatpush1.bf16.msra.mxu1 %v953_v40  ;;  %v6417_v2 = vld [vmem:[%s10613_s3 + $0x50] sm:$0xff]   ;;  %v6483_v35 = vld [vmem:[%s10613_s3 + $0x80] sm:$0xff]   ;;  %v6516_v10 = vld [vmem:[%s10613_s3 + $0x98] sm:$0xff]  }
 0x296   :  { %5273 = vmatprep.subr.msk.bf16.mxu0 %vm1190_vm2, %v977_v36  ;;  %5341 = vmatprep.subr.bf16.mxu1 %v10637_v33  ;;  %v955_v47 = vpack.c.bf16 %v913_v41, %v906_v59  ;;  %v957_v9 = vpack.c.bf16 %v915_v14, %v908_v56  ;;  %v6461_v34 = vld [vmem:[%s10613_s3 + $0x70] sm:$0xff]   ;;  %v6527_v38 = vld [vmem:[%s10613_s3 + $0xa0] sm:$0xff]  }
 0x297   :  { %v6505_v17 = vld [vmem:[%s10613_s3 + $0x90] sm:$0xff]   ;;  %11303 = vst [vmem:[#allocation20_spill] sm:$0xff] %v6527_v38 }
 0x298   :  { %5230 = vmatmul.mubr.msk.bf16.vlgmr.msra.gmra.mxu0 %vm1126_vm3, %v6269_v30  ;;  %5252 = vmatmul.mubr.msk.bf16.vlgmr.msra.gmra.mxu1 %vm1126_vm3, %v6269_v30 }
 0x299   :  { %1707 = vmatpush1.bf16.msra.mxu0 %v1204_v23  ;;  %5342 = vmatpush3.bf16.msra.mxu1 %v1210_v24 }
 0x29a   :  { %1708 = vmatprep.subr.bf16.mxu0 %v970_v13  ;;  %5343 = vmatprep.subr.bf16.mxu1 %v10637_v33 }
 0x29b   :  { %1254 = vmatprep.mubr.bf16.mxu0 %v11299_v39  ;;  %1497 = vmatprep.mubr.bf16.mxu1 %v11299_v39 }
 0x29d   :  { %1709 = vmatpush1.bf16.msra.mxu0 %v969_v48  ;;  %5344 = vmatpush3.bf16.msra.mxu1 %v971_v46 }
 0x29e   :  { %1710 = vmatprep.subr.bf16.mxu0 %v963_v16  ;;  %5345 = vmatprep.subr.bf16.mxu1 %v10637_v33 }
 0x2a0   :  { %5231 = vmatmul.mubr.msk.bf16.gmra.mxu0 %vm1126_vm3, %v6303_v57  ;;  %5253 = vmatmul.mubr.msk.bf16.gmra.mxu1 %vm1126_vm3, %v6303_v57 }
 0x2a1   :  { %1711 = vmatpush1.bf16.msra.mxu0 %v962_v27  ;;  %5346 = vmatpush3.bf16.msra.mxu1 %v964_v15 }
 0x2a2   :  { %1712 = vmatprep.subr.bf16.mxu0 %v956_v4  ;;  %5347 = vmatprep.subr.bf16.mxu1 %v10637_v33 }
 0x2a3   :  { %1264 = vmatprep.mubr.bf16.mxu0 %v11299_v39  ;;  %1507 = vmatprep.mubr.bf16.mxu1 %v11299_v39 }
 0x2a5   :  { %1713 = vmatpush1.bf16.msra.mxu0 %v955_v47  ;;  %5348 = vmatpush3.bf16.msra.mxu1 %v957_v9 }
 0x2a8   :  { %5232 = vmatmul.mubr.msk.bf16.gmra.mxu0 %vm1126_vm3, %v6329_v0  ;;  %5254 = vmatmul.mubr.msk.bf16.gmra.mxu1 %vm1126_vm3, %v6329_v0 }
 0x2a9   :  { %1274 = vmatprep.mubr.bf16.mxu0 %v11299_v39  ;;  %1517 = vmatprep.mubr.bf16.mxu1 %v11299_v39 }
 0x2b0   :  { %5233 = vmatmul.mubr.msk.bf16.gmra.mxu0 %vm1126_vm3, %v6340_v51  ;;  %5255 = vmatmul.mubr.msk.bf16.gmra.mxu1 %vm1126_vm3, %v6340_v51 }
 0x2b1   :  { %1284 = vmatprep.mubr.bf16.mxu0 %v11299_v39  ;;  %1527 = vmatprep.mubr.bf16.mxu1 %v11299_v39 }
 0x2b8   :  { %5234 = vmatmul.mubr.msk.bf16.gmra.mxu0 %vm1126_vm3, %v6351_v55  ;;  %5256 = vmatmul.mubr.msk.bf16.gmra.mxu1 %vm1126_vm3, %v6351_v55 }
 0x2b9   :  { %1294 = vmatprep.mubr.bf16.mxu0 %v11299_v39  ;;  %1537 = vmatprep.mubr.bf16.mxu1 %v11299_v39 }
 0x2c0   :  { %5235 = vmatmul.mubr.msk.bf16.gmra.mxu0 %vm1126_vm3, %v6362_v45  ;;  %5257 = vmatmul.mubr.msk.bf16.gmra.mxu1 %vm1126_vm3, %v6362_v45 }
 0x2c1   :  { %1304 = vmatprep.mubr.bf16.mxu0 %v11299_v39  ;;  %1547 = vmatprep.mubr.bf16.mxu1 %v11299_v39 }
 0x2c8   :  { %5236 = vmatmul.mubr.msk.bf16.gmra.mxu0 %vm1126_vm3, %v6373_v62  ;;  %5258 = vmatmul.mubr.msk.bf16.gmra.mxu1 %vm1126_vm3, %v6373_v62 }
 0x2c9   :  { %1314 = vmatprep.mubr.bf16.mxu0 %v11299_v39  ;;  %1557 = vmatprep.mubr.bf16.mxu1 %v11299_v39 }
 0x2d0   :  { %5237 = vmatmul.mubr.msk.bf16.gmra.mxu0 %vm1126_vm3, %v6384_v3  ;;  %5259 = vmatmul.mubr.msk.bf16.gmra.mxu1 %vm1126_vm3, %v6384_v3 }
 0x2d1   :  { %1324 = vmatprep.mubr.bf16.mxu0 %v11299_v39  ;;  %1567 = vmatprep.mubr.bf16.mxu1 %v11299_v39 }
 0x2d8   :  { %5238 = vmatmul.mubr.msk.bf16.gmra.mxu0 %vm1126_vm3, %v6395_v6  ;;  %5260 = vmatmul.mubr.msk.bf16.gmra.mxu1 %vm1126_vm3, %v6395_v6 }
 0x2d9   :  { %1334 = vmatprep.mubr.bf16.mxu0 %v11299_v39  ;;  %1577 = vmatprep.mubr.bf16.mxu1 %v11299_v39 }
 0x2e0   :  { %5239 = vmatmul.mubr.msk.bf16.gmra.mxu0 %vm1126_vm3, %v6406_v61  ;;  %5261 = vmatmul.mubr.msk.bf16.gmra.mxu1 %vm1126_vm3, %v6406_v61 }
 0x2e1   :  { %1344 = vmatprep.mubr.bf16.mxu0 %v11299_v39  ;;  %1587 = vmatprep.mubr.bf16.mxu1 %v11299_v39 }
 0x2e8   :  { %5240 = vmatmul.mubr.msk.bf16.gmra.mxu0 %vm1126_vm3, %v6417_v2  ;;  %5262 = vmatmul.mubr.msk.bf16.gmra.mxu1 %vm1126_vm3, %v6417_v2 }
 0x2e9   :  { %1354 = vmatprep.mubr.bf16.mxu0 %v11299_v39  ;;  %1597 = vmatprep.mubr.bf16.mxu1 %v11299_v39 }
 0x2f0   :  { %5241 = vmatmul.mubr.msk.bf16.gmra.mxu0 %vm1126_vm3, %v6428_v43  ;;  %5263 = vmatmul.mubr.msk.bf16.gmra.mxu1 %vm1126_vm3, %v6428_v43 }
 0x2f1   :  { %1364 = vmatprep.mubr.bf16.mxu0 %v11299_v39  ;;  %1607 = vmatprep.mubr.bf16.mxu1 %v11299_v39 }
 0x2f8   :  { %5242 = vmatmul.mubr.msk.bf16.gmra.mxu0 %vm1126_vm3, %v6439_v52  ;;  %5264 = vmatmul.mubr.msk.bf16.gmra.mxu1 %vm1126_vm3, %v6439_v52 }
 0x2f9   :  { %1374 = vmatprep.mubr.bf16.mxu0 %v11299_v39  ;;  %1617 = vmatprep.mubr.bf16.mxu1 %v11299_v39 }
 0x300   :  { %5243 = vmatmul.mubr.msk.bf16.gmra.mxu0 %vm1126_vm3, %v6450_v63  ;;  %5265 = vmatmul.mubr.msk.bf16.gmra.mxu1 %vm1126_vm3, %v6450_v63 }
 0x301   :  { %1384 = vmatprep.mubr.bf16.mxu0 %v11299_v39  ;;  %1627 = vmatprep.mubr.bf16.mxu1 %v11299_v39 }
 0x308   :  { %5244 = vmatmul.mubr.msk.bf16.gmra.mxu0 %vm1126_vm3, %v6461_v34  ;;  %5266 = vmatmul.mubr.msk.bf16.gmra.mxu1 %vm1126_vm3, %v6461_v34 }
 0x309   :  { %1394 = vmatprep.mubr.bf16.mxu0 %v11299_v39  ;;  %1637 = vmatprep.mubr.bf16.mxu1 %v11299_v39 }
 0x310   :  { %5245 = vmatmul.mubr.msk.bf16.gmra.mxu0 %vm1126_vm3, %v6472_v7  ;;  %5267 = vmatmul.mubr.msk.bf16.gmra.mxu1 %vm1126_vm3, %v6472_v7 }
 0x311   :  { %1404 = vmatprep.mubr.bf16.mxu0 %v11299_v39  ;;  %1647 = vmatprep.mubr.bf16.mxu1 %v11299_v39 }
 0x318   :  { %5246 = vmatmul.mubr.msk.bf16.gmra.mxu0 %vm1126_vm3, %v6483_v35  ;;  %5268 = vmatmul.mubr.msk.bf16.gmra.mxu1 %vm1126_vm3, %v6483_v35 }
 0x319   :  { %1414 = vmatprep.mubr.bf16.mxu0 %v11299_v39  ;;  %1657 = vmatprep.mubr.bf16.mxu1 %v11299_v39 }
 0x320   :  { %5247 = vmatmul.mubr.msk.bf16.gmra.mxu0 %vm1126_vm3, %v6494_v18  ;;  %5269 = vmatmul.mubr.msk.bf16.gmra.mxu1 %vm1126_vm3, %v6494_v18 }
 0x321   :  { %1424 = vmatprep.mubr.bf16.mxu0 %v11299_v39  ;;  %1667 = vmatprep.mubr.bf16.mxu1 %v11299_v39 }
 0x328   :  { %5248 = vmatmul.mubr.msk.bf16.gmra.mxu0 %vm1126_vm3, %v6505_v17  ;;  %5270 = vmatmul.mubr.msk.bf16.gmra.mxu1 %vm1126_vm3, %v6505_v17 }
 0x329   :  { %1434 = vmatprep.mubr.bf16.mxu0 %v11299_v39  ;;  %1677 = vmatprep.mubr.bf16.mxu1 %v11299_v39 }
 0x330   :  { %5249 = vmatmul.mubr.msk.bf16.gmra.mxu0 %vm1126_vm3, %v6516_v10  ;;  %5271 = vmatmul.mubr.msk.bf16.gmra.mxu1 %vm1126_vm3, %v6516_v10 }
 0x331   :  { %1444 = vmatprep.mubr.bf16.mxu0 %v11299_v39  ;;  %1687 = vmatprep.mubr.bf16.mxu1 %v11299_v39 }
 0x338   :  { %5250 = vmatmul.mubr.msk.bf16.gmra.mxu0 %vm1126_vm3, %v6527_v38  ;;  %5272 = vmatmul.mubr.msk.bf16.gmra.mxu1 %vm1126_vm3, %v6527_v38 }
 0x339   :  { %1730 = vmatprep.mubr.bf16.mxu0 %v11299_v39  ;;  %5349 = vmatprep.mubr.msk.bf16.mxu1 %vm5649_vm4, %v10637_v33 }
 0x340   :  { %5274 = vmatmul.mubr.msk.bf16.vlgmr.msra.gmra.mxu0 %vm1126_vm3, %v6269_v30  ;;  %5350 = vmatmul.mubr.msk.bf16.vlgmr.msra.gmra.mxu1 %vm1126_vm3, %v6269_v30 }
 0x341   :  { %1740 = vmatprep.mubr.bf16.mxu0 %v11299_v39  ;;  %5353 = vmatprep.mubr.msk.bf16.mxu1 %vm5649_vm4, %v10637_v33 }
 0x348   :  { %5275 = vmatmul.mubr.msk.bf16.gmra.mxu0 %vm1126_vm3, %v6303_v57  ;;  %5354 = vmatmul.mubr.msk.bf16.gmra.mxu1 %vm1126_vm3, %v6303_v57 }
 0x349   :  { %1750 = vmatprep.mubr.bf16.mxu0 %v11299_v39  ;;  %5357 = vmatprep.mubr.msk.bf16.mxu1 %vm5649_vm4, %v10637_v33 }
 0x350   :  { %5276 = vmatmul.mubr.msk.bf16.gmra.mxu0 %vm1126_vm3, %v6329_v0  ;;  %5358 = vmatmul.mubr.msk.bf16.gmra.mxu1 %vm1126_vm3, %v6329_v0 }
 0x351   :  { %1760 = vmatprep.mubr.bf16.mxu0 %v11299_v39  ;;  %5361 = vmatprep.mubr.msk.bf16.mxu1 %vm5649_vm4, %v10637_v33 }
 0x358   :  { %v6557_v29 = vpop.f32.mrf.mxu0  ;;  %5277 = vmatmul.mubr.msk.bf16.gmra.mxu0 %vm1126_vm3, %v6340_v51  ;;  %v6561_v40 = vpop.f32.mrf.mxu1  ;;  %5362 = vmatmul.mubr.msk.bf16.gmra.mxu1 %vm1126_vm3, %v6340_v51 }
 0x359   :  { %11304 = vst [vmem:[#allocation21_spill] sm:$0xff] %v6557_v29  ;;  %11305 = vst [vmem:[#allocation18_spill] sm:$0xff] %v6561_v40  ;;  %1770 = vmatprep.mubr.bf16.mxu0 %v11299_v39  ;;  %5365 = vmatprep.mubr.msk.bf16.mxu1 %vm5649_vm4, %v10637_v33 }
 0x35a   :  { %v6568_v60 = vpop.f32.mrf.mxu0  ;;  %v6570_v36 = vpop.f32.mrf.mxu1 }
 0x35b   :  { %11306 = vst [vmem:[#allocation19_spill] sm:$0xff] %v6568_v60  ;;  %11307 = vst [vmem:[#allocation13_spill] sm:$0xff] %v6570_v36 }
 0x35c   :  { %v6572_v30 = vpop.f32.mrf.mxu0  ;;  %v6574_v31 = vpop.f32.mrf.mxu1 }
 0x35d   :  { %11308 = vst [vmem:[#allocation11_spill] sm:$0xff] %v6572_v30  ;;  %11309 = vst [vmem:[#allocation12_spill] sm:$0xff] %v6574_v31 }
 0x35e   :  { %v6576_v32 = vpop.f32.mrf.mxu0  ;;  %v6578_v50 = vpop.f32.mrf.mxu1 }
 0x35f   :  { %11310 = vst [vmem:[#allocation16_spill] sm:$0xff] %v6576_v32  ;;  %11311 = vst [vmem:[#allocation17_spill] sm:$0xff] %v6578_v50 }
 0x360   :  { %v6580_v37 = vpop.f32.mrf.mxu0  ;;  %5278 = vmatmul.mubr.msk.bf16.gmra.mxu0 %vm1126_vm3, %v6351_v55  ;;  %v6584_v54 = vpop.f32.mrf.mxu1  ;;  %5366 = vmatmul.mubr.msk.bf16.gmra.mxu1 %vm1126_vm3, %v6351_v55 }
 0x361   :  { %11312 = vst [vmem:[#allocation14_spill] sm:$0xff] %v6580_v37  ;;  %11313 = vst [vmem:[#allocation15_spill] sm:$0xff] %v6584_v54  ;;  %1780 = vmatprep.mubr.bf16.mxu0 %v11299_v39  ;;  %5369 = vmatprep.mubr.msk.bf16.mxu1 %vm5649_vm4, %v10637_v33 }
 0x362   :  { %v6589_v5 = vpop.f32.mrf.mxu0  ;;  %v6591_v28 = vpop.f32.mrf.mxu1 }
 0x363   :  { %11314 = vst [vmem:[#allocation28_spill] sm:$0xff] %v6589_v5  ;;  %11315 = vst [vmem:[#allocation26_spill] sm:$0xff] %v6591_v28 }
 0x364   :  { %v6595_v11 = vpop.f32.mrf.mxu0  ;;  %v6597_v23 = vpop.f32.mrf.mxu1 }
 0x365   :  { %11316 = vst [vmem:[#allocation25_spill] sm:$0xff] %v6595_v11  ;;  %11317 = vst [vmem:[#allocation27_spill] sm:$0xff] %v6597_v23 }
 0x366   :  { %v6599_v24 = vpop.f32.mrf.mxu0  ;;  %v6601_v13 = vpop.f32.mrf.mxu1 }
 0x367   :  { %11318 = vst [vmem:[#allocation24_spill] sm:$0xff] %v6599_v24  ;;  %11319 = vst [vmem:[#allocation23_spill] sm:$0xff] %v6601_v13 }
 0x368   :  { %v6603_v1 = vpop.f32.mrf.mxu0  ;;  %5279 = vmatmul.mubr.msk.bf16.gmra.mxu0 %vm1126_vm3, %v6362_v45  ;;  %v6607_v53 = vpop.f32.mrf.mxu1  ;;  %5370 = vmatmul.mubr.msk.bf16.gmra.mxu1 %vm1126_vm3, %v6362_v45 }
 0x369   :  { %11320 = vst [vmem:[#allocation22_spill] sm:$0xff] %v6603_v1  ;;  %11321 = vst [vmem:[#allocation29_spill] sm:$0xff] %v6607_v53  ;;  %1790 = vmatprep.mubr.bf16.mxu0 %v11299_v39  ;;  %5373 = vmatprep.mubr.msk.bf16.mxu1 %vm5649_vm4, %v10637_v33 }
 0x36a   :  { %v6612_v8 = vpop.f32.mrf.mxu0  ;;  %v6614_v25 = vpop.f32.mrf.mxu1 }
 0x36b   :  { %11322 = vst [vmem:[#allocation30_spill] sm:$0xff] %v6612_v8  ;;  %11323 = vst [vmem:[#allocation31_spill] sm:$0xff] %v6614_v25 }
 0x36c   :  { %v6618_v48 = vpop.f32.mrf.mxu0  ;;  %v6620_v49 = vpop.f32.mrf.mxu1 }
 0x36d   :  { %11324 = vst [vmem:[#allocation32_spill] sm:$0xff] %v6618_v48  ;;  %11325 = vst [vmem:[#allocation33_spill] sm:$0xff] %v6620_v49 }
 0x36e   :  { %v6622_v46 = vpop.f32.mrf.mxu0  ;;  %v6624_v12 = vpop.f32.mrf.mxu1 }
 0x36f   :  { %11326 = vst [vmem:[#allocation34_spill] sm:$0xff] %v6622_v46  ;;  %11327 = vst [vmem:[#allocation35_spill] sm:$0xff] %v6624_v12 }
 0x370   :  { %v6626_v21 = vpop.f32.mrf.mxu0  ;;  %5280 = vmatmul.mubr.msk.bf16.gmra.mxu0 %vm1126_vm3, %v6373_v62  ;;  %v6630_v22 = vpop.f32.mrf.mxu1  ;;  %5374 = vmatmul.mubr.msk.bf16.gmra.mxu1 %vm1126_vm3, %v6373_v62 }
 0x371   :  { %11328 = vst [vmem:[#allocation36_spill] sm:$0xff] %v6626_v21  ;;  %11329 = vst [vmem:[#allocation37_spill] sm:$0xff] %v6630_v22  ;;  %1800 = vmatprep.mubr.bf16.mxu0 %v11299_v39  ;;  %5377 = vmatprep.mubr.msk.bf16.mxu1 %vm5649_vm4, %v10637_v33 }
 0x372   :  { %v6635_v16 = vpop.f32.mrf.mxu0  ;;  %v6637_v57 = vpop.f32.mrf.mxu1 }
 0x373   :  { %11330 = vst [vmem:[#allocation38_spill] sm:$0xff] %v6635_v16  ;;  %11331 = vst [vmem:[#allocation39_spill] sm:$0xff] %v6637_v57 }
 0x374   :  { %v6641_v19 = vpop.f32.mrf.mxu0  ;;  %v6643_v44 = vpop.f32.mrf.mxu1 }
 0x375   :  { %11332 = vst [vmem:[#allocation40_spill] sm:$0xff] %v6641_v19  ;;  %11333 = vst [vmem:[#allocation41_spill] sm:$0xff] %v6643_v44 }
 0x376   :  { %v6645_v26 = vpop.f32.mrf.mxu0  ;;  %v6647_v20 = vpop.f32.mrf.mxu1 }
 0x377   :  { %11334 = vst [vmem:[#allocation42_spill] sm:$0xff] %v6645_v26  ;;  %11335 = vst [vmem:[#allocation43_spill] sm:$0xff] %v6647_v20 }
 0x378   :  { %v6649_v42 = vpop.f32.mrf.mxu0  ;;  %5281 = vmatmul.mubr.msk.bf16.gmra.mxu0 %vm1126_vm3, %v6384_v3  ;;  %v6653_v27 = vpop.f32.mrf.mxu1  ;;  %5378 = vmatmul.mubr.msk.bf16.gmra.mxu1 %vm1126_vm3, %v6384_v3 }
 0x379   :  { %11336 = vst [vmem:[#allocation44_spill] sm:$0xff] %v6649_v42  ;;  %11337 = vst [vmem:[#allocation45_spill] sm:$0xff] %v6653_v27  ;;  %1810 = vmatprep.mubr.bf16.mxu0 %v11299_v39  ;;  %5381 = vmatprep.mubr.msk.bf16.mxu1 %vm5649_vm4, %v10637_v33 }
 0x37a   :  { %v6658_v15 = vpop.f32.mrf.mxu0  ;;  %v6660_v58 = vpop.f32.mrf.mxu1 }
 0x37b   :  { %11338 = vst [vmem:[#allocation46_spill] sm:$0xff] %v6658_v15  ;;  %11339 = vst [vmem:[#allocation47_spill] sm:$0xff] %v6660_v58 }
 0x37c   :  { %v6664_v41 = vpop.f32.mrf.mxu0  ;;  %v6666_v14 = vpop.f32.mrf.mxu1 }
 0x37d   :  { %11340 = vst [vmem:[#allocation48_spill] sm:$0xff] %v6664_v41  ;;  %11341 = vst [vmem:[#allocation49_spill] sm:$0xff] %v6666_v14 }
 0x37e   :  { %v6668_v4 = vpop.f32.mrf.mxu0  ;;  %v6670_v59 = vpop.f32.mrf.mxu1 }
 0x37f   :  { %11342 = vst [vmem:[#allocation50_spill] sm:$0xff] %v6668_v4  ;;  %11343 = vst [vmem:[#allocation51_spill] sm:$0xff] %v6670_v59 }
 0x380   :  { %v6672_v56 = vpop.f32.mrf.mxu0  ;;  %5282 = vmatmul.mubr.msk.bf16.gmra.mxu0 %vm1126_vm3, %v6395_v6  ;;  %v6676_v47 = vpop.f32.mrf.mxu1  ;;  %5382 = vmatmul.mubr.msk.bf16.gmra.mxu1 %vm1126_vm3, %v6395_v6 }
 0x381   :  { %11344 = vst [vmem:[#allocation52_spill] sm:$0xff] %v6672_v56  ;;  %11345 = vst [vmem:[#allocation53_spill] sm:$0xff] %v6676_v47  ;;  %1820 = vmatprep.mubr.bf16.mxu0 %v11299_v39  ;;  %5385 = vmatprep.mubr.msk.bf16.mxu1 %vm5649_vm4, %v10637_v33 }
 0x382   :  { %v6681_v9 = vpop.f32.mrf.mxu0  ;;  %v6683_v0 = vpop.f32.mrf.mxu1 }
 0x383   :  { %11346 = vst [vmem:[#allocation54_spill] sm:$0xff] %v6681_v9  ;;  %11347 = vst [vmem:[#allocation55_spill] sm:$0xff] %v6683_v0 }
 0x384   :  { %v6687_v51 = vpop.f32.mrf.mxu0  ;;  %v6689_v55 = vpop.f32.mrf.mxu1 }
 0x385   :  { %11348 = vst [vmem:[#allocation56_spill] sm:$0xff] %v6687_v51  ;;  %11349 = vst [vmem:[#allocation57_spill] sm:$0xff] %v6689_v55  ;;  %v11356_v55 = vmov 0.0  }
 0x386   :  { %v6691_v45 = vpop.f32.mrf.mxu0  ;;  %v6693_v62 = vpop.f32.mrf.mxu1 }
 0x387   :  { %11350 = vst [vmem:[#allocation58_spill] sm:$0xff] %v6691_v45  ;;  %11351 = vst [vmem:[#allocation59_spill] sm:$0xff] %v6693_v62 }
 0x388   :  { %v6695_v3 = vpop.f32.mrf.mxu0  ;;  %5283 = vmatmul.mubr.msk.bf16.gmra.mxu0 %vm1126_vm3, %v6406_v61  ;;  %v6699_v6 = vpop.f32.mrf.mxu1  ;;  %5386 = vmatmul.mubr.msk.bf16.gmra.mxu1 %vm1126_vm3, %v6406_v61 }
 0x389   :  { %11352 = vst [vmem:[#allocation60_spill] sm:$0xff] %v6695_v3  ;;  %11353 = vst [vmem:[#allocation61_spill] sm:$0xff] %v6699_v6  ;;  %1830 = vmatprep.mubr.bf16.mxu0 %v11299_v39  ;;  %5389 = vmatprep.mubr.msk.bf16.mxu1 %vm5649_vm4, %v11356_v55 }
 0x38a   :  { %v6704_v33 = vpop.f32.mrf.mxu0  ;;  %v6706_v0 = vpop.f32.mrf.mxu1 }
 0x38b   :  { %11354 = vst [vmem:[#allocation62_spill] sm:$0xff] %v6704_v33  ;;  %11355 = vst [vmem:[#allocation63_spill] sm:$0xff] %v6706_v0 }
 0x38c   :  { %v6710_v62 = vpop.f32.mrf.mxu0  ;;  %v6712_v3 = vpop.f32.mrf.mxu1 }
 0x38d   :  { %11357 = vst [vmem:[#allocation64_spill] sm:$0xff] %v6710_v62  ;;  %11358 = vst [vmem:[#allocation65_spill] sm:$0xff] %v6712_v3 }
 0x38e   :  { %v6714_v38 = vpop.f32.mrf.mxu0  ;;  %v6716_v51 = vpop.f32.mrf.mxu1 }
 0x38f   :  { %11359 = vst [vmem:[#allocation66_spill] sm:$0xff] %v6714_v38  ;;  %11360 = vst [vmem:[#allocation67_spill] sm:$0xff] %v6716_v51 }
 0x390   :  { %v6718_v6 = vpop.f32.mrf.mxu0  ;;  %5284 = vmatmul.mubr.msk.bf16.gmra.mxu0 %vm1126_vm3, %v6417_v2  ;;  %v6722_v61 = vpop.f32.mrf.mxu1  ;;  %5390 = vmatmul.mubr.msk.bf16.gmra.mxu1 %vm1126_vm3, %v6417_v2 }
 0x391   :  { %11361 = vst [vmem:[#allocation68_spill] sm:$0xff] %v6718_v6  ;;  %11362 = vst [vmem:[#allocation69_spill] sm:$0xff] %v6722_v61  ;;  %1840 = vmatprep.mubr.bf16.mxu0 %v11299_v39  ;;  %5393 = vmatprep.mubr.msk.bf16.mxu1 %vm5649_vm4, %v11356_v55 }
 0x392   :  { %v6727_v0 = vpop.f32.mrf.mxu0  ;;  %v6729_v62 = vpop.f32.mrf.mxu1 }
 0x393   :  { %11363 = vst [vmem:[#allocation70_spill] sm:$0xff] %v6727_v0  ;;  %11364 = vst [vmem:[#allocation71_spill] sm:$0xff] %v6729_v62  ;;  %v2584_v0 = vmul.f32 %v6599_v24, %v6599_v24 }
 0x394   :  { %v6733_v51 = vpop.f32.mrf.mxu0  ;;  %v6735_v3 = vpop.f32.mrf.mxu1 }
 0x395   :  { %11365 = vst [vmem:[#allocation72_spill] sm:$0xff] %v6733_v51  ;;  %11366 = vst [vmem:[#allocation73_spill] sm:$0xff] %v6735_v3 }
 0x396   :  { %v6737_v6 = vpop.f32.mrf.mxu0  ;;  %v6739_v38 = vpop.f32.mrf.mxu1 }
 0x397   :  { %11367 = vst [vmem:[#allocation74_spill] sm:$0xff] %v6737_v6  ;;  %11368 = vst [vmem:[#allocation75_spill] sm:$0xff] %v6739_v38 }
 0x398   :  { %v6741_v61 = vpop.f32.mrf.mxu0  ;;  %5285 = vmatmul.mubr.msk.bf16.gmra.mxu0 %vm1126_vm3, %v6428_v43  ;;  %v6745_v2 = vpop.f32.mrf.mxu1  ;;  %5394 = vmatmul.mubr.msk.bf16.gmra.mxu1 %vm1126_vm3, %v6428_v43 }
 0x399   :  { %11369 = vst [vmem:[#allocation76_spill] sm:$0xff] %v6741_v61  ;;  %11370 = vst [vmem:[#allocation77_spill] sm:$0xff] %v6745_v2  ;;  %1850 = vmatprep.mubr.bf16.mxu0 %v11299_v39  ;;  %5397 = vmatprep.mubr.msk.bf16.mxu1 %vm5649_vm4, %v11356_v55 }
 0x39a   :  { %v6750_v62 = vpop.f32.mrf.mxu0  ;;  %v6752_v51 = vpop.f32.mrf.mxu1 }
 0x39b   :  { %11371 = vst [vmem:[#allocation78_spill] sm:$0xff] %v6750_v62  ;;  %11372 = vst [vmem:[#allocation79_spill] sm:$0xff] %v6752_v51  ;;  %v2576_v62 = vmul.f32 %v6580_v37, %v6580_v37 }
 0x39c   :  { %v6756_v38 = vpop.f32.mrf.mxu0  ;;  %v6758_v3 = vpop.f32.mrf.mxu1 }
 0x39d   :  { %11373 = vst [vmem:[#allocation80_spill] sm:$0xff] %v6756_v38  ;;  %11374 = vst [vmem:[#allocation81_spill] sm:$0xff] %v6758_v3 }
 0x39e   :  { %v6760_v61 = vpop.f32.mrf.mxu0  ;;  %v6762_v6 = vpop.f32.mrf.mxu1 }
 0x39f   :  { %11375 = vst [vmem:[#allocation82_spill] sm:$0xff] %v6760_v61  ;;  %11376 = vst [vmem:[#allocation83_spill] sm:$0xff] %v6762_v6 }
 0x3a0   :  { %v6764_v2 = vpop.f32.mrf.mxu0  ;;  %5286 = vmatmul.mubr.msk.bf16.gmra.mxu0 %vm1126_vm3, %v6439_v52  ;;  %v6768_v43 = vpop.f32.mrf.mxu1  ;;  %5398 = vmatmul.mubr.msk.bf16.gmra.mxu1 %vm1126_vm3, %v6439_v52 }
 0x3a1   :  { %11377 = vst [vmem:[#allocation84_spill] sm:$0xff] %v6764_v2  ;;  %11378 = vst [vmem:[#allocation85_spill] sm:$0xff] %v6768_v43  ;;  %1860 = vmatprep.mubr.bf16.mxu0 %v11299_v39  ;;  %5401 = vmatprep.mubr.msk.bf16.mxu1 %vm5649_vm4, %v11356_v55 }
 0x3a2   :  { %v6773_v51 = vpop.f32.mrf.mxu0  ;;  %v6775_v38 = vpop.f32.mrf.mxu1 }
 0x3a3   :  { %11379 = vst [vmem:[#allocation86_spill] sm:$0xff] %v6773_v51  ;;  %11380 = vst [vmem:[#allocation87_spill] sm:$0xff] %v6775_v38 }
 0x3a4   :  { %v6779_v6 = vpop.f32.mrf.mxu0  ;;  %v6781_v2 = vpop.f32.mrf.mxu1 }
 0x3a5   :  { %11381 = vst [vmem:[#allocation88_spill] sm:$0xff] %v6779_v6  ;;  %11382 = vst [vmem:[#allocation89_spill] sm:$0xff] %v6781_v2 }
 0x3a6   :  { %v6783_v3 = vpop.f32.mrf.mxu0  ;;  %v6785_v61 = vpop.f32.mrf.mxu1 }
 0x3a7   :  { %11383 = vst [vmem:[#allocation90_spill] sm:$0xff] %v6783_v3  ;;  %11384 = vst [vmem:[#allocation91_spill] sm:$0xff] %v6785_v61 }
 0x3a8   :  { %v6787_v43 = vpop.f32.mrf.mxu0  ;;  %5287 = vmatmul.mubr.msk.bf16.gmra.mxu0 %vm1126_vm3, %v6450_v63  ;;  %v6791_v52 = vpop.f32.mrf.mxu1  ;;  %5402 = vmatmul.mubr.msk.bf16.gmra.mxu1 %vm1126_vm3, %v6450_v63 }
 0x3a9   :  { %11385 = vst [vmem:[#allocation92_spill] sm:$0xff] %v6787_v43  ;;  %11386 = vst [vmem:[#allocation93_spill] sm:$0xff] %v6791_v52  ;;  %1870 = vmatprep.mubr.bf16.mxu0 %v11299_v39  ;;  %5405 = vmatprep.mubr.msk.bf16.mxu1 %vm5649_vm4, %v11356_v55 }
 0x3aa   :  { %v6796_v38 = vpop.f32.mrf.mxu0  ;;  %v6798_v6 = vpop.f32.mrf.mxu1 }
 0x3ab   :  { %11387 = vst [vmem:[#allocation94_spill] sm:$0xff] %v6796_v38  ;;  %11388 = vst [vmem:[#allocation95_spill] sm:$0xff] %v6798_v6 }
 0x3ac   :  { %v6802_v61 = vpop.f32.mrf.mxu0  ;;  %v6804_v2 = vpop.f32.mrf.mxu1 }
 0x3ad   :  { %11389 = vst [vmem:[#allocation96_spill] sm:$0xff] %v6802_v61  ;;  %11390 = vst [vmem:[#allocation97_spill] sm:$0xff] %v6804_v2 }
 0x3ae   :  { %v6806_v43 = vpop.f32.mrf.mxu0  ;;  %v6808_v3 = vpop.f32.mrf.mxu1 }
 0x3af   :  { %11391 = vst [vmem:[#allocation98_spill] sm:$0xff] %v6806_v43  ;;  %11392 = vst [vmem:[#allocation99_spill] sm:$0xff] %v6808_v3 }
 0x3b0   :  { %v6810_v52 = vpop.f32.mrf.mxu0  ;;  %5288 = vmatmul.mubr.msk.bf16.gmra.mxu0 %vm1126_vm3, %v6461_v34  ;;  %v6814_v63 = vpop.f32.mrf.mxu1  ;;  %5406 = vmatmul.mubr.msk.bf16.gmra.mxu1 %vm1126_vm3, %v6461_v34 }
 0x3b1   :  { %11393 = vst [vmem:[#allocation100_spill] sm:$0xff] %v6810_v52  ;;  %11394 = vst [vmem:[#allocation101_spill] sm:$0xff] %v6814_v63  ;;  %1880 = vmatprep.mubr.bf16.mxu0 %v11299_v39  ;;  %5409 = vmatprep.mubr.msk.bf16.mxu1 %vm5649_vm4, %v11356_v55 }
 0x3b2   :  { %v6819_v6 = vpop.f32.mrf.mxu0  ;;  %v6821_v61 = vpop.f32.mrf.mxu1 }
 0x3b3   :  { %11395 = vst [vmem:[#allocation102_spill] sm:$0xff] %v6819_v6  ;;  %11396 = vst [vmem:[#allocation103_spill] sm:$0xff] %v6821_v61  ;;  %v2564_v6 = vmul.f32 %v6561_v40, %v6561_v40 }
 0x3b4   :  { %v6825_v3 = vpop.f32.mrf.mxu0  ;;  %v6827_v2 = vpop.f32.mrf.mxu1 }
 0x3b5   :  { %11397 = vst [vmem:[#allocation104_spill] sm:$0xff] %v6825_v3  ;;  %11398 = vst [vmem:[#allocation105_spill] sm:$0xff] %v6827_v2 }
 0x3b6   :  { %v6829_v52 = vpop.f32.mrf.mxu0  ;;  %v6831_v43 = vpop.f32.mrf.mxu1 }
 0x3b7   :  { %11399 = vst [vmem:[#allocation106_spill] sm:$0xff] %v6829_v52  ;;  %11400 = vst [vmem:[#allocation107_spill] sm:$0xff] %v6831_v43 }
 0x3b8   :  { %v6833_v63 = vpop.f32.mrf.mxu0  ;;  %5289 = vmatmul.mubr.msk.bf16.gmra.mxu0 %vm1126_vm3, %v6472_v7  ;;  %v6837_v34 = vpop.f32.mrf.mxu1  ;;  %5410 = vmatmul.mubr.msk.bf16.gmra.mxu1 %vm1126_vm3, %v6472_v7 }
 0x3b9   :  { %11401 = vst [vmem:[#allocation108_spill] sm:$0xff] %v6833_v63  ;;  %11402 = vst [vmem:[#allocation109_spill] sm:$0xff] %v6837_v34  ;;  %1890 = vmatprep.mubr.bf16.mxu0 %v11299_v39  ;;  %5413 = vmatprep.mubr.msk.bf16.mxu1 %vm5649_vm4, %v11356_v55 }
 0x3ba   :  { %v6842_v61 = vpop.f32.mrf.mxu0  ;;  %v6844_v3 = vpop.f32.mrf.mxu1 }
 0x3bb   :  { %11403 = vst [vmem:[#allocation110_spill] sm:$0xff] %v6842_v61  ;;  %11404 = vst [vmem:[#allocation111_spill] sm:$0xff] %v6844_v3  ;;  %v2569_v3 = vmul.f32 %v6572_v30, %v6572_v30 }
 0x3bc   :  { %v6848_v43 = vpop.f32.mrf.mxu0  ;;  %v6850_v63 = vpop.f32.mrf.mxu1 }
 0x3bd   :  { %11405 = vst [vmem:[#allocation112_spill] sm:$0xff] %v6848_v43  ;;  %11406 = vst [vmem:[#allocation113_spill] sm:$0xff] %v6850_v63  ;;  %v2563_v43 = vmul.f32 %v6568_v60, %v6568_v60 }
 0x3be   :  { %v6852_v2 = vpop.f32.mrf.mxu0  ;;  %v6854_v52 = vpop.f32.mrf.mxu1 }
 0x3bf   :  { %11407 = vst [vmem:[#allocation114_spill] sm:$0xff] %v6852_v2  ;;  %11408 = vst [vmem:[#allocation115_spill] sm:$0xff] %v6854_v52 }
 0x3c0   :  { %v6856_v34 = vpop.f32.mrf.mxu0  ;;  %5290 = vmatmul.mubr.msk.bf16.gmra.mxu0 %vm1126_vm3, %v6483_v35  ;;  %v6860_v7 = vpop.f32.mrf.mxu1  ;;  %5414 = vmatmul.mubr.msk.bf16.gmra.mxu1 %vm1126_vm3, %v6483_v35 }
 0x3c1   :  { %11409 = vst [vmem:[#allocation116_spill] sm:$0xff] %v6856_v34  ;;  %11410 = vst [vmem:[#allocation117_spill] sm:$0xff] %v6860_v7  ;;  %1900 = vmatprep.mubr.bf16.mxu0 %v11299_v39  ;;  %5417 = vmatprep.mubr.msk.bf16.mxu1 %vm5649_vm4, %v11356_v55  ;;  %v2570_v34 = vmul.f32 %v6576_v32, %v6576_v32  ;;  %v2562_v7 = vmul.f32 %v6557_v29, %v6557_v29 }
 0x3c2   :  { %v6867_v63 = vpop.f32.mrf.mxu0  ;;  %v6869_v2 = vpop.f32.mrf.mxu1 }
 0x3c3   :  { %11411 = vst [vmem:[#allocation118_spill] sm:$0xff] %v6867_v63  ;;  %11412 = vst [vmem:[#allocation119_spill] sm:$0xff] %v6869_v2  ;;  %v2577_v63 = vmul.f32 %v6589_v5, %v6589_v5  ;;  %v2142_v2 = vadd.f32 %v6568_v60, %v6557_v29  ;;  %v2856_v61 = vadd.f32 %v2563_v43, %v2562_v7 }
 0x3c4   :  { %v6877_v52 = vpop.f32.mrf.mxu0  ;;  %v6879_v35 = vpop.f32.mrf.mxu1  ;;  %v2571_v43 = vmul.f32 %v6574_v31, %v6574_v31  ;;  %v2591_v7 = vmul.f32 %v6612_v8, %v6612_v8 }
 0x3c5   :  { %11413 = vst [vmem:[#allocation120_spill] sm:$0xff] %v6877_v52  ;;  %11414 = vst [vmem:[#allocation121_spill] sm:$0xff] %v6879_v35  ;;  %v2151_v35 = vadd.f32 %v6576_v32, %v6572_v30  ;;  %v2865_v52 = vadd.f32 %v2570_v34, %v2569_v3  ;;  %v2160_v3 = vadd.f32 %v6589_v5, %v6580_v37 }
 0x3c6   :  { %v6889_v38 = vpop.f32.mrf.mxu0  ;;  %v6891_v51 = vpop.f32.mrf.mxu1  ;;  %v2874_v34 = vadd.f32 %v2577_v63, %v2576_v62  ;;  %v2578_v32 = vmul.f32 %v6584_v54, %v6584_v54  ;;  %v2583_v30 = vmul.f32 %v6595_v11, %v6595_v11 }
 0x3c7   :  { %11415 = vst [vmem:[#allocation122_spill] sm:$0xff] %v6889_v38  ;;  %11416 = vst [vmem:[#allocation123_spill] sm:$0xff] %v6891_v51  ;;  %v2857_v51 = vadd.f32 %v2856_v61, %v2564_v6  ;;  %v2152_v63 = vadd.f32 %v2151_v35, %v6574_v31  ;;  %v2866_v5 = vadd.f32 %v2865_v52, %v2571_v43 }
 0x3c8   :  { %v6903_v60 = vpop.f32.mrf.mxu0  ;;  %5291 = vmatmul.mubr.msk.bf16.gmra.mxu0 %vm1126_vm3, %v6494_v18  ;;  %v6907_v29 = vpop.f32.mrf.mxu1  ;;  %5418 = vmatmul.mubr.msk.bf16.gmra.mxu1 %vm1126_vm3, %v6494_v18  ;;  %v2590_v18 = vmul.f32 %v6603_v1, %v6603_v1  ;;  %v2883_v37 = vadd.f32 %v2584_v0, %v2583_v30  ;;  %v2565_v6 = vmul.f32 %v6570_v36, %v6570_v36 }
 0x3c9   :  { %11417 = vst [vmem:[#allocation124_spill] sm:$0xff] %v6903_v60  ;;  %11418 = vst [vmem:[#allocation125_spill] sm:$0xff] %v6907_v29  ;;  %1910 = vmatprep.mubr.bf16.mxu0 %v11299_v39  ;;  %v2143_v60 = vadd.f32 %v2142_v2, %v6561_v40  ;;  %v2169_v29 = vadd.f32 %v6599_v24, %v6595_v11  ;;  %5421 = vmatprep.mubr.msk.bf16.mxu1 %vm5649_vm4, %v11356_v55 }
 0x3ca   :  { %v6923_v38 = vpop.f32.mrf.mxu0  ;;  %v6925_v62 = vpop.f32.mrf.mxu1  ;;  %v2178_v61 = vadd.f32 %v6612_v8, %v6603_v1  ;;  %v2892_v2 = vadd.f32 %v2591_v7, %v2590_v18  ;;  %v2592_v24 = vmul.f32 %v6607_v53, %v6607_v53  ;;  %v2161_v52 = vadd.f32 %v2160_v3, %v6584_v54 }
 0x3cb   :  { %11419 = vst [vmem:[#allocation126_spill] sm:$0xff] %v6923_v38  ;;  %11420 = vst [vmem:[#allocation127_spill] sm:$0xff] %v6925_v62  ;;  %v2572_v62 = vmul.f32 %v6578_v50, %v6578_v50  ;;  %v2875_v30 = vadd.f32 %v2874_v34, %v2578_v32  ;;  %v2585_v0 = vmul.f32 %v6597_v23, %v6597_v23 }
 0x3cc   :  { %v6936_v11 = vpop.f32.mrf.mxu0  ;;  %v6938_v40 = vpop.f32.mrf.mxu1  ;;  %v6946_v35 = vadd.f32 %v2143_v60, %v6570_v36  ;;  %v6948_v43 = vadd.f32 %v2857_v51, %v2565_v6  ;;  %v2170_v7 = vadd.f32 %v2169_v29, %v6597_v23  ;;  %v2598_v18 = vmul.f32 %v6622_v46, %v6622_v46 }
 0x3cd   :  { %11421 = vst [vmem:[#allocation128_spill] sm:$0xff] %v6936_v11  ;;  %11422 = vst [vmem:[#allocation129_spill] sm:$0xff] %v6938_v40  ;;  %v2579_v32 = vmul.f32 %v6591_v28, %v6591_v28  ;;  %v2884_v3 = vadd.f32 %v2883_v37, %v2585_v0  ;;  %v6960_v34 = vadd.f32 %v2152_v63, %v6578_v50 }
 0x3ce   :  { %v6953_v8 = vpop.f32.mrf.mxu0  ;;  %v6955_v1 = vpop.f32.mrf.mxu1  ;;  %v6962_v60 = vadd.f32 %v2866_v5, %v2572_v62  ;;  %v2179_v51 = vadd.f32 %v2178_v61, %v6607_v53  ;;  %v2893_v6 = vadd.f32 %v2892_v2, %v2592_v24  ;;  %v2597_v29 = vmul.f32 %v6618_v48, %v6618_v48 }
 0x3cf   :  { %11423 = vst [vmem:[#allocation130_spill] sm:$0xff] %v6953_v8  ;;  %11424 = vst [vmem:[#allocation131_spill] sm:$0xff] %v6955_v1  ;;  %v6976_v37 = vadd.f32 %v2161_v52, %v6591_v28  ;;  %v6978_v5 = vadd.f32 %v2875_v30, %v2579_v32  ;;  %v2586_v24 = vmul.f32 %v6601_v13, %v6601_v13 }
 0x3d0   :  { %v6967_v31 = vpop.f32.mrf.mxu0  ;;  %5292 = vmatmul.mubr.msk.bf16.gmra.mxu0 %vm1126_vm3, %v6505_v17  ;;  %v6971_v23 = vpop.f32.mrf.mxu1  ;;  %5422 = vmatmul.mubr.msk.bf16.gmra.mxu1 %vm1126_vm3, %v6505_v17  ;;  %v2605_v62 = vmul.f32 %v6635_v16, %v6635_v16  ;;  %v2593_v63 = vmul.f32 %v6614_v25, %v6614_v25  ;;  %v2187_v61 = vadd.f32 %v6622_v46, %v6618_v48 }
 0x3d1   :  { %11425 = vst [vmem:[#allocation132_spill] sm:$0xff] %v6967_v31  ;;  %11426 = vst [vmem:[#allocation133_spill] sm:$0xff] %v6971_v23  ;;  %1920 = vmatprep.mubr.bf16.mxu0 %v11299_v39  ;;  %v2901_v17 = vadd.f32 %v2598_v18, %v2597_v29  ;;  %5425 = vmatprep.mubr.msk.bf16.mxu1 %vm5649_vm4, %v11356_v55  ;;  %v6996_v30 = vadd.f32 %v2170_v7, %v6601_v13 }
 0x3d2   :  { %v6989_v2 = vpop.f32.mrf.mxu0  ;;  %v6991_v52 = vpop.f32.mrf.mxu1  ;;  %v2599_v0 = vmul.f32 %v6620_v49, %v6620_v49  ;;  %v2604_v32 = vmul.f32 %v6626_v21, %v6626_v21  ;;  %v2612_v53 = vmul.f32 %v6645_v26, %v6645_v26  ;;  %v7004_v18 = vadd.f32 %v2884_v3, %v2586_v24 }
 0x3d3   :  { %11427 = vst [vmem:[#allocation134_spill] sm:$0xff] %v6989_v2  ;;  %11428 = vst [vmem:[#allocation135_spill] sm:$0xff] %v6991_v52  ;;  %v7007_v29 = vadd.f32 %v2179_v51, %v6614_v25  ;;  %v7009_v46 = vadd.f32 %v2893_v6, %v2593_v63  ;;  %v2600_v7 = vmul.f32 %v6624_v12, %v6624_v12 }
 0x3d4   :  { %v2196_v48 = vadd.f32 %v6635_v16, %v6626_v21  ;;  %v7015_v50 = vpop.f32.mrf.mxu0  ;;  %v7017_v13 = vpop.f32.mrf.mxu1  ;;  %v2910_v28 = vadd.f32 %v2605_v62, %v2604_v32  ;;  %v2606_v3 = vmul.f32 %v6630_v22, %v6630_v22  ;;  %v2611_v51 = vmul.f32 %v6641_v19, %v6641_v19 }
 0x3d5   :  { %11429 = vst [vmem:[#allocation136_spill] sm:$0xff] %v7015_v50  ;;  %11430 = vst [vmem:[#allocation137_spill] sm:$0xff] %v7017_v13  ;;  %v2619_v6 = vmul.f32 %v6658_v15, %v6658_v15  ;;  %v2188_v24 = vadd.f32 %v2187_v61, %v6620_v49  ;;  %v2902_v63 = vadd.f32 %v2901_v17, %v2599_v0  ;;  %v11468_v50 = vld [vmem:[#allocation76_spill] sm:$0xff] }
 0x3d6   :  { %v2607_v16 = vmul.f32 %v6637_v57, %v6637_v57  ;;  %v2205_v21 = vadd.f32 %v6645_v26, %v6641_v19  ;;  %v7030_v25 = vpop.f32.mrf.mxu0  ;;  %v7032_v62 = vpop.f32.mrf.mxu1  ;;  %v2919_v32 = vadd.f32 %v2612_v53, %v2611_v51  ;;  %v2618_v54 = vmul.f32 %v6649_v42, %v6649_v42 }
 0x3d7   :  { %11431 = vst [vmem:[#allocation138_spill] sm:$0xff] %v7030_v25  ;;  %11432 = vst [vmem:[#allocation139_spill] sm:$0xff] %v7032_v62  ;;  %v2214_v36 = vadd.f32 %v6658_v15, %v6649_v42  ;;  %v2626_v61 = vmul.f32 %v6668_v4, %v6668_v4  ;;  %v2197_v17 = vadd.f32 %v2196_v48, %v6630_v22 }
 0x3d8   :  { %v2613_v0 = vmul.f32 %v6643_v44, %v6643_v44  ;;  %v2633_v26 = vmul.f32 %v6681_v9, %v6681_v9  ;;  %v7045_v19 = vpop.f32.mrf.mxu0  ;;  %5293 = vmatmul.mubr.msk.bf16.gmra.mxu0 %vm1126_vm3, %v6516_v10  ;;  %v7049_v53 = vpop.f32.mrf.mxu1  ;;  %5426 = vmatmul.mubr.msk.bf16.gmra.mxu1 %vm1126_vm3, %v6516_v10  ;;  %v2911_v51 = vadd.f32 %v2910_v28, %v2606_v3 }
 0x3d9   :  { %11433 = vst [vmem:[#allocation140_spill] sm:$0xff] %v7045_v19  ;;  %11434 = vst [vmem:[#allocation141_spill] sm:$0xff] %v7049_v53  ;;  %v2928_v15 = vadd.f32 %v2619_v6, %v2618_v54  ;;  %v2620_v48 = vmul.f32 %v6653_v27, %v6653_v27  ;;  %v2625_v42 = vmul.f32 %v6664_v41, %v6664_v41  ;;  %1930 = vmatprep.mubr.bf16.mxu0 %v11299_v39 }
 0x3da   :  { %v2206_v22 = vadd.f32 %v2205_v21, %v6643_v44  ;;  %v2223_v49 = vadd.f32 %v6668_v4, %v6664_v41  ;;  %v2632_v53 = vmul.f32 %v6672_v56, %v6672_v56  ;;  %v7063_v19 = vpop.f32.mrf.mxu0  ;;  %v7065_v10 = vpop.f32.mrf.mxu1  ;;  %5429 = vmatprep.mubr.msk.bf16.mxu1 %vm5649_vm4, %v11356_v55  ;;  %v7070_v54 = vadd.f32 %v2188_v24, %v6624_v12 }
 0x3db   :  { %11435 = vst [vmem:[#allocation142_spill] sm:$0xff] %v7063_v19  ;;  %11436 = vst [vmem:[#allocation143_spill] sm:$0xff] %v7065_v10  ;;  %v2920_v28 = vadd.f32 %v2919_v32, %v2613_v0  ;;  %v2215_v39 = vadd.f32 %v2214_v36, %v6653_v27  ;;  %v2937_v21 = vadd.f32 %v2626_v61, %v2625_v42 }
 0x3dc   :  { %v2232_v3 = vadd.f32 %v6681_v9, %v6672_v56  ;;  %v7076_v6 = vadd.f32 %v2197_v17, %v6637_v57  ;;  %v2946_v4 = vadd.f32 %v2633_v26, %v2632_v53  ;;  %v2634_v41 = vmul.f32 %v6676_v47, %v6676_v47  ;;  %v7080_v44 = vpop.f32.mrf.mxu0  ;;  %v7082_v55 = vpop.f32.mrf.mxu1  ;;  %v11441_v56 = vld [vmem:[#allocation56_spill] sm:$0xff] }
 0x3dd   :  { %11437 = vst [vmem:[#allocation144_spill] sm:$0xff] %v7080_v44  ;;  %11438 = vst [vmem:[#allocation145_spill] sm:$0xff] %v7082_v55  ;;  %v7084_v24 = vadd.f32 %v2902_v63, %v2600_v7  ;;  %v7086_v32 = vadd.f32 %v2911_v51, %v2607_v16  ;;  %v2614_v36 = vmul.f32 %v6647_v20, %v6647_v20  ;;  %v11443_v57 = vld [vmem:[#allocation20_spill] sm:$0xff] }
 0x3de   :  { %v2929_v42 = vadd.f32 %v2928_v15, %v2620_v48  ;;  %v2627_v61 = vmul.f32 %v6666_v14, %v6666_v14  ;;  %v2621_v26 = vmul.f32 %v6660_v58, %v6660_v58  ;;  %v2224_v17 = vadd.f32 %v2223_v49, %v6666_v14  ;;  %v7097_v53 = vpop.f32.mrf.mxu0  ;;  %v7099_v7 = vpop.f32.mrf.mxu1  ;;  %v11458_v44 = vld [vmem:[#allocation68_spill] sm:$0xff] }
 0x3df   :  { %v2640_v0 = vmul.f32 %v6691_v45, %v6691_v45  ;;  %11439 = vst [vmem:[#allocation146_spill] sm:$0xff] %v7097_v53  ;;  %11440 = vst [vmem:[#allocation147_spill] sm:$0xff] %v7099_v7  ;;  %v7102_v16 = vadd.f32 %v2206_v22, %v6647_v20  ;;  %v7105_v15 = vadd.f32 %v2215_v39, %v6660_v58 }
 0x3e0   :  { %v2938_v63 = vadd.f32 %v2937_v21, %v2627_v61  ;;  %v2233_v51 = vadd.f32 %v2232_v3, %v6676_v47  ;;  %v7108_v48 = vadd.f32 %v2920_v28, %v2614_v36  ;;  %v2628_v49 = vmul.f32 %v6670_v59, %v6670_v59  ;;  %v7114_v14 = vpop.f32.mrf.mxu0  ;;  %5294 = vmatmul.mubr.msk.bf16.gmra.mxu0 %vm1126_vm3, %v11443_v57  ;;  %v7118_v22 = vpop.f32.mrf.mxu1  ;;  %v11445_v28 = vld [vmem:[#allocation55_spill] sm:$0xff]  ;;  %v11446_v3 = vld [vmem:[#allocation57_spill] sm:$0xff]  ;;  %v11447_v47 = vld [vmem:[#allocation66_spill] sm:$0xff] }
 0x3e1   :  { %v2947_v9 = vadd.f32 %v2946_v4, %v2634_v41  ;;  %v2639_v27 = vmul.f32 %v11441_v56, %v11441_v56  ;;  %11442 = vst [vmem:[#allocation148_spill] sm:$0xff] %v7114_v14  ;;  %11444 = vst [vmem:[#allocation20_spill] sm:$0xff] %v7118_v22  ;;  %5430 = vmatmul.mubr.msk.bf16.gmra.mxu1 %vm1126_vm3, %v11443_v57  ;;  %v7122_v39 = vadd.f32 %v2929_v42, %v2621_v26  ;;  %v11451_v22 = vld [vmem:[#allocation59_spill] sm:$0xff] }
 0x3e2   :  { %v2635_v21 = vmul.f32 %v11445_v28, %v11445_v28  ;;  %v2241_v41 = vadd.f32 %v6691_v45, %v11441_v56  ;;  %v2647_v4 = vmul.f32 %v6704_v33, %v6704_v33  ;;  %v2641_v36 = vmul.f32 %v11446_v3, %v11446_v3  ;;  %v7134_v20 = vpop.f32.mrf.mxu0  ;;  %v7136_v57 = vpop.f32.mrf.mxu1  ;;  %v11450_v45 = vld [vmem:[#allocation60_spill] sm:$0xff] }
 0x3e3   :  { %v2955_v61 = vadd.f32 %v2640_v0, %v2639_v27  ;;  %v2654_v58 = vmul.f32 %v11447_v47, %v11447_v47  ;;  %11448 = vst [vmem:[#allocation149_spill] sm:$0xff] %v7134_v20  ;;  %11449 = vst [vmem:[#allocation150_spill] sm:$0xff] %v7136_v57  ;;  %v7139_v42 = vadd.f32 %v2224_v17, %v6670_v59  ;;  %v11452_v57 = vld [vmem:[#allocation64_spill] sm:$0xff]  ;;  %v11453_v59 = vld [vmem:[#allocation70_spill] sm:$0xff] }
 0x3e4   :  { %v7142_v26 = vadd.f32 %v2233_v51, %v11445_v28  ;;  %v2646_v56 = vmul.f32 %v11450_v45, %v11450_v45  ;;  %v2250_v12 = vadd.f32 %v6704_v33, %v11450_v45  ;;  %v7148_v27 = vadd.f32 %v2938_v63, %v2628_v49  ;;  %v7158_v28 = vpop.f32.mrf.mxu0  ;;  %v7160_v14 = vpop.f32.mrf.mxu1  ;;  %v11456_v63 = vld [vmem:[#allocation61_spill] sm:$0xff]  ;;  %v11457_v49 = vld [vmem:[#allocation74_spill] sm:$0xff] }
 0x3e5   :  { %v7150_v0 = vadd.f32 %v2947_v9, %v2635_v21  ;;  %v2642_v20 = vmul.f32 %v11451_v22, %v11451_v22  ;;  %v2653_v17 = vmul.f32 %v11452_v57, %v11452_v57  ;;  %v2661_v51 = vmul.f32 %v11453_v59, %v11453_v59  ;;  %11454 = vst [vmem:[#allocation151_spill] sm:$0xff] %v7158_v28 }
 0x3e6   :  { %11455 = vst [vmem:[#allocation152_spill] sm:$0xff] %v7160_v14  ;;  %v2242_v7 = vadd.f32 %v2241_v41, %v11446_v3  ;;  %v2964_v33 = vadd.f32 %v2647_v4, %v2646_v56  ;;  %v2648_v9 = vmul.f32 %v11456_v63, %v11456_v63  ;;  %v2668_v21 = vmul.f32 %v11457_v49, %v11457_v49  ;;  %v7171_v28 = vpop.f32.mrf.mxu0  ;;  %v7173_v14 = vpop.f32.mrf.mxu1  ;;  %v11461_v41 = vld [vmem:[#allocation63_spill] sm:$0xff]  ;;  %v11462_v3 = vld [vmem:[#allocation72_spill] sm:$0xff] }
 0x3e7   :  { %v2956_v45 = vadd.f32 %v2955_v61, %v2641_v36  ;;  %v2259_v53 = vadd.f32 %v11447_v47, %v11452_v57  ;;  %v2973_v55 = vadd.f32 %v2654_v58, %v2653_v17  ;;  %v2660_v10 = vmul.f32 %v11458_v44, %v11458_v44  ;;  %11459 = vst [vmem:[#allocation153_spill] sm:$0xff] %v7171_v28  ;;  %v11463_v36 = vld [vmem:[#allocation78_spill] sm:$0xff]  ;;  %v11464_v47 = vld [vmem:[#allocation65_spill] sm:$0xff] }
 0x3e8   :  { %11460 = vst [vmem:[#allocation154_spill] sm:$0xff] %v7173_v14  ;;  %v2251_v56 = vadd.f32 %v2250_v12, %v11456_v63  ;;  %v2649_v4 = vmul.f32 %v11461_v41, %v11461_v41  ;;  %v2667_v19 = vmul.f32 %v11462_v3, %v11462_v3  ;;  %v2675_v61 = vmul.f32 %v11463_v36, %v11463_v36  ;;  %v11465_v28 = vld [vmem:[#allocation69_spill] sm:$0xff]  ;;  %v7188_v12 = vpop.f32.mrf.mxu0  ;;  %v7190_v63 = vpop.f32.mrf.mxu1 }
 0x3e9   :  { %v2655_v58 = vmul.f32 %v11464_v47, %v11464_v47  ;;  %v2268_v17 = vadd.f32 %v11453_v59, %v11458_v44  ;;  %v2982_v57 = vadd.f32 %v2661_v51, %v2660_v10  ;;  %v2662_v14 = vmul.f32 %v11465_v28, %v11465_v28  ;;  %11466 = vst [vmem:[#allocation155_spill] sm:$0xff] %v7188_v12 }
 0x3ea   :  { %11467 = vst [vmem:[#allocation156_spill] sm:$0xff] %v7190_v63  ;;  %v2965_v62 = vadd.f32 %v2964_v33, %v2648_v9  ;;  %v2277_v13 = vadd.f32 %v11457_v49, %v11462_v3  ;;  %v2991_v25 = vadd.f32 %v2668_v21, %v2667_v19  ;;  %v2674_v52 = vmul.f32 %v11468_v50, %v11468_v50  ;;  %v7199_v51 = vpop.f32.mrf.mxu0  ;;  %v7201_v59 = vpop.f32.mrf.mxu1  ;;  %v11471_v33 = vld [vmem:[#allocation73_spill] sm:$0xff] }
 0x3eb   :  { %v2260_v23 = vadd.f32 %v2259_v53, %v11464_v47  ;;  %v2974_v2 = vadd.f32 %v2973_v55, %v2655_v58  ;;  %v2286_v10 = vadd.f32 %v11463_v36, %v11468_v50  ;;  %11469 = vst [vmem:[#allocation157_spill] sm:$0xff] %v7199_v51  ;;  %11470 = vst [vmem:[#allocation158_spill] sm:$0xff] %v7201_v59  ;;  %v11472_v21 = vld [vmem:[#allocation77_spill] sm:$0xff]  ;;  %v11474_v53 = vld [vmem:[#allocation67_spill] sm:$0xff] }
 0x3ec   :  { %v7204_v44 = vadd.f32 %v2242_v7, %v11451_v22  ;;  %v2669_v9 = vmul.f32 %v11471_v33, %v11471_v33  ;;  %v3000_v19 = vadd.f32 %v2675_v61, %v2674_v52  ;;  %v2676_v49 = vmul.f32 %v11472_v21, %v11472_v21  ;;  %v7218_v7 = vpop.f32.mrf.mxu0  ;;  %v7220_v47 = vpop.f32.mrf.mxu1 }
 0x3ed   :  { %v7210_v3 = vadd.f32 %v2956_v45, %v2642_v20  ;;  %v7213_v55 = vadd.f32 %v2251_v56, %v11461_v41  ;;  %v2656_v58 = vmul.f32 %v11474_v53, %v11474_v53  ;;  %v2269_v36 = vadd.f32 %v2268_v17, %v11465_v28  ;;  %11475 = vst [vmem:[#allocation160_spill] sm:$0xff] %v7218_v7  ;;  %v11478_v20 = vld [vmem:[#allocation82_spill] sm:$0xff]  ;;  %v11479_v56 = vld [vmem:[#allocation71_spill] sm:$0xff]  ;;  %v11485_v17 = vld [vmem:[#allocation80_spill] sm:$0xff] }
 0x3ee   :  { %v2983_v50 = vadd.f32 %v2982_v57, %v2662_v14  ;;  %11476 = vst [vmem:[#allocation161_spill] sm:$0xff] %v7220_v47  ;;  %v7222_v22 = vadd.f32 %v2965_v62, %v2649_v4  ;;  %v2278_v52 = vadd.f32 %v2277_v13, %v11471_v33  ;;  %v2992_v61 = vadd.f32 %v2991_v25, %v2669_v9  ;;  %v7230_v63 = vpop.f32.mrf.mxu0  ;;  %v7232_v14 = vpop.f32.mrf.mxu1  ;;  %v11484_v4 = vld [vmem:[#allocation75_spill] sm:$0xff]  ;;  %v11503_v7 = vld [vmem:[#allocation85_spill] sm:$0xff] }
 0x3ef   :  { %11473 = vst [vmem:[#allocation159_spill] sm:$0xff] %v7213_v55  ;;  %v2682_v45 = vmul.f32 %v11478_v20, %v11478_v20  ;;  %v2663_v41 = vmul.f32 %v11479_v56, %v11479_v56  ;;  %v2287_v59 = vadd.f32 %v2286_v10, %v11472_v21  ;;  %11480 = vst [vmem:[#allocation163_spill] sm:$0xff] %v7230_v63  ;;  %v11488_v28 = vld [vmem:[#allocation79_spill] sm:$0xff] }
 0x3f0   :  { %11477 = vst [vmem:[#allocation162_spill] sm:$0xff] %v7222_v22  ;;  %11481 = vst [vmem:[#allocation164_spill] sm:$0xff] %v7232_v14  ;;  %v7235_v57 = vadd.f32 %v2260_v23, %v11474_v53  ;;  %v7237_v62 = vadd.f32 %v2974_v2, %v2656_v58  ;;  %v2670_v13 = vmul.f32 %v11484_v4, %v11484_v4  ;;  %v11489_v2 = vld [vmem:[#allocation86_spill] sm:$0xff]  ;;  %v7254_v53 = vpop.f32.mrf.mxu0  ;;  %v11516_v22 = vld [vmem:[#allocation100_spill] sm:$0xff] }
 0x3f1   :  { %v3001_v25 = vadd.f32 %v3000_v19, %v2676_v49  ;;  %v2681_v9 = vmul.f32 %v11485_v17, %v11485_v17  ;;  %v2295_v33 = vadd.f32 %v11478_v20, %v11485_v17  ;;  %v7246_v10 = vadd.f32 %v2269_v36, %v11479_v56  ;;  %11490 = vst [vmem:[#allocation169_spill] sm:$0xff] %v7254_v53  ;;  %v7256_v49 = vpop.f32.mrf.mxu1  ;;  %v11492_v19 = vld [vmem:[#allocation81_spill] sm:$0xff]  ;;  %v11497_v53 = vld [vmem:[#allocation90_spill] sm:$0xff] }
 0x3f2   :  { %11482 = vst [vmem:[#allocation165_spill] sm:$0xff] %v7235_v57  ;;  %11483 = vst [vmem:[#allocation166_spill] sm:$0xff] %v7237_v62  ;;  %v7248_v21 = vadd.f32 %v2983_v50, %v2663_v41  ;;  %v2677_v23 = vmul.f32 %v11488_v28, %v11488_v28  ;;  %v2689_v58 = vmul.f32 %v11489_v2, %v11489_v2  ;;  %v11496_v41 = vld [vmem:[#allocation84_spill] sm:$0xff]  ;;  %v7274_v47 = vpop.f32.mrf.mxu0 }
 0x3f3   :  { %11486 = vst [vmem:[#allocation167_spill] sm:$0xff] %v7246_v10  ;;  %11491 = vst [vmem:[#allocation170_spill] sm:$0xff] %v7256_v49  ;;  %v2683_v14 = vmul.f32 %v11492_v19, %v11492_v19  ;;  %v3009_v63 = vadd.f32 %v2682_v45, %v2681_v9  ;;  %v7261_v20 = vadd.f32 %v2278_v52, %v11484_v4  ;;  %v7276_v45 = vpop.f32.mrf.mxu1  ;;  %v11502_v9 = vld [vmem:[#allocation94_spill] sm:$0xff] }
 0x3f4   :  { %11487 = vst [vmem:[#allocation168_spill] sm:$0xff] %v7248_v21  ;;  %v7263_v36 = vadd.f32 %v2992_v61, %v2670_v13  ;;  %v7266_v50 = vadd.f32 %v2287_v59, %v11488_v28  ;;  %v2688_v17 = vmul.f32 %v11496_v41, %v11496_v41  ;;  %v2304_v56 = vadd.f32 %v11489_v2, %v11496_v41  ;;  %v11501_v13 = vld [vmem:[#allocation83_spill] sm:$0xff]  ;;  %v11504_v41 = vld [vmem:[#allocation88_spill] sm:$0xff]  ;;  %v11511_v10 = vld [vmem:[#allocation102_spill] sm:$0xff] }
 0x3f5   :  { %11493 = vst [vmem:[#allocation171_spill] sm:$0xff] %v7261_v20  ;;  %v2696_v49 = vmul.f32 %v11497_v53, %v11497_v53  ;;  %11498 = vst [vmem:[#allocation174_spill] sm:$0xff] %v7274_v47  ;;  %v7278_v52 = vadd.f32 %v3001_v25, %v2677_v23  ;;  %v2296_v61 = vadd.f32 %v2295_v33, %v11492_v19  ;;  %v11505_v47 = vld [vmem:[#allocation98_spill] sm:$0xff]  ;;  %v7291_v25 = vpop.f32.mrf.mxu0  ;;  %v7293_v23 = vpop.f32.mrf.mxu1  ;;  %v11508_v19 = vld [vmem:[#allocation87_spill] sm:$0xff] }
 0x3f6   :  { %11494 = vst [vmem:[#allocation172_spill] sm:$0xff] %v7263_v36  ;;  %11495 = vst [vmem:[#allocation173_spill] sm:$0xff] %v7266_v50  ;;  %v2684_v59 = vmul.f32 %v11501_v13, %v11501_v13  ;;  %v2703_v28 = vmul.f32 %v11502_v9, %v11502_v9  ;;  %v3018_v4 = vadd.f32 %v2689_v58, %v2688_v17  ;;  %v11509_v58 = vld [vmem:[#allocation92_spill] sm:$0xff] }
 0x3f7   :  { %11499 = vst [vmem:[#allocation175_spill] sm:$0xff] %v7276_v45  ;;  %11500 = vst [vmem:[#allocation176_spill] sm:$0xff] %v7278_v52  ;;  %v2690_v2 = vmul.f32 %v11503_v7, %v11503_v7  ;;  %v2695_v51 = vmul.f32 %v11504_v41, %v11504_v41  ;;  %v2710_v45 = vmul.f32 %v11505_v47, %v11505_v47  ;;  %v11510_v20 = vld [vmem:[#allocation96_spill] sm:$0xff] }
 0x3f8   :  { %11506 = vst [vmem:[#allocation177_spill] sm:$0xff] %v7291_v25  ;;  %11507 = vst [vmem:[#allocation178_spill] sm:$0xff] %v7293_v23  ;;  %v3010_v33 = vadd.f32 %v3009_v63, %v2683_v14  ;;  %v2691_v12 = vmul.f32 %v11508_v19, %v11508_v19  ;;  %v2313_v17 = vadd.f32 %v11497_v53, %v11504_v41  ;;  %v7306_v23 = vpop.f32.mrf.mxu0  ;;  %v7308_v63 = vpop.f32.mrf.mxu1  ;;  %v11514_v41 = vld [vmem:[#allocation93_spill] sm:$0xff] }
 0x3f9   :  { %v2702_v52 = vmul.f32 %v11509_v58, %v11509_v58  ;;  %v2305_v50 = vadd.f32 %v2304_v56, %v11503_v7  ;;  %v3027_v36 = vadd.f32 %v2696_v49, %v2695_v51  ;;  %v2709_v21 = vmul.f32 %v11510_v20, %v11510_v20  ;;  %11512 = vst [vmem:[#allocation179_spill] sm:$0xff] %v7306_v23  ;;  %v11515_v49 = vld [vmem:[#allocation89_spill] sm:$0xff] }
 0x3fa   :  { %v2717_v25 = vmul.f32 %v11511_v10, %v11511_v10  ;;  %11513 = vst [vmem:[#allocation180_spill] sm:$0xff] %v7308_v63  ;;  %v2322_v14 = vadd.f32 %v11502_v9, %v11509_v58  ;;  %v2704_v62 = vmul.f32 %v11514_v41, %v11514_v41  ;;  %v2331_v51 = vadd.f32 %v11505_v47, %v11510_v20  ;;  %v7320_v55 = vpop.f32.mrf.mxu0  ;;  %v7322_v63 = vpop.f32.mrf.mxu1  ;;  %v11519_v47 = vld [vmem:[#allocation97_spill] sm:$0xff] }
 0x3fb   :  { %v3036_v53 = vadd.f32 %v2703_v28, %v2702_v52  ;;  %v3019_v56 = vadd.f32 %v3018_v4, %v2690_v2  ;;  %v2697_v7 = vmul.f32 %v11515_v49, %v11515_v49  ;;  %v3045_v57 = vadd.f32 %v2710_v45, %v2709_v21  ;;  %11517 = vst [vmem:[#allocation181_spill] sm:$0xff] %v7320_v55  ;;  %v11520_v20 = vld [vmem:[#allocation101_spill] sm:$0xff] }
 0x3fc   :  { %v2716_v23 = vmul.f32 %v11516_v22, %v11516_v22  ;;  %11518 = vst [vmem:[#allocation182_spill] sm:$0xff] %v7322_v63  ;;  %v2314_v28 = vadd.f32 %v2313_v17, %v11515_v49  ;;  %v2340_v52 = vadd.f32 %v11511_v10, %v11516_v22  ;;  %v7328_v9 = vadd.f32 %v2296_v61, %v11501_v13  ;;  %v7336_v55 = vpop.f32.mrf.mxu0  ;;  %v7338_v63 = vpop.f32.mrf.mxu1 }
 0x3fd   :  { %v7330_v4 = vadd.f32 %v3010_v33, %v2684_v59  ;;  %v3028_v2 = vadd.f32 %v3027_v36, %v2697_v7  ;;  %v2711_v21 = vmul.f32 %v11519_v47, %v11519_v47  ;;  %v2718_v58 = vmul.f32 %v11520_v20, %v11520_v20  ;;  %11521 = vst [vmem:[#allocation183_spill] sm:$0xff] %v7336_v55  ;;  %v11523_v36 = vld [vmem:[#allocation91_spill] sm:$0xff]  ;;  %v11524_v33 = vld [vmem:[#allocation106_spill] sm:$0xff] }
 0x3fe   :  { %v3054_v45 = vadd.f32 %v2717_v25, %v2716_v23  ;;  %11522 = vst [vmem:[#allocation184_spill] sm:$0xff] %v7338_v63  ;;  %v7341_v17 = vadd.f32 %v2305_v50, %v11508_v19  ;;  %v2323_v61 = vadd.f32 %v2322_v14, %v11514_v41  ;;  %v3037_v10 = vadd.f32 %v3036_v53, %v2704_v62  ;;  %v7351_v49 = vpop.f32.mrf.mxu0  ;;  %v7353_v13 = vpop.f32.mrf.mxu1  ;;  %v11527_v50 = vld [vmem:[#allocation95_spill] sm:$0xff]  ;;  %v11528_v62 = vld [vmem:[#allocation104_spill] sm:$0xff] }
 0x3ff   :  { %v2332_v59 = vadd.f32 %v2331_v51, %v11519_v47  ;;  %v7345_v7 = vadd.f32 %v3019_v56, %v2691_v12  ;;  %v2698_v25 = vmul.f32 %v11523_v36, %v11523_v36  ;;  %v3046_v23 = vadd.f32 %v3045_v57, %v2711_v21  ;;  %11525 = vst [vmem:[#allocation185_spill] sm:$0xff] %v7351_v49  ;;  %v11529_v51 = vld [vmem:[#allocation99_spill] sm:$0xff]  ;;  %v11536_v49 = vld [vmem:[#allocation110_spill] sm:$0xff] }
 0x400   :  { %v2724_v22 = vmul.f32 %v11524_v33, %v11524_v33  ;;  %11526 = vst [vmem:[#allocation186_spill] sm:$0xff] %v7353_v13  ;;  %v2705_v19 = vmul.f32 %v11527_v50, %v11527_v50  ;;  %v2341_v53 = vadd.f32 %v2340_v52, %v11520_v20  ;;  %v2349_v12 = vadd.f32 %v11524_v33, %v11528_v62  ;;  %v7367_v47 = vpop.f32.mrf.mxu0  ;;  %v7369_v41 = vpop.f32.mrf.mxu1 }
 0x401   :  { %v7361_v14 = vadd.f32 %v2314_v28, %v11523_v36  ;;  %v2712_v57 = vmul.f32 %v11529_v51, %v11529_v51  ;;  %v3055_v56 = vadd.f32 %v3054_v45, %v2718_v58  ;;  %v2723_v21 = vmul.f32 %v11528_v62, %v11528_v62  ;;  %11530 = vst [vmem:[#allocation187_spill] sm:$0xff] %v7367_v47  ;;  %v11533_v28 = vld [vmem:[#allocation103_spill] sm:$0xff]  ;;  %v11535_v58 = vld [vmem:[#allocation105_spill] sm:$0xff] }
 0x402   :  { %11531 = vst [vmem:[#allocation188_spill] sm:$0xff] %v7369_v41  ;;  %v7371_v13 = vadd.f32 %v3028_v2, %v2698_v25  ;;  %v7374_v52 = vadd.f32 %v2323_v61, %v11527_v50  ;;  %v7376_v33 = vadd.f32 %v3037_v10, %v2705_v19  ;;  %v2719_v20 = vmul.f32 %v11533_v28, %v11533_v28  ;;  %v7387_v2 = vpop.f32.mrf.mxu0  ;;  %v7389_v25 = vpop.f32.mrf.mxu1  ;;  %v11543_v50 = vld [vmem:[#allocation108_spill] sm:$0xff] }
 0x403   :  { %v7381_v36 = vadd.f32 %v2332_v59, %v11529_v51  ;;  %v2725_v45 = vmul.f32 %v11535_v58, %v11535_v58  ;;  %v3063_v62 = vadd.f32 %v2724_v22, %v2723_v21  ;;  %v2731_v41 = vmul.f32 %v11536_v49, %v11536_v49  ;;  %11537 = vst [vmem:[#allocation191_spill] sm:$0xff] %v7387_v2  ;;  %v11541_v59 = vld [vmem:[#allocation107_spill] sm:$0xff] }
 0x404   :  { %11532 = vst [vmem:[#allocation189_spill] sm:$0xff] %v7376_v33  ;;  %11538 = vst [vmem:[#allocation192_spill] sm:$0xff] %v7389_v25  ;;  %v7391_v61 = vadd.f32 %v3046_v23, %v2712_v57  ;;  %v7394_v10 = vadd.f32 %v2341_v53, %v11533_v28  ;;  %v2350_v19 = vadd.f32 %v2349_v12, %v11535_v58  ;;  %v7409_v57 = vpop.f32.mrf.mxu0  ;;  %v5351_v12 = vpop.f32.mrf.mxu1 }
 0x405   :  { %11534 = vst [vmem:[#allocation190_spill] sm:$0xff] %v7381_v36  ;;  %v2726_v51 = vmul.f32 %v11541_v59, %v11541_v59  ;;  %v2145_v22 = vadd.f32 %v6946_v35, %v7387_v2  ;;  %v7401_v21 = vadd.f32 %v3055_v56, %v2719_v20  ;;  %v2730_v47 = vmul.f32 %v11543_v50, %v11543_v50 }
 0x406   :  { %11539 = vst [vmem:[#allocation193_spill] sm:$0xff] %v7391_v61  ;;  %11540 = vst [vmem:[#allocation194_spill] sm:$0xff] %v7394_v10  ;;  %v2358_v23 = vadd.f32 %v11536_v49, %v11543_v50  ;;  %v2566_v53 = vmul.f32 %v7387_v2, %v7387_v2  ;;  %v2567_v58 = vmul.f32 %v7409_v57, %v7409_v57  ;;  %v2147_v56 = vsel %vm640_vm1, %v7389_v25, 0.0  ;;  %v11545_v49 = vld [vmem:[#allocation109_spill] sm:$0xff]  ;;  %v7420_v2 = vpop.f32.mrf.mxu0  ;;  %v7422_v55 = vpop.f32.mrf.mxu1 }
 0x407   :  { %11542 = vst [vmem:[#allocation195_spill] sm:$0xff] %v7401_v21  ;;  %11544 = vst [vmem:[#allocation196_spill] sm:$0xff] %v7409_v57  ;;  %v2568_v35 = vmul.f32 %v7389_v25, %v7389_v25  ;;  %v2146_v20 = vadd.f32 %v2145_v22, %v7409_v57  ;;  %v3064_v28 = vadd.f32 %v3063_v62, %v2725_v45  ;;  %v11548_v21 = vld [vmem:[#allocation111_spill] sm:$0xff]  ;;  %v11550_v62 = vld [vmem:[#allocation112_spill] sm:$0xff] }
 0x408   :  { %v3072_v63 = vadd.f32 %v2731_v41, %v2730_v47  ;;  %v2732_v50 = vmul.f32 %v11545_v49, %v11545_v49  ;;  %11546 = vst [vmem:[#allocation197_spill] sm:$0xff] %v7420_v2  ;;  %11547 = vst [vmem:[#allocation198_spill] sm:$0xff] %v7422_v55  ;;  %v2859_v12 = vadd.f32 %v6948_v43, %v2566_v53  ;;  %v7437_v57 = vpop.f32.mrf.mxu0  ;;  %v5352_v53 = vpop.f32.mrf.mxu1 }
 0x409   :  { %v2733_v10 = vmul.f32 %v11548_v21, %v11548_v21  ;;  %v2154_v22 = vadd.f32 %v6960_v34, %v7420_v2  ;;  %v2573_v25 = vmul.f32 %v7420_v2, %v7420_v2  ;;  %v7432_v47 = vadd.f32 %v2350_v19, %v11541_v59  ;;  %11551 = vst [vmem:[#allocation200_spill] sm:$0xff] %v7437_v57 }
 0x40a   :  { %v2359_v41 = vadd.f32 %v2358_v23, %v11545_v49  ;;  %v2737_v45 = vmul.f32 %v11550_v62, %v11550_v62  ;;  %v2148_v43 = vadd.f32 %v2147_v56, %v2146_v20  ;;  %v2860_v61 = vadd.f32 %v2859_v12, %v2567_v58  ;;  %v7450_v20 = vpop.f32.mrf.mxu0  ;;  %v7452_v58 = vpop.f32.mrf.mxu1  ;;  %v11555_v56 = vld [vmem:[#allocation114_spill] sm:$0xff] }
 0x40b   :  { %11549 = vst [vmem:[#allocation199_spill] sm:$0xff] %v7432_v47  ;;  %v2574_v36 = vmul.f32 %v7437_v57, %v7437_v57  ;;  %v2861_v34 = vsel %vm640_vm1, %v2568_v35, 0.0  ;;  %v2155_v2 = vadd.f32 %v2154_v22, %v7437_v57  ;;  %v2868_v19 = vadd.f32 %v6962_v60, %v2573_v25  ;;  %v11552_v47 = vld [vmem:[#allocation113_spill] sm:$0xff]  ;;  %11553 = vst [vmem:[#allocation201_spill] sm:$0xff] %v7450_v20 }
 0x40c   :  { %v3073_v59 = vadd.f32 %v3072_v63, %v2732_v50  ;;  %v7446_v23 = vmul.f32 %v11552_v47, %v11552_v47  ;;  %v2575_v49 = vmul.f32 %v7422_v55, %v7422_v55  ;;  %2149 = vadd.xlane.f32.xlu1 %v2148_v43  ;;  %11554 = vst [vmem:[#allocation202_spill] sm:$0xff] %v7452_v58  ;;  %v2156_v35 = vsel %vm640_vm1, %v7422_v55, 0.0  ;;  %v7464_v22 = vpop.f32.mrf.mxu0  ;;  %v5355_v53 = vpop.f32.mrf.mxu1 }
 0x40d   :  { %v2738_v12 = vmul.f32 %v11555_v56, %v11555_v56  ;;  %v2163_v60 = vadd.f32 %v6976_v37, %v7450_v20  ;;  %v2580_v63 = vmul.f32 %v7450_v20, %v7450_v20  ;;  %v2157_v50 = vadd.f32 %v2156_v35, %v2155_v2  ;;  %11556 = vst [vmem:[#allocation203_spill] sm:$0xff] %v7464_v22 }
 0x40e   :  { %v2367_v25 = vadd.f32 %v11555_v56, %v11550_v62  ;;  %v2862_v43 = vadd.f32 %v2861_v34, %v2860_v61  ;;  %v2869_v57 = vadd.f32 %v2868_v19, %v2574_v36  ;;  %v2165_v55 = vsel %vm640_vm1, %v7452_v58, 0.0  ;;  %v11557_v61 = vld [vmem:[#allocation115_spill] sm:$0xff]  ;;  %v7481_v34 = vpop.f32.mrf.mxu0  ;;  %v7483_v19 = vpop.f32.mrf.mxu1 }
 0x40f   :  { %v2581_v33 = vmul.f32 %v7464_v22, %v7464_v22  ;;  %v2582_v37 = vmul.f32 %v7452_v58, %v7452_v58  ;;  %2158 = vadd.xlane.f32.xlu0 %v2157_v50  ;;  %v2164_v2 = vadd.f32 %v2163_v60, %v7464_v22  ;;  %v2877_v35 = vadd.f32 %v6978_v5, %v2580_v63 }
 0x410   :  { %v7475_v56 = vadd.f32 %v2359_v41, %v11548_v21  ;;  %v7479_v36 = vmul.f32 %v11557_v61, %v11557_v61  ;;  %2863 = vadd.xlane.f32.xlu1 %v2862_v43  ;;  %11558 = vst [vmem:[#allocation204_spill] sm:$0xff] %v7481_v34  ;;  %11559 = vst [vmem:[#allocation205_spill] sm:$0xff] %v7483_v19  ;;  %v2870_v53 = vsel %vm640_vm1, %v2575_v49, 0.0  ;;  %v7495_v58 = vpop.f32.mrf.mxu0  ;;  %v5356_v22 = vpop.f32.mrf.mxu1 }
 0x411   :  { %v7486_v62 = vadd.f32 %v3064_v28, %v2726_v51  ;;  %v2172_v60 = vadd.f32 %v6996_v30, %v7481_v34  ;;  %v2587_v5 = vmul.f32 %v7481_v34, %v7481_v34  ;;  %v2871_v41 = vadd.f32 %v2870_v53, %v2869_v57  ;;  %11560 = vst [vmem:[#allocation206_spill] sm:$0xff] %v7495_v58  ;;  %v11565_v22 = vld [vmem:[#allocation117_spill] sm:$0xff] }
 0x412   :  { %v2166_v63 = vadd.f32 %v2165_v55, %v2164_v2  ;;  %v7492_v50 = vadd.f32 %v3073_v59, %v2733_v10  ;;  %v2368_v43 = vadd.f32 %v2367_v25, %v11552_v47  ;;  %v3081_v21 = vadd.f32 %v2738_v12, %v2737_v45  ;;  %v11561_v55 = vld [vmem:[#allocation116_spill] sm:$0xff]  ;;  %v11562_v59 = vld [vmem:[#allocation118_spill] sm:$0xff]  ;;  %v7510_v12 = vpop.f32.mrf.mxu1 }
 0x413   :  { %v2878_v20 = vadd.f32 %v2877_v35, %v2581_v33  ;;  %v2588_v49 = vmul.f32 %v7495_v58, %v7495_v58  ;;  %2872 = vadd.xlane.f32.xlu0 %v2871_v41  ;;  %v2879_v30 = vsel %vm640_vm1, %v2582_v37, 0.0  ;;  %v2173_v51 = vadd.f32 %v2172_v60, %v7495_v58  ;;  %v7508_v33 = vpop.f32.mrf.mxu0  ;;  %11564 = vst [vmem:[#allocation208_spill] sm:$0xff] %v7510_v12 }
 0x414   :  { %v2886_v28 = vadd.f32 %v7004_v18, %v2587_v5  ;;  %v2744_v10 = vmul.f32 %v11561_v55, %v11561_v55  ;;  %v2745_v57 = vmul.f32 %v11562_v59, %v11562_v59  ;;  %v2589_v45 = vmul.f32 %v7483_v19, %v7483_v19  ;;  %2167 = vadd.xlane.f32.xlu1 %v2166_v63  ;;  %v5359_v41 = vpop.f32.mrf.mxu1 }
 0x415   :  { %11563 = vst [vmem:[#allocation207_spill] sm:$0xff] %v7508_v33  ;;  %v2174_v25 = vsel %vm640_vm1, %v7483_v19, 0.0  ;;  %v2746_v18 = vmul.f32 %v11565_v22, %v11565_v22  ;;  %v2181_v37 = vadd.f32 %v7007_v29, %v7508_v33  ;;  %v2594_v2 = vmul.f32 %v7508_v33, %v7508_v33  ;;  %v7522_v60 = vpop.f32.mrf.mxu0 }
 0x416   :  { %v2175_v35 = vadd.f32 %v2174_v25, %v2173_v51  ;;  %v2376_v53 = vadd.f32 %v11562_v59, %v11561_v55  ;;  %11566 = vst [vmem:[#allocation209_spill] sm:$0xff] %v7522_v60  ;;  %v2880_v5 = vadd.f32 %v2879_v30, %v2878_v20  ;;  %v2887_v63 = vadd.f32 %v2886_v28, %v2588_v49  ;;  %v11567_v20 = vld [vmem:[#allocation119_spill] sm:$0xff]  ;;  %v7537_v28 = vpop.f32.mrf.mxu1 }
 0x417   :  { %v2183_v47 = vsel %vm640_vm1, %v7510_v12, 0.0  ;;  %v2595_v19 = vmul.f32 %v7522_v60, %v7522_v60  ;;  %v2596_v29 = vmul.f32 %v7510_v12, %v7510_v12  ;;  %v2182_v51 = vadd.f32 %v2181_v37, %v7522_v60  ;;  %v7535_v30 = vpop.f32.mrf.mxu0  ;;  %11569 = vst [vmem:[#allocation211_spill] sm:$0xff] %v7537_v28 }
 0x418   :  { %2176 = vadd.xlane.f32.xlu0 %v2175_v35  ;;  %v2895_v25 = vadd.f32 %v7009_v46, %v2594_v2  ;;  %v3082_v59 = vadd.f32 %v3081_v21, %v7446_v23  ;;  %v3090_v55 = vadd.f32 %v2745_v57, %v2744_v10  ;;  %v2747_v49 = vmul.f32 %v11567_v20, %v11567_v20  ;;  %v11570_v23 = vld [vmem:[#allocation120_spill] sm:$0xff] }
 0x419   :  { %2881 = vadd.xlane.f32.xlu1 %v2880_v5  ;;  %11568 = vst [vmem:[#allocation210_spill] sm:$0xff] %v7535_v30  ;;  %v2888_v41 = vsel %vm640_vm1, %v2589_v45, 0.0  ;;  %v2190_v35 = vadd.f32 %v7070_v54, %v7535_v30  ;;  %v2601_v37 = vmul.f32 %v7535_v30, %v7535_v30  ;;  %v2184_v2 = vadd.f32 %v2183_v47, %v2182_v51  ;;  %v7547_v57 = vpop.f32.mrf.mxu0  ;;  %v5360_v5 = vpop.f32.mrf.mxu1  ;;  %v11572_v51 = vld [vmem:[#allocation121_spill] sm:$0xff] }
 0x41a   :  { %v2889_v46 = vadd.f32 %v2888_v41, %v2887_v63  ;;  %v2377_v21 = vadd.f32 %v2376_v53, %v11565_v22  ;;  %v2751_v10 = vmul.f32 %v11570_v23, %v11570_v23  ;;  %11571 = vst [vmem:[#allocation212_spill] sm:$0xff] %v7547_v57  ;;  %v2896_v12 = vadd.f32 %v2895_v25, %v2595_v19 }
 0x41b   :  { %v7550_v60 = vadd.f32 %v2368_v43, %v11557_v61  ;;  %v2602_v54 = vmul.f32 %v7547_v57, %v7547_v57  ;;  %v2897_v45 = vsel %vm640_vm1, %v2596_v29, 0.0  ;;  %v2191_v47 = vadd.f32 %v2190_v35, %v7547_v57  ;;  %v7563_v43 = vpop.f32.mrf.mxu0  ;;  %v7565_v25 = vpop.f32.mrf.mxu1 }
 0x41c   :  { %2890 = vadd.xlane.f32.xlu0 %v2889_v46  ;;  %v2904_v53 = vadd.f32 %v7084_v24, %v2601_v37  ;;  %v3091_v63 = vadd.f32 %v3090_v55, %v2746_v18  ;;  %v7559_v41 = vmul.f32 %v11572_v51, %v11572_v51  ;;  %v2603_v19 = vmul.f32 %v7537_v28, %v7537_v28  ;;  %v11575_v46 = vld [vmem:[#allocation122_spill] sm:$0xff] }
 0x41d   :  { %2185 = vadd.xlane.f32.xlu1 %v2184_v2  ;;  %11573 = vst [vmem:[#allocation213_spill] sm:$0xff] %v7563_v43  ;;  %11574 = vst [vmem:[#allocation214_spill] sm:$0xff] %v7565_v25  ;;  %v2192_v29 = vsel %vm640_vm1, %v7537_v28, 0.0  ;;  %v2752_v35 = vmul.f32 %v11575_v46, %v11575_v46  ;;  %v2199_v24 = vadd.f32 %v7076_v6, %v7563_v43  ;;  %v7577_v2 = vpop.f32.mrf.mxu0  ;;  %v5363_v22 = vpop.f32.mrf.mxu1  ;;  %v2201_v33 = vsel %vm640_vm1, %v7565_v25, 0.0 }
 0x41e   :  { %v2608_v55 = vmul.f32 %v7563_v43, %v7563_v43  ;;  %v2193_v18 = vadd.f32 %v2192_v29, %v2191_v47  ;;  %v2385_v37 = vadd.f32 %v11575_v46, %v11570_v23  ;;  %11576 = vst [vmem:[#allocation215_spill] sm:$0xff] %v7577_v2  ;;  %v2898_v5 = vadd.f32 %v2897_v45, %v2896_v12  ;;  %v7581_v28 = vpop.permute.xlu1 %4375  ;;  %v11578_v22 = vld [vmem:[#allocation123_spill] sm:$0xff] }
 0x41f   :  { %v2905_v61 = vadd.f32 %v2904_v53, %v2602_v54  ;;  %11577 = vst [vmem:[#allocation216_spill] sm:$0xff] %v7581_v28  ;;  %v2609_v6 = vmul.f32 %v7577_v2, %v7577_v2  ;;  %v2610_v43 = vmul.f32 %v7565_v25, %v7565_v25  ;;  %v2200_v47 = vadd.f32 %v2199_v24, %v7577_v2  ;;  %v7596_v45 = vpop.f32.mrf.mxu0  ;;  %v7598_v53 = vpop.f32.mrf.mxu1 }
 0x420   :  { %2194 = vadd.xlane.f32.xlu0 %v2193_v18  ;;  %v2913_v29 = vadd.f32 %v7086_v32, %v2608_v55  ;;  %v7590_v12 = vadd.f32 %v2377_v21, %v11567_v20  ;;  %v7594_v54 = vmul.f32 %v11578_v22, %v11578_v22  ;;  %11579 = vst [vmem:[#allocation217_spill] sm:$0xff] %v7596_v45  ;;  %11580 = vst [vmem:[#allocation218_spill] sm:$0xff] %v7598_v53  ;;  %v7604_v24 = vpop.permute.xlu0 %4370 }
 0x421   :  { %2899 = vadd.xlane.f32.xlu1 %v2898_v5  ;;  %v2906_v28 = vsel %vm640_vm1, %v2603_v19, 0.0  ;;  %v7602_v18 = vadd.f32 %v3082_v59, %v7479_v36  ;;  %11581 = vst [vmem:[#allocation219_spill] sm:$0xff] %v7604_v24  ;;  %v2208_v32 = vadd.f32 %v7102_v16, %v7596_v45  ;;  %v2615_v21 = vmul.f32 %v7596_v45, %v7596_v45  ;;  %v7613_v25 = vpop.f32.mrf.mxu0  ;;  %v5364_v19 = vpop.f32.mrf.mxu1 }
 0x422   :  { %v2907_v55 = vadd.f32 %v2906_v28, %v2905_v61  ;;  %v2202_v46 = vadd.f32 %v2201_v33, %v2200_v47  ;;  %v7610_v5 = vadd.f32 %v3091_v63, %v2747_v49  ;;  %v2386_v23 = vadd.f32 %v2385_v37, %v11572_v51  ;;  %11582 = vst [vmem:[#allocation220_spill] sm:$0xff] %v7613_v25  ;;  %v11583_v33 = vld [vmem:[#allocation124_spill] sm:$0xff]  ;;  %v7632_v37 = vpop.permute.xlu1 %4385 }
 0x423   :  { %v3099_v20 = vadd.f32 %v2752_v35, %v2751_v10  ;;  %v2914_v36 = vadd.f32 %v2913_v29, %v2609_v6  ;;  %v2616_v59 = vmul.f32 %v7613_v25, %v7613_v25  ;;  %v2915_v16 = vsel %vm640_vm1, %v2610_v43, 0.0  ;;  %v7626_v63 = vpop.f32.mrf.mxu0  ;;  %v7628_v35 = vpop.f32.mrf.mxu1  ;;  %11586 = vst [vmem:[#allocation223_spill] sm:$0xff] %v7632_v37 }
 0x424   :  { %2908 = vadd.xlane.f32.xlu0 %v2907_v55  ;;  %v2209_v24 = vadd.f32 %v2208_v32, %v7613_v25  ;;  %v2922_v61 = vadd.f32 %v7108_v48, %v2615_v21  ;;  %v2758_v49 = vmul.f32 %v11583_v33, %v11583_v33  ;;  %v2759_v28 = vmul.f32 %v6923_v38, %v6923_v38  ;;  %v11587_v48 = vld [vmem:[#allocation125_spill] sm:$0xff]  ;;  %v7646_v2 = vpop.permute.xlu0 %4380 }
 0x425   :  { %v2617_v10 = vmul.f32 %v7598_v53, %v7598_v53  ;;  %2203 = vadd.xlane.f32.xlu1 %v2202_v46  ;;  %11584 = vst [vmem:[#allocation221_spill] sm:$0xff] %v7626_v63  ;;  %11585 = vst [vmem:[#allocation222_spill] sm:$0xff] %v7628_v35  ;;  %v2210_v43 = vsel %vm640_vm1, %v7598_v53, 0.0  ;;  %v2760_v6 = vmul.f32 %v11587_v48, %v11587_v48  ;;  %v7642_v21 = vpop.f32.mrf.mxu0  ;;  %v5367_v19 = vpop.f32.mrf.mxu1  ;;  %v2219_v37 = vsel %vm640_vm1, %v7628_v35, 0.0 }
 0x426   :  { %v2217_v47 = vadd.f32 %v7105_v15, %v7626_v63  ;;  %v2622_v29 = vmul.f32 %v7626_v63, %v7626_v63  ;;  %v2211_v32 = vadd.f32 %v2210_v43, %v2209_v24  ;;  %v2394_v46 = vadd.f32 %v6923_v38, %v11583_v33  ;;  %11588 = vst [vmem:[#allocation224_spill] sm:$0xff] %v7642_v21 }
 0x427   :  { %v2916_v55 = vadd.f32 %v2915_v16, %v2914_v36  ;;  %v2923_v51 = vadd.f32 %v2922_v61, %v2616_v59  ;;  %11589 = vst [vmem:[#allocation225_spill] sm:$0xff] %v7646_v2  ;;  %v2623_v15 = vmul.f32 %v7642_v21, %v7642_v21  ;;  %v2624_v63 = vmul.f32 %v7628_v35, %v7628_v35  ;;  %v11590_v59 = vld [vmem:[#allocation127_spill] sm:$0xff]  ;;  %v7657_v19 = vpop.f32.mrf.mxu0  ;;  %v7659_v2 = vpop.f32.mrf.mxu1 }
 0x428   :  { %2212 = vadd.xlane.f32.xlu0 %v2211_v32  ;;  %v2218_v24 = vadd.f32 %v2217_v47, %v7642_v21  ;;  %v2931_v43 = vadd.f32 %v7122_v39, %v2622_v29  ;;  %v3100_v36 = vadd.f32 %v3099_v20, %v7559_v41  ;;  %v3108_v16 = vadd.f32 %v2759_v28, %v2758_v49 }
 0x429   :  { %v2761_v61 = vmul.f32 %v11590_v59, %v11590_v59  ;;  %2917 = vadd.xlane.f32.xlu1 %v2916_v55  ;;  %11591 = vst [vmem:[#allocation226_spill] sm:$0xff] %v7657_v19  ;;  %11592 = vst [vmem:[#allocation227_spill] sm:$0xff] %v7659_v2  ;;  %v2924_v38 = vsel %vm640_vm1, %v2617_v10, 0.0  ;;  %v2226_v32 = vadd.f32 %v7139_v42, %v7657_v19  ;;  %v7669_v49 = vpop.f32.mrf.mxu0  ;;  %v5368_v28 = vpop.f32.mrf.mxu1 }
 0x42a   :  { %v2629_v47 = vmul.f32 %v7657_v19, %v7657_v19  ;;  %v2925_v39 = vadd.f32 %v2924_v38, %v2923_v51  ;;  %v2220_v29 = vadd.f32 %v2219_v37, %v2218_v24  ;;  %v2395_v20 = vadd.f32 %v2394_v46, %v11587_v48  ;;  %11593 = vst [vmem:[#allocation228_spill] sm:$0xff] %v7669_v49  ;;  %v7674_v10 = vpop.permute.xlu1 %4395  ;;  %v3376_v19 = vld [vmem:[%s10614_s4 + $0x80] sm:$0xff] }
 0x42b   :  { %v2765_v41 = vmul.f32 %v6936_v11, %v6936_v11  ;;  %v2932_v55 = vadd.f32 %v2931_v43, %v2623_v15  ;;  %v7672_v33 = vadd.f32 %v2386_v23, %v11578_v22  ;;  %11594 = vst [vmem:[#allocation229_spill] sm:$0xff] %v7674_v10  ;;  %v2630_v42 = vmul.f32 %v7669_v49, %v7669_v49  ;;  %v7687_v24 = vpop.f32.mrf.mxu0  ;;  %v7689_v43 = vpop.f32.mrf.mxu1 }
 0x42c   :  { %2926 = vadd.xlane.f32.xlu0 %v2925_v39  ;;  %v2933_v38 = vsel %vm640_vm1, %v2624_v63, 0.0  ;;  %v2227_v51 = vadd.f32 %v2226_v32, %v7669_v49  ;;  %v2940_v37 = vadd.f32 %v7148_v27, %v2629_v47  ;;  %v2766_v46 = vmul.f32 %v6953_v8, %v6953_v8  ;;  %11595 = vst [vmem:[#allocation230_spill] sm:$0xff] %v7687_v24  ;;  %v7693_v32 = vpop.permute.xlu0 %4390 }
 0x42d   :  { %v2767_v15 = vmul.f32 %v6938_v40, %v6938_v40  ;;  %v2631_v23 = vmul.f32 %v7659_v2, %v7659_v2  ;;  %2221 = vadd.xlane.f32.xlu1 %v2220_v29  ;;  %11596 = vst [vmem:[#allocation231_spill] sm:$0xff] %v7689_v43  ;;  %v2228_v63 = vsel %vm640_vm1, %v7659_v2, 0.0  ;;  %11597 = vst [vmem:[#allocation232_spill] sm:$0xff] %v7693_v32  ;;  %v7701_v10 = vpop.f32.mrf.mxu0  ;;  %v5371_v22 = vpop.f32.mrf.mxu1  ;;  %v2237_v21 = vsel %vm640_vm1, %v7689_v43, 0.0 }
 0x42e   :  { %v3109_v27 = vadd.f32 %v3108_v16, %v2760_v6  ;;  %v2235_v47 = vadd.f32 %v7142_v26, %v7687_v24  ;;  %v2636_v39 = vmul.f32 %v7687_v24, %v7687_v24  ;;  %v2229_v28 = vadd.f32 %v2228_v63, %v2227_v51  ;;  %11598 = vst [vmem:[#allocation233_spill] sm:$0xff] %v7701_v10  ;;  %v7722_v32 = vpop.permute.xlu1 %4405 }
 0x42f   :  { %v2403_v29 = vadd.f32 %v6953_v8, %v6936_v11  ;;  %v2934_v48 = vadd.f32 %v2933_v38, %v2932_v55  ;;  %v2941_v35 = vadd.f32 %v2940_v37, %v2630_v42  ;;  %v2637_v6 = vmul.f32 %v7701_v10, %v7701_v10  ;;  %v7714_v22 = vpop.f32.mrf.mxu0  ;;  %v7716_v42 = vpop.f32.mrf.mxu1  ;;  %11601 = vst [vmem:[#allocation236_spill] sm:$0xff] %v7722_v32 }
 0x430   :  { %v2638_v26 = vmul.f32 %v7689_v43, %v7689_v43  ;;  %2230 = vadd.xlane.f32.xlu0 %v2229_v28  ;;  %v2236_v16 = vadd.f32 %v2235_v47, %v7701_v10  ;;  %v2949_v51 = vadd.f32 %v7150_v0, %v2636_v39  ;;  %v7712_v63 = vadd.f32 %v2395_v20, %v11590_v59  ;;  %v7735_v28 = vpop.permute.xlu0 %4400  ;;  %v11644_v43 = vld [vmem:[#allocation176_spill] sm:$0xff] }
 0x431   :  { %v3117_v55 = vadd.f32 %v2766_v46, %v2765_v41  ;;  %2935 = vadd.xlane.f32.xlu1 %v2934_v48  ;;  %11599 = vst [vmem:[#allocation234_spill] sm:$0xff] %v7714_v22  ;;  %11600 = vst [vmem:[#allocation235_spill] sm:$0xff] %v7716_v42  ;;  %v2942_v38 = vsel %vm640_vm1, %v2631_v23, 0.0  ;;  %v7720_v37 = vadd.f32 %v3100_v36, %v7594_v54  ;;  %v7733_v39 = vpop.f32.mrf.mxu0  ;;  %v5372_v54 = vpop.f32.mrf.mxu1 }
 0x432   :  { %v2244_v47 = vadd.f32 %v7204_v44, %v7714_v22  ;;  %v2643_v0 = vmul.f32 %v7714_v22, %v7714_v22  ;;  %v2943_v20 = vadd.f32 %v2942_v38, %v2941_v35  ;;  %v2238_v41 = vadd.f32 %v2237_v21, %v2236_v16  ;;  %11602 = vst [vmem:[#allocation237_spill] sm:$0xff] %v7733_v39  ;;  %v7764_v59 = vpop.permute.xlu1 %4415 }
 0x433   :  { %v7728_v48 = vadd.f32 %v3109_v27, %v2761_v61  ;;  %v2404_v46 = vadd.f32 %v2403_v29, %v6938_v40  ;;  %v2768_v23 = vmul.f32 %v6955_v1, %v6955_v1  ;;  %v2950_v36 = vadd.f32 %v2949_v51, %v2637_v6  ;;  %11603 = vst [vmem:[#allocation238_spill] sm:$0xff] %v7735_v28  ;;  %v11604_v29 = vld [vmem:[#allocation134_spill] sm:$0xff]  ;;  %v7748_v51 = vpop.f32.mrf.mxu0  ;;  %v7750_v38 = vpop.f32.mrf.mxu1 }
 0x434   :  { %v2644_v44 = vmul.f32 %v7733_v39, %v7733_v39  ;;  %2944 = vadd.xlane.f32.xlu0 %v2943_v20  ;;  %v2951_v35 = vsel %vm640_vm1, %v2638_v26, 0.0  ;;  %v2245_v21 = vadd.f32 %v2244_v47, %v7733_v39  ;;  %v2958_v61 = vadd.f32 %v7210_v3, %v2643_v0  ;;  %11605 = vst [vmem:[#allocation239_spill] sm:$0xff] %v7748_v51  ;;  %v11607_v3 = vld [vmem:[#allocation159_spill] sm:$0xff] }
 0x435   :  { %v2772_v27 = vmul.f32 %v6967_v31, %v6967_v31  ;;  %v2773_v16 = vmul.f32 %v11604_v29, %v11604_v29  ;;  %v2645_v6 = vmul.f32 %v7716_v42, %v7716_v42  ;;  %2239 = vadd.xlane.f32.xlu1 %v2238_v41  ;;  %11606 = vst [vmem:[#allocation240_spill] sm:$0xff] %v7750_v38  ;;  %v2246_v26 = vsel %vm640_vm1, %v7716_v42, 0.0  ;;  %v7760_v32 = vpop.f32.mrf.mxu0  ;;  %v5375_v40 = vpop.f32.mrf.mxu1 }
 0x436   :  { %v3118_v47 = vadd.f32 %v3117_v55, %v2767_v15  ;;  %v2253_v0 = vadd.f32 %v11607_v3, %v7748_v51  ;;  %v2650_v20 = vmul.f32 %v7748_v51, %v7748_v51  ;;  %v2247_v54 = vadd.f32 %v2246_v26, %v2245_v21  ;;  %11608 = vst [vmem:[#allocation159_spill] sm:$0xff] %v7760_v32  ;;  %v11610_v26 = vld [vmem:[#allocation162_spill] sm:$0xff] }
 0x437   :  { %v2412_v28 = vadd.f32 %v11604_v29, %v6967_v31  ;;  %v2952_v41 = vadd.f32 %v2951_v35, %v2950_v36  ;;  %v2959_v8 = vadd.f32 %v2958_v61, %v2644_v44  ;;  %v2255_v11 = vsel %vm640_vm1, %v7750_v38, 0.0  ;;  %11609 = vst [vmem:[#allocation241_spill] sm:$0xff] %v7764_v59  ;;  %v11611_v44 = vld [vmem:[#allocation133_spill] sm:$0xff]  ;;  %v7777_v61 = vpop.f32.mrf.mxu0  ;;  %v7779_v59 = vpop.f32.mrf.mxu1 }
 0x438   :  { %v2651_v15 = vmul.f32 %v7760_v32, %v7760_v32  ;;  %v2652_v55 = vmul.f32 %v7750_v38, %v7750_v38  ;;  %2248 = vadd.xlane.f32.xlu0 %v2247_v54  ;;  %v2254_v21 = vadd.f32 %v2253_v0, %v7760_v32  ;;  %v2967_v3 = vadd.f32 %v11610_v26, %v2650_v20  ;;  %v7782_v31 = vpop.permute.xlu0 %4410  ;;  %v11615_v0 = vld [vmem:[#allocation165_spill] sm:$0xff]  ;;  %v11616_v26 = vld [vmem:[#allocation135_spill] sm:$0xff] }
 0x439   :  { %v7773_v36 = vadd.f32 %v2404_v46, %v6955_v1  ;;  %v3126_v40 = vadd.f32 %v2773_v16, %v2772_v27  ;;  %v2774_v35 = vmul.f32 %v11611_v44, %v11611_v44  ;;  %2953 = vadd.xlane.f32.xlu1 %v2952_v41  ;;  %11612 = vst [vmem:[#allocation162_spill] sm:$0xff] %v7777_v61  ;;  %11613 = vst [vmem:[#allocation242_spill] sm:$0xff] %v7779_v59  ;;  %v7793_v38 = vpop.f32.mrf.mxu0 }
 0x43a   :  { %v2960_v29 = vsel %vm640_vm1, %v2645_v6, 0.0  ;;  %11614 = vst [vmem:[#allocation243_spill] sm:$0xff] %v7782_v31  ;;  %v2262_v54 = vadd.f32 %v11615_v0, %v7777_v61  ;;  %v2657_v46 = vmul.f32 %v7777_v61, %v7777_v61  ;;  %v2256_v27 = vadd.f32 %v2255_v11, %v2254_v21  ;;  %11617 = vst [vmem:[#allocation165_spill] sm:$0xff] %v7793_v38  ;;  %v5376_v6 = vpop.f32.mrf.mxu1  ;;  %v11618_v11 = vld [vmem:[#allocation166_spill] sm:$0xff] }
 0x43b   :  { %v2961_v20 = vadd.f32 %v2960_v29, %v2959_v8  ;;  %v7788_v16 = vadd.f32 %v3118_v47, %v2768_v23  ;;  %v2413_v41 = vadd.f32 %v2412_v28, %v11611_v44  ;;  %v2775_v1 = vmul.f32 %v11616_v26, %v11616_v26  ;;  %v11619_v29 = vld [vmem:[#allocation136_spill] sm:$0xff]  ;;  %v11620_v47 = vld [vmem:[#allocation138_spill] sm:$0xff] }
 0x43c   :  { %v2968_v32 = vadd.f32 %v2967_v3, %v2651_v15  ;;  %v2658_v31 = vmul.f32 %v7793_v38, %v7793_v38  ;;  %v2969_v0 = vsel %vm640_vm1, %v2652_v55, 0.0  ;;  %v2263_v8 = vadd.f32 %v2262_v54, %v7793_v38  ;;  %v7806_v15 = vpop.f32.mrf.mxu0  ;;  %v7808_v3 = vpop.f32.mrf.mxu1 }
 0x43d   :  { %2962 = vadd.xlane.f32.xlu0 %v2961_v20  ;;  %v2976_v23 = vadd.f32 %v11618_v11, %v2657_v46  ;;  %v2779_v28 = vmul.f32 %v11619_v29, %v11619_v29  ;;  %v2780_v21 = vmul.f32 %v11620_v47, %v11620_v47  ;;  %v2659_v6 = vmul.f32 %v7779_v59, %v7779_v59  ;;  %v7812_v54 = vpop.permute.xlu1 %4425  ;;  %v11624_v20 = vld [vmem:[#allocation167_spill] sm:$0xff] }
 0x43e   :  { %2257 = vadd.xlane.f32.xlu1 %v2256_v27  ;;  %11621 = vst [vmem:[#allocation166_spill] sm:$0xff] %v7806_v15  ;;  %11622 = vst [vmem:[#allocation244_spill] sm:$0xff] %v7808_v3  ;;  %v2264_v55 = vsel %vm640_vm1, %v7779_v59, 0.0  ;;  %v3127_v46 = vadd.f32 %v3126_v40, %v2774_v35  ;;  %v2271_v11 = vadd.f32 %v11624_v20, %v7806_v15  ;;  %v7820_v61 = vpop.f32.mrf.mxu0  ;;  %v5379_v42 = vpop.f32.mrf.mxu1  ;;  %v2273_v59 = vsel %vm640_vm1, %v7808_v3, 0.0 }
 0x43f   :  { %11623 = vst [vmem:[#allocation245_spill] sm:$0xff] %v7812_v54  ;;  %v2664_v44 = vmul.f32 %v7806_v15, %v7806_v15  ;;  %v2265_v38 = vadd.f32 %v2264_v55, %v2263_v8  ;;  %v2421_v27 = vadd.f32 %v11620_v47, %v11619_v29  ;;  %11625 = vst [vmem:[#allocation167_spill] sm:$0xff] %v7820_v61  ;;  %v7824_v54 = vpop.permute.xlu0 %4420  ;;  %v11627_v55 = vld [vmem:[#allocation168_spill] sm:$0xff]  ;;  %v11628_v42 = vld [vmem:[#allocation137_spill] sm:$0xff]  ;;  %v2978_v47 = vsel %vm640_vm1, %v2659_v6, 0.0 }
 0x440   :  { %v2970_v51 = vadd.f32 %v2969_v0, %v2968_v32  ;;  %v2977_v39 = vadd.f32 %v2976_v23, %v2658_v31  ;;  %11626 = vst [vmem:[#allocation246_spill] sm:$0xff] %v7824_v54  ;;  %v2665_v40 = vmul.f32 %v7820_v61, %v7820_v61  ;;  %v2666_v35 = vmul.f32 %v7808_v3, %v7808_v3  ;;  %v7837_v23 = vpop.f32.mrf.mxu0  ;;  %v7839_v54 = vpop.f32.mrf.mxu1 }
 0x441   :  { %2266 = vadd.xlane.f32.xlu0 %v2265_v38  ;;  %v2272_v8 = vadd.f32 %v2271_v11, %v7820_v61  ;;  %v2985_v20 = vadd.f32 %v11627_v55, %v2664_v44  ;;  %v7833_v32 = vadd.f32 %v2413_v41, %v11616_v26  ;;  %v3135_v31 = vadd.f32 %v2780_v21, %v2779_v28  ;;  %v11631_v38 = vld [vmem:[#allocation171_spill] sm:$0xff]  ;;  %v7853_v6 = vpop.permute.xlu1 %4435 }
 0x442   :  { %v2781_v0 = vmul.f32 %v11628_v42, %v11628_v42  ;;  %2971 = vadd.xlane.f32.xlu1 %v2970_v51  ;;  %11629 = vst [vmem:[#allocation168_spill] sm:$0xff] %v7837_v23  ;;  %11630 = vst [vmem:[#allocation247_spill] sm:$0xff] %v7839_v54  ;;  %v2280_v29 = vadd.f32 %v11631_v38, %v7837_v23  ;;  %v2671_v44 = vmul.f32 %v7837_v23, %v7837_v23  ;;  %v11632_v21 = vld [vmem:[#allocation139_spill] sm:$0xff]  ;;  %v7851_v26 = vpop.f32.mrf.mxu0  ;;  %v5380_v3 = vpop.f32.mrf.mxu1 }
 0x443   :  { %v2979_v11 = vadd.f32 %v2978_v47, %v2977_v39  ;;  %v2274_v41 = vadd.f32 %v2273_v59, %v2272_v8  ;;  %v7846_v55 = vadd.f32 %v3127_v46, %v2775_v1  ;;  %v2422_v28 = vadd.f32 %v2421_v27, %v11628_v42  ;;  %11633 = vst [vmem:[#allocation171_spill] sm:$0xff] %v7851_v26  ;;  %v11635_v59 = vld [vmem:[#allocation172_spill] sm:$0xff]  ;;  %v11637_v42 = vld [vmem:[#allocation142_spill] sm:$0xff] }
 0x444   :  { %v2782_v51 = vmul.f32 %v11632_v21, %v11632_v21  ;;  %v2986_v61 = vadd.f32 %v2985_v20, %v2665_v40  ;;  %11634 = vst [vmem:[#allocation248_spill] sm:$0xff] %v7853_v6  ;;  %v2672_v38 = vmul.f32 %v7851_v26, %v7851_v26  ;;  %v2987_v39 = vsel %vm640_vm1, %v2666_v35, 0.0  ;;  %v11636_v27 = vld [vmem:[#allocation140_spill] sm:$0xff]  ;;  %v11638_v40 = vld [vmem:[#allocation141_spill] sm:$0xff]  ;;  %v7868_v6 = vpop.f32.mrf.mxu0  ;;  %v7872_v35 = vpop.permute.xlu0 %4430 }
 0x445   :  { %2980 = vadd.xlane.f32.xlu0 %v2979_v11  ;;  %v2281_v1 = vadd.f32 %v2280_v29, %v7851_v26  ;;  %v2994_v47 = vadd.f32 %v11635_v59, %v2671_v44  ;;  %v3136_v46 = vadd.f32 %v3135_v31, %v2781_v0  ;;  %v2786_v8 = vmul.f32 %v11636_v27, %v11636_v27  ;;  %v7870_v11 = vpop.f32.mrf.mxu1  ;;  %v11642_v31 = vld [vmem:[#allocation173_spill] sm:$0xff] }
 0x446   :  { %v2787_v3 = vmul.f32 %v11637_v42, %v11637_v42  ;;  %v7866_v20 = vmul.f32 %v11638_v40, %v11638_v40  ;;  %2275 = vadd.xlane.f32.xlu1 %v2274_v41  ;;  %11639 = vst [vmem:[#allocation172_spill] sm:$0xff] %v7868_v6  ;;  %11640 = vst [vmem:[#allocation249_spill] sm:$0xff] %v7870_v11  ;;  %v2673_v29 = vmul.f32 %v7839_v54, %v7839_v54  ;;  %v7882_v26 = vpop.f32.mrf.mxu0 }
 0x447   :  { %11641 = vst [vmem:[#allocation250_spill] sm:$0xff] %v7872_v35  ;;  %v2289_v0 = vadd.f32 %v11642_v31, %v7868_v6  ;;  %v2678_v44 = vmul.f32 %v7868_v6, %v7868_v6  ;;  %v2282_v59 = vsel %vm640_vm1, %v7839_v54, 0.0  ;;  %11643 = vst [vmem:[#allocation173_spill] sm:$0xff] %v7882_v26  ;;  %v2291_v41 = vsel %vm640_vm1, %v7870_v11, 0.0  ;;  %v5383_v35 = vpop.f32.mrf.mxu1 }
 0x448   :  { %v2988_v23 = vadd.f32 %v2987_v39, %v2986_v61  ;;  %v2283_v15 = vadd.f32 %v2282_v59, %v2281_v1  ;;  %v2995_v22 = vadd.f32 %v2994_v47, %v2672_v38  ;;  %v2679_v31 = vmul.f32 %v7882_v26, %v7882_v26  ;;  %v11645_v61 = vld [vmem:[#allocation143_spill] sm:$0xff]  ;;  %v7905_v1 = vpop.permute.xlu1 %4445 }
 0x449   :  { %v3003_v10 = vadd.f32 %v11644_v43, %v2678_v44  ;;  %v2290_v24 = vadd.f32 %v2289_v0, %v7882_v26  ;;  %v2680_v6 = vmul.f32 %v7870_v11, %v7870_v11  ;;  %v7893_v54 = vadd.f32 %v2422_v28, %v11632_v21  ;;  %v7901_v43 = vpop.f32.mrf.mxu0  ;;  %v7903_v38 = vpop.f32.mrf.mxu1  ;;  %11648 = vst [vmem:[#allocation252_spill] sm:$0xff] %v7905_v1 }
 0x44a   :  { %v2430_v2 = vadd.f32 %v11637_v42, %v11636_v27  ;;  %v7899_v39 = vmul.f32 %v11645_v61, %v11645_v61  ;;  %2989 = vadd.xlane.f32.xlu1 %v2988_v23  ;;  %2284 = vadd.xlane.f32.xlu0 %v2283_v15  ;;  %11646 = vst [vmem:[#allocation176_spill] sm:$0xff] %v7901_v43  ;;  %11647 = vst [vmem:[#allocation251_spill] sm:$0xff] %v7903_v38  ;;  %v2996_v0 = vsel %vm640_vm1, %v2673_v29, 0.0  ;;  %v7916_v21 = vpop.permute.xlu0 %4440 }
 0x44b   :  { %v7907_v47 = vadd.f32 %v3136_v46, %v2782_v51  ;;  %v2298_v28 = vadd.f32 %v7328_v9, %v7901_v43  ;;  %v2685_v35 = vmul.f32 %v7901_v43, %v7901_v43  ;;  %v3144_v44 = vadd.f32 %v2787_v3, %v2786_v8  ;;  %v7914_v23 = vpop.f32.mrf.mxu0  ;;  %v5384_v27 = vpop.f32.mrf.mxu1  ;;  %11650 = vst [vmem:[#allocation254_spill] sm:$0xff] %v7916_v21  ;;  %v11651_v8 = vld [vmem:[#allocation144_spill] sm:$0xff]  ;;  %v11652_v3 = vld [vmem:[#allocation145_spill] sm:$0xff]  ;;  %v11657_v43 = vld [vmem:[#allocation146_spill] sm:$0xff] }
 0x44c   :  { %v3004_v59 = vadd.f32 %v3003_v10, %v2679_v31  ;;  %11649 = vst [vmem:[#allocation253_spill] sm:$0xff] %v7914_v23  ;;  %v2997_v15 = vadd.f32 %v2996_v0, %v2995_v22  ;;  %v2292_v42 = vadd.f32 %v2291_v41, %v2290_v24  ;;  %v2686_v51 = vmul.f32 %v7914_v23, %v7914_v23  ;;  %v7946_v21 = vpop.permute.xlu1 %4455 }
 0x44d   :  { %v3005_v46 = vsel %vm640_vm1, %v2680_v6, 0.0  ;;  %v2299_v9 = vadd.f32 %v2298_v28, %v7914_v23  ;;  %v3012_v1 = vadd.f32 %v7330_v4, %v2685_v35  ;;  %v2431_v29 = vadd.f32 %v2430_v2, %v11638_v40  ;;  %v7930_v22 = vpop.f32.mrf.mxu0  ;;  %v7932_v27 = vpop.f32.mrf.mxu1  ;;  %11656 = vst [vmem:[#allocation258_spill] sm:$0xff] %v7946_v21 }
 0x44e   :  { %v2793_v10 = vmul.f32 %v11651_v8, %v11651_v8  ;;  %v7928_v24 = vmul.f32 %v11652_v3, %v11652_v3  ;;  %2998 = vadd.xlane.f32.xlu0 %v2997_v15  ;;  %2293 = vadd.xlane.f32.xlu1 %v2292_v42  ;;  %11653 = vst [vmem:[#allocation255_spill] sm:$0xff] %v7930_v22  ;;  %11654 = vst [vmem:[#allocation256_spill] sm:$0xff] %v7932_v27  ;;  %v2300_v41 = vsel %vm640_vm1, %v7903_v38, 0.0 }
 0x44f   :  { %v2687_v6 = vmul.f32 %v7903_v38, %v7903_v38  ;;  %v2307_v4 = vadd.f32 %v7341_v17, %v7930_v22  ;;  %v2692_v2 = vmul.f32 %v7930_v22, %v7930_v22  ;;  %v7942_v31 = vpop.f32.mrf.mxu0  ;;  %v2309_v42 = vsel %vm640_vm1, %v7932_v27, 0.0  ;;  %v5387_v0 = vpop.f32.mrf.mxu1 }
 0x450   :  { %11655 = vst [vmem:[#allocation257_spill] sm:$0xff] %v7942_v31  ;;  %v3006_v28 = vadd.f32 %v3005_v46, %v3004_v59  ;;  %v2301_v35 = vadd.f32 %v2300_v41, %v2299_v9  ;;  %v3013_v15 = vadd.f32 %v3012_v1, %v2686_v51  ;;  %v2693_v22 = vmul.f32 %v7942_v31, %v7942_v31  ;;  %v7963_v46 = vpop.permute.xlu0 %4450 }
 0x451   :  { %v3021_v40 = vadd.f32 %v7345_v7, %v2692_v2  ;;  %v2308_v17 = vadd.f32 %v2307_v4, %v7942_v31  ;;  %v2694_v38 = vmul.f32 %v7932_v27, %v7932_v27  ;;  %v3145_v23 = vadd.f32 %v3144_v44, %v7866_v20  ;;  %v7959_v51 = vpop.f32.mrf.mxu0  ;;  %v7961_v7 = vpop.f32.mrf.mxu1  ;;  %11660 = vst [vmem:[#allocation261_spill] sm:$0xff] %v7963_v46  ;;  %v11661_v2 = vld [vmem:[#allocation147_spill] sm:$0xff] }
 0x452   :  { %v2439_v59 = vadd.f32 %v11657_v43, %v11651_v8  ;;  %v2794_v1 = vmul.f32 %v11657_v43, %v11657_v43  ;;  %3007 = vadd.xlane.f32.xlu1 %v3006_v28  ;;  %2302 = vadd.xlane.f32.xlu0 %v2301_v35  ;;  %11658 = vst [vmem:[#allocation259_spill] sm:$0xff] %v7959_v51  ;;  %11659 = vst [vmem:[#allocation260_spill] sm:$0xff] %v7961_v7  ;;  %v3014_v4 = vsel %vm640_vm1, %v2687_v6, 0.0 }
 0x453   :  { %v7966_v9 = vadd.f32 %v2431_v29, %v11645_v61  ;;  %v2316_v20 = vadd.f32 %v7361_v14, %v7959_v51  ;;  %v2699_v44 = vmul.f32 %v7959_v51, %v7959_v51  ;;  %v7975_v41 = vmul.f32 %v11661_v2, %v11661_v2  ;;  %v7977_v35 = vpop.f32.mrf.mxu0  ;;  %v5388_v46 = vpop.f32.mrf.mxu1 }
 0x454   :  { %v3022_v28 = vadd.f32 %v3021_v40, %v2693_v22  ;;  %11662 = vst [vmem:[#allocation262_spill] sm:$0xff] %v7977_v35  ;;  %v3015_v0 = vadd.f32 %v3014_v4, %v3013_v15  ;;  %v2310_v21 = vadd.f32 %v2309_v42, %v2308_v17  ;;  %v2700_v29 = vmul.f32 %v7977_v35, %v7977_v35  ;;  %v7992_v15 = vpop.permute.xlu1 %4465 }
 0x455   :  { %v3023_v14 = vsel %vm640_vm1, %v2694_v38, 0.0  ;;  %v2317_v43 = vadd.f32 %v2316_v20, %v7977_v35  ;;  %v3030_v8 = vadd.f32 %v7371_v13, %v2699_v44  ;;  %v7985_v6 = vadd.f32 %v3145_v23, %v7899_v39  ;;  %v7988_v22 = vpop.f32.mrf.mxu0  ;;  %v7990_v42 = vpop.f32.mrf.mxu1  ;;  %11665 = vst [vmem:[#allocation265_spill] sm:$0xff] %v7992_v15  ;;  %v11668_v44 = vld [vmem:[#allocation189_spill] sm:$0xff] }
 0x456   :  { %v3153_v61 = vadd.f32 %v2794_v1, %v2793_v10  ;;  %v2440_v40 = vadd.f32 %v2439_v59, %v11652_v3  ;;  %3016 = vadd.xlane.f32.xlu0 %v3015_v0  ;;  %2311 = vadd.xlane.f32.xlu1 %v2310_v21  ;;  %11663 = vst [vmem:[#allocation263_spill] sm:$0xff] %v7988_v22  ;;  %11664 = vst [vmem:[#allocation264_spill] sm:$0xff] %v7990_v42  ;;  %v2318_v23 = vsel %vm640_vm1, %v7961_v7, 0.0  ;;  %v8006_v20 = vpop.permute.xlu0 %4460  ;;  %v11669_v3 = vld [vmem:[#allocation148_spill] sm:$0xff] }
 0x457   :  { %v2701_v38 = vmul.f32 %v7961_v7, %v7961_v7  ;;  %v2325_v13 = vadd.f32 %v7374_v52, %v7988_v22  ;;  %v2706_v39 = vmul.f32 %v7988_v22, %v7988_v22  ;;  %v8002_v10 = vpop.f32.mrf.mxu0  ;;  %v2327_v21 = vsel %vm640_vm1, %v7990_v42, 0.0  ;;  %v5391_v1 = vpop.f32.mrf.mxu1  ;;  %11667 = vst [vmem:[#allocation267_spill] sm:$0xff] %v8006_v20  ;;  %v11670_v7 = vld [vmem:[#allocation149_spill] sm:$0xff] }
 0x458   :  { %11666 = vst [vmem:[#allocation266_spill] sm:$0xff] %v8002_v10  ;;  %v3024_v17 = vadd.f32 %v3023_v14, %v3022_v28  ;;  %v2319_v59 = vadd.f32 %v2318_v23, %v2317_v43  ;;  %v3031_v46 = vadd.f32 %v3030_v8, %v2700_v29  ;;  %v2707_v0 = vmul.f32 %v8002_v10, %v8002_v10  ;;  %v11671_v28 = vld [vmem:[#allocation20_spill] sm:$0xff]  ;;  %v8035_v51 = vpop.permute.xlu1 %4475 }
 0x459   :  { %v3039_v4 = vadd.f32 %v11668_v44, %v2706_v39  ;;  %v2326_v52 = vadd.f32 %v2325_v13, %v8002_v10  ;;  %v2708_v15 = vmul.f32 %v7990_v42, %v7990_v42  ;;  %v2800_v22 = vmul.f32 %v11669_v3, %v11669_v3  ;;  %v8020_v29 = vpop.f32.mrf.mxu0  ;;  %v8022_v14 = vpop.f32.mrf.mxu1  ;;  %v11674_v39 = vld [vmem:[#allocation190_spill] sm:$0xff]  ;;  %11676 = vst [vmem:[#allocation269_spill] sm:$0xff] %v8035_v51 }
 0x45a   :  { %v2801_v43 = vmul.f32 %v11670_v7, %v11670_v7  ;;  %v2802_v8 = vmul.f32 %v11671_v28, %v11671_v28  ;;  %3025 = vadd.xlane.f32.xlu1 %v3024_v17  ;;  %2320 = vadd.xlane.f32.xlu0 %v2319_v59  ;;  %11672 = vst [vmem:[#allocation189_spill] sm:$0xff] %v8020_v29  ;;  %11673 = vst [vmem:[#allocation268_spill] sm:$0xff] %v8022_v14  ;;  %v3032_v44 = vsel %vm640_vm1, %v2701_v38, 0.0 }
 0x45b   :  { %v3154_v13 = vadd.f32 %v3153_v61, %v7928_v24  ;;  %v2334_v23 = vadd.f32 %v11674_v39, %v8020_v29  ;;  %v2713_v1 = vmul.f32 %v8020_v29, %v8020_v29  ;;  %v8031_v20 = vadd.f32 %v2440_v40, %v11661_v2  ;;  %v8033_v17 = vpop.f32.mrf.mxu0  ;;  %v5392_v35 = vpop.f32.mrf.mxu1  ;;  %v11677_v61 = vld [vmem:[#allocation193_spill] sm:$0xff] }
 0x45c   :  { %v3040_v42 = vadd.f32 %v3039_v4, %v2707_v0  ;;  %11675 = vst [vmem:[#allocation190_spill] sm:$0xff] %v8033_v17  ;;  %v3033_v59 = vadd.f32 %v3032_v44, %v3031_v46  ;;  %v2328_v10 = vadd.f32 %v2327_v21, %v2326_v52  ;;  %v2714_v39 = vmul.f32 %v8033_v17, %v8033_v17  ;;  %v11678_v0 = vld [vmem:[#allocation150_spill] sm:$0xff]  ;;  %v8052_v52 = vpop.permute.xlu0 %4470 }
 0x45d   :  { %v3048_v24 = vadd.f32 %v11677_v61, %v2713_v1  ;;  %v3041_v29 = vsel %vm640_vm1, %v2708_v15, 0.0  ;;  %v2335_v38 = vadd.f32 %v2334_v23, %v8033_v17  ;;  %v2448_v40 = vadd.f32 %v11670_v7, %v11669_v3  ;;  %v8048_v35 = vpop.f32.mrf.mxu0  ;;  %v8050_v21 = vpop.f32.mrf.mxu1  ;;  %11681 = vst [vmem:[#allocation271_spill] sm:$0xff] %v8052_v52  ;;  %v11682_v23 = vld [vmem:[#allocation194_spill] sm:$0xff]  ;;  %v11684_v7 = vld [vmem:[#allocation195_spill] sm:$0xff] }
 0x45e   :  { %v3162_v4 = vadd.f32 %v2801_v43, %v2800_v22  ;;  %v8046_v46 = vmul.f32 %v11678_v0, %v11678_v0  ;;  %3034 = vadd.xlane.f32.xlu0 %v3033_v59  ;;  %2329 = vadd.xlane.f32.xlu1 %v2328_v10  ;;  %11679 = vst [vmem:[#allocation193_spill] sm:$0xff] %v8048_v35  ;;  %11680 = vst [vmem:[#allocation270_spill] sm:$0xff] %v8050_v21  ;;  %v2336_v43 = vsel %vm640_vm1, %v8022_v14, 0.0 }
 0x45f   :  { %v2715_v15 = vmul.f32 %v8022_v14, %v8022_v14  ;;  %v2343_v1 = vadd.f32 %v11682_v23, %v8048_v35  ;;  %v2720_v22 = vmul.f32 %v8048_v35, %v8048_v35  ;;  %v3049_v44 = vadd.f32 %v3048_v24, %v2714_v39  ;;  %v8062_v10 = vpop.f32.mrf.mxu0  ;;  %v5395_v52 = vpop.f32.mrf.mxu1  ;;  %v11685_v14 = vld [vmem:[#allocation151_spill] sm:$0xff] }
 0x460   :  { %11683 = vst [vmem:[#allocation194_spill] sm:$0xff] %v8062_v10  ;;  %v2345_v59 = vsel %vm640_vm1, %v8050_v21, 0.0  ;;  %v3042_v61 = vadd.f32 %v3041_v29, %v3040_v42  ;;  %v2337_v51 = vadd.f32 %v2336_v43, %v2335_v38  ;;  %v2721_v23 = vmul.f32 %v8062_v10, %v8062_v10  ;;  %v8082_v38 = vpop.permute.xlu1 %4485  ;;  %v11689_v52 = vld [vmem:[#allocation152_spill] sm:$0xff]  ;;  %v8093_v17 = vpop.permute.xlu0 %4480 }
 0x461   :  { %v3057_v3 = vadd.f32 %v11684_v7, %v2720_v22  ;;  %v2344_v2 = vadd.f32 %v2343_v1, %v8062_v10  ;;  %v2722_v35 = vmul.f32 %v8050_v21, %v8050_v21  ;;  %v8073_v24 = vadd.f32 %v3154_v13, %v7975_v41  ;;  %v8078_v29 = vpop.f32.mrf.mxu0  ;;  %v8080_v7 = vpop.f32.mrf.mxu1  ;;  %11688 = vst [vmem:[#allocation273_spill] sm:$0xff] %v8082_v38  ;;  %v11690_v22 = vld [vmem:[#allocation199_spill] sm:$0xff] }
 0x462   :  { %v2449_v39 = vadd.f32 %v2448_v40, %v11671_v28  ;;  %v2807_v42 = vmul.f32 %v11685_v14, %v11685_v14  ;;  %3043 = vadd.xlane.f32.xlu1 %v3042_v61  ;;  %2338 = vadd.xlane.f32.xlu0 %v2337_v51  ;;  %11686 = vst [vmem:[#allocation195_spill] sm:$0xff] %v8078_v29  ;;  %11687 = vst [vmem:[#allocation272_spill] sm:$0xff] %v8080_v7  ;;  %v3050_v40 = vsel %vm640_vm1, %v2715_v15, 0.0 }
 0x463   :  { %v2809_v1 = vmul.f32 %v11689_v52, %v11689_v52  ;;  %v2352_v41 = vadd.f32 %v11690_v22, %v8078_v29  ;;  %v2727_v13 = vmul.f32 %v8078_v29, %v8078_v29  ;;  %v3163_v43 = vadd.f32 %v3162_v4, %v2802_v8  ;;  %v8091_v51 = vpop.f32.mrf.mxu0  ;;  %v5396_v10 = vpop.f32.mrf.mxu1  ;;  %11692 = vst [vmem:[#allocation274_spill] sm:$0xff] %v8093_v17 }
 0x464   :  { %v3058_v61 = vadd.f32 %v3057_v3, %v2721_v23  ;;  %11691 = vst [vmem:[#allocation199_spill] sm:$0xff] %v8091_v51  ;;  %v3051_v28 = vadd.f32 %v3050_v40, %v3049_v44  ;;  %v2346_v21 = vadd.f32 %v2345_v59, %v2344_v2  ;;  %v2728_v22 = vmul.f32 %v8091_v51, %v8091_v51  ;;  %v11693_v3 = vld [vmem:[#allocation153_spill] sm:$0xff]  ;;  %v8123_v40 = vpop.permute.xlu1 %4495 }
 0x465   :  { %v3066_v38 = vadd.f32 %v7486_v62, %v2727_v13  ;;  %v2353_v27 = vadd.f32 %v2352_v41, %v8091_v51  ;;  %v3059_v29 = vsel %vm640_vm1, %v2722_v35, 0.0  ;;  %v8101_v15 = vadd.f32 %v2449_v39, %v11678_v0  ;;  %v8107_v4 = vpop.f32.mrf.mxu0  ;;  %v8109_v62 = vpop.f32.mrf.mxu1  ;;  %11696 = vst [vmem:[#allocation277_spill] sm:$0xff] %v8123_v40  ;;  %v11697_v0 = vld [vmem:[#allocation154_spill] sm:$0xff] }
 0x466   :  { %v2457_v8 = vadd.f32 %v11693_v3, %v11685_v14  ;;  %v2808_v2 = vmul.f32 %v11693_v3, %v11693_v3  ;;  %3052 = vadd.xlane.f32.xlu0 %v3051_v28  ;;  %2347 = vadd.xlane.f32.xlu1 %v2346_v21  ;;  %11694 = vst [vmem:[#allocation275_spill] sm:$0xff] %v8109_v62  ;;  %v2354_v44 = vsel %vm640_vm1, %v8080_v7, 0.0  ;;  %v2363_v28 = vsel %vm640_vm1, %v8109_v62, 0.0 }
 0x467   :  { %v2729_v35 = vmul.f32 %v8080_v7, %v8080_v7  ;;  %v2361_v10 = vadd.f32 %v7475_v56, %v8107_v4  ;;  %v2734_v59 = vmul.f32 %v8107_v4, %v8107_v4  ;;  %v3067_v23 = vadd.f32 %v3066_v38, %v2728_v22  ;;  %v8119_v39 = vpop.f32.mrf.mxu0  ;;  %v5399_v13 = vpop.f32.mrf.mxu1 }
 0x468   :  { %11695 = vst [vmem:[#allocation276_spill] sm:$0xff] %v8119_v39  ;;  %v3060_v21 = vadd.f32 %v3059_v29, %v3058_v61  ;;  %v2355_v41 = vadd.f32 %v2354_v44, %v2353_v27  ;;  %v2735_v56 = vmul.f32 %v8119_v39, %v8119_v39  ;;  %v2736_v38 = vmul.f32 %v8109_v62, %v8109_v62  ;;  %v8140_v61 = vpop.permute.xlu0 %4490 }
 0x469   :  { %v3075_v17 = vadd.f32 %v7492_v50, %v2734_v59  ;;  %v2362_v3 = vadd.f32 %v2361_v10, %v8119_v39  ;;  %v8132_v22 = vadd.f32 %v3163_v43, %v8046_v46  ;;  %v3171_v14 = vadd.f32 %v2808_v2, %v2807_v42  ;;  %v8136_v29 = vpop.f32.mrf.mxu0  ;;  %v8138_v50 = vpop.f32.mrf.mxu1  ;;  %11700 = vst [vmem:[#allocation280_spill] sm:$0xff] %v8140_v61  ;;  %v11701_v43 = vld [vmem:[#allocation155_spill] sm:$0xff]  ;;  %v11704_v39 = vld [vmem:[#allocation156_spill] sm:$0xff] }
 0x46a   :  { %v2810_v27 = vmul.f32 %v11697_v0, %v11697_v0  ;;  %3061 = vadd.xlane.f32.xlu1 %v3060_v21  ;;  %2356 = vadd.xlane.f32.xlu0 %v2355_v41  ;;  %11698 = vst [vmem:[#allocation278_spill] sm:$0xff] %v8136_v29  ;;  %11699 = vst [vmem:[#allocation279_spill] sm:$0xff] %v8138_v50  ;;  %v2458_v44 = vadd.f32 %v2457_v8, %v11689_v52  ;;  %v3068_v42 = vsel %vm640_vm1, %v2729_v35, 0.0  ;;  %v11703_v35 = vld [vmem:[#allocation157_spill] sm:$0xff] }
 0x46b   :  { %v2370_v10 = vadd.f32 %v7550_v60, %v8136_v29  ;;  %v2741_v46 = vmul.f32 %v8136_v29, %v8136_v29  ;;  %v2814_v2 = vmul.f32 %v11701_v43, %v11701_v43  ;;  %v3076_v59 = vadd.f32 %v3075_v17, %v2735_v56  ;;  %v8150_v21 = vpop.f32.mrf.mxu0  ;;  %v5400_v40 = vpop.f32.mrf.mxu1 }
 0x46c   :  { %11702 = vst [vmem:[#allocation281_spill] sm:$0xff] %v8150_v21  ;;  %v3069_v41 = vadd.f32 %v3068_v42, %v3067_v23  ;;  %v2364_v13 = vadd.f32 %v2363_v28, %v2362_v3  ;;  %v2742_v60 = vmul.f32 %v8150_v21, %v8150_v21  ;;  %v3077_v52 = vsel %vm640_vm1, %v2736_v38, 0.0  ;;  %v8167_v23 = vpop.permute.xlu1 %4505 }
 0x46d   :  { %v3084_v61 = vadd.f32 %v7602_v18, %v2741_v46  ;;  %v2371_v8 = vadd.f32 %v2370_v10, %v8150_v21  ;;  %v3172_v29 = vadd.f32 %v3171_v14, %v2809_v1  ;;  %v2815_v62 = vmul.f32 %v11703_v35, %v11703_v35  ;;  %v8163_v3 = vpop.f32.mrf.mxu0  ;;  %v8165_v18 = vpop.f32.mrf.mxu1  ;;  %11707 = vst [vmem:[#allocation284_spill] sm:$0xff] %v8167_v23 }
 0x46e   :  { %v8161_v17 = vmul.f32 %v11704_v39, %v11704_v39  ;;  %3070 = vadd.xlane.f32.xlu0 %v3069_v41  ;;  %2365 = vadd.xlane.f32.xlu1 %v2364_v13  ;;  %11705 = vst [vmem:[#allocation282_spill] sm:$0xff] %v8163_v3  ;;  %11706 = vst [vmem:[#allocation283_spill] sm:$0xff] %v8165_v18  ;;  %v2372_v28 = vsel %vm640_vm1, %v8138_v50, 0.0  ;;  %v2743_v14 = vmul.f32 %v8138_v50, %v8138_v50  ;;  %v8181_v13 = vpop.permute.xlu0 %4500 }
 0x46f   :  { %v2379_v1 = vadd.f32 %v7590_v12, %v8163_v3  ;;  %v2748_v40 = vmul.f32 %v8163_v3, %v8163_v3  ;;  %v3085_v56 = vadd.f32 %v3084_v61, %v2742_v60  ;;  %v8177_v38 = vpop.f32.mrf.mxu0  ;;  %v2381_v10 = vsel %vm640_vm1, %v8165_v18, 0.0  ;;  %v5403_v41 = vpop.f32.mrf.mxu1  ;;  %11709 = vst [vmem:[#allocation286_spill] sm:$0xff] %v8181_v13  ;;  %v3390_v3 = vld [vmem:[%s10614_s4 + $0xf0] sm:$0xff] }
 0x470   :  { %11708 = vst [vmem:[#allocation285_spill] sm:$0xff] %v8177_v38  ;;  %v3078_v46 = vadd.f32 %v3077_v52, %v3076_v59  ;;  %v2373_v42 = vadd.f32 %v2372_v28, %v2371_v8  ;;  %v2749_v12 = vmul.f32 %v8177_v38, %v8177_v38  ;;  %v2750_v61 = vmul.f32 %v8165_v18, %v8165_v18  ;;  %v11710_v59 = vld [vmem:[#allocation158_spill] sm:$0xff]  ;;  %v8211_v18 = vpop.permute.xlu1 %4515 }
 0x471   :  { %v3093_v23 = vadd.f32 %v7610_v5, %v2748_v40  ;;  %v2380_v50 = vadd.f32 %v2379_v1, %v8177_v38  ;;  %v8190_v60 = vadd.f32 %v2458_v44, %v11697_v0  ;;  %v2466_v52 = vadd.f32 %v11703_v35, %v11701_v43  ;;  %v8198_v5 = vpop.f32.mrf.mxu0  ;;  %v8200_v28 = vpop.f32.mrf.mxu1  ;;  %11714 = vst [vmem:[#allocation290_spill] sm:$0xff] %v8211_v18 }
 0x472   :  { %v8196_v8 = vmul.f32 %v11710_v59, %v11710_v59  ;;  %3079 = vadd.xlane.f32.xlu1 %v3078_v46  ;;  %2374 = vadd.xlane.f32.xlu0 %v2373_v42  ;;  %11711 = vst [vmem:[#allocation287_spill] sm:$0xff] %v8198_v5  ;;  %11712 = vst [vmem:[#allocation288_spill] sm:$0xff] %v8200_v28  ;;  %v8202_v1 = vadd.f32 %v3172_v29, %v2810_v27  ;;  %v3086_v41 = vsel %vm640_vm1, %v2743_v14, 0.0 }
 0x473   :  { %v2388_v40 = vadd.f32 %v7672_v33, %v8198_v5  ;;  %v2755_v44 = vmul.f32 %v8198_v5, %v8198_v5  ;;  %v3180_v13 = vadd.f32 %v2815_v62, %v2814_v2  ;;  %v3094_v35 = vadd.f32 %v3093_v23, %v2749_v12  ;;  %v8209_v43 = vpop.f32.mrf.mxu0  ;;  %v5404_v0 = vpop.f32.mrf.mxu1  ;;  %v11715_v62 = vld [vmem:[#allocation160_spill] sm:$0xff]  ;;  %v11716_v23 = vld [vmem:[#allocation161_spill] sm:$0xff] }
 0x474   :  { %11713 = vst [vmem:[#allocation289_spill] sm:$0xff] %v8209_v43  ;;  %v3087_v46 = vadd.f32 %v3086_v41, %v3085_v56  ;;  %v2382_v42 = vadd.f32 %v2381_v10, %v2380_v50  ;;  %v2756_v33 = vmul.f32 %v8209_v43, %v8209_v43  ;;  %v3095_v5 = vsel %vm640_vm1, %v2750_v61, 0.0  ;;  %v8229_v56 = vpop.permute.xlu0 %4510 }
 0x475   :  { %v3102_v27 = vadd.f32 %v7720_v37, %v2755_v44  ;;  %v2389_v29 = vadd.f32 %v2388_v40, %v8209_v43  ;;  %v2467_v14 = vadd.f32 %v2466_v52, %v11704_v39  ;;  %v2821_v2 = vmul.f32 %v11715_v62, %v11715_v62  ;;  %v8225_v0 = vpop.f32.mrf.mxu0  ;;  %v8227_v37 = vpop.f32.mrf.mxu1  ;;  %11719 = vst [vmem:[#allocation293_spill] sm:$0xff] %v8229_v56 }
 0x476   :  { %v8223_v50 = vmul.f32 %v11716_v23, %v11716_v23  ;;  %3088 = vadd.xlane.f32.xlu0 %v3087_v46  ;;  %2383 = vadd.xlane.f32.xlu1 %v2382_v42  ;;  %11717 = vst [vmem:[#allocation291_spill] sm:$0xff] %v8225_v0  ;;  %11718 = vst [vmem:[#allocation292_spill] sm:$0xff] %v8227_v37  ;;  %v2390_v10 = vsel %vm640_vm1, %v8200_v28, 0.0  ;;  %v2757_v12 = vmul.f32 %v8200_v28, %v8200_v28 }
 0x477   :  { %v2397_v61 = vadd.f32 %v7712_v63, %v8225_v0  ;;  %v2762_v52 = vmul.f32 %v8225_v0, %v8225_v0  ;;  %v3103_v40 = vadd.f32 %v3102_v27, %v2756_v33  ;;  %v8239_v44 = vpop.f32.mrf.mxu0  ;;  %v2399_v41 = vsel %vm640_vm1, %v8227_v37, 0.0  ;;  %v5407_v18 = vpop.f32.mrf.mxu1  ;;  %v11721_v33 = vld [vmem:[#allocation163_spill] sm:$0xff] }
 0x478   :  { %11720 = vst [vmem:[#allocation294_spill] sm:$0xff] %v8239_v44  ;;  %v3096_v46 = vadd.f32 %v3095_v5, %v3094_v35  ;;  %v2391_v42 = vadd.f32 %v2390_v10, %v2389_v29  ;;  %v2763_v28 = vmul.f32 %v8239_v44, %v8239_v44  ;;  %v2764_v63 = vmul.f32 %v8227_v37, %v8227_v37  ;;  %v8258_v5 = vpop.permute.xlu1 %4525 }
 0x479   :  { %v3111_v56 = vadd.f32 %v7728_v48, %v2762_v52  ;;  %v2398_v39 = vadd.f32 %v2397_v61, %v8239_v44  ;;  %v3181_v27 = vadd.f32 %v3180_v13, %v8161_v17  ;;  %v2475_v0 = vadd.f32 %v11721_v33, %v11715_v62  ;;  %v8254_v18 = vpop.f32.mrf.mxu0  ;;  %v8256_v48 = vpop.f32.mrf.mxu1  ;;  %11724 = vst [vmem:[#allocation297_spill] sm:$0xff] %v8258_v5  ;;  %v11725_v61 = vld [vmem:[#allocation164_spill] sm:$0xff] }
 0x47a   :  { %v2822_v35 = vmul.f32 %v11721_v33, %v11721_v33  ;;  %3097 = vadd.xlane.f32.xlu1 %v3096_v46  ;;  %2392 = vadd.xlane.f32.xlu0 %v2391_v42  ;;  %11722 = vst [vmem:[#allocation295_spill] sm:$0xff] %v8254_v18  ;;  %11723 = vst [vmem:[#allocation296_spill] sm:$0xff] %v8256_v48  ;;  %v8261_v29 = vadd.f32 %v2467_v14, %v11710_v59  ;;  %v3104_v10 = vsel %vm640_vm1, %v2757_v12, 0.0  ;;  %v8274_v14 = vpop.permute.xlu0 %4520 }
 0x47b   :  { %v2406_v17 = vadd.f32 %v7773_v36, %v8254_v18  ;;  %v2769_v13 = vmul.f32 %v8254_v18, %v8254_v18  ;;  %v8270_v52 = vmul.f32 %v11725_v61, %v11725_v61  ;;  %v3112_v46 = vadd.f32 %v3111_v56, %v2763_v28  ;;  %v8272_v42 = vpop.f32.mrf.mxu0  ;;  %v5408_v62 = vpop.f32.mrf.mxu1  ;;  %11727 = vst [vmem:[#allocation299_spill] sm:$0xff] %v8274_v14 }
 0x47c   :  { %11726 = vst [vmem:[#allocation298_spill] sm:$0xff] %v8272_v42  ;;  %v3105_v33 = vadd.f32 %v3104_v10, %v3103_v40  ;;  %v2400_v5 = vadd.f32 %v2399_v41, %v2398_v39  ;;  %v2770_v18 = vmul.f32 %v8272_v42, %v8272_v42  ;;  %v3113_v12 = vsel %vm640_vm1, %v2764_v63, 0.0 }
 0x47d   :  { %v3120_v59 = vadd.f32 %v7788_v16, %v2769_v13  ;;  %v2407_v36 = vadd.f32 %v2406_v17, %v8272_v42  ;;  %v8282_v37 = vadd.f32 %v3181_v27, %v8196_v8  ;;  %v3189_v28 = vadd.f32 %v2822_v35, %v2821_v2  ;;  %v8285_v39 = vpop.f32.mrf.mxu0  ;;  %v8287_v62 = vpop.f32.mrf.mxu1 }
 0x47e   :  { %v2476_v56 = vadd.f32 %v2475_v0, %v11716_v23  ;;  %3106 = vadd.xlane.f32.xlu0 %v3105_v33  ;;  %2401 = vadd.xlane.f32.xlu1 %v2400_v5  ;;  %11728 = vst [vmem:[#allocation300_spill] sm:$0xff] %v8285_v39  ;;  %11729 = vst [vmem:[#allocation301_spill] sm:$0xff] %v8287_v62  ;;  %v2408_v16 = vsel %vm640_vm1, %v8256_v48, 0.0  ;;  %v2771_v40 = vmul.f32 %v8256_v48, %v8256_v48  ;;  %v8301_v5 = vpop.permute.xlu1 %4535  ;;  %v11733_v23 = vld [vmem:[#allocation174_spill] sm:$0xff] }
 0x47f   :  { %v2415_v41 = vadd.f32 %v7833_v32, %v8285_v39  ;;  %v2776_v8 = vmul.f32 %v8285_v39, %v8285_v39  ;;  %v3121_v2 = vadd.f32 %v3120_v59, %v2770_v18  ;;  %v8297_v0 = vpop.f32.mrf.mxu0  ;;  %v2417_v63 = vsel %vm640_vm1, %v8287_v62, 0.0  ;;  %v5411_v35 = vpop.f32.mrf.mxu1  ;;  %11731 = vst [vmem:[#allocation303_spill] sm:$0xff] %v8301_v5  ;;  %v11732_v18 = vld [vmem:[#allocation169_spill] sm:$0xff] }
 0x480   :  { %11730 = vst [vmem:[#allocation302_spill] sm:$0xff] %v8297_v0  ;;  %v3114_v27 = vadd.f32 %v3113_v12, %v3112_v46  ;;  %v2409_v33 = vadd.f32 %v2408_v16, %v2407_v36  ;;  %v2777_v32 = vmul.f32 %v8297_v0, %v8297_v0  ;;  %v2778_v59 = vmul.f32 %v8287_v62, %v8287_v62  ;;  %v11734_v36 = vld [vmem:[#allocation170_spill] sm:$0xff] }
 0x481   :  { %v3129_v17 = vadd.f32 %v7846_v55, %v2776_v8  ;;  %v2416_v13 = vadd.f32 %v2415_v41, %v8297_v0  ;;  %v2828_v10 = vmul.f32 %v11732_v18, %v11732_v18  ;;  %v2829_v46 = vmul.f32 %v11733_v23, %v11733_v23  ;;  %v8315_v55 = vpop.f32.mrf.mxu0  ;;  %v8317_v16 = vpop.f32.mrf.mxu1 }
 0x482   :  { %v2830_v12 = vmul.f32 %v11734_v36, %v11734_v36  ;;  %3115 = vadd.xlane.f32.xlu1 %v3114_v27  ;;  %2410 = vadd.xlane.f32.xlu0 %v2409_v33  ;;  %11735 = vst [vmem:[#allocation304_spill] sm:$0xff] %v8315_v55  ;;  %11736 = vst [vmem:[#allocation305_spill] sm:$0xff] %v8317_v16  ;;  %v8319_v41 = vpop.permute.xlu0 %4530  ;;  %v3190_v8 = vadd.f32 %v3189_v28, %v8223_v50  ;;  %v3122_v14 = vsel %vm640_vm1, %v2771_v40, 0.0 }
 0x483   :  { %11737 = vst [vmem:[#allocation306_spill] sm:$0xff] %v8319_v41  ;;  %v2424_v35 = vadd.f32 %v7893_v54, %v8315_v55  ;;  %v2783_v5 = vmul.f32 %v8315_v55, %v8315_v55  ;;  %v8328_v62 = vadd.f32 %v2476_v56, %v11725_v61  ;;  %v3130_v27 = vadd.f32 %v3129_v17, %v2777_v32  ;;  %v8330_v33 = vpop.f32.mrf.mxu0  ;;  %v5412_v48 = vpop.f32.mrf.mxu1  ;;  %v11739_v61 = vld [vmem:[#allocation175_spill] sm:$0xff]  ;;  %v3394_v55 = vld [vmem:[%s10614_s4 + $0x110] sm:$0xff] }
 0x484   :  { %11738 = vst [vmem:[#allocation307_spill] sm:$0xff] %v8330_v33  ;;  %v3123_v0 = vadd.f32 %v3122_v14, %v3121_v2  ;;  %v2418_v39 = vadd.f32 %v2417_v63, %v2416_v13  ;;  %v2784_v54 = vmul.f32 %v8330_v33, %v8330_v33  ;;  %v3131_v28 = vsel %vm640_vm1, %v2778_v59, 0.0  ;;  %v8347_v14 = vpop.permute.xlu1 %4545 }
 0x485   :  { %v3138_v41 = vadd.f32 %v7907_v47, %v2783_v5  ;;  %v2425_v50 = vadd.f32 %v2424_v35, %v8330_v33  ;;  %v2484_v40 = vadd.f32 %v11733_v23, %v11732_v18  ;;  %v3198_v56 = vadd.f32 %v2829_v46, %v2828_v10  ;;  %v8343_v48 = vpop.f32.mrf.mxu0  ;;  %v8345_v47 = vpop.f32.mrf.mxu1  ;;  %11742 = vst [vmem:[#allocation310_spill] sm:$0xff] %v8347_v14 }
 0x486   :  { %v8341_v17 = vmul.f32 %v11739_v61, %v11739_v61  ;;  %3124 = vadd.xlane.f32.xlu0 %v3123_v0  ;;  %2419 = vadd.xlane.f32.xlu1 %v2418_v39  ;;  %11740 = vst [vmem:[#allocation308_spill] sm:$0xff] %v8343_v48  ;;  %11741 = vst [vmem:[#allocation309_spill] sm:$0xff] %v8345_v47  ;;  %v2426_v2 = vsel %vm640_vm1, %v8317_v16, 0.0  ;;  %v2785_v63 = vmul.f32 %v8317_v16, %v8317_v16  ;;  %v8361_v35 = vpop.permute.xlu0 %4540 }
 0x487   :  { %v2433_v5 = vadd.f32 %v7966_v9, %v8343_v48  ;;  %v2790_v13 = vmul.f32 %v8343_v48, %v8343_v48  ;;  %v3139_v0 = vadd.f32 %v3138_v41, %v2784_v54  ;;  %v8357_v39 = vpop.f32.mrf.mxu0  ;;  %v2435_v32 = vsel %vm640_vm1, %v8345_v47, 0.0  ;;  %v5415_v46 = vpop.f32.mrf.mxu1  ;;  %11744 = vst [vmem:[#allocation312_spill] sm:$0xff] %v8361_v35 }
 0x488   :  { %11743 = vst [vmem:[#allocation311_spill] sm:$0xff] %v8357_v39  ;;  %v3132_v59 = vadd.f32 %v3131_v28, %v3130_v27  ;;  %v2427_v10 = vadd.f32 %v2426_v2, %v2425_v50  ;;  %v2791_v9 = vmul.f32 %v8357_v39, %v8357_v39  ;;  %v2792_v41 = vmul.f32 %v8345_v47, %v8345_v47  ;;  %v11745_v27 = vld [vmem:[#allocation177_spill] sm:$0xff]  ;;  %v11748_v2 = vld [vmem:[#allocation178_spill] sm:$0xff]  ;;  %v8388_v47 = vpop.permute.xlu1 %4555 }
 0x489   :  { %v3147_v23 = vadd.f32 %v7985_v6, %v2790_v13  ;;  %v2434_v18 = vadd.f32 %v2433_v5, %v8357_v39  ;;  %v8370_v54 = vadd.f32 %v3190_v8, %v8270_v52  ;;  %v2485_v14 = vadd.f32 %v2484_v40, %v11734_v36  ;;  %v8375_v28 = vpop.f32.mrf.mxu0  ;;  %v8377_v6 = vpop.f32.mrf.mxu1  ;;  %11750 = vst [vmem:[#allocation316_spill] sm:$0xff] %v8388_v47 }
 0x48a   :  { %v2835_v50 = vmul.f32 %v11745_v27, %v11745_v27  ;;  %3133 = vadd.xlane.f32.xlu1 %v3132_v59  ;;  %2428 = vadd.xlane.f32.xlu0 %v2427_v10  ;;  %11746 = vst [vmem:[#allocation313_spill] sm:$0xff] %v8375_v28  ;;  %11747 = vst [vmem:[#allocation314_spill] sm:$0xff] %v8377_v6  ;;  %v2837_v5 = vmul.f32 %v11748_v2, %v11748_v2  ;;  %v3140_v8 = vsel %vm640_vm1, %v2785_v63, 0.0 }
 0x48b   :  { %v2442_v13 = vadd.f32 %v8031_v20, %v8375_v28  ;;  %v2797_v52 = vmul.f32 %v8375_v28, %v8375_v28  ;;  %v3199_v40 = vadd.f32 %v3198_v56, %v2830_v12  ;;  %v3148_v46 = vadd.f32 %v3147_v23, %v2791_v9  ;;  %v8386_v36 = vpop.f32.mrf.mxu0  ;;  %v5416_v35 = vpop.f32.mrf.mxu1  ;;  %v11751_v23 = vld [vmem:[#allocation179_spill] sm:$0xff] }
 0x48c   :  { %11749 = vst [vmem:[#allocation315_spill] sm:$0xff] %v8386_v36  ;;  %v3141_v59 = vadd.f32 %v3140_v8, %v3139_v0  ;;  %v2436_v10 = vadd.f32 %v2435_v32, %v2434_v18  ;;  %v2798_v20 = vmul.f32 %v8386_v36, %v8386_v36  ;;  %v3149_v28 = vsel %vm640_vm1, %v2792_v41, 0.0  ;;  %v8406_v0 = vpop.permute.xlu0 %4550 }
 0x48d   :  { %v3156_v39 = vadd.f32 %v8073_v24, %v2797_v52  ;;  %v2443_v48 = vadd.f32 %v2442_v13, %v8386_v36  ;;  %v8396_v63 = vadd.f32 %v2485_v14, %v11739_v61  ;;  %v2493_v12 = vadd.f32 %v11751_v23, %v11745_v27  ;;  %v8402_v56 = vpop.f32.mrf.mxu0  ;;  %v8404_v24 = vpop.f32.mrf.mxu1  ;;  %11754 = vst [vmem:[#allocation319_spill] sm:$0xff] %v8406_v0 }
 0x48e   :  { %v2836_v18 = vmul.f32 %v11751_v23, %v11751_v23  ;;  %3142 = vadd.xlane.f32.xlu0 %v3141_v59  ;;  %2437 = vadd.xlane.f32.xlu1 %v2436_v10  ;;  %11752 = vst [vmem:[#allocation317_spill] sm:$0xff] %v8402_v56  ;;  %11753 = vst [vmem:[#allocation318_spill] sm:$0xff] %v8404_v24  ;;  %v2444_v32 = vsel %vm640_vm1, %v8377_v6, 0.0  ;;  %v2799_v14 = vmul.f32 %v8377_v6, %v8377_v6 }
 0x48f   :  { %v2451_v35 = vadd.f32 %v8101_v15, %v8402_v56  ;;  %v2804_v9 = vmul.f32 %v8402_v56, %v8402_v56  ;;  %v3157_v41 = vadd.f32 %v3156_v39, %v2798_v20  ;;  %v8416_v13 = vpop.f32.mrf.mxu0  ;;  %v2453_v52 = vsel %vm640_vm1, %v8404_v24, 0.0  ;;  %v5419_v10 = vpop.f32.mrf.mxu1  ;;  %v11756_v20 = vld [vmem:[#allocation180_spill] sm:$0xff] }
 0x490   :  { %11755 = vst [vmem:[#allocation320_spill] sm:$0xff] %v8416_v13  ;;  %v3150_v8 = vadd.f32 %v3149_v28, %v3148_v46  ;;  %v2445_v59 = vadd.f32 %v2444_v32, %v2443_v48  ;;  %v2805_v61 = vmul.f32 %v8416_v13, %v8416_v13  ;;  %v2806_v15 = vmul.f32 %v8404_v24, %v8404_v24 }
 0x491   :  { %v3165_v23 = vadd.f32 %v8132_v22, %v2804_v9  ;;  %v2452_v27 = vadd.f32 %v2451_v35, %v8416_v13  ;;  %v3207_v47 = vadd.f32 %v2836_v18, %v2835_v50  ;;  %v2494_v39 = vadd.f32 %v2493_v12, %v11748_v2  ;;  %v8429_v48 = vpop.f32.mrf.mxu0  ;;  %v8431_v28 = vpop.f32.mrf.mxu1  ;;  %v11760_v18 = vld [vmem:[#allocation181_spill] sm:$0xff] }
 0x492   :  { %v2838_v0 = vmul.f32 %v11756_v20, %v11756_v20  ;;  %3151 = vadd.xlane.f32.xlu1 %v3150_v8  ;;  %2446 = vadd.xlane.f32.xlu0 %v2445_v59  ;;  %11757 = vst [vmem:[#allocation321_spill] sm:$0xff] %v8429_v48  ;;  %11758 = vst [vmem:[#allocation322_spill] sm:$0xff] %v8431_v28  ;;  %v8433_v22 = vpop.permute.xlu1 %4565  ;;  %v8436_v46 = vadd.f32 %v3199_v40, %v8341_v17  ;;  %v3158_v12 = vsel %vm640_vm1, %v2799_v14, 0.0  ;;  %v8447_v2 = vpop.permute.xlu0 %4560  ;;  %v11773_v13 = vld [vmem:[#allocation185_spill] sm:$0xff] }
 0x493   :  { %11759 = vst [vmem:[#allocation323_spill] sm:$0xff] %v8433_v22  ;;  %v2460_v32 = vadd.f32 %v8190_v60, %v8429_v48  ;;  %v2811_v50 = vmul.f32 %v8429_v48, %v8429_v48  ;;  %v2842_v35 = vmul.f32 %v11760_v18, %v11760_v18  ;;  %v3166_v9 = vadd.f32 %v3165_v23, %v2805_v61  ;;  %v8445_v8 = vpop.f32.mrf.mxu0  ;;  %v5420_v22 = vpop.f32.mrf.mxu1  ;;  %v11763_v61 = vld [vmem:[#allocation182_spill] sm:$0xff] }
 0x494   :  { %11761 = vst [vmem:[#allocation324_spill] sm:$0xff] %v8445_v8  ;;  %v3159_v59 = vadd.f32 %v3158_v12, %v3157_v41  ;;  %v2454_v10 = vadd.f32 %v2453_v52, %v2452_v27  ;;  %11762 = vst [vmem:[#allocation325_spill] sm:$0xff] %v8447_v2  ;;  %v2812_v40 = vmul.f32 %v8445_v8, %v8445_v8  ;;  %v3167_v14 = vsel %vm640_vm1, %v2806_v15, 0.0 }
 0x495   :  { %v3174_v17 = vadd.f32 %v8202_v1, %v2811_v50  ;;  %v2461_v60 = vadd.f32 %v2460_v32, %v8445_v8  ;;  %v3208_v48 = vadd.f32 %v3207_v47, %v2837_v5  ;;  %v8455_v24 = vadd.f32 %v2494_v39, %v11756_v20  ;;  %v8461_v27 = vpop.f32.mrf.mxu0  ;;  %v8463_v1 = vpop.f32.mrf.mxu1 }
 0x496   :  { %v8459_v23 = vmul.f32 %v11763_v61, %v11763_v61  ;;  %3160 = vadd.xlane.f32.xlu0 %v3159_v59  ;;  %2455 = vadd.xlane.f32.xlu1 %v2454_v10  ;;  %11764 = vst [vmem:[#allocation326_spill] sm:$0xff] %v8461_v27  ;;  %11765 = vst [vmem:[#allocation327_spill] sm:$0xff] %v8463_v1  ;;  %v2462_v41 = vsel %vm640_vm1, %v8431_v28, 0.0  ;;  %v2813_v52 = vmul.f32 %v8431_v28, %v8431_v28  ;;  %v2150_v47 = vpop.xlane.xlu1 %2149  ;;  %v11768_v28 = vld [vmem:[#allocation184_spill] sm:$0xff] }
 0x497   :  { %v2469_v5 = vadd.f32 %v8261_v29, %v8461_v27  ;;  %v2818_v15 = vmul.f32 %v8461_v27, %v8461_v27  ;;  %v3175_v39 = vadd.f32 %v3174_v17, %v2812_v40  ;;  %v8473_v22 = vpop.f32.mrf.mxu0  ;;  %v2471_v32 = vsel %vm640_vm1, %v8463_v1, 0.0  ;;  %v5423_v59 = vpop.f32.mrf.mxu1  ;;  %v11767_v17 = vld [vmem:[#allocation183_spill] sm:$0xff] }
 0x498   :  { %11766 = vst [vmem:[#allocation328_spill] sm:$0xff] %v8473_v22  ;;  %v3168_v50 = vadd.f32 %v3167_v14, %v3166_v9  ;;  %v2463_v12 = vadd.f32 %v2462_v41, %v2461_v60  ;;  %v2819_v2 = vmul.f32 %v8473_v22, %v8473_v22  ;;  %v2820_v29 = vmul.f32 %v8463_v1, %v8463_v1  ;;  %v11770_v14 = vld [vmem:[#allocation187_spill] sm:$0xff] }
 0x499   :  { %v3183_v10 = vadd.f32 %v8282_v37, %v2818_v15  ;;  %v2470_v20 = vadd.f32 %v2469_v5, %v8473_v22  ;;  %v2502_v40 = vadd.f32 %v11767_v17, %v11760_v18  ;;  %v2843_v27 = vmul.f32 %v11767_v17, %v11767_v17  ;;  %v8491_v37 = vpop.xlane.xlu0 %2158  ;;  %v8493_v60 = vpop.f32.mrf.mxu0 }
 0x49a   :  { %v8489_v9 = vmul.f32 %v11768_v28, %v11768_v28  ;;  %3169 = vadd.xlane.f32.xlu1 %v3168_v50  ;;  %2464 = vadd.xlane.f32.xlu0 %v2463_v12  ;;  %11769 = vst [vmem:[#allocation329_spill] sm:$0xff] %v8493_v60  ;;  %v2850_v41 = vmul.f32 %v11770_v14, %v11770_v14  ;;  %v2864_v5 = vpop.xlane.xlu1 %2863  ;;  %v8501_v17 = vpop.f32.mrf.mxu1  ;;  %v3176_v18 = vsel %vm640_vm1, %v2813_v52, 0.0 }
 0x49b   :  { %v2478_v15 = vadd.f32 %v8328_v62, %v8493_v60  ;;  %v2825_v59 = vmul.f32 %v8493_v60, %v8493_v60  ;;  %11771 = vst [vmem:[#allocation330_spill] sm:$0xff] %v8501_v17  ;;  %v3209_v50 = vadd.f32 %v3208_v48, %v2838_v0  ;;  %v3184_v12 = vadd.f32 %v3183_v10, %v2819_v2  ;;  %v8504_v1 = vpop.f32.mrf.mxu0 }
 0x49c   :  { %11772 = vst [vmem:[#allocation331_spill] sm:$0xff] %v8504_v1  ;;  %v3177_v22 = vadd.f32 %v3176_v18, %v3175_v39  ;;  %v2472_v8 = vadd.f32 %v2471_v32, %v2470_v20  ;;  %v2849_v56 = vmul.f32 %v11773_v13, %v11773_v13  ;;  %v2826_v62 = vmul.f32 %v8504_v1, %v8504_v1  ;;  %v5424_v36 = vpop.f32.mrf.mxu1 }
 0x49d   :  { %v3192_v6 = vadd.f32 %v8370_v54, %v2825_v59  ;;  %v3185_v60 = vsel %vm640_vm1, %v2820_v29, 0.0  ;;  %v3216_v16 = vadd.f32 %v2843_v27, %v2842_v35  ;;  %v2503_v52 = vadd.f32 %v2502_v40, %v11763_v61  ;;  %v8514_v0 = vpop.xlane.xlu0 %2872  ;;  %v8516_v20 = vpop.f32.mrf.mxu0 }
 0x49e   :  { %v2479_v2 = vadd.f32 %v2478_v15, %v8504_v1  ;;  %3178 = vadd.xlane.f32.xlu0 %v3177_v22  ;;  %2473 = vadd.xlane.f32.xlu1 %v2472_v8  ;;  %11774 = vst [vmem:[#allocation332_spill] sm:$0xff] %v8516_v20  ;;  %v2511_v54 = vadd.f32 %v11770_v14, %v11773_v13  ;;  %v2168_v18 = vpop.xlane.xlu1 %2167  ;;  %v8524_v27 = vpop.f32.mrf.mxu1  ;;  %v8526_v39 = vmul.f32 0.0012755102, %v2150_v47  ;;  %v2480_v8 = vsel %vm640_vm1, %v8501_v17, 0.0  ;;  %v11777_v47 = vld [vmem:[#allocation186_spill] sm:$0xff] }
 0x49f   :  { %v3225_v48 = vadd.f32 %v2850_v41, %v2849_v56  ;;  %v2487_v36 = vadd.f32 %v8396_v63, %v8516_v20  ;;  %v2832_v35 = vmul.f32 %v8516_v20, %v8516_v20  ;;  %11775 = vst [vmem:[#allocation333_spill] sm:$0xff] %v8524_v27  ;;  %v2827_v22 = vmul.f32 %v8501_v17, %v8501_v17  ;;  %v8532_v32 = vpop.f32.mrf.mxu0 }
 0x4a0   :  { %11776 = vst [vmem:[#allocation334_spill] sm:$0xff] %v8532_v32  ;;  %v3186_v56 = vadd.f32 %v3185_v60, %v3184_v12  ;;  %v3193_v10 = vadd.f32 %v3192_v6, %v2826_v62  ;;  %v2833_v40 = vmul.f32 %v8532_v32, %v8532_v32  ;;  %v5427_v41 = vpop.f32.mrf.mxu1  ;;  %v2851_v15 = vmul.f32 %v11777_v47, %v11777_v47 }
 0x4a1   :  { %v3201_v29 = vadd.f32 %v8436_v46, %v2832_v35  ;;  %v2488_v63 = vadd.f32 %v2487_v36, %v8532_v32  ;;  %v2489_v59 = vsel %vm640_vm1, %v8524_v27, 0.0  ;;  %v2834_v14 = vmul.f32 %v8524_v27, %v8524_v27  ;;  %v2177_v6 = vpop.xlane.xlu0 %2176  ;;  %v8544_v12 = vpop.f32.mrf.mxu0 }
 0x4a2   :  { %3187 = vadd.xlane.f32.xlu1 %v3186_v56  ;;  %v2481_v60 = vadd.f32 %v2480_v8, %v2479_v2  ;;  %11778 = vst [vmem:[#allocation335_spill] sm:$0xff] %v8544_v12  ;;  %v3217_v46 = vadd.f32 %v3216_v16, %v8459_v23  ;;  %v2504_v62 = vadd.f32 %v2503_v52, %v11768_v28  ;;  %v2882_v35 = vpop.xlane.xlu1 %2881  ;;  %v8551_v13 = vpop.f32.mrf.mxu1  ;;  %v3234_v32 = vmul.f32 0.0012755102, %v2864_v5 }
 0x4a3   :  { %v2512_v36 = vadd.f32 %v2511_v54, %v11777_v47  ;;  %v2496_v41 = vadd.f32 %v8455_v24, %v8544_v12  ;;  %11779 = vst [vmem:[#allocation336_spill] sm:$0xff] %v8551_v13  ;;  %v3226_v61 = vadd.f32 %v3225_v48, %v2851_v15  ;;  %v2839_v2 = vmul.f32 %v8544_v12, %v8544_v12  ;;  %v8555_v8 = vpop.f32.mrf.mxu0  ;;  %v11782_v12 = vld [vmem:[#allocation188_spill] sm:$0xff] }
 0x4a4   :  { %2482 = vadd.xlane.f32.xlu0 %v2481_v60  ;;  %11780 = vst [vmem:[#allocation337_spill] sm:$0xff] %v8555_v8  ;;  %v3194_v16 = vsel %vm640_vm1, %v2827_v22, 0.0  ;;  %v3276_v23 = vmul.f32 %v8526_v39, %v8526_v39  ;;  %v3202_v52 = vadd.f32 %v3201_v29, %v2833_v40  ;;  %v2490_v56 = vadd.f32 %v2489_v59, %v2488_v63  ;;  %v5428_v47 = vpop.f32.mrf.mxu1 }
 0x4a5   :  { %v3195_v54 = vadd.f32 %v3194_v16, %v3193_v10  ;;  %v3210_v24 = vadd.f32 %v3209_v50, %v2839_v2  ;;  %v2497_v28 = vadd.f32 %v2496_v41, %v8555_v8  ;;  %v2840_v5 = vmul.f32 %v8555_v8, %v8555_v8  ;;  %v2891_v48 = vpop.xlane.xlu0 %2890  ;;  %v8563_v15 = vpop.f32.mrf.mxu0 }
 0x4a6   :  { %11781 = vst [vmem:[#allocation338_spill] sm:$0xff] %v8563_v15  ;;  %v3203_v60 = vsel %vm640_vm1, %v2834_v14, 0.0  ;;  %v3218_v22 = vadd.f32 %v3217_v46, %v8489_v9  ;;  %v2852_v27 = vmul.f32 %v11782_v12, %v11782_v12  ;;  %2491 = vadd.xlane.f32.xlu1 %v2490_v56  ;;  %v2186_v10 = vpop.xlane.xlu1 %2185  ;;  %v2505_v29 = vadd.f32 %v2504_v62, %v8563_v15  ;;  %v8572_v63 = vpop.f32.mrf.mxu1 }
 0x4a7   :  { %v2846_v50 = vmul.f32 %v8563_v15, %v8563_v15  ;;  %11783 = vst [vmem:[#allocation339_spill] sm:$0xff] %v8572_v63  ;;  %v2513_v40 = vadd.f32 %v2512_v36, %v11782_v12  ;;  %v3318_v47 = vsub.f32 %v3234_v32, %v3276_v23  ;;  %v8575_v59 = vmul.f32 0.0012755102, %v2168_v18  ;;  %v8579_v14 = vpop.f32.mrf.mxu0 }
 0x4a8   :  { %v2498_v9 = vsel %vm640_vm1, %v8551_v13, 0.0  ;;  %3196 = vadd.xlane.f32.xlu0 %v3195_v54  ;;  %11784 = vst [vmem:[#allocation340_spill] sm:$0xff] %v8579_v14  ;;  %v2841_v46 = vmul.f32 %v8551_v13, %v8551_v13  ;;  %v2847_v41 = vmul.f32 %v8579_v14, %v8579_v14  ;;  %v3204_v2 = vadd.f32 %v3203_v60, %v3202_v52  ;;  %v5431_v16 = vpop.f32.mrf.mxu1 }
 0x4a9   :  { %v3219_v62 = vadd.f32 %v3218_v22, %v2846_v50  ;;  %v3227_v56 = vadd.f32 %v3226_v61, %v2852_v27  ;;  %v3211_v36 = vadd.f32 %v3210_v24, %v2840_v5  ;;  %v2506_v18 = vadd.f32 %v2505_v29, %v8579_v14  ;;  %v2195_v23 = vpop.xlane.xlu0 %2194  ;;  %v8586_v12 = vpop.f32.mrf.mxu0 }
 0x4aa   :  { %v2499_v32 = vadd.f32 %v2498_v9, %v2497_v28  ;;  %11785 = vst [vmem:[#allocation341_spill] sm:$0xff] %v8586_v12  ;;  %v3236_v54 = vmul.f32 0.0012755102, %v2882_v35  ;;  %v2507_v15 = vsel %vm640_vm1, %v8572_v63, 0.0  ;;  %v2848_v22 = vmul.f32 %v8572_v63, %v8572_v63  ;;  %3205 = vadd.xlane.f32.xlu1 %v3204_v2  ;;  %v2900_v50 = vpop.xlane.xlu1 %2899  ;;  %v8593_v60 = vpop.f32.mrf.mxu1 }
 0x4ab   :  { %v2514_v52 = vadd.f32 %v2513_v40, %v8586_v12  ;;  %11786 = vst [vmem:[#allocation342_spill] sm:$0xff] %v8593_v60  ;;  %v3402_v61 = vadd.f32 1e-05, %v3318_v47  ;;  %v8596_v27 = vmul.f32 0.0012755102, %v8491_v37  ;;  %v3278_v28 = vmul.f32 %v8575_v59, %v8575_v59  ;;  %v8602_v24 = vpop.f32.mrf.mxu0 }
 0x4ac   :  { %2500 = vadd.xlane.f32.xlu0 %v2499_v32  ;;  %v2853_v35 = vmul.f32 %v8586_v12, %v8586_v12  ;;  %11787 = vst [vmem:[#allocation343_spill] sm:$0xff] %v8602_v24  ;;  %v8604_v5 = vmul.f32 0.0012755102, %v2177_v6  ;;  %v3220_v29 = vadd.f32 %v3219_v62, %v2847_v41  ;;  %v3212_v9 = vsel %vm640_vm1, %v2841_v46, 0.0  ;;  %v5432_v47 = vpop.f32.mrf.mxu1 }
 0x4ad   :  { %v2515_v40 = vadd.f32 %v2514_v52, %v8602_v24  ;;  %v2854_v37 = vmul.f32 %v8602_v24, %v8602_v24  ;;  %v3213_v16 = vadd.f32 %v3212_v9, %v3211_v36  ;;  %v2508_v63 = vadd.f32 %v2507_v15, %v2506_v18  ;;  %v2909_v32 = vpop.xlane.xlu0 %2908 }
 0x4ae   :  { %11788 = vst [vmem:[#allocation344_spill] sm:$0xff] %v8604_v5  ;;  %v3228_v2 = vadd.f32 %v3227_v56, %v2853_v35  ;;  %v3320_v14 = vsub.f32 %v3236_v54, %v3278_v28  ;;  %v3237_v13 = vmul.f32 0.0012755102, %v2891_v48  ;;  %v2516_v12 = vsel %vm640_vm1, %v8593_v60, 0.0  ;;  %v2204_v6 = vpop.xlane.xlu1 %2203 }
 0x4af   :  { %v3221_v62 = vsel %vm640_vm1, %v2848_v22, 0.0  ;;  %v3235_v41 = vmul.f32 0.0012755102, %v8514_v0  ;;  %v8614_v52 = vmul.f32 0.0012755102, %v2195_v23  ;;  %2509 = vadd.xlane.f32.xlu1 %v2508_v63  ;;  %v2517_v46 = vadd.f32 %v2516_v12, %v2515_v40 }
 0x4b0   :  { %3214 = vadd.xlane.f32.xlu0 %v3213_v16  ;;  %5491 = vrsqrt.f32 %v3402_v61  ;;  %v3277_v15 = vmul.f32 %v8596_v27, %v8596_v27  ;;  %v3279_v48 = vmul.f32 %v8604_v5, %v8604_v5  ;;  %v2855_v56 = vmul.f32 %v8593_v60, %v8593_v60 }
 0x4b1   :  { %v8622_v36 = vmul.f32 0.0012755102, %v2186_v10  ;;  %v3229_v18 = vadd.f32 %v3228_v2, %v2854_v37  ;;  %v3239_v54 = vmul.f32 0.0012755102, %v2909_v32  ;;  %v3222_v0 = vadd.f32 %v3221_v62, %v3220_v29  ;;  %v2213_v23 = vpop.xlane.xlu0 %2212 }
 0x4b2   :  { %v3404_v22 = vadd.f32 1e-05, %v3320_v14  ;;  %v3321_v28 = vsub.f32 %v3237_v13, %v3279_v48  ;;  %v2918_v63 = vpop.xlane.xlu1 %2917  ;;  %v3319_v12 = vsub.f32 %v3235_v41, %v3277_v15  ;;  %v3238_v61 = vmul.f32 0.0012755102, %v2900_v50 }
 0x4b3   :  { %v3281_v35 = vmul.f32 %v8614_v52, %v8614_v52  ;;  %3223 = vadd.xlane.f32.xlu1 %v3222_v0  ;;  %v8626_v40 = vmul.f32 0.0012755102, %v2213_v23  ;;  %v3230_v9 = vsel %vm640_vm1, %v2855_v56, 0.0  ;;  %v3280_v10 = vmul.f32 %v8622_v36, %v8622_v36 }
 0x4b4   :  { %2518 = vadd.xlane.f32.xlu0 %v2517_v46  ;;  %v8631_v29 = vmul.f32 0.0012755102, %v2204_v6  ;;  %v3231_v14 = vadd.f32 %v3230_v9, %v3229_v18  ;;  %5493 = vrsqrt.f32 %v3404_v22  ;;  %v3405_v2 = vadd.f32 1e-05, %v3321_v28 }
 0x4b5   :  { %v3323_v47 = vsub.f32 %v3239_v54, %v3281_v35  ;;  %v2927_v13 = vpop.xlane.xlu0 %2926  ;;  %v3403_v16 = vadd.f32 1e-05, %v3319_v12  ;;  %v3322_v32 = vsub.f32 %v3238_v61, %v3280_v10  ;;  %v3240_v62 = vmul.f32 0.0012755102, %v2918_v63 }
 0x4b6   :  { %v3241_v50 = vmul.f32 0.0012755102, %v2927_v13  ;;  %v2222_v37 = vpop.xlane.xlu1 %2221  ;;  %v3283_v41 = vmul.f32 %v8626_v40, %v8626_v40  ;;  %v3282_v6 = vmul.f32 %v8631_v29, %v8631_v29  ;;  %5495 = vrsqrt.f32 %v3405_v2 }
 0x4b7   :  { %v8635_v46 = vmul.f32 0.0012755102, %v2222_v37  ;;  %v3407_v15 = vadd.f32 1e-05, %v3323_v47  ;;  %5497 = vrsqrt.f32 %v3403_v16  ;;  %v3406_v0 = vadd.f32 1e-05, %v3322_v32 }
 0x4b8   :  { %3232 = vadd.xlane.f32.xlu0 %v3231_v14  ;;  %v3325_v56 = vsub.f32 %v3241_v50, %v3283_v41  ;;  %v3324_v23 = vsub.f32 %v3240_v62, %v3282_v6  ;;  %v3360_v14 = vld [vmem:[%s10614_s4] sm:$0xff] }
 0x4b9   :  { %11789 = vst [vmem:[#allocation345_spill] sm:$0xff] %v8635_v46  ;;  %v2231_v48 = vpop.xlane.xlu0 %2230  ;;  %v3284_v28 = vmul.f32 %v8635_v46, %v8635_v46  ;;  %5499 = vrsqrt.f32 %v3407_v15 }
 0x4ba   :  { %v2936_v18 = vpop.xlane.xlu1 %2935  ;;  %v8639_v54 = vmul.f32 0.0012755102, %v2231_v48  ;;  %v3409_v61 = vadd.f32 1e-05, %v3325_v56  ;;  %5501 = vrsqrt.f32 %v3406_v0  ;;  %v3408_v13 = vadd.f32 1e-05, %v3324_v23 }
 0x4bb   :  { %v3242_v22 = vmul.f32 0.0012755102, %v2936_v18  ;;  %v3362_v18 = vld [vmem:[%s10614_s4 + $0x10] sm:$0xff] }
 0x4bc   :  { %11790 = vst [vmem:[#allocation346_spill] sm:$0xff] %v8639_v54  ;;  %v3285_v9 = vmul.f32 %v8639_v54, %v8639_v54  ;;  %5503 = vrsqrt.f32 %v3409_v61 }
 0x4bd   :  { %v5492_v63 = vpop.eup %5491  ;;  %v2945_v12 = vpop.xlane.xlu0 %2944  ;;  %v3326_v35 = vsub.f32 %v3242_v22, %v3284_v28  ;;  %5505 = vrsqrt.f32 %v3408_v13  ;;  %v3361_v13 = vld [vmem:[%s10614_s4 + $0x8] sm:$0xff] }
 0x4be   :  { %v3243_v10 = vmul.f32 0.0012755102, %v2945_v12  ;;  %v2240_v47 = vpop.xlane.xlu1 %2239  ;;  %v3486_v16 = vmul.f32 %v5492_v63, %v3360_v14 }
 0x4bf   :  { %v8648_v2 = vmul.f32 0.0012755102, %v2240_v47  ;;  %v3410_v32 = vadd.f32 1e-05, %v3326_v35 }
 0x4c0   :  { %v3327_v50 = vsub.f32 %v3243_v10, %v3285_v9  ;;  %v3363_v10 = vld [vmem:[%s10614_s4 + $0x18] sm:$0xff] }
 0x4c1   :  { %11791 = vst [vmem:[#allocation347_spill] sm:$0xff] %v8648_v2  ;;  %v2249_v37 = vpop.xlane.xlu0 %2248  ;;  %v5494_v6 = vpop.eup %5493  ;;  %v3286_v48 = vmul.f32 %v8648_v2, %v8648_v2 }
 0x4c2   :  { %v3411_v62 = vadd.f32 1e-05, %v3327_v50  ;;  %v2954_v41 = vpop.xlane.xlu1 %2953  ;;  %v8650_v15 = vmul.f32 0.0012755102, %v2249_v37  ;;  %v3488_v12 = vmul.f32 %v5494_v6, %v3362_v18  ;;  %v3365_v18 = vld [vmem:[%s10614_s4 + $0x28] sm:$0xff] }
 0x4c3   :  { %v3244_v56 = vmul.f32 0.0012755102, %v2954_v41  ;;  %v5496_v61 = vpop.eup %5495 }
 0x4c4   :  { %5507 = vrsqrt.f32 %v3411_v62  ;;  %3824 = vperm.xlu1 %5444, %v3486_v16   ;;  %v3287_v22 = vmul.f32 %v8650_v15, %v8650_v15  ;;  %v5498_v47 = vpop.eup %5497  ;;  %v3489_v41 = vmul.f32 %v5496_v61, %v3363_v10  ;;  %v11795_v61 = vld [vmem:[#allocation19_spill] sm:$0xff] }
 0x4c5   :  { %v3328_v0 = vsub.f32 %v3244_v56, %v3286_v48  ;;  %5509 = vrsqrt.f32 %v3410_v32  ;;  %v3487_v56 = vmul.f32 %v5498_v47, %v3361_v13 }
 0x4c6   :  { %v2963_v23 = vpop.xlane.xlu0 %2962  ;;  %v5500_v37 = vpop.eup %5499 }
 0x4c7   :  { %v3245_v28 = vmul.f32 0.0012755102, %v2963_v23  ;;  %v2258_v63 = vpop.xlane.xlu1 %2257  ;;  %v3412_v35 = vadd.f32 1e-05, %v3328_v0  ;;  %v5502_v0 = vpop.eup %5501  ;;  %v3364_v23 = vld [vmem:[%s10614_s4 + $0x20] sm:$0xff]  ;;  %v3491_v13 = vmul.f32 %v5500_v37, %v3365_v18  ;;  %v3366_v37 = vld [vmem:[%s10614_s4 + $0x30] sm:$0xff] }
 0x4c8   :  { %v8659_v9 = vmul.f32 0.0012755102, %v2258_v63  ;;  %3834 = vperm.xlu1 %5444, %v3488_v12   ;;  %v11794_v63 = vld [vmem:[#allocation21_spill] sm:$0xff]  ;;  %v11803_v12 = vld [vmem:[#allocation28_spill] sm:$0xff] }
 0x4c9   :  { %v3329_v14 = vsub.f32 %v3245_v28, %v3287_v22  ;;  %5511 = vrsqrt.f32 %v3412_v35 }
 0x4ca   :  { %11792 = vst [vmem:[#allocation348_spill] sm:$0xff] %v8659_v9  ;;  %v2267_v50 = vpop.xlane.xlu0 %2266  ;;  %v3288_v6 = vmul.f32 %v8659_v9, %v8659_v9 }
 0x4cb   :  { %v3413_v16 = vadd.f32 1e-05, %v3329_v14  ;;  %v2972_v32 = vpop.xlane.xlu1 %2971  ;;  %v8667_v62 = vmul.f32 0.0012755102, %v2267_v50  ;;  %v11796_v50 = vld [vmem:[#allocation18_spill] sm:$0xff] }
 0x4cc   :  { %v3246_v48 = vmul.f32 0.0012755102, %v2972_v32  ;;  %3839 = vperm.xlu1 %5444, %v3489_v41   ;;  %v5504_v32 = vpop.eup %5503 }
 0x4cd   :  { %11793 = vst [vmem:[#allocation349_spill] sm:$0xff] %v8667_v62  ;;  %5513 = vrsqrt.f32 %v3413_v16  ;;  %v3289_v10 = vmul.f32 %v8667_v62, %v8667_v62  ;;  %v5506_v60 = vpop.eup %5505 }
 0x4ce   :  { %v3330_v22 = vsub.f32 %v3246_v48, %v3288_v6  ;;  %3829 = vperm.xlu0 %5443, %v3487_v56   ;;  %v2981_v28 = vpop.xlane.xlu0 %2980  ;;  %v3490_v48 = vmul.f32 %v5502_v0, %v3364_v23  ;;  %v3367_v56 = vld [vmem:[%s10614_s4 + $0x38] sm:$0xff]  ;;  %v3492_v8 = vmul.f32 %v5506_v60, %v3366_v37 }
 0x4cf   :  { %v3247_v47 = vmul.f32 0.0012755102, %v2981_v28  ;;  %v2276_v14 = vpop.xlane.xlu1 %2275 }
 0x4d0   :  { %v3414_v41 = vadd.f32 1e-05, %v3330_v22  ;;  %v8685_v6 = vmul.f32 0.0012755102, %v2276_v14  ;;  %3849 = vperm.xlu1 %5444, %v3491_v13   ;;  %v3493_v14 = vmul.f32 %v5504_v32, %v3367_v56  ;;  %v11807_v56 = vld [vmem:[#allocation203_spill] sm:$0xff] }
 0x4d1   :  { %v3331_v24 = vsub.f32 %v3247_v47, %v3289_v10  ;;  %v5508_v16 = vpop.eup %5507  ;;  %v3369_v10 = vld [vmem:[%s10614_s4 + $0x48] sm:$0xff] }
 0x4d2   :  { %11797 = vst [vmem:[#allocation21_spill] sm:$0xff] %v8685_v6  ;;  %5515 = vrsqrt.f32 %v3414_v41  ;;  %3844 = vperm.xlu0 %5443, %v3490_v48   ;;  %v5510_v18 = vpop.eup %5509  ;;  %v3290_v13 = vmul.f32 %v8685_v6, %v8685_v6  ;;  %v3495_v32 = vmul.f32 %v5508_v16, %v3369_v10  ;;  %v3370_v10 = vld [vmem:[%s10614_s4 + $0x50] sm:$0xff] }
 0x4d3   :  { %v3415_v0 = vadd.f32 1e-05, %v3331_v24  ;;  %v2990_v17 = vpop.xlane.xlu1 %2989  ;;  %v2285_v1 = vpop.xlane.xlu0 %2284  ;;  %v3368_v24 = vld [vmem:[%s10614_s4 + $0x40] sm:$0xff] }
 0x4d4   :  { %v3248_v47 = vmul.f32 0.0012755102, %v2990_v17  ;;  %v8716_v35 = vmul.f32 0.0012755102, %v2285_v1  ;;  %3859 = vperm.xlu1 %5444, %v3493_v14   ;;  %v3494_v16 = vmul.f32 %v5510_v18, %v3368_v24 }
 0x4d5   :  { %5517 = vrsqrt.f32 %v3415_v0 }
 0x4d6   :  { %v3332_v23 = vsub.f32 %v3248_v47, %v3290_v13  ;;  %3854 = vperm.xlu0 %5443, %v3492_v8   ;;  %v3371_v8 = vld [vmem:[%s10614_s4 + $0x58] sm:$0xff]  ;;  %v5512_v1 = vpop.eup %5511  ;;  %v3291_v18 = vmul.f32 %v8716_v35, %v8716_v35 }
 0x4d7   :  { %v2999_v0 = vpop.xlane.xlu0 %2998  ;;  %v2294_v14 = vpop.xlane.xlu1 %2293  ;;  %v3496_v5 = vmul.f32 %v5512_v1, %v3370_v10 }
 0x4d8   :  { %v3416_v20 = vadd.f32 1e-05, %v3332_v23  ;;  %v3249_v24 = vmul.f32 0.0012755102, %v2999_v0  ;;  %v8745_v48 = vmul.f32 0.0012755102, %v2294_v14  ;;  %3869 = vperm.xlu1 %5444, %v3495_v32  }
 0x4d9   :  { %v11817_v0 = vld [vmem:[#allocation17_spill] sm:$0xff] }
 0x4da   :  { %v5514_v23 = vpop.eup %5513  ;;  %5519 = vrsqrt.f32 %v3416_v20  ;;  %v3333_v17 = vsub.f32 %v3249_v24, %v3291_v18  ;;  %3864 = vperm.xlu0 %5443, %v3494_v16   ;;  %v3292_v20 = vmul.f32 %v8745_v48, %v8745_v48  ;;  %v3372_v24 = vld [vmem:[%s10614_s4 + $0x60] sm:$0xff] }
 0x4db   :  { %v3008_v60 = vpop.xlane.xlu1 %3007  ;;  %v2303_v41 = vpop.xlane.xlu0 %2302  ;;  %v3497_v47 = vmul.f32 %v5514_v23, %v3371_v8 }
 0x4dc   :  { %v3417_v22 = vadd.f32 1e-05, %v3333_v17  ;;  %v3250_v16 = vmul.f32 0.0012755102, %v3008_v60  ;;  %v8765_v18 = vmul.f32 0.0012755102, %v2303_v41 }
 0x4dd   :  { %3879 = vperm.xlu1 %5444, %v3497_v47   ;;  %v3373_v17 = vld [vmem:[%s10614_s4 + $0x68] sm:$0xff]  ;;  %v11827_v60 = vld [vmem:[#allocation30_spill] sm:$0xff] }
 0x4de   :  { %5521 = vrsqrt.f32 %v3417_v22  ;;  %v3334_v41 = vsub.f32 %v3250_v16, %v3292_v20  ;;  %3874 = vperm.xlu0 %5443, %v3496_v5   ;;  %v3293_v10 = vmul.f32 %v8765_v18, %v8765_v18  ;;  %v11832_v22 = vld [vmem:[#allocation209_spill] sm:$0xff] }
 0x4df   :  { %v5516_v14 = vpop.eup %5515  ;;  %v3017_v23 = vpop.xlane.xlu0 %3016 }
 0x4e0   :  { %v2312_v8 = vpop.xlane.xlu1 %2311  ;;  %v3418_v47 = vadd.f32 1e-05, %v3334_v41  ;;  %v3251_v57 = vmul.f32 0.0012755102, %v3017_v23  ;;  %v3498_v34 = vmul.f32 %v5516_v14, %v3372_v24  ;;  %v11834_v14 = vld [vmem:[#allocation40_spill] sm:$0xff]  ;;  %v3375_v24 = vld [vmem:[%s10614_s4 + $0x78] sm:$0xff] }
 0x4e1   :  { %v8793_v30 = vmul.f32 0.0012755102, %v2312_v8  ;;  %v11833_v8 = vld [vmem:[#allocation208_spill] sm:$0xff] }
 0x4e2   :  { %v5518_v5 = vpop.eup %5517  ;;  %5523 = vrsqrt.f32 %v3418_v47  ;;  %v3335_v28 = vsub.f32 %v3251_v57, %v3293_v10  ;;  %3884 = vperm.xlu0 %5443, %v3498_v34   ;;  %v11845_v47 = vld [vmem:[#allocation214_spill] sm:$0xff] }
 0x4e3   :  { %11828 = vst [vmem:[#allocation19_spill] sm:$0xff] %v8793_v30  ;;  %v2321_v1 = vpop.xlane.xlu0 %2320  ;;  %v3499_v58 = vmul.f32 %v5518_v5, %v3373_v17  ;;  %v3294_v34 = vmul.f32 %v8793_v30, %v8793_v30  ;;  %v3374_v17 = vld [vmem:[%s10614_s4 + $0x70] sm:$0xff] }
 0x4e4   :  { %v3026_v41 = vpop.xlane.xlu1 %3025  ;;  %v3419_v57 = vadd.f32 1e-05, %v3335_v28  ;;  %v8815_v23 = vmul.f32 0.0012755102, %v2321_v1 }
 0x4e5   :  { %v3252_v10 = vmul.f32 0.0012755102, %v3026_v41  ;;  %3889 = vperm.xlu1 %5444, %v3499_v58  }
 0x4e6   :  { %11838 = vst [vmem:[#allocation18_spill] sm:$0xff] %v8815_v23  ;;  %5525 = vrsqrt.f32 %v3419_v57  ;;  %v3295_v5 = vmul.f32 %v8815_v23, %v8815_v23 }
 0x4e7   :  { %v3336_v1 = vsub.f32 %v3252_v10, %v3294_v34  ;;  %v5520_v20 = vpop.eup %5519  ;;  %v3035_v45 = vpop.xlane.xlu0 %3034 }
 0x4e8   :  { %v2330_v32 = vpop.xlane.xlu1 %2329  ;;  %v3253_v41 = vmul.f32 0.0012755102, %v3035_v45  ;;  %v3500_v16 = vmul.f32 %v5520_v20, %v3374_v17 }
 0x4e9   :  { %v3420_v10 = vadd.f32 1e-05, %v3336_v1  ;;  %v8840_v58 = vmul.f32 0.0012755102, %v2330_v32 }
 0x4ea   :  { %v3337_v45 = vsub.f32 %v3253_v41, %v3295_v5  ;;  %3894 = vperm.xlu0 %5443, %v3500_v16  }
 0x4eb   :  { %5527 = vrsqrt.f32 %v3420_v10  ;;  %v5522_v57 = vpop.eup %5521  ;;  %v3296_v13 = vmul.f32 %v8840_v58, %v8840_v58  ;;  %v2339_v28 = vpop.xlane.xlu0 %2338 }
 0x4ec   :  { %v3044_v25 = vpop.xlane.xlu1 %3043  ;;  %v3421_v41 = vadd.f32 1e-05, %v3337_v45  ;;  %v8865_v32 = vmul.f32 0.0012755102, %v2339_v28  ;;  %v3501_v17 = vmul.f32 %v5522_v57, %v3375_v24  ;;  %v3377_v57 = vld [vmem:[%s10614_s4 + $0x88] sm:$0xff] }
 0x4ed   :  { %v3254_v20 = vmul.f32 0.0012755102, %v3044_v25 }
 0x4ee   :  { %11852 = vst [vmem:[#allocation28_spill] sm:$0xff] %v8865_v32  ;;  %5529 = vrsqrt.f32 %v3421_v41  ;;  %3899 = vperm.xlu1 %5444, %v3501_v17   ;;  %v3297_v37 = vmul.f32 %v8865_v32, %v8865_v32 }
 0x4ef   :  { %v3338_v25 = vsub.f32 %v3254_v20, %v3296_v13  ;;  %v5524_v54 = vpop.eup %5523  ;;  %v3053_v49 = vpop.xlane.xlu0 %3052 }
 0x4f0   :  { %v2348_v53 = vpop.xlane.xlu1 %2347  ;;  %v3255_v28 = vmul.f32 0.0012755102, %v3053_v49  ;;  %v3502_v16 = vmul.f32 %v5524_v54, %v3376_v19  ;;  %v3378_v54 = vld [vmem:[%s10614_s4 + $0x90] sm:$0xff] }
 0x4f1   :  { %v3422_v17 = vadd.f32 1e-05, %v3338_v25  ;;  %v8890_v24 = vmul.f32 0.0012755102, %v2348_v53 }
 0x4f2   :  { %v3339_v53 = vsub.f32 %v3255_v28, %v3297_v37  ;;  %3904 = vperm.xlu0 %5443, %v3502_v16  }
 0x4f3   :  { %5531 = vrsqrt.f32 %v3422_v17  ;;  %v5526_v46 = vpop.eup %5525  ;;  %v3298_v34 = vmul.f32 %v8890_v24, %v8890_v24  ;;  %v2357_v10 = vpop.xlane.xlu0 %2356 }
 0x4f4   :  { %v3062_v1 = vpop.xlane.xlu1 %3061  ;;  %v3423_v28 = vadd.f32 1e-05, %v3339_v53  ;;  %v8915_v19 = vmul.f32 0.0012755102, %v2357_v10  ;;  %v3503_v13 = vmul.f32 %v5526_v46, %v3377_v57  ;;  %v3379_v57 = vld [vmem:[%s10614_s4 + $0x98] sm:$0xff] }
 0x4f5   :  { %v3256_v49 = vmul.f32 0.0012755102, %v3062_v1 }
 0x4f6   :  { %5533 = vrsqrt.f32 %v3423_v28  ;;  %3909 = vperm.xlu1 %5444, %v3503_v13   ;;  %v3299_v5 = vmul.f32 %v8915_v19, %v8915_v19 }
 0x4f7   :  { %v3340_v1 = vsub.f32 %v3256_v49, %v3298_v34  ;;  %v3071_v45 = vpop.xlane.xlu0 %3070 }
 0x4f8   :  { %v5528_v2 = vpop.eup %5527  ;;  %v2366_v41 = vpop.xlane.xlu1 %2365  ;;  %v3257_v10 = vmul.f32 0.0012755102, %v3071_v45 }
 0x4f9   :  { %v3424_v49 = vadd.f32 1e-05, %v3340_v1  ;;  %v8940_v46 = vmul.f32 0.0012755102, %v2366_v41  ;;  %v3504_v37 = vmul.f32 %v5528_v2, %v3378_v54  ;;  %v3380_v54 = vld [vmem:[%s10614_s4 + $0xa0] sm:$0xff] }
 0x4fa   :  { %v3341_v45 = vsub.f32 %v3257_v10, %v3299_v5 }
 0x4fb   :  { %5535 = vrsqrt.f32 %v3424_v49  ;;  %3914 = vperm.xlu0 %5443, %v3504_v37   ;;  %v5530_v9 = vpop.eup %5529  ;;  %v3300_v20 = vmul.f32 %v8940_v46, %v8940_v46  ;;  %v2375_v17 = vpop.xlane.xlu0 %2374  ;;  %v11898_v37 = vld [vmem:[#allocation168_spill] sm:$0xff] }
 0x4fc   :  { %v3080_v25 = vpop.xlane.xlu1 %3079  ;;  %v3425_v10 = vadd.f32 1e-05, %v3341_v45  ;;  %v8965_v2 = vmul.f32 0.0012755102, %v2375_v17  ;;  %v3505_v34 = vmul.f32 %v5530_v9, %v3379_v57  ;;  %v3381_v57 = vld [vmem:[%s10614_s4 + $0xa8] sm:$0xff] }
 0x4fd   :  { %v3258_v41 = vmul.f32 0.0012755102, %v3080_v25 }
 0x4fe   :  { %5537 = vrsqrt.f32 %v3425_v10  ;;  %3919 = vperm.xlu1 %5444, %v3505_v34   ;;  %v3301_v16 = vmul.f32 %v8965_v2, %v8965_v2 }
 0x4ff   :  { %v3342_v25 = vsub.f32 %v3258_v41, %v3300_v20  ;;  %v3089_v53 = vpop.xlane.xlu0 %3088 }
 0x500   :  { %v5532_v62 = vpop.eup %5531  ;;  %v2384_v28 = vpop.xlane.xlu1 %2383  ;;  %v3259_v17 = vmul.f32 0.0012755102, %v3089_v53 }
 0x501   :  { %v3426_v41 = vadd.f32 1e-05, %v3342_v25  ;;  %v8990_v9 = vmul.f32 0.0012755102, %v2384_v28  ;;  %v3506_v5 = vmul.f32 %v5532_v62, %v3380_v54  ;;  %v3382_v54 = vld [vmem:[%s10614_s4 + $0xb0] sm:$0xff] }
 0x502   :  { %v3343_v53 = vsub.f32 %v3259_v17, %v3301_v16 }
 0x503   :  { %5539 = vrsqrt.f32 %v3426_v41  ;;  %3924 = vperm.xlu0 %5443, %v3506_v5   ;;  %v5534_v6 = vpop.eup %5533  ;;  %v3302_v13 = vmul.f32 %v8990_v9, %v8990_v9  ;;  %v2393_v49 = vpop.xlane.xlu0 %2392 }
 0x504   :  { %v3098_v1 = vpop.xlane.xlu1 %3097  ;;  %v3427_v5 = vadd.f32 1e-05, %v3343_v53  ;;  %v9015_v28 = vmul.f32 0.0012755102, %v2393_v49  ;;  %v3507_v20 = vmul.f32 %v5534_v6, %v3381_v57  ;;  %v3383_v57 = vld [vmem:[%s10614_s4 + $0xb8] sm:$0xff] }
 0x505   :  { %v3260_v17 = vmul.f32 0.0012755102, %v3098_v1 }
 0x506   :  { %5541 = vrsqrt.f32 %v3427_v5  ;;  %3929 = vperm.xlu1 %5444, %v3507_v20   ;;  %v3303_v62 = vmul.f32 %v9015_v28, %v9015_v28 }
 0x507   :  { %v3344_v1 = vsub.f32 %v3260_v17, %v3302_v13  ;;  %v3107_v45 = vpop.xlane.xlu0 %3106 }
 0x508   :  { %v5536_v34 = vpop.eup %5535  ;;  %v2402_v10 = vpop.xlane.xlu1 %2401  ;;  %v3261_v49 = vmul.f32 0.0012755102, %v3107_v45 }
 0x509   :  { %v3428_v17 = vadd.f32 1e-05, %v3344_v1  ;;  %v9040_v6 = vmul.f32 0.0012755102, %v2402_v10  ;;  %v3508_v26 = vmul.f32 %v5536_v34, %v3382_v54  ;;  %v3384_v34 = vld [vmem:[%s10614_s4 + $0xc0] sm:$0xff] }
 0x50a   :  { %v3345_v45 = vsub.f32 %v3261_v49, %v3303_v62 }
 0x50b   :  { %5543 = vrsqrt.f32 %v3428_v17  ;;  %3934 = vperm.xlu0 %5443, %v3508_v26   ;;  %v5538_v13 = vpop.eup %5537  ;;  %v3304_v11 = vmul.f32 %v9040_v6, %v9040_v6  ;;  %v2411_v41 = vpop.xlane.xlu0 %2410 }
 0x50c   :  { %v3116_v25 = vpop.xlane.xlu1 %3115  ;;  %v3429_v49 = vadd.f32 1e-05, %v3345_v45  ;;  %v9065_v31 = vmul.f32 0.0012755102, %v2411_v41  ;;  %v3509_v54 = vmul.f32 %v5538_v13, %v3383_v57  ;;  %v3385_v13 = vld [vmem:[%s10614_s4 + $0xc8] sm:$0xff] }
 0x50d   :  { %v3262_v10 = vmul.f32 0.0012755102, %v3116_v25 }
 0x50e   :  { %11922 = vst [vmem:[#allocation203_spill] sm:$0xff] %v9065_v31  ;;  %5545 = vrsqrt.f32 %v3429_v49  ;;  %3939 = vperm.xlu1 %5444, %v3509_v54   ;;  %v3305_v16 = vmul.f32 %v9065_v31, %v9065_v31 }
 0x50f   :  { %v3346_v25 = vsub.f32 %v3262_v10, %v3304_v11  ;;  %v3125_v53 = vpop.xlane.xlu0 %3124 }
 0x510   :  { %v5540_v30 = vpop.eup %5539  ;;  %v2420_v5 = vpop.xlane.xlu1 %2419  ;;  %v3263_v57 = vmul.f32 0.0012755102, %v3125_v53 }
 0x511   :  { %v3430_v54 = vadd.f32 1e-05, %v3346_v25  ;;  %v9090_v41 = vmul.f32 0.0012755102, %v2420_v5  ;;  %v3510_v26 = vmul.f32 %v5540_v30, %v3384_v34  ;;  %v3386_v34 = vld [vmem:[%s10614_s4 + $0xd0] sm:$0xff] }
 0x512   :  { %v3347_v53 = vsub.f32 %v3263_v57, %v3305_v16 }
 0x513   :  { %5547 = vrsqrt.f32 %v3430_v54  ;;  %3944 = vperm.xlu0 %5443, %v3510_v26   ;;  %v5542_v23 = vpop.eup %5541  ;;  %v3306_v20 = vmul.f32 %v9090_v41, %v9090_v41  ;;  %v2429_v17 = vpop.xlane.xlu0 %2428 }
 0x514   :  { %v3134_v1 = vpop.xlane.xlu1 %3133  ;;  %v3431_v57 = vadd.f32 1e-05, %v3347_v53  ;;  %v9115_v30 = vmul.f32 0.0012755102, %v2429_v17  ;;  %v3511_v11 = vmul.f32 %v5542_v23, %v3385_v13  ;;  %v3387_v13 = vld [vmem:[%s10614_s4 + $0xd8] sm:$0xff] }
 0x515   :  { %v3264_v5 = vmul.f32 0.0012755102, %v3134_v1 }
 0x516   :  { %11941 = vst [vmem:[#allocation17_spill] sm:$0xff] %v9115_v30  ;;  %5549 = vrsqrt.f32 %v3431_v57  ;;  %3949 = vperm.xlu1 %5444, %v3511_v11   ;;  %v3307_v62 = vmul.f32 %v9115_v30, %v9115_v30 }
 0x517   :  { %v3348_v1 = vsub.f32 %v3264_v5, %v3306_v20  ;;  %v3143_v45 = vpop.xlane.xlu0 %3142  ;;  %v11950_v20 = vld [vmem:[#allocation106_spill] sm:$0xff] }
 0x518   :  { %v5544_v32 = vpop.eup %5543  ;;  %v2438_v49 = vpop.xlane.xlu1 %2437  ;;  %v3265_v17 = vmul.f32 0.0012755102, %v3143_v45 }
 0x519   :  { %v3432_v5 = vadd.f32 1e-05, %v3348_v1  ;;  %v9140_v23 = vmul.f32 0.0012755102, %v2438_v49  ;;  %v3512_v16 = vmul.f32 %v5544_v32, %v3386_v34  ;;  %v3388_v49 = vld [vmem:[%s10614_s4 + $0xe0] sm:$0xff] }
 0x51a   :  { %v3349_v45 = vsub.f32 %v3265_v17, %v3307_v62 }
 0x51b   :  { %11951 = vst [vmem:[#allocation30_spill] sm:$0xff] %v9140_v23  ;;  %5551 = vrsqrt.f32 %v3432_v5  ;;  %3954 = vperm.xlu0 %5443, %v3512_v16   ;;  %v5546_v11 = vpop.eup %5545  ;;  %v3308_v10 = vmul.f32 %v9140_v23, %v9140_v23  ;;  %v2447_v54 = vpop.xlane.xlu0 %2446 }
 0x51c   :  { %v3152_v25 = vpop.xlane.xlu1 %3151  ;;  %v3433_v17 = vadd.f32 1e-05, %v3349_v45  ;;  %v9165_v7 = vmul.f32 0.0012755102, %v2447_v54  ;;  %v3513_v34 = vmul.f32 %v5546_v11, %v3387_v13  ;;  %v3389_v11 = vld [vmem:[%s10614_s4 + $0xe8] sm:$0xff] }
 0x51d   :  { %v3266_v32 = vmul.f32 0.0012755102, %v3152_v25  ;;  %v11966_v54 = vld [vmem:[#allocation279_spill] sm:$0xff] }
 0x51e   :  { %5553 = vrsqrt.f32 %v3433_v17  ;;  %3959 = vperm.xlu1 %5444, %v3513_v34   ;;  %v3309_v51 = vmul.f32 %v9165_v7, %v9165_v7 }
 0x51f   :  { %v3350_v25 = vsub.f32 %v3266_v32, %v3308_v10  ;;  %v3161_v53 = vpop.xlane.xlu0 %3160 }
 0x520   :  { %v5548_v26 = vpop.eup %5547  ;;  %v2456_v57 = vpop.xlane.xlu1 %2455  ;;  %v3267_v34 = vmul.f32 0.0012755102, %v3161_v53 }
 0x521   :  { %v3434_v32 = vadd.f32 1e-05, %v3350_v25  ;;  %v9190_v13 = vmul.f32 0.0012755102, %v2456_v57  ;;  %v3514_v62 = vmul.f32 %v5548_v26, %v3388_v49  ;;  %v3392_v25 = vld [vmem:[%s10614_s4 + $0x100] sm:$0xff] }
 0x522   :  { %v3351_v53 = vsub.f32 %v3267_v34, %v3309_v51 }
 0x523   :  { %5555 = vrsqrt.f32 %v3434_v32  ;;  %3964 = vperm.xlu0 %5443, %v3514_v62   ;;  %v5550_v21 = vpop.eup %5549  ;;  %v3310_v16 = vmul.f32 %v9190_v13, %v9190_v13  ;;  %v2465_v5 = vpop.xlane.xlu0 %2464  ;;  %v3393_v32 = vld [vmem:[%s10614_s4 + $0x108] sm:$0xff] }
 0x524   :  { %v3170_v1 = vpop.xlane.xlu1 %3169  ;;  %v3435_v34 = vadd.f32 1e-05, %v3351_v53  ;;  %v9215_v26 = vmul.f32 0.0012755102, %v2465_v5  ;;  %v3515_v49 = vmul.f32 %v5550_v21, %v3389_v11  ;;  %v3391_v5 = vld [vmem:[%s10614_s4 + $0xf8] sm:$0xff] }
 0x525   :  { %v3268_v57 = vmul.f32 0.0012755102, %v3170_v1 }
 0x526   :  { %5557 = vrsqrt.f32 %v3435_v34  ;;  %3969 = vperm.xlu1 %5444, %v3515_v49   ;;  %v3311_v17 = vmul.f32 %v9215_v26, %v9215_v26  ;;  %v11995_v34 = vld [vmem:[#allocation300_spill] sm:$0xff] }
 0x527   :  { %v3352_v1 = vsub.f32 %v3268_v57, %v3310_v16  ;;  %v3179_v38 = vpop.xlane.xlu0 %3178  ;;  %v11983_v57 = vld [vmem:[#allocation292_spill] sm:$0xff] }
 0x528   :  { %v5552_v51 = vpop.eup %5551  ;;  %v2474_v45 = vpop.xlane.xlu1 %2473  ;;  %v3269_v21 = vmul.f32 0.0012755102, %v3179_v38 }
 0x529   :  { %v3436_v49 = vadd.f32 1e-05, %v3352_v1  ;;  %v9240_v43 = vmul.f32 0.0012755102, %v2474_v45  ;;  %v3516_v11 = vmul.f32 %v5552_v51, %v3390_v3 }
 0x52a   :  { %v3353_v38 = vsub.f32 %v3269_v21, %v3311_v17 }
 0x52b   :  { %5559 = vrsqrt.f32 %v3436_v49  ;;  %3974 = vperm.xlu0 %5443, %v3516_v11   ;;  %v5554_v53 = vpop.eup %5553  ;;  %v3312_v11 = vmul.f32 %v9240_v43, %v9240_v43 }
 0x52c   :  { %v3188_v10 = vpop.xlane.xlu1 %3187  ;;  %v3437_v21 = vadd.f32 1e-05, %v3353_v38  ;;  %v3517_v16 = vmul.f32 %v5554_v53, %v3391_v5 }
 0x52d   :  { %v3270_v49 = vmul.f32 0.0012755102, %v3188_v10  ;;  %v2483_v45 = vpop.xlane.xlu0 %2482 }
 0x52e   :  { %5561 = vrsqrt.f32 %v3437_v21  ;;  %v9278_v53 = vmul.f32 0.0012755102, %v2483_v45  ;;  %3979 = vperm.xlu1 %5444, %v3517_v16  }
 0x52f   :  { %v3354_v10 = vsub.f32 %v3270_v49, %v3312_v11 }
 0x530   :  { %11993 = vst [vmem:[#allocation209_spill] sm:$0xff] %v9278_v53  ;;  %v5556_v3 = vpop.eup %5555  ;;  %v2492_v45 = vpop.xlane.xlu1 %2491  ;;  %v3313_v5 = vmul.f32 %v9278_v53, %v9278_v53  ;;  %v12052_v53 = vld [vmem:[#allocation192_spill] sm:$0xff] }
 0x531   :  { %v3438_v11 = vadd.f32 1e-05, %v3354_v10  ;;  %v3518_v49 = vmul.f32 %v5556_v3, %v3392_v25  ;;  %v3197_v31 = vpop.xlane.xlu0 %3196  ;;  %v9307_v51 = vmul.f32 0.0012755102, %v2492_v45  ;;  %v12015_v10 = vld [vmem:[#allocation147_spill] sm:$0xff]  ;;  %v3396_v25 = vld [vmem:[%s10614_s4 + $0x120] sm:$0xff] }
 0x532   :  { %v3271_v38 = vmul.f32 0.0012755102, %v3197_v31 }
 0x533   :  { %5563 = vrsqrt.f32 %v3438_v11  ;;  %12003 = vst [vmem:[#allocation208_spill] sm:$0xff] %v9307_v51  ;;  %3984 = vperm.xlu0 %5443, %v3518_v49   ;;  %v5558_v16 = vpop.eup %5557  ;;  %v3314_v45 = vmul.f32 %v9307_v51, %v9307_v51 }
 0x534   :  { %v3355_v3 = vsub.f32 %v3271_v38, %v3313_v5  ;;  %v3206_v30 = vpop.xlane.xlu1 %3205  ;;  %v3519_v42 = vmul.f32 %v5558_v16, %v3393_v32  ;;  %v3395_v38 = vld [vmem:[%s10614_s4 + $0x118] sm:$0xff]  ;;  %v12026_v5 = vld [vmem:[#allocation318_spill] sm:$0xff] }
 0x535   :  { %v3272_v1 = vmul.f32 0.0012755102, %v3206_v30  ;;  %v2501_v62 = vpop.xlane.xlu0 %2500 }
 0x536   :  { %v3439_v16 = vadd.f32 1e-05, %v3355_v3  ;;  %v9332_v17 = vmul.f32 0.0012755102, %v2501_v62  ;;  %3989 = vperm.xlu1 %5444, %v3519_v42  }
 0x537   :  { %v3356_v51 = vsub.f32 %v3272_v1, %v3314_v45  ;;  %v12050_v1 = vld [vmem:[#allocation196_spill] sm:$0xff] }
 0x538   :  { %12013 = vst [vmem:[#allocation40_spill] sm:$0xff] %v9332_v17  ;;  %v5560_v31 = vpop.eup %5559  ;;  %v2510_v44 = vpop.xlane.xlu1 %2509  ;;  %5565 = vrsqrt.f32 %v3439_v16  ;;  %v3315_v30 = vmul.f32 %v9332_v17, %v9332_v17 }
 0x539   :  { %v3520_v62 = vmul.f32 %v5560_v31, %v3394_v55  ;;  %v3215_v23 = vpop.xlane.xlu0 %3214  ;;  %v9361_v49 = vmul.f32 0.0012755102, %v2510_v44  ;;  %v3440_v31 = vadd.f32 1e-05, %v3356_v51 }
 0x53a   :  { %v3273_v21 = vmul.f32 0.0012755102, %v3215_v23 }
 0x53b   :  { %12025 = vst [vmem:[#allocation214_spill] sm:$0xff] %v9361_v49  ;;  %3994 = vperm.xlu0 %5443, %v3520_v62   ;;  %v5562_v42 = vpop.eup %5561  ;;  %5567 = vrsqrt.f32 %v3440_v31  ;;  %v12043_v31 = vsub.f32 %v11794_v63, %v8526_v39  ;;  %v12051_v63 = vsub.f32 %v12050_v1, %v8526_v39 }
 0x53c   :  { %v3357_v3 = vsub.f32 %v3273_v21, %v3315_v30  ;;  %v3521_v17 = vmul.f32 %v5562_v42, %v3395_v38  ;;  %v3224_v62 = vpop.xlane.xlu1 %3223  ;;  %v3316_v42 = vmul.f32 %v9361_v49, %v9361_v49  ;;  %v12039_v38 = vld [vmem:[#allocation326_spill] sm:$0xff] }
 0x53d   :  { %v2519_v33 = vpop.xlane.xlu0 %2518  ;;  %v3274_v23 = vmul.f32 0.0012755102, %v3224_v62  ;;  %v12046_v62 = vld [vmem:[#allocation13_spill] sm:$0xff] }
 0x53e   :  { %v3441_v30 = vadd.f32 1e-05, %v3357_v3  ;;  %v9386_v44 = vmul.f32 0.0012755102, %v2519_v33  ;;  %3999 = vperm.xlu1 %5444, %v3521_v17   ;;  %v12040_v33 = vld [vmem:[#allocation328_spill] sm:$0xff]  ;;  %v12047_v55 = vsub.f32 %v12046_v62, %v8526_v39 }
 0x53f   :  { %v3358_v21 = vsub.f32 %v3274_v23, %v3316_v42 }
 0x540   :  { %12035 = vst [vmem:[#allocation168_spill] sm:$0xff] %v9386_v44  ;;  %v5564_v45 = vpop.eup %5563  ;;  %5569 = vrsqrt.f32 %v3441_v30  ;;  %v3825_v17 = vpop.permute.xlu1 %3824  ;;  %v3317_v11 = vmul.f32 %v9386_v44, %v9386_v44  ;;  %v12045_v30 = vsub.f32 %v11796_v50, %v8526_v39  ;;  %v12048_v44 = vld [vmem:[#allocation191_spill] sm:$0xff] }
 0x541   :  { %v3522_v49 = vmul.f32 %v5564_v45, %v3396_v25  ;;  %v3442_v51 = vadd.f32 1e-05, %v3358_v21  ;;  %v4032_v23 = vmul.f32 %v3825_v17, %v12043_v31  ;;  %v12044_v25 = vsub.f32 %v11795_v61, %v8526_v39  ;;  %v3233_v32 = vpop.xlane.xlu0 %3232  ;;  %v12054_v50 = vld [vmem:[#allocation219_spill] sm:$0xff] }
 0x542   :  { %v4034_v42 = vmul.f32 %v3825_v17, %v12045_v30  ;;  %v4035_v3 = vmul.f32 %v3825_v17, %v12047_v55  ;;  %v12049_v21 = vsub.f32 %v12048_v44, %v8526_v39  ;;  %v4037_v31 = vmul.f32 %v3825_v17, %v12051_v63 }
 0x543   :  { %v4033_v45 = vmul.f32 %v3825_v17, %v12044_v25  ;;  %4004 = vperm.xlu0 %5443, %v3522_v49   ;;  %v12053_v61 = vsub.f32 %v12052_v53, %v8526_v39  ;;  %5571 = vrsqrt.f32 %v3442_v51  ;;  %v4578_v49 = vadd.f32 %v12054_v50, %v4032_v23  ;;  %v12055_v53 = vld [vmem:[#allocation14_spill] sm:$0xff] }
 0x544   :  { %v4036_v16 = vmul.f32 %v3825_v17, %v12049_v21  ;;  %v4580_v55 = vadd.f32 %v12054_v50, %v4034_v42  ;;  %v4581_v62 = vadd.f32 %v12054_v50, %v4035_v3  ;;  %v4583_v21 = vadd.f32 %v12054_v50, %v4037_v31  ;;  %v3835_v63 = vpop.permute.xlu1 %3834  ;;  %v12058_v3 = vld [vmem:[#allocation15_spill] sm:$0xff] }
 0x545   :  { %v4038_v25 = vmul.f32 %v3825_v17, %v12053_v61  ;;  %v4579_v30 = vadd.f32 %v12054_v50, %v4033_v45  ;;  %4872 = vst [vmem:[#allocation7] sm:$0xff] %v4578_v49  ;;  %v3275_v39 = vmul.f32 0.0012755102, %v3233_v32  ;;  %v12056_v51 = vsub.f32 %v12055_v53, %v8575_v59  ;;  %v5566_v31 = vpop.eup %5565  ;;  %v12060_v61 = vld [vmem:[#allocation26_spill] sm:$0xff] }
 0x546   :  { %v4582_v44 = vadd.f32 %v12054_v50, %v4036_v16  ;;  %4874 = vst [vmem:[#allocation7 + $0x10] sm:$0xff] %v4580_v55  ;;  %v12057_v23 = vsub.f32 %v11803_v12, %v8575_v59  ;;  %v12059_v16 = vsub.f32 %v12058_v3, %v8575_v59  ;;  %4875 = vst [vmem:[#allocation7 + $0x18] sm:$0xff] %v4581_v62  ;;  %v12065_v53 = vld [vmem:[#allocation202_spill] sm:$0xff] }
 0x547   :  { %v4584_v1 = vadd.f32 %v12054_v50, %v4038_v25  ;;  %4873 = vst [vmem:[#allocation7 + $0x8] sm:$0xff] %v4579_v30  ;;  %v4046_v17 = vmul.f32 %v3835_v63, %v12056_v51  ;;  %4877 = vst [vmem:[#allocation7 + $0x28] sm:$0xff] %v4583_v21  ;;  %v12061_v32 = vsub.f32 %v12060_v61, %v8575_v59  ;;  %v12062_v50 = vld [vmem:[#allocation201_spill] sm:$0xff] }
 0x548   :  { %v4047_v45 = vmul.f32 %v3835_v63, %v12057_v23  ;;  %v4048_v42 = vmul.f32 %v3835_v63, %v12059_v16  ;;  %4876 = vst [vmem:[#allocation7 + $0x20] sm:$0xff] %v4582_v44  ;;  %v12063_v49 = vsub.f32 %v12062_v50, %v8575_v59  ;;  %v12064_v12 = vsub.f32 %v11807_v56, %v8575_v59  ;;  %v3397_v44 = vld [vmem:[%s10614_s4 + $0x128] sm:$0xff] }
 0x549   :  { %4878 = vst.msk [vmem:[#allocation7 + $0x30] sm:$0xff] %vm640_vm1, %v4584_v1  ;;  %v4049_v25 = vmul.f32 %v3835_v63, %v12061_v32  ;;  %v12066_v51 = vsub.f32 %v12065_v53, %v8575_v59  ;;  %v3359_v21 = vsub.f32 %v3275_v39, %v3317_v11  ;;  %v12067_v1 = vld [vmem:[#allocation225_spill] sm:$0xff]  ;;  %v3523_v11 = vmul.f32 %v5566_v31, %v3397_v44  ;;  %v3830_v53 = vpop.permute.xlu0 %3829 }
 0x54a   :  { %v4050_v30 = vmul.f32 %v3835_v63, %v12063_v49  ;;  %v4051_v55 = vmul.f32 %v3835_v63, %v12064_v12  ;;  %v4592_v23 = vadd.f32 %v12067_v1, %v4046_v17  ;;  %v4593_v3 = vadd.f32 %v12067_v1, %v4047_v45  ;;  %v12068_v39 = vld [vmem:[#allocation25_spill] sm:$0xff]  ;;  %v12069_v17 = vld [vmem:[#allocation344_spill] sm:$0xff] }
 0x54b   :  { %v4052_v62 = vmul.f32 %v3835_v63, %v12066_v51  ;;  %v4594_v16 = vadd.f32 %v12067_v1, %v4048_v42  ;;  %v4595_v61 = vadd.f32 %v12067_v1, %v4049_v25  ;;  %v3840_v63 = vpop.permute.xlu1 %3839  ;;  %v3443_v50 = vadd.f32 1e-05, %v3359_v21  ;;  %v12071_v12 = vld [vmem:[#allocation24_spill] sm:$0xff]  ;;  %4009 = vperm.xlu1 %5444, %v3523_v11  }
 0x54c   :  { %v4596_v56 = vadd.f32 %v12067_v1, %v4050_v30  ;;  %v4597_v32 = vadd.f32 %v12067_v1, %v4051_v55  ;;  %4886 = vst [vmem:[#allocation7 + $0x70] sm:$0xff] %v4592_v23  ;;  %4887 = vst [vmem:[#allocation7 + $0x78] sm:$0xff] %v4593_v3  ;;  %v12070_v49 = vsub.f32 %v12068_v39, %v12069_v17  ;;  %v12073_v30 = vld [vmem:[#allocation27_spill] sm:$0xff]  ;;  %v12077_v21 = vld [vmem:[#allocation204_spill] sm:$0xff] }
 0x54d   :  { %v4598_v59 = vadd.f32 %v12067_v1, %v4052_v62  ;;  %4888 = vst [vmem:[#allocation7 + $0x80] sm:$0xff] %v4594_v16  ;;  %v12072_v42 = vsub.f32 %v12071_v12, %v12069_v17  ;;  %4889 = vst [vmem:[#allocation7 + $0x88] sm:$0xff] %v4595_v61  ;;  %v12074_v55 = vsub.f32 %v12073_v30, %v12069_v17  ;;  %v12075_v62 = vld [vmem:[#allocation23_spill] sm:$0xff]  ;;  %v12079_v3 = vld [vmem:[#allocation206_spill] sm:$0xff]  ;;  %5573 = vrsqrt.f32 %v3443_v50 }
 0x54e   :  { %v4053_v45 = vmul.f32 %v3840_v63, %v12070_v49  ;;  %4890 = vst [vmem:[#allocation7 + $0x90] sm:$0xff] %v4596_v56  ;;  %4891 = vst [vmem:[#allocation7 + $0x98] sm:$0xff] %v4597_v32  ;;  %v12076_v31 = vsub.f32 %v12075_v62, %v12069_v17  ;;  %v12078_v1 = vsub.f32 %v12077_v21, %v12069_v17  ;;  %v12081_v56 = vld [vmem:[#allocation205_spill] sm:$0xff]  ;;  %v12083_v39 = vld [vmem:[#allocation223_spill] sm:$0xff] }
 0x54f   :  { %v4054_v25 = vmul.f32 %v3840_v63, %v12072_v42  ;;  %4892 = vst.msk [vmem:[#allocation7 + $0xa0] sm:$0xff] %vm640_vm1, %v4598_v59  ;;  %v4055_v51 = vmul.f32 %v3840_v63, %v12074_v55  ;;  %v12080_v16 = vsub.f32 %v12079_v3, %v12069_v17  ;;  %v12082_v32 = vsub.f32 %v12081_v56, %v12069_v17  ;;  %v5568_v42 = vpop.eup %5567  ;;  %v3398_v50 = vld [vmem:[%s10614_s4 + $0x130] sm:$0xff]  ;;  %v12084_v17 = vld [vmem:[#allocation11_spill] sm:$0xff]  ;;  %v12091_v56 = vld [vmem:[#allocation197_spill] sm:$0xff] }
 0x550   :  { %v4056_v44 = vmul.f32 %v3840_v63, %v12076_v31  ;;  %v4057_v23 = vmul.f32 %v3840_v63, %v12078_v1  ;;  %v4599_v49 = vadd.f32 %v12083_v39, %v4053_v45  ;;  %v9495_v11 = vpop.eup %5569  ;;  %v12085_v45 = vsub.f32 %v12084_v17, %v8596_v27  ;;  %v12088_v1 = vld [vmem:[#allocation12_spill] sm:$0xff]  ;;  %v12095_v17 = vld [vmem:[#allocation198_spill] sm:$0xff] }
 0x551   :  { %v4058_v61 = vmul.f32 %v3840_v63, %v12080_v16  ;;  %v4059_v59 = vmul.f32 %v3840_v63, %v12082_v32  ;;  %v4600_v12 = vadd.f32 %v12083_v39, %v4054_v25  ;;  %v4601_v30 = vadd.f32 %v12083_v39, %v4055_v51  ;;  %v12086_v51 = vld [vmem:[#allocation16_spill] sm:$0xff] }
 0x552   :  { %v4602_v55 = vadd.f32 %v12083_v39, %v4056_v44  ;;  %v4603_v62 = vadd.f32 %v12083_v39, %v4057_v23  ;;  %4893 = vst [vmem:[#allocation7 + $0xa8] sm:$0xff] %v4599_v49  ;;  %v4039_v25 = vmul.f32 %v3830_v53, %v12085_v45  ;;  %v12087_v44 = vsub.f32 %v12086_v51, %v8596_v27 }
 0x553   :  { %v4604_v31 = vadd.f32 %v12083_v39, %v4058_v61  ;;  %v4605_v63 = vadd.f32 %v12083_v39, %v4059_v59  ;;  %4894 = vst [vmem:[#allocation7 + $0xb0] sm:$0xff] %v4600_v12  ;;  %v12089_v23 = vsub.f32 %v12088_v1, %v8596_v27  ;;  %4895 = vst [vmem:[#allocation7 + $0xb8] sm:$0xff] %v4601_v30  ;;  %v12093_v39 = vld [vmem:[#allocation200_spill] sm:$0xff]  ;;  %v3850_v30 = vpop.permute.xlu1 %3849  ;;  %v3845_v1 = vpop.permute.xlu0 %3844 }
 0x554   :  { %v4040_v21 = vmul.f32 %v3830_v53, %v12087_v44  ;;  %4896 = vst [vmem:[#allocation7 + $0xc0] sm:$0xff] %v4602_v55  ;;  %4897 = vst [vmem:[#allocation7 + $0xc8] sm:$0xff] %v4603_v62  ;;  %v12090_v16 = vsub.f32 %v11817_v0, %v8596_v27  ;;  %v12092_v32 = vsub.f32 %v12091_v56, %v8596_v27  ;;  %v12097_v55 = vld [vmem:[#allocation216_spill] sm:$0xff] }
 0x555   :  { %v4041_v3 = vmul.f32 %v3830_v53, %v12089_v23  ;;  %4898 = vst [vmem:[#allocation7 + $0xd0] sm:$0xff] %v4604_v31  ;;  %v12094_v49 = vsub.f32 %v12093_v39, %v8596_v27  ;;  %v12096_v45 = vsub.f32 %v12095_v17, %v8596_v27  ;;  %4899 = vst.msk [vmem:[#allocation7 + $0xd8] sm:$0xff] %vm640_vm1, %v4605_v63  ;;  %v9523_v23 = vpop.eup %5571  ;;  %v12098_v63 = vld [vmem:[#allocation32_spill] sm:$0xff]  ;;  %v12104_v39 = vld [vmem:[#allocation35_spill] sm:$0xff] }
 0x556   :  { %v4042_v61 = vmul.f32 %v3830_v53, %v12090_v16  ;;  %v4043_v59 = vmul.f32 %v3830_v53, %v12092_v32  ;;  %v4585_v62 = vadd.f32 %v12097_v55, %v4039_v25  ;;  %v4586_v0 = vadd.f32 %v12097_v55, %v4040_v21  ;;  %v12102_v32 = vld [vmem:[#allocation33_spill] sm:$0xff]  ;;  %v12106_v17 = vld [vmem:[#allocation210_spill] sm:$0xff] }
 0x557   :  { %v4044_v12 = vmul.f32 %v3830_v53, %v12094_v49  ;;  %v4045_v51 = vmul.f32 %v3830_v53, %v12096_v45  ;;  %v4587_v31 = vadd.f32 %v12097_v55, %v4041_v3  ;;  %v3524_v44 = vmul.f32 %v5568_v42, %v3398_v50  ;;  %v12100_v42 = vld [vmem:[#allocation34_spill] sm:$0xff] }
 0x558   :  { %v4588_v16 = vadd.f32 %v12097_v55, %v4042_v61  ;;  %v4589_v56 = vadd.f32 %v12097_v55, %v4043_v59  ;;  %4879 = vst [vmem:[#allocation7 + $0x38] sm:$0xff] %v4585_v62  ;;  %4880 = vst [vmem:[#allocation7 + $0x40] sm:$0xff] %v4586_v0  ;;  %v12099_v25 = vsub.f32 %v12098_v63, %v8614_v52 }
 0x559   :  { %v4590_v27 = vadd.f32 %v12097_v55, %v4044_v12  ;;  %v4591_v53 = vadd.f32 %v12097_v55, %v4045_v51  ;;  %4881 = vst [vmem:[#allocation7 + $0x48] sm:$0xff] %v4587_v31  ;;  %4014 = vperm.xlu0 %5443, %v3524_v44   ;;  %v12101_v50 = vsub.f32 %v12100_v42, %v8614_v52  ;;  %v12108_v55 = vld [vmem:[#allocation212_spill] sm:$0xff]  ;;  %v12110_v31 = vld [vmem:[#allocation211_spill] sm:$0xff] }
 0x55a   :  { %v4067_v21 = vmul.f32 %v3850_v30, %v12099_v25  ;;  %v12103_v61 = vsub.f32 %v12102_v32, %v8614_v52  ;;  %v12105_v49 = vsub.f32 %v12104_v39, %v8614_v52  ;;  %4882 = vst [vmem:[#allocation7 + $0x50] sm:$0xff] %v4588_v16  ;;  %4883 = vst [vmem:[#allocation7 + $0x58] sm:$0xff] %v4589_v56  ;;  %v12112_v25 = vld [vmem:[#allocation22_spill] sm:$0xff]  ;;  %v12114_v56 = vld [vmem:[#allocation229_spill] sm:$0xff] }
 0x55b   :  { %v4068_v3 = vmul.f32 %v3850_v30, %v12101_v50  ;;  %4884 = vst [vmem:[#allocation7 + $0x60] sm:$0xff] %v4590_v27  ;;  %4885 = vst.msk [vmem:[#allocation7 + $0x68] sm:$0xff] %vm640_vm1, %v4591_v53  ;;  %v12107_v45 = vsub.f32 %v12106_v17, %v8614_v52  ;;  %v12109_v62 = vsub.f32 %v12108_v55, %v8614_v52  ;;  %v12118_v17 = vld [vmem:[#allocation31_spill] sm:$0xff] }
 0x55c   :  { %v4069_v59 = vmul.f32 %v3850_v30, %v12103_v61  ;;  %v4070_v12 = vmul.f32 %v3850_v30, %v12105_v49  ;;  %v12111_v44 = vsub.f32 %v12110_v31, %v8614_v52  ;;  %v12113_v42 = vsub.f32 %v12112_v25, %v8622_v36  ;;  %v3399_v61 = vld [vmem:[%s10614_s4 + $0x138] sm:$0xff]  ;;  %v12120_v55 = vld [vmem:[#allocation207_spill] sm:$0xff] }
 0x55d   :  { %v4071_v51 = vmul.f32 %v3850_v30, %v12107_v45  ;;  %v4072_v0 = vmul.f32 %v3850_v30, %v12109_v62  ;;  %v4613_v27 = vadd.f32 %v12114_v56, %v4067_v21  ;;  %v4614_v53 = vadd.f32 %v12114_v56, %v4068_v3  ;;  %v12116_v3 = vld [vmem:[#allocation29_spill] sm:$0xff] }
 0x55e   :  { %v4073_v63 = vmul.f32 %v3850_v30, %v12111_v44  ;;  %v4060_v16 = vmul.f32 %v3845_v1, %v12113_v42  ;;  %v4615_v50 = vadd.f32 %v12114_v56, %v4069_v59  ;;  %v4616_v32 = vadd.f32 %v12114_v56, %v4070_v12  ;;  %v3860_v44 = vpop.permute.xlu1 %3859  ;;  %v12124_v42 = vld [vmem:[#allocation232_spill] sm:$0xff] }
 0x55f   :  { %v4617_v39 = vadd.f32 %v12114_v56, %v4071_v51  ;;  %v4618_v52 = vadd.f32 %v12114_v56, %v4072_v0  ;;  %v12115_v49 = vsub.f32 %v11827_v60, %v8622_v36  ;;  %4907 = vst [vmem:[#allocation7 + $0x118] sm:$0xff] %v4613_v27  ;;  %4908 = vst [vmem:[#allocation7 + $0x120] sm:$0xff] %v4614_v53 }
 0x560   :  { %v4619_v30 = vadd.f32 %v12114_v56, %v4073_v63  ;;  %4909 = vst [vmem:[#allocation7 + $0x128] sm:$0xff] %v4615_v50  ;;  %4910 = vst [vmem:[#allocation7 + $0x130] sm:$0xff] %v4616_v32  ;;  %v12117_v59 = vsub.f32 %v12116_v3, %v8622_v36  ;;  %v12119_v45 = vsub.f32 %v12118_v17, %v8622_v36 }
 0x561   :  { %v4061_v21 = vmul.f32 %v3845_v1, %v12115_v49  ;;  %v12121_v62 = vsub.f32 %v12120_v55, %v8622_v36  ;;  %v12122_v60 = vsub.f32 %v11832_v22, %v8622_v36  ;;  %4911 = vst [vmem:[#allocation7 + $0x138] sm:$0xff] %v4617_v39  ;;  %4912 = vst [vmem:[#allocation7 + $0x140] sm:$0xff] %v4618_v52  ;;  %v3855_v52 = vpop.permute.xlu0 %3854  ;;  %v12128_v49 = vld [vmem:[#allocation41_spill] sm:$0xff]  ;;  %v12134_v55 = vld [vmem:[#allocation220_spill] sm:$0xff] }
 0x562   :  { %v4062_v12 = vmul.f32 %v3845_v1, %v12117_v59  ;;  %v4063_v51 = vmul.f32 %v3845_v1, %v12119_v45  ;;  %4913 = vst.msk [vmem:[#allocation7 + $0x148] sm:$0xff] %vm640_vm1, %v4619_v30  ;;  %v12123_v63 = vsub.f32 %v11833_v8, %v8622_v36  ;;  %v4606_v56 = vadd.f32 %v12124_v42, %v4060_v16  ;;  %v9590_v30 = vpop.eup %5573  ;;  %v12130_v59 = vld [vmem:[#allocation43_spill] sm:$0xff]  ;;  %v12132_v45 = vld [vmem:[#allocation217_spill] sm:$0xff] }
 0x563   :  { %v4064_v0 = vmul.f32 %v3845_v1, %v12121_v62  ;;  %v4065_v31 = vmul.f32 %v3845_v1, %v12122_v60  ;;  %v4607_v27 = vadd.f32 %v12124_v42, %v4061_v21  ;;  %v3525_v53 = vmul.f32 %v9495_v11, %v3399_v61  ;;  %v12136_v60 = vld [vmem:[#allocation218_spill] sm:$0xff] }
 0x564   :  { %v4066_v25 = vmul.f32 %v3845_v1, %v12123_v63  ;;  %v4608_v50 = vadd.f32 %v12124_v42, %v4062_v12  ;;  %v4609_v22 = vadd.f32 %v12124_v42, %v4063_v51  ;;  %4900 = vst [vmem:[#allocation7 + $0xe0] sm:$0xff] %v4606_v56  ;;  %v12125_v8 = vsub.f32 %v11834_v14, %v8626_v40  ;;  %v12126_v1 = vld [vmem:[#allocation42_spill] sm:$0xff] }
 0x565   :  { %v4610_v32 = vadd.f32 %v12124_v42, %v4064_v0  ;;  %v4611_v39 = vadd.f32 %v12124_v42, %v4065_v31  ;;  %4901 = vst [vmem:[#allocation7 + $0xe8] sm:$0xff] %v4607_v27  ;;  %4019 = vperm.xlu1 %5444, %v3525_v53   ;;  %v12127_v16 = vsub.f32 %v12126_v1, %v8626_v40  ;;  %v12139_v53 = vld [vmem:[#allocation36_spill] sm:$0xff] }
 0x566   :  { %v4612_v36 = vadd.f32 %v12124_v42, %v4066_v25  ;;  %v4081_v11 = vmul.f32 %v3860_v44, %v12125_v8  ;;  %v12129_v21 = vsub.f32 %v12128_v49, %v8626_v40  ;;  %4902 = vst [vmem:[#allocation7 + $0xf0] sm:$0xff] %v4608_v50  ;;  %4903 = vst [vmem:[#allocation7 + $0xf8] sm:$0xff] %v4609_v22  ;;  %v12138_v25 = vld [vmem:[#allocation236_spill] sm:$0xff]  ;;  %v12141_v8 = vld [vmem:[#allocation38_spill] sm:$0xff] }
 0x567   :  { %v4082_v61 = vmul.f32 %v3860_v44, %v12127_v16  ;;  %4904 = vst [vmem:[#allocation7 + $0x100] sm:$0xff] %v4610_v32  ;;  %4905 = vst [vmem:[#allocation7 + $0x108] sm:$0xff] %v4611_v39  ;;  %v12131_v12 = vsub.f32 %v12130_v59, %v8626_v40  ;;  %v12133_v14 = vsub.f32 %v12132_v45, %v8626_v40  ;;  %v3400_v32 = vld [vmem:[%s10614_s4 + $0x140] sm:$0xff]  ;;  %v12143_v16 = vld [vmem:[#allocation37_spill] sm:$0xff] }
 0x568   :  { %v4083_v3 = vmul.f32 %v3860_v44, %v12129_v21  ;;  %v12135_v62 = vsub.f32 %v12134_v55, %v8626_v40  ;;  %v12137_v31 = vsub.f32 %v12136_v60, %v8626_v40  ;;  %4906 = vst.msk [vmem:[#allocation7 + $0x110] sm:$0xff] %vm640_vm1, %v4612_v36  ;;  %v4627_v42 = vadd.f32 %v12138_v25, %v4081_v11  ;;  %v12145_v21 = vld [vmem:[#allocation39_spill] sm:$0xff] }
 0x569   :  { %v4084_v17 = vmul.f32 %v3860_v44, %v12131_v12  ;;  %v4085_v51 = vmul.f32 %v3860_v44, %v12133_v14  ;;  %v4628_v56 = vadd.f32 %v12138_v25, %v4082_v61  ;;  %v12140_v50 = vsub.f32 %v12139_v53, %v8631_v29  ;;  %v12147_v12 = vld [vmem:[#allocation213_spill] sm:$0xff]  ;;  %v3870_v14 = vpop.permute.xlu1 %3869 }
 0x56a   :  { %v4086_v0 = vmul.f32 %v3860_v44, %v12135_v62  ;;  %v4087_v63 = vmul.f32 %v3860_v44, %v12137_v31  ;;  %v4629_v27 = vadd.f32 %v12138_v25, %v4083_v3  ;;  %4921 = vst [vmem:[#allocation7 + $0x188] sm:$0xff] %v4627_v42  ;;  %v12142_v11 = vsub.f32 %v12141_v8, %v8631_v29  ;;  %v12152_v31 = vld [vmem:[#allocation238_spill] sm:$0xff]  ;;  %v3865_v42 = vpop.permute.xlu0 %3864 }
 0x56b   :  { %v4074_v22 = vmul.f32 %v3855_v52, %v12140_v50  ;;  %v4630_v39 = vadd.f32 %v12138_v25, %v4084_v17  ;;  %v4631_v40 = vadd.f32 %v12138_v25, %v4085_v51  ;;  %4922 = vst [vmem:[#allocation7 + $0x190] sm:$0xff] %v4628_v56  ;;  %v12144_v61 = vsub.f32 %v12143_v16, %v8631_v29  ;;  %v12149_v51 = vld [vmem:[#allocation215_spill] sm:$0xff] }
 0x56c   :  { %v4632_v44 = vadd.f32 %v12138_v25, %v4086_v0  ;;  %v4633_v36 = vadd.f32 %v12138_v25, %v4087_v63  ;;  %4923 = vst [vmem:[#allocation7 + $0x198] sm:$0xff] %v4629_v27  ;;  %v4075_v1 = vmul.f32 %v3855_v52, %v12142_v11  ;;  %v12146_v3 = vsub.f32 %v12145_v21, %v8631_v29 }
 0x56d   :  { %v4076_v49 = vmul.f32 %v3855_v52, %v12144_v61  ;;  %v12148_v17 = vsub.f32 %v12147_v12, %v8631_v29  ;;  %4924 = vst [vmem:[#allocation7 + $0x1a0] sm:$0xff] %v4630_v39  ;;  %4925 = vst [vmem:[#allocation7 + $0x1a8] sm:$0xff] %v4631_v40  ;;  %v12150_v55 = vsub.f32 %v12149_v51, %v8631_v29  ;;  %v12166_v51 = vld [vmem:[#allocation227_spill] sm:$0xff] }
 0x56e   :  { %v4077_v59 = vmul.f32 %v3855_v52, %v12146_v3  ;;  %4926 = vst [vmem:[#allocation7 + $0x1b0] sm:$0xff] %v4632_v44  ;;  %4927 = vst.msk [vmem:[#allocation7 + $0x1b8] sm:$0xff] %vm640_vm1, %v4633_v36  ;;  %v12151_v0 = vsub.f32 %v11845_v47, %v8631_v29  ;;  %v4620_v63 = vadd.f32 %v12152_v31, %v4074_v22  ;;  %v12153_v29 = vld [vmem:[#allocation48_spill] sm:$0xff]  ;;  %v12154_v47 = vld [vmem:[#allocation346_spill] sm:$0xff] }
 0x56f   :  { %v4078_v45 = vmul.f32 %v3855_v52, %v12148_v17  ;;  %v4079_v62 = vmul.f32 %v3855_v52, %v12150_v55  ;;  %v3526_v25 = vmul.f32 %v9523_v23, %v3400_v32  ;;  %v4621_v56 = vadd.f32 %v12152_v31, %v4075_v1  ;;  %v12156_v23 = vld [vmem:[#allocation50_spill] sm:$0xff]  ;;  %v12158_v36 = vld [vmem:[#allocation49_spill] sm:$0xff]  ;;  %v12160_v1 = vld [vmem:[#allocation51_spill] sm:$0xff] }
 0x570   :  { %v4080_v60 = vmul.f32 %v3855_v52, %v12151_v0  ;;  %v4622_v27 = vadd.f32 %v12152_v31, %v4076_v49  ;;  %v4623_v53 = vadd.f32 %v12152_v31, %v4077_v59  ;;  %4914 = vst [vmem:[#allocation7 + $0x150] sm:$0xff] %v4620_v63  ;;  %v12155_v52 = vsub.f32 %v12153_v29, %v12154_v47  ;;  %v12162_v49 = vld [vmem:[#allocation226_spill] sm:$0xff]  ;;  %v12164_v59 = vld [vmem:[#allocation228_spill] sm:$0xff]  ;;  %v12168_v0 = vld [vmem:[#allocation241_spill] sm:$0xff] }
 0x571   :  { %v4624_v50 = vadd.f32 %v12152_v31, %v4078_v45  ;;  %v4625_v39 = vadd.f32 %v12152_v31, %v4079_v62  ;;  %4024 = vperm.xlu0 %5443, %v3526_v25   ;;  %v12157_v32 = vsub.f32 %v12156_v23, %v12154_v47  ;;  %4915 = vst [vmem:[#allocation7 + $0x158] sm:$0xff] %v4621_v56  ;;  %v4366_v45 = vld [vmem:[%s10615_s5 + $0x140] sm:$0xff]  ;;  %v12169_v63 = vld [vmem:[#allocation44_spill] sm:$0xff]  ;;  %v12170_v25 = vld [vmem:[#allocation345_spill] sm:$0xff] }
 0x572   :  { %v4626_v40 = vadd.f32 %v12152_v31, %v4080_v60  ;;  %v4095_v22 = vmul.f32 %v3870_v14, %v12155_v52  ;;  %4916 = vst [vmem:[#allocation7 + $0x160] sm:$0xff] %v4622_v27  ;;  %4917 = vst [vmem:[#allocation7 + $0x168] sm:$0xff] %v4623_v53  ;;  %v12159_v8 = vsub.f32 %v12158_v36, %v12154_v47  ;;  %v12174_v23 = vld [vmem:[#allocation45_spill] sm:$0xff]  ;;  %v12176_v36 = vld [vmem:[#allocation47_spill] sm:$0xff] }
 0x573   :  { %v4096_v44 = vmul.f32 %v3870_v14, %v12157_v32  ;;  %4918 = vst [vmem:[#allocation7 + $0x170] sm:$0xff] %v4624_v50  ;;  %v12161_v16 = vsub.f32 %v12160_v1, %v12154_v47  ;;  %v12163_v21 = vsub.f32 %v12162_v49, %v12154_v47  ;;  %v12165_v12 = vsub.f32 %v12164_v59, %v12154_v47  ;;  %v3875_v1 = vpop.permute.xlu0 %3874 }
 0x574   :  { %v4097_v11 = vmul.f32 %v3870_v14, %v12159_v8  ;;  %4919 = vst [vmem:[#allocation7 + $0x178] sm:$0xff] %v4625_v39  ;;  %4920 = vst.msk [vmem:[#allocation7 + $0x180] sm:$0xff] %vm640_vm1, %v4626_v40  ;;  %v12167_v55 = vsub.f32 %v12166_v51, %v12154_v47  ;;  %v4641_v60 = vadd.f32 %v12168_v0, %v4095_v22  ;;  %v12172_v47 = vld [vmem:[#allocation46_spill] sm:$0xff] }
 0x575   :  { %v4098_v61 = vmul.f32 %v3870_v14, %v12161_v16  ;;  %v4099_v3 = vmul.f32 %v3870_v14, %v12163_v21  ;;  %v4100_v17 = vmul.f32 %v3870_v14, %v12165_v12  ;;  %v4642_v31 = vadd.f32 %v12168_v0, %v4096_v44  ;;  %4570 = vperm.xlu0 %5443, %v4366_v45   ;;  %v12178_v16 = vld [vmem:[#allocation221_spill] sm:$0xff]  ;;  %v12180_v21 = vld [vmem:[#allocation224_spill] sm:$0xff]  ;;  %v12182_v12 = vld [vmem:[#allocation222_spill] sm:$0xff] }
 0x576   :  { %v4101_v62 = vmul.f32 %v3870_v14, %v12167_v55  ;;  %v12171_v56 = vsub.f32 %v12169_v63, %v12170_v25  ;;  %v4643_v53 = vadd.f32 %v12168_v0, %v4097_v11  ;;  %v3401_v14 = vld [vmem:[%s10614_s4 + $0x148] sm:$0xff]  ;;  %4935 = vst [vmem:[#allocation7 + $0x1f8] sm:$0xff] %v4641_v60  ;;  %v12173_v52 = vsub.f32 %v12172_v47, %v12170_v25  ;;  %v3880_v63 = vpop.permute.xlu1 %3879 }
 0x577   :  { %v4644_v50 = vadd.f32 %v12168_v0, %v4098_v61  ;;  %v4645_v39 = vadd.f32 %v12168_v0, %v4099_v3  ;;  %v4646_v40 = vadd.f32 %v12168_v0, %v4100_v17  ;;  %4936 = vst [vmem:[#allocation7 + $0x200] sm:$0xff] %v4642_v31  ;;  %v12175_v32 = vsub.f32 %v12174_v23, %v12170_v25  ;;  %v12184_v55 = vld [vmem:[#allocation243_spill] sm:$0xff] }
 0x578   :  { %v4088_v27 = vmul.f32 %v3865_v42, %v12171_v56  ;;  %v4647_v29 = vadd.f32 %v12168_v0, %v4101_v62  ;;  %v4089_v22 = vmul.f32 %v3865_v42, %v12173_v52  ;;  %v12177_v8 = vsub.f32 %v12176_v36, %v12170_v25  ;;  %4937 = vst [vmem:[#allocation7 + $0x208] sm:$0xff] %v4643_v53 }
 0x579   :  { %v4090_v44 = vmul.f32 %v3865_v42, %v12175_v32  ;;  %4938 = vst [vmem:[#allocation7 + $0x210] sm:$0xff] %v4644_v50  ;;  %4939 = vst [vmem:[#allocation7 + $0x218] sm:$0xff] %v4645_v39  ;;  %v12179_v61 = vsub.f32 %v12178_v16, %v12170_v25  ;;  %v12181_v3 = vsub.f32 %v12180_v21, %v12170_v25 }
 0x57a   :  { %v4091_v11 = vmul.f32 %v3865_v42, %v12177_v8  ;;  %4940 = vst [vmem:[#allocation7 + $0x220] sm:$0xff] %v4646_v40  ;;  %v12183_v17 = vsub.f32 %v12182_v12, %v12170_v25  ;;  %v4634_v62 = vadd.f32 %v12184_v55, %v4088_v27  ;;  %4941 = vst.msk [vmem:[#allocation7 + $0x228] sm:$0xff] %vm640_vm1, %v4647_v29  ;;  %v12186_v27 = vld [vmem:[#allocation347_spill] sm:$0xff]  ;;  %v12188_v40 = vld [vmem:[#allocation54_spill] sm:$0xff] }
 0x57b   :  { %v4092_v49 = vmul.f32 %v3865_v42, %v12179_v61  ;;  %v4093_v59 = vmul.f32 %v3865_v42, %v12181_v3  ;;  %v4635_v45 = vadd.f32 %v12184_v55, %v4089_v22  ;;  %v4636_v0 = vadd.f32 %v12184_v55, %v4090_v44  ;;  %v12192_v22 = vld [vmem:[#allocation55_spill] sm:$0xff]  ;;  %v12194_v44 = vld [vmem:[#allocation230_spill] sm:$0xff] }
 0x57c   :  { %v4094_v51 = vmul.f32 %v3865_v42, %v12183_v17  ;;  %v4637_v60 = vadd.f32 %v12184_v55, %v4091_v11  ;;  %v3527_v31 = vmul.f32 %v9590_v30, %v3401_v14  ;;  %4928 = vst [vmem:[#allocation7 + $0x1c0] sm:$0xff] %v4634_v62  ;;  %v12185_v42 = vld [vmem:[#allocation52_spill] sm:$0xff]  ;;  %v12189_v29 = vsub.f32 %v12188_v40, %v12186_v27  ;;  %v12190_v14 = vld [vmem:[#allocation53_spill] sm:$0xff]  ;;  %v4367_v62 = vld [vmem:[%s10615_s5 + $0x148] sm:$0xff]  ;;  %s5650_s5 = smov [#allocation7]  }
 0x57d   :  { %v4638_v56 = vadd.f32 %v12184_v55, %v4092_v49  ;;  %v4639_v53 = vadd.f32 %v12184_v55, %v4093_v59  ;;  %v12187_v50 = vsub.f32 %v12185_v42, %v12186_v27  ;;  %4929 = vst [vmem:[#allocation7 + $0x1c8] sm:$0xff] %v4635_v45  ;;  %4930 = vst [vmem:[#allocation7 + $0x1d0] sm:$0xff] %v4636_v0  ;;  %v12196_v11 = vld [vmem:[#allocation233_spill] sm:$0xff]  ;;  %v12198_v49 = vld [vmem:[#allocation231_spill] sm:$0xff]  ;;  %s5171_s30 = sshll.u32 %s5650_s5, 4  ;;  %s5172_s30 = int_to_ptr.vmem [resolvable:$true] %s5171_s30 }
 0x57e   :  { %v4640_v25 = vadd.f32 %v12184_v55, %v4094_v51  ;;  %4931 = vst [vmem:[#allocation7 + $0x1d8] sm:$0xff] %v4637_v60  ;;  %4029 = vperm.xlu1 %5444, %v3527_v31   ;;  %v4103_v30 = vmul.f32 %v3875_v1, %v12189_v29  ;;  %v12191_v47 = vsub.f32 %v12190_v14, %v12186_v27  ;;  %v12200_v59 = vld [vmem:[#allocation246_spill] sm:$0xff]  ;;  %v12201_v17 = vld [vmem:[#allocation56_spill] sm:$0xff]  ;;  %v12207_v29 = vld [vmem:[#allocation59_spill] sm:$0xff]  ;;  %s5615_s7 = scalar_lea.vmem %s5172_s30, 37632  ;;  %p5620_p11 = scmp.lt.s32.totalorder %s5172_s30, %s5172_s30 }
 0x57f   :  { %v4102_v39 = vmul.f32 %v3875_v1, %v12187_v50  ;;  %v12193_v23 = vsub.f32 %v12192_v22, %v12186_v27  ;;  %v12195_v36 = vsub.f32 %v12194_v44, %v12186_v27  ;;  %4932 = vst [vmem:[#allocation7 + $0x1e0] sm:$0xff] %v4638_v56  ;;  %4933 = vst [vmem:[#allocation7 + $0x1e8] sm:$0xff] %v4639_v53  ;;  %v3885_v56 = vpop.permute.xlu0 %3884  ;;  %v12205_v50 = vld [vmem:[#allocation57_spill] sm:$0xff]  ;;  %p5616_p10 = scmp.ne.s32.totalorder %s5172_s30, %s5615_s7  ;;  %p5621_p12 = scmp.lt.s32.totalorder %s5615_s7, %s5615_s7 }
 0x580   :  { %v4104_v52 = vmul.f32 %v3875_v1, %v12191_v47  ;;  %4934 = vst.msk [vmem:[#allocation7 + $0x1f0] sm:$0xff] %vm640_vm1, %v4640_v25  ;;  %v12197_v16 = vsub.f32 %v12196_v11, %v12186_v27  ;;  %v12199_v21 = vsub.f32 %v12198_v49, %v12186_v27  ;;  %v12202_v51 = vsub.f32 %v12201_v17, %v8650_v15  ;;  %v12203_v25 = vld [vmem:[#allocation58_spill] sm:$0xff] }
 0x581   :  { %v4105_v32 = vmul.f32 %v3875_v1, %v12193_v23  ;;  %v4106_v8 = vmul.f32 %v3875_v1, %v12195_v36  ;;  %v4648_v12 = vadd.f32 %v12200_v59, %v4102_v39  ;;  %v4649_v45 = vadd.f32 %v12200_v59, %v4103_v30  ;;  %v12209_v47 = vld [vmem:[#allocation234_spill] sm:$0xff]  ;;  %v12211_v23 = vld [vmem:[#allocation237_spill] sm:$0xff]  ;;  %v12213_v36 = vld [vmem:[#allocation235_spill] sm:$0xff]  ;;  %p5622_p13 = por %p5621_p12, %p5620_p11 }
 0x582   :  { %v4107_v61 = vmul.f32 %v3875_v1, %v12197_v16  ;;  %v4108_v3 = vmul.f32 %v3875_v1, %v12199_v21  ;;  %v4109_v55 = vmul.f32 %v3880_v63, %v12202_v51  ;;  %v4650_v0 = vadd.f32 %v12200_v59, %v4104_v52  ;;  %4575 = vperm.xlu1 %5444, %v4367_v62   ;;  %v12215_v16 = vld [vmem:[#allocation245_spill] sm:$0xff]  ;;  %v3890_v51 = vpop.permute.xlu1 %3889 }
 0x583   :  { %v4651_v60 = vadd.f32 %v12200_v59, %v4105_v32  ;;  %v4652_v31 = vadd.f32 %v12200_v59, %v4106_v8  ;;  %4942 = vst [vmem:[#allocation7 + $0x230] sm:$0xff] %v4648_v12  ;;  %v12204_v42 = vsub.f32 %v12203_v25, %v8650_v15  ;;  %v12206_v39 = vsub.f32 %v12205_v50, %v8650_v15  ;;  %v12223_v25 = vld [vmem:[#allocation63_spill] sm:$0xff]  ;;  %p5623_p0 = pnand %p5622_p13, %p5616_p10 }
 0x584   :  { %v4653_v1 = vadd.f32 %v12200_v59, %v4107_v61  ;;  %v4654_v53 = vadd.f32 %v12200_v59, %v4108_v3  ;;  %4943 = vst [vmem:[#allocation7 + $0x238] sm:$0xff] %v4649_v45  ;;  %4944 = vst [vmem:[#allocation7 + $0x240] sm:$0xff] %v4650_v0  ;;  %v12208_v30 = vsub.f32 %v12207_v29, %v8650_v15  ;;  %v12216_v3 = vld [vmem:[#allocation60_spill] sm:$0xff]  ;;  %v12225_v50 = vld [vmem:[#allocation239_spill] sm:$0xff] }
 0x585   :  { %v4110_v27 = vmul.f32 %v3880_v63, %v12204_v42  ;;  %v4111_v40 = vmul.f32 %v3880_v63, %v12206_v39  ;;  %4945 = vst [vmem:[#allocation7 + $0x248] sm:$0xff] %v4651_v60  ;;  %4946 = vst [vmem:[#allocation7 + $0x250] sm:$0xff] %v4652_v31  ;;  %v12210_v52 = vsub.f32 %v12209_v47, %v8650_v15  ;;  %v12217_v59 = vld [vmem:[#allocation348_spill] sm:$0xff]  ;;  %v12221_v31 = vld [vmem:[#allocation61_spill] sm:$0xff] }
 0x586   :  { %v4112_v14 = vmul.f32 %v3880_v63, %v12208_v30  ;;  %v12212_v32 = vsub.f32 %v12211_v23, %v8650_v15  ;;  %v12214_v8 = vsub.f32 %v12213_v36, %v8650_v15  ;;  %4947 = vst [vmem:[#allocation7 + $0x258] sm:$0xff] %v4653_v1  ;;  %4948 = vst.msk [vmem:[#allocation7 + $0x260] sm:$0xff] %vm640_vm1, %v4654_v53  ;;  %v12227_v29 = vld [vmem:[#allocation159_spill] sm:$0xff]  ;;  %v12229_v47 = vld [vmem:[#allocation240_spill] sm:$0xff] }
 0x587   :  { %v4113_v22 = vmul.f32 %v3880_v63, %v12210_v52  ;;  %v4655_v61 = vadd.f32 %v12215_v16, %v4109_v55  ;;  %v4656_v49 = vadd.f32 %v12215_v16, %v4110_v27  ;;  %v4657_v21 = vadd.f32 %v12215_v16, %v4111_v40  ;;  %v12219_v55 = vld [vmem:[#allocation62_spill] sm:$0xff]  ;;  %v12233_v36 = vld [vmem:[#allocation349_spill] sm:$0xff] }
 0x588   :  { %v4114_v44 = vmul.f32 %v3880_v63, %v12212_v32  ;;  %v4115_v11 = vmul.f32 %v3880_v63, %v12214_v8  ;;  %v12218_v12 = vsub.f32 %v12216_v3, %v12217_v59  ;;  %v4658_v45 = vadd.f32 %v12215_v16, %v4112_v14  ;;  %v12231_v23 = vld [vmem:[#allocation250_spill] sm:$0xff]  ;;  %v3895_v3 = vpop.permute.xlu0 %3894 }
 0x589   :  { %v4659_v15 = vadd.f32 %v12215_v16, %v4113_v22  ;;  %4949 = vst [vmem:[#allocation7 + $0x268] sm:$0xff] %v4655_v61  ;;  %4950 = vst [vmem:[#allocation7 + $0x270] sm:$0xff] %v4656_v49  ;;  %v12220_v0 = vsub.f32 %v12219_v55, %v12217_v59  ;;  %v12222_v1 = vsub.f32 %v12221_v31, %v12217_v59  ;;  %v12239_v55 = vld [vmem:[#allocation67_spill] sm:$0xff]  ;;  %v12241_v31 = vld [vmem:[#allocation162_spill] sm:$0xff] }
 0x58a   :  { %v4116_v17 = vmul.f32 %v3885_v56, %v12218_v12  ;;  %v4660_v63 = vadd.f32 %v12215_v16, %v4114_v44  ;;  %v4661_v62 = vadd.f32 %v12215_v16, %v4115_v11  ;;  %4951 = vst [vmem:[#allocation7 + $0x278] sm:$0xff] %v4657_v21  ;;  %v12224_v42 = vsub.f32 %v12223_v25, %v12217_v59  ;;  %v12232_v44 = vld [vmem:[#allocation64_spill] sm:$0xff]  ;;  %v12243_v25 = vld [vmem:[#allocation165_spill] sm:$0xff] }
 0x58b   :  { %v4117_v60 = vmul.f32 %v3885_v56, %v12220_v0  ;;  %v4118_v53 = vmul.f32 %v3885_v56, %v12222_v1  ;;  %v12226_v39 = vsub.f32 %v12225_v50, %v12217_v59  ;;  %4952 = vst [vmem:[#allocation7 + $0x280] sm:$0xff] %v4658_v45  ;;  %4953 = vst [vmem:[#allocation7 + $0x288] sm:$0xff] %v4659_v15  ;;  %v12237_v15 = vld [vmem:[#allocation65_spill] sm:$0xff]  ;;  %v12245_v50 = vld [vmem:[#allocation242_spill] sm:$0xff] }
 0x58c   :  { %v4119_v27 = vmul.f32 %v3885_v56, %v12224_v42  ;;  %4954 = vst [vmem:[#allocation7 + $0x290] sm:$0xff] %v4660_v63  ;;  %4955 = vst.msk [vmem:[#allocation7 + $0x298] sm:$0xff] %vm640_vm1, %v4661_v62  ;;  %v12228_v30 = vsub.f32 %v12227_v29, %v12217_v59  ;;  %v12230_v52 = vsub.f32 %v12229_v47, %v12217_v59  ;;  %v12247_v29 = vld [vmem:[#allocation248_spill] sm:$0xff] }
 0x58d   :  { %v4120_v40 = vmul.f32 %v3885_v56, %v12226_v39  ;;  %v4662_v32 = vadd.f32 %v12231_v23, %v4116_v17  ;;  %v12234_v8 = vsub.f32 %v12232_v44, %v12233_v36  ;;  %v4663_v16 = vadd.f32 %v12231_v23, %v4117_v60  ;;  %v3900_v44 = vpop.permute.xlu1 %3899 }
 0x58e   :  { %v4121_v14 = vmul.f32 %v3885_v56, %v12228_v30  ;;  %v4122_v22 = vmul.f32 %v3885_v56, %v12230_v52  ;;  %v4664_v61 = vadd.f32 %v12231_v23, %v4118_v53  ;;  %v4665_v49 = vadd.f32 %v12231_v23, %v4119_v27  ;;  %v12235_v56 = vld [vmem:[#allocation66_spill] sm:$0xff]  ;;  %v12248_v52 = vld [vmem:[#allocation68_spill] sm:$0xff] }
 0x58f   :  { %v4123_v11 = vmul.f32 %v3890_v51, %v12234_v8  ;;  %v4666_v21 = vadd.f32 %v12231_v23, %v4120_v40  ;;  %4956 = vst [vmem:[#allocation7 + $0x2a0] sm:$0xff] %v4662_v32  ;;  %v12236_v17 = vsub.f32 %v12235_v56, %v12233_v36  ;;  %v12238_v63 = vsub.f32 %v12237_v15, %v12233_v36  ;;  %v12255_v56 = vld [vmem:[#allocation71_spill] sm:$0xff]  ;;  %v12257_v15 = vld [vmem:[#allocation166_spill] sm:$0xff] }
 0x590   :  { %v4667_v12 = vadd.f32 %v12231_v23, %v4121_v14  ;;  %v4668_v59 = vadd.f32 %v12231_v23, %v4122_v22  ;;  %4957 = vst [vmem:[#allocation7 + $0x2a8] sm:$0xff] %v4663_v16  ;;  %4958 = vst [vmem:[#allocation7 + $0x2b0] sm:$0xff] %v4664_v61  ;;  %v12240_v0 = vsub.f32 %v12239_v55, %v12233_v36  ;;  %v12249_v22 = vld [vmem:[#allocation21_spill] sm:$0xff]  ;;  %v12259_v55 = vld [vmem:[#allocation167_spill] sm:$0xff] }
 0x591   :  { %v4124_v45 = vmul.f32 %v3890_v51, %v12236_v17  ;;  %v4125_v62 = vmul.f32 %v3890_v51, %v12238_v63  ;;  %4959 = vst [vmem:[#allocation7 + $0x2b8] sm:$0xff] %v4665_v49  ;;  %4960 = vst [vmem:[#allocation7 + $0x2c0] sm:$0xff] %v4666_v21  ;;  %v12242_v1 = vsub.f32 %v12241_v31, %v12233_v36  ;;  %v12253_v21 = vld [vmem:[#allocation69_spill] sm:$0xff]  ;;  %v12261_v31 = vld [vmem:[#allocation244_spill] sm:$0xff] }
 0x592   :  { %v4126_v60 = vmul.f32 %v3890_v51, %v12240_v0  ;;  %v12244_v42 = vsub.f32 %v12243_v25, %v12233_v36  ;;  %v12246_v39 = vsub.f32 %v12245_v50, %v12233_v36  ;;  %4961 = vst [vmem:[#allocation7 + $0x2c8] sm:$0xff] %v4667_v12  ;;  %4962 = vst.msk [vmem:[#allocation7 + $0x2d0] sm:$0xff] %vm640_vm1, %v4668_v59  ;;  %v12263_v25 = vld [vmem:[#allocation254_spill] sm:$0xff] }
 0x593   :  { %v4127_v53 = vmul.f32 %v3890_v51, %v12242_v1  ;;  %v4669_v30 = vadd.f32 %v12247_v29, %v4123_v11  ;;  %v4670_v14 = vadd.f32 %v12247_v29, %v4124_v45  ;;  %v4671_v47 = vadd.f32 %v12247_v29, %v4125_v62  ;;  %v12251_v11 = vld [vmem:[#allocation70_spill] sm:$0xff] }
 0x594   :  { %v4128_v27 = vmul.f32 %v3890_v51, %v12244_v42  ;;  %v4129_v40 = vmul.f32 %v3890_v51, %v12246_v39  ;;  %v12250_v23 = vsub.f32 %v12248_v52, %v12249_v22  ;;  %v4672_v8 = vadd.f32 %v12247_v29, %v4126_v60 }
 0x595   :  { %v4673_v16 = vadd.f32 %v12247_v29, %v4127_v53  ;;  %4963 = vst [vmem:[#allocation7 + $0x2d8] sm:$0xff] %v4669_v30  ;;  %4964 = vst [vmem:[#allocation7 + $0x2e0] sm:$0xff] %v4670_v14  ;;  %v12252_v61 = vsub.f32 %v12251_v11, %v12249_v22  ;;  %v12254_v12 = vsub.f32 %v12253_v21, %v12249_v22 }
 0x596   :  { %v4130_v32 = vmul.f32 %v3895_v3, %v12250_v23  ;;  %v4674_v51 = vadd.f32 %v12247_v29, %v4128_v27  ;;  %v4675_v36 = vadd.f32 %v12247_v29, %v4129_v40  ;;  %4965 = vst [vmem:[#allocation7 + $0x2e8] sm:$0xff] %v4671_v47  ;;  %v12256_v17 = vsub.f32 %v12255_v56, %v12249_v22  ;;  %v12264_v27 = vld [vmem:[#allocation72_spill] sm:$0xff]  ;;  %v3905_v47 = vpop.permute.xlu0 %3904 }
 0x597   :  { %v4131_v49 = vmul.f32 %v3895_v3, %v12252_v61  ;;  %v4132_v59 = vmul.f32 %v3895_v3, %v12254_v12  ;;  %v12258_v63 = vsub.f32 %v12257_v15, %v12249_v22  ;;  %4966 = vst [vmem:[#allocation7 + $0x2f0] sm:$0xff] %v4672_v8  ;;  %4967 = vst [vmem:[#allocation7 + $0x2f8] sm:$0xff] %v4673_v16  ;;  %v12268_v8 = vld [vmem:[#allocation73_spill] sm:$0xff]  ;;  %v12273_v12 = vld [vmem:[#allocation171_spill] sm:$0xff] }
 0x598   :  { %v4133_v45 = vmul.f32 %v3895_v3, %v12256_v17  ;;  %4968 = vst [vmem:[#allocation7 + $0x300] sm:$0xff] %v4674_v51  ;;  %4969 = vst.msk [vmem:[#allocation7 + $0x308] sm:$0xff] %vm640_vm1, %v4675_v36  ;;  %v12260_v0 = vsub.f32 %v12259_v55, %v12249_v22  ;;  %v12262_v1 = vsub.f32 %v12261_v31, %v12249_v22  ;;  %v12270_v36 = vld [vmem:[#allocation75_spill] sm:$0xff] }
 0x599   :  { %v4134_v62 = vmul.f32 %v3895_v3, %v12258_v63  ;;  %v4676_v42 = vadd.f32 %v12263_v25, %v4130_v32  ;;  %v12265_v50 = vsub.f32 %v12264_v27, %v8716_v35  ;;  %v4677_v40 = vadd.f32 %v12263_v25, %v4131_v49  ;;  %v12275_v17 = vld [vmem:[#allocation247_spill] sm:$0xff]  ;;  %v12277_v63 = vld [vmem:[#allocation252_spill] sm:$0xff] }
 0x59a   :  { %v4135_v60 = vmul.f32 %v3895_v3, %v12260_v0  ;;  %v4136_v53 = vmul.f32 %v3895_v3, %v12262_v1  ;;  %v4678_v29 = vadd.f32 %v12263_v25, %v4132_v59  ;;  %v4679_v30 = vadd.f32 %v12263_v25, %v4133_v45  ;;  %v12266_v3 = vld [vmem:[#allocation74_spill] sm:$0xff]  ;;  %v3910_v1 = vpop.permute.xlu1 %3909 }
 0x59b   :  { %v4137_v39 = vmul.f32 %v3900_v44, %v12265_v50  ;;  %v4680_v14 = vadd.f32 %v12263_v25, %v4134_v62  ;;  %4970 = vst [vmem:[#allocation7 + $0x310] sm:$0xff] %v4676_v42  ;;  %v12267_v23 = vsub.f32 %v12266_v3, %v8716_v35  ;;  %v12269_v16 = vsub.f32 %v12268_v8, %v8716_v35  ;;  %v12280_v42 = vld [vmem:[#allocation78_spill] sm:$0xff] }
 0x59c   :  { %v4681_v52 = vadd.f32 %v12263_v25, %v4135_v60  ;;  %v4682_v22 = vadd.f32 %v12263_v25, %v4136_v53  ;;  %4971 = vst [vmem:[#allocation7 + $0x318] sm:$0xff] %v4677_v40  ;;  %4972 = vst [vmem:[#allocation7 + $0x320] sm:$0xff] %v4678_v29  ;;  %v12271_v11 = vsub.f32 %v12270_v36, %v8716_v35  ;;  %v12278_v60 = vld [vmem:[#allocation76_spill] sm:$0xff] }
 0x59d   :  { %v4138_v32 = vmul.f32 %v3900_v44, %v12267_v23  ;;  %v4139_v51 = vmul.f32 %v3900_v44, %v12269_v16  ;;  %4973 = vst [vmem:[#allocation7 + $0x328] sm:$0xff] %v4679_v30  ;;  %4974 = vst [vmem:[#allocation7 + $0x330] sm:$0xff] %v4680_v14  ;;  %v12272_v49 = vsub.f32 %v11898_v37, %v8716_v35  ;;  %v12284_v30 = vld [vmem:[#allocation79_spill] sm:$0xff] }
 0x59e   :  { %v4140_v61 = vmul.f32 %v3900_v44, %v12271_v11  ;;  %v12274_v59 = vsub.f32 %v12273_v12, %v8716_v35  ;;  %v12276_v45 = vsub.f32 %v12275_v17, %v8716_v35  ;;  %4975 = vst [vmem:[#allocation7 + $0x338] sm:$0xff] %v4681_v52  ;;  %4976 = vst.msk [vmem:[#allocation7 + $0x340] sm:$0xff] %vm640_vm1, %v4682_v22  ;;  %v12286_v22 = vld [vmem:[#allocation172_spill] sm:$0xff] }
 0x59f   :  { %v4141_v21 = vmul.f32 %v3900_v44, %v12272_v49  ;;  %v4683_v62 = vadd.f32 %v12277_v63, %v4137_v39  ;;  %v4684_v55 = vadd.f32 %v12277_v63, %v4138_v32  ;;  %v4685_v0 = vadd.f32 %v12277_v63, %v4139_v51  ;;  %v12282_v39 = vld [vmem:[#allocation77_spill] sm:$0xff] }
 0x5a0   :  { %v4142_v56 = vmul.f32 %v3900_v44, %v12274_v59  ;;  %v4143_v15 = vmul.f32 %v3900_v44, %v12276_v45  ;;  %v12279_v37 = vsub.f32 %v12278_v60, %v8745_v48  ;;  %v4686_v53 = vadd.f32 %v12277_v63, %v4140_v61  ;;  %v12288_v32 = vld [vmem:[#allocation173_spill] sm:$0xff] }
 0x5a1   :  { %v4687_v25 = vadd.f32 %v12277_v63, %v4141_v21  ;;  %4977 = vst [vmem:[#allocation7 + $0x348] sm:$0xff] %v4683_v62  ;;  %4978 = vst [vmem:[#allocation7 + $0x350] sm:$0xff] %v4684_v55  ;;  %v12281_v27 = vsub.f32 %v12280_v42, %v8745_v48  ;;  %v12283_v40 = vsub.f32 %v12282_v39, %v8745_v48  ;;  %v12290_v51 = vld [vmem:[#allocation249_spill] sm:$0xff]  ;;  %v12293_v21 = vld [vmem:[#allocation80_spill] sm:$0xff] }
 0x5a2   :  { %v4144_v31 = vmul.f32 %v3905_v47, %v12279_v37  ;;  %v4688_v35 = vadd.f32 %v12277_v63, %v4142_v56  ;;  %v4689_v44 = vadd.f32 %v12277_v63, %v4143_v15  ;;  %4979 = vst [vmem:[#allocation7 + $0x358] sm:$0xff] %v4685_v0  ;;  %v12285_v14 = vsub.f32 %v12284_v30, %v8745_v48  ;;  %v12292_v61 = vld [vmem:[#allocation261_spill] sm:$0xff]  ;;  %v3915_v63 = vpop.permute.xlu0 %3914 }
 0x5a3   :  { %v4145_v50 = vmul.f32 %v3905_v47, %v12281_v27  ;;  %v4146_v29 = vmul.f32 %v3905_v47, %v12283_v40  ;;  %v12287_v3 = vsub.f32 %v12286_v22, %v8745_v48  ;;  %4980 = vst [vmem:[#allocation7 + $0x360] sm:$0xff] %v4686_v53  ;;  %4981 = vst [vmem:[#allocation7 + $0x368] sm:$0xff] %v4687_v25  ;;  %v12297_v60 = vld [vmem:[#allocation81_spill] sm:$0xff]  ;;  %v12299_v53 = vld [vmem:[#allocation83_spill] sm:$0xff] }
 0x5a4   :  { %v4147_v52 = vmul.f32 %v3905_v47, %v12285_v14  ;;  %4982 = vst [vmem:[#allocation7 + $0x370] sm:$0xff] %v4688_v35  ;;  %4983 = vst.msk [vmem:[#allocation7 + $0x378] sm:$0xff] %vm640_vm1, %v4689_v44  ;;  %v12289_v8 = vsub.f32 %v12288_v32, %v8745_v48  ;;  %v12291_v36 = vsub.f32 %v12290_v51, %v8745_v48  ;;  %v12301_v44 = vld [vmem:[#allocation176_spill] sm:$0xff] }
 0x5a5   :  { %v4148_v23 = vmul.f32 %v3905_v47, %v12287_v3  ;;  %v4690_v49 = vadd.f32 %v12292_v61, %v4144_v31  ;;  %v12294_v12 = vsub.f32 %v12293_v21, %v8765_v18  ;;  %v4691_v56 = vadd.f32 %v12292_v61, %v4145_v50  ;;  %v12303_v50 = vld [vmem:[#allocation253_spill] sm:$0xff]  ;;  %v12308_v32 = vld [vmem:[#allocation84_spill] sm:$0xff] }
 0x5a6   :  { %v4149_v16 = vmul.f32 %v3905_v47, %v12289_v8  ;;  %v4150_v11 = vmul.f32 %v3905_v47, %v12291_v36  ;;  %v4692_v17 = vadd.f32 %v12292_v61, %v4146_v29  ;;  %v4693_v45 = vadd.f32 %v12292_v61, %v4147_v52  ;;  %v12295_v47 = vld [vmem:[#allocation82_spill] sm:$0xff]  ;;  %v12305_v29 = vld [vmem:[#allocation251_spill] sm:$0xff]  ;;  %v3920_v36 = vpop.permute.xlu1 %3919 }
 0x5a7   :  { %v4151_v59 = vmul.f32 %v3910_v1, %v12294_v12  ;;  %v4694_v15 = vadd.f32 %v12292_v61, %v4148_v23  ;;  %4984 = vst [vmem:[#allocation7 + $0x380] sm:$0xff] %v4690_v49  ;;  %v12296_v55 = vsub.f32 %v12295_v47, %v8765_v18  ;;  %v12298_v37 = vsub.f32 %v12297_v60, %v8765_v18  ;;  %v12307_v52 = vld [vmem:[#allocation258_spill] sm:$0xff]  ;;  %v12309_v8 = vld [vmem:[#allocation19_spill] sm:$0xff] }
 0x5a8   :  { %v4695_v62 = vadd.f32 %v12292_v61, %v4149_v16  ;;  %v4696_v48 = vadd.f32 %v12292_v61, %v4150_v11  ;;  %4985 = vst [vmem:[#allocation7 + $0x388] sm:$0xff] %v4691_v56  ;;  %4986 = vst [vmem:[#allocation7 + $0x390] sm:$0xff] %v4692_v17  ;;  %v12300_v25 = vsub.f32 %v12299_v53, %v8765_v18  ;;  %v12311_v49 = vld [vmem:[#allocation86_spill] sm:$0xff] }
 0x5a9   :  { %v4152_v0 = vmul.f32 %v3910_v1, %v12296_v55  ;;  %v4153_v31 = vmul.f32 %v3910_v1, %v12298_v37  ;;  %4987 = vst [vmem:[#allocation7 + $0x398] sm:$0xff] %v4693_v45  ;;  %4988 = vst [vmem:[#allocation7 + $0x3a0] sm:$0xff] %v4694_v15  ;;  %v12302_v42 = vsub.f32 %v12301_v44, %v8765_v18  ;;  %v12315_v45 = vld [vmem:[#allocation87_spill] sm:$0xff] }
 0x5aa   :  { %v4154_v35 = vmul.f32 %v3910_v1, %v12300_v25  ;;  %v12304_v39 = vsub.f32 %v12303_v50, %v8765_v18  ;;  %v12306_v30 = vsub.f32 %v12305_v29, %v8765_v18  ;;  %4989 = vst [vmem:[#allocation7 + $0x3a8] sm:$0xff] %v4695_v62  ;;  %4990 = vst.msk [vmem:[#allocation7 + $0x3b0] sm:$0xff] %vm640_vm1, %v4696_v48  ;;  %v12317_v48 = vld [vmem:[#allocation255_spill] sm:$0xff] }
 0x5ab   :  { %v4155_v27 = vmul.f32 %v3910_v1, %v12302_v42  ;;  %v4697_v22 = vadd.f32 %v12307_v52, %v4151_v59  ;;  %v4698_v3 = vadd.f32 %v12307_v52, %v4152_v0  ;;  %v4699_v23 = vadd.f32 %v12307_v52, %v4153_v31  ;;  %v12313_v59 = vld [vmem:[#allocation85_spill] sm:$0xff]  ;;  %v12321_v31 = vld [vmem:[#allocation256_spill] sm:$0xff] }
 0x5ac   :  { %v4156_v40 = vmul.f32 %v3910_v1, %v12304_v39  ;;  %v4157_v14 = vmul.f32 %v3910_v1, %v12306_v30  ;;  %v12310_v16 = vsub.f32 %v12308_v32, %v12309_v8  ;;  %v4700_v11 = vadd.f32 %v12307_v52, %v4154_v35  ;;  %v12319_v0 = vld [vmem:[#allocation257_spill] sm:$0xff]  ;;  %v12323_v35 = vld [vmem:[#allocation267_spill] sm:$0xff]  ;;  %v12324_v42 = vld [vmem:[#allocation88_spill] sm:$0xff] }
 0x5ad   :  { %v4701_v61 = vadd.f32 %v12307_v52, %v4155_v27  ;;  %4991 = vst [vmem:[#allocation7 + $0x3b8] sm:$0xff] %v4697_v22  ;;  %4992 = vst [vmem:[#allocation7 + $0x3c0] sm:$0xff] %v4698_v3  ;;  %v12312_v21 = vsub.f32 %v12311_v49, %v12309_v8  ;;  %v12314_v56 = vsub.f32 %v12313_v59, %v12309_v8  ;;  %v12325_v27 = vld [vmem:[#allocation18_spill] sm:$0xff] }
 0x5ae   :  { %v4158_v51 = vmul.f32 %v3915_v63, %v12310_v16  ;;  %v4702_v18 = vadd.f32 %v12307_v52, %v4156_v40  ;;  %v4703_v1 = vadd.f32 %v12307_v52, %v4157_v14  ;;  %4993 = vst [vmem:[#allocation7 + $0x3c8] sm:$0xff] %v4699_v23  ;;  %v12316_v15 = vsub.f32 %v12315_v45, %v12309_v8  ;;  %v3925_v52 = vpop.permute.xlu0 %3924 }
 0x5af   :  { %v4159_v12 = vmul.f32 %v3915_v63, %v12312_v21  ;;  %v4160_v17 = vmul.f32 %v3915_v63, %v12314_v56  ;;  %v12318_v47 = vsub.f32 %v12317_v48, %v12309_v8  ;;  %4994 = vst [vmem:[#allocation7 + $0x3d0] sm:$0xff] %v4700_v11  ;;  %4995 = vst [vmem:[#allocation7 + $0x3d8] sm:$0xff] %v4701_v61  ;;  %v12331_v11 = vld [vmem:[#allocation91_spill] sm:$0xff] }
 0x5b0   :  { %v4161_v62 = vmul.f32 %v3915_v63, %v12316_v15  ;;  %4996 = vst [vmem:[#allocation7 + $0x3e0] sm:$0xff] %v4702_v18  ;;  %4997 = vst.msk [vmem:[#allocation7 + $0x3e8] sm:$0xff] %vm640_vm1, %v4703_v1  ;;  %v12320_v60 = vsub.f32 %v12319_v0, %v12309_v8  ;;  %v12322_v53 = vsub.f32 %v12321_v31, %v12309_v8  ;;  %v12329_v8 = vld [vmem:[#allocation89_spill] sm:$0xff]  ;;  %v12333_v1 = vld [vmem:[#allocation259_spill] sm:$0xff]  ;;  %v3930_v31 = vpop.permute.xlu1 %3929 }
 0x5b1   :  { %v4162_v55 = vmul.f32 %v3915_v63, %v12318_v47  ;;  %v4704_v44 = vadd.f32 %v12323_v35, %v4158_v51  ;;  %v12326_v50 = vsub.f32 %v12324_v42, %v12325_v27  ;;  %v4705_v40 = vadd.f32 %v12323_v35, %v4159_v12  ;;  %v12335_v12 = vld [vmem:[#allocation262_spill] sm:$0xff]  ;;  %v12340_v0 = vld [vmem:[#allocation92_spill] sm:$0xff] }
 0x5b2   :  { %v4163_v37 = vmul.f32 %v3915_v63, %v12320_v60  ;;  %v4164_v25 = vmul.f32 %v3915_v63, %v12322_v53  ;;  %v4706_v29 = vadd.f32 %v12323_v35, %v4160_v17  ;;  %v4707_v30 = vadd.f32 %v12323_v35, %v4161_v62  ;;  %v12327_v63 = vld [vmem:[#allocation90_spill] sm:$0xff]  ;;  %v12337_v17 = vld [vmem:[#allocation260_spill] sm:$0xff]  ;;  %v12339_v62 = vld [vmem:[#allocation265_spill] sm:$0xff] }
 0x5b3   :  { %v4165_v39 = vmul.f32 %v3920_v36, %v12326_v50  ;;  %v4708_v14 = vadd.f32 %v12323_v35, %v4162_v55  ;;  %4998 = vst [vmem:[#allocation7 + $0x3f0] sm:$0xff] %v4704_v44  ;;  %v12328_v23 = vsub.f32 %v12327_v63, %v12325_v27  ;;  %v12330_v16 = vsub.f32 %v12329_v8, %v12325_v27  ;;  %v12342_v44 = vld [vmem:[#allocation94_spill] sm:$0xff]  ;;  %v12344_v50 = vld [vmem:[#allocation93_spill] sm:$0xff] }
 0x5b4   :  { %v4709_v22 = vadd.f32 %v12323_v35, %v4163_v37  ;;  %v4710_v3 = vadd.f32 %v12323_v35, %v4164_v25  ;;  %4999 = vst [vmem:[#allocation7 + $0x3f8] sm:$0xff] %v4705_v40  ;;  %5000 = vst [vmem:[#allocation7 + $0x400] sm:$0xff] %v4706_v29  ;;  %v12332_v61 = vsub.f32 %v12331_v11, %v12325_v27  ;;  %v12346_v29 = vld [vmem:[#allocation95_spill] sm:$0xff] }
 0x5b5   :  { %v4166_v32 = vmul.f32 %v3920_v36, %v12328_v23  ;;  %v4167_v51 = vmul.f32 %v3920_v36, %v12330_v16  ;;  %5001 = vst [vmem:[#allocation7 + $0x408] sm:$0xff] %v4707_v30  ;;  %5002 = vst [vmem:[#allocation7 + $0x410] sm:$0xff] %v4708_v14  ;;  %v12334_v49 = vsub.f32 %v12333_v1, %v12325_v27  ;;  %v12350_v23 = vld [vmem:[#allocation266_spill] sm:$0xff]  ;;  %v12352_v16 = vld [vmem:[#allocation264_spill] sm:$0xff] }
 0x5b6   :  { %v4168_v18 = vmul.f32 %v3920_v36, %v12332_v61  ;;  %v12336_v59 = vsub.f32 %v12335_v12, %v12325_v27  ;;  %v12338_v45 = vsub.f32 %v12337_v17, %v12325_v27  ;;  %5003 = vst [vmem:[#allocation7 + $0x418] sm:$0xff] %v4709_v22  ;;  %5004 = vst.msk [vmem:[#allocation7 + $0x420] sm:$0xff] %vm640_vm1, %v4710_v3  ;;  %v12348_v22 = vld [vmem:[#allocation263_spill] sm:$0xff]  ;;  %v12355_v1 = vld [vmem:[#allocation96_spill] sm:$0xff] }
 0x5b7   :  { %v4169_v21 = vmul.f32 %v3920_v36, %v12334_v49  ;;  %v4711_v48 = vadd.f32 %v12339_v62, %v4165_v39  ;;  %v4712_v47 = vadd.f32 %v12339_v62, %v4166_v32  ;;  %v4713_v55 = vadd.f32 %v12339_v62, %v4167_v51  ;;  %v12354_v61 = vld [vmem:[#allocation271_spill] sm:$0xff]  ;;  %v12356_v49 = vld [vmem:[#allocation28_spill] sm:$0xff] }
 0x5b8   :  { %v4170_v56 = vmul.f32 %v3920_v36, %v12336_v59  ;;  %v4171_v15 = vmul.f32 %v3920_v36, %v12338_v45  ;;  %v12341_v60 = vsub.f32 %v12340_v0, %v8840_v58  ;;  %v4714_v53 = vadd.f32 %v12339_v62, %v4168_v18 }
 0x5b9   :  { %v4715_v25 = vadd.f32 %v12339_v62, %v4169_v21  ;;  %5005 = vst [vmem:[#allocation7 + $0x428] sm:$0xff] %v4711_v48  ;;  %5006 = vst [vmem:[#allocation7 + $0x430] sm:$0xff] %v4712_v47  ;;  %v12343_v42 = vsub.f32 %v12342_v44, %v8840_v58  ;;  %v12345_v39 = vsub.f32 %v12344_v50, %v8840_v58 }
 0x5ba   :  { %v4172_v37 = vmul.f32 %v3925_v52, %v12341_v60  ;;  %v4716_v36 = vadd.f32 %v12339_v62, %v4170_v56  ;;  %v4717_v35 = vadd.f32 %v12339_v62, %v4171_v15  ;;  %5007 = vst [vmem:[#allocation7 + $0x438] sm:$0xff] %v4713_v55  ;;  %v12347_v30 = vsub.f32 %v12346_v29, %v8840_v58  ;;  %v3935_v15 = vpop.permute.xlu0 %3934  ;;  %v12360_v55 = vld [vmem:[#allocation97_spill] sm:$0xff] }
 0x5bb   :  { %v4173_v27 = vmul.f32 %v3925_v52, %v12343_v42  ;;  %v4174_v40 = vmul.f32 %v3925_v52, %v12345_v39  ;;  %v12349_v3 = vsub.f32 %v12348_v22, %v8840_v58  ;;  %5008 = vst [vmem:[#allocation7 + $0x440] sm:$0xff] %v4714_v53  ;;  %5009 = vst [vmem:[#allocation7 + $0x448] sm:$0xff] %v4715_v25  ;;  %v12366_v42 = vld [vmem:[#allocation190_spill] sm:$0xff]  ;;  %v12368_v39 = vld [vmem:[#allocation268_spill] sm:$0xff] }
 0x5bc   :  { %v4175_v14 = vmul.f32 %v3925_v52, %v12347_v30  ;;  %5010 = vst [vmem:[#allocation7 + $0x450] sm:$0xff] %v4716_v36  ;;  %5011 = vst.msk [vmem:[#allocation7 + $0x458] sm:$0xff] %vm640_vm1, %v4717_v35  ;;  %v12351_v32 = vsub.f32 %v12350_v23, %v8840_v58  ;;  %v12353_v51 = vsub.f32 %v12352_v16, %v8840_v58  ;;  %v12364_v36 = vld [vmem:[#allocation189_spill] sm:$0xff] }
 0x5bd   :  { %v4176_v63 = vmul.f32 %v3925_v52, %v12349_v3  ;;  %v4718_v18 = vadd.f32 %v12354_v61, %v4172_v37  ;;  %v12357_v21 = vsub.f32 %v12355_v1, %v12356_v49  ;;  %v4719_v59 = vadd.f32 %v12354_v61, %v4173_v27  ;;  %v12362_v37 = vld [vmem:[#allocation99_spill] sm:$0xff]  ;;  %v12370_v30 = vld [vmem:[#allocation269_spill] sm:$0xff] }
 0x5be   :  { %v4177_v8 = vmul.f32 %v3925_v52, %v12351_v32  ;;  %v4178_v11 = vmul.f32 %v3925_v52, %v12353_v51  ;;  %v4720_v56 = vadd.f32 %v12354_v61, %v4174_v40  ;;  %v4721_v17 = vadd.f32 %v12354_v61, %v4175_v14  ;;  %v12358_v52 = vld [vmem:[#allocation98_spill] sm:$0xff] }
 0x5bf   :  { %v4179_v12 = vmul.f32 %v3930_v31, %v12357_v21  ;;  %v4722_v45 = vadd.f32 %v12354_v61, %v4176_v63  ;;  %5012 = vst [vmem:[#allocation7 + $0x460] sm:$0xff] %v4718_v18  ;;  %v12359_v48 = vsub.f32 %v12358_v52, %v12356_v49  ;;  %v12361_v0 = vsub.f32 %v12360_v55, %v12356_v49  ;;  %v12371_v63 = vld [vmem:[#allocation100_spill] sm:$0xff]  ;;  %v12381_v52 = vld [vmem:[#allocation194_spill] sm:$0xff] }
 0x5c0   :  { %v4723_v62 = vadd.f32 %v12354_v61, %v4177_v8  ;;  %v4724_v58 = vadd.f32 %v12354_v61, %v4178_v11  ;;  %5013 = vst [vmem:[#allocation7 + $0x468] sm:$0xff] %v4719_v59  ;;  %5014 = vst [vmem:[#allocation7 + $0x470] sm:$0xff] %v4720_v56  ;;  %v12363_v53 = vsub.f32 %v12362_v37, %v12356_v49  ;;  %v3940_v8 = vpop.permute.xlu1 %3939  ;;  %v12373_v61 = vld [vmem:[#allocation102_spill] sm:$0xff]  ;;  %v12377_v59 = vld [vmem:[#allocation103_spill] sm:$0xff] }
 0x5c1   :  { %v4180_v47 = vmul.f32 %v3930_v31, %v12359_v48  ;;  %v4181_v60 = vmul.f32 %v3930_v31, %v12361_v0  ;;  %5015 = vst [vmem:[#allocation7 + $0x478] sm:$0xff] %v4721_v17  ;;  %5016 = vst [vmem:[#allocation7 + $0x480] sm:$0xff] %v4722_v45  ;;  %v12365_v35 = vsub.f32 %v12364_v36, %v12356_v49  ;;  %v12379_v45 = vld [vmem:[#allocation193_spill] sm:$0xff]  ;;  %v12383_v55 = vld [vmem:[#allocation270_spill] sm:$0xff] }
 0x5c2   :  { %v4182_v25 = vmul.f32 %v3930_v31, %v12363_v53  ;;  %v12367_v27 = vsub.f32 %v12366_v42, %v12356_v49  ;;  %v12369_v40 = vsub.f32 %v12368_v39, %v12356_v49  ;;  %5017 = vst [vmem:[#allocation7 + $0x488] sm:$0xff] %v4723_v62  ;;  %5018 = vst.msk [vmem:[#allocation7 + $0x490] sm:$0xff] %vm640_vm1, %v4724_v58  ;;  %v12375_v49 = vld [vmem:[#allocation101_spill] sm:$0xff]  ;;  %v12385_v37 = vld [vmem:[#allocation274_spill] sm:$0xff]  ;;  %v3945_v39 = vpop.permute.xlu0 %3944 }
 0x5c3   :  { %v4183_v44 = vmul.f32 %v3930_v31, %v12365_v35  ;;  %v4725_v14 = vadd.f32 %v12370_v30, %v4179_v12  ;;  %v4726_v22 = vadd.f32 %v12370_v30, %v4180_v47  ;;  %v4727_v3 = vadd.f32 %v12370_v30, %v4181_v60 }
 0x5c4   :  { %v4184_v50 = vmul.f32 %v3930_v31, %v12367_v27  ;;  %v4185_v29 = vmul.f32 %v3930_v31, %v12369_v40  ;;  %v12372_v23 = vsub.f32 %v12371_v63, %v8890_v24  ;;  %v4728_v16 = vadd.f32 %v12370_v30, %v4182_v25  ;;  %v12386_v25 = vld [vmem:[#allocation104_spill] sm:$0xff] }
 0x5c5   :  { %v4729_v51 = vadd.f32 %v12370_v30, %v4183_v44  ;;  %5019 = vst [vmem:[#allocation7 + $0x498] sm:$0xff] %v4725_v14  ;;  %5020 = vst [vmem:[#allocation7 + $0x4a0] sm:$0xff] %v4726_v22  ;;  %v12374_v18 = vsub.f32 %v12373_v61, %v8890_v24  ;;  %v12376_v21 = vsub.f32 %v12375_v49, %v8890_v24  ;;  %v12397_v61 = vld [vmem:[#allocation272_spill] sm:$0xff]  ;;  %v12399_v49 = vld [vmem:[#allocation273_spill] sm:$0xff] }
 0x5c6   :  { %v4186_v32 = vmul.f32 %v3935_v15, %v12372_v23  ;;  %v4730_v31 = vadd.f32 %v12370_v30, %v4184_v50  ;;  %v4731_v11 = vadd.f32 %v12370_v30, %v4185_v29  ;;  %5021 = vst [vmem:[#allocation7 + $0x4a8] sm:$0xff] %v4727_v3  ;;  %v12378_v56 = vsub.f32 %v12377_v59, %v8890_v24  ;;  %v12389_v30 = vld [vmem:[#allocation105_spill] sm:$0xff]  ;;  %v12391_v3 = vld [vmem:[#allocation107_spill] sm:$0xff] }
 0x5c7   :  { %v4187_v1 = vmul.f32 %v3935_v15, %v12374_v18  ;;  %v4188_v12 = vmul.f32 %v3935_v15, %v12376_v21  ;;  %v12380_v62 = vsub.f32 %v12379_v45, %v8890_v24  ;;  %5022 = vst [vmem:[#allocation7 + $0x4b0] sm:$0xff] %v4728_v16  ;;  %5023 = vst [vmem:[#allocation7 + $0x4b8] sm:$0xff] %v4729_v51 }
 0x5c8   :  { %v4189_v17 = vmul.f32 %v3935_v15, %v12378_v56  ;;  %5024 = vst [vmem:[#allocation7 + $0x4c0] sm:$0xff] %v4730_v31  ;;  %5025 = vst.msk [vmem:[#allocation7 + $0x4c8] sm:$0xff] %vm640_vm1, %v4731_v11  ;;  %v12382_v48 = vsub.f32 %v12381_v52, %v8890_v24  ;;  %v12384_v0 = vsub.f32 %v12383_v55, %v8890_v24  ;;  %v12395_v31 = vld [vmem:[#allocation199_spill] sm:$0xff]  ;;  %v12400_v56 = vld [vmem:[#allocation108_spill] sm:$0xff] }
 0x5c9   :  { %v4190_v58 = vmul.f32 %v3935_v15, %v12380_v62  ;;  %v4732_v53 = vadd.f32 %v12385_v37, %v4186_v32  ;;  %v12387_v36 = vsub.f32 %v12386_v25, %v8915_v19  ;;  %v4733_v44 = vadd.f32 %v12385_v37, %v4187_v1  ;;  %v12393_v32 = vld [vmem:[#allocation195_spill] sm:$0xff]  ;;  %v3950_v62 = vpop.permute.xlu1 %3949 }
 0x5ca   :  { %v4191_v47 = vmul.f32 %v3935_v15, %v12382_v48  ;;  %v4192_v60 = vmul.f32 %v3935_v15, %v12384_v0  ;;  %v4734_v42 = vadd.f32 %v12385_v37, %v4188_v12  ;;  %v4735_v27 = vadd.f32 %v12385_v37, %v4189_v17  ;;  %v12402_v48 = vld [vmem:[#allocation110_spill] sm:$0xff]  ;;  %v12404_v0 = vld [vmem:[#allocation109_spill] sm:$0xff] }
 0x5cb   :  { %v4193_v35 = vmul.f32 %v3940_v8, %v12387_v36  ;;  %v4736_v50 = vadd.f32 %v12385_v37, %v4190_v58  ;;  %5026 = vst [vmem:[#allocation7 + $0x4d0] sm:$0xff] %v4732_v53  ;;  %v12388_v15 = vsub.f32 %v11950_v20, %v8915_v19  ;;  %v12390_v14 = vsub.f32 %v12389_v30, %v8915_v19  ;;  %v12406_v53 = vld [vmem:[#allocation111_spill] sm:$0xff] }
 0x5cc   :  { %v4737_v40 = vadd.f32 %v12385_v37, %v4191_v47  ;;  %v4738_v24 = vadd.f32 %v12385_v37, %v4192_v60  ;;  %5027 = vst [vmem:[#allocation7 + $0x4d8] sm:$0xff] %v4733_v44  ;;  %5028 = vst [vmem:[#allocation7 + $0x4e0] sm:$0xff] %v4734_v42  ;;  %v12392_v63 = vsub.f32 %v12391_v3, %v8915_v19  ;;  %v12409_v42 = vld [vmem:[#allocation276_spill] sm:$0xff] }
 0x5cd   :  { %v4194_v29 = vmul.f32 %v3940_v8, %v12388_v15  ;;  %v4195_v22 = vmul.f32 %v3940_v8, %v12390_v14  ;;  %5029 = vst [vmem:[#allocation7 + $0x4e8] sm:$0xff] %v4735_v27  ;;  %5030 = vst [vmem:[#allocation7 + $0x4f0] sm:$0xff] %v4736_v50  ;;  %v12394_v16 = vsub.f32 %v12393_v32, %v8915_v19  ;;  %v12414_v14 = vld [vmem:[#allocation112_spill] sm:$0xff] }
 0x5ce   :  { %v4196_v23 = vmul.f32 %v3940_v8, %v12392_v63  ;;  %v12396_v20 = vsub.f32 %v12395_v31, %v8915_v19  ;;  %v12398_v18 = vsub.f32 %v12397_v61, %v8915_v19  ;;  %5031 = vst [vmem:[#allocation7 + $0x4f8] sm:$0xff] %v4737_v40  ;;  %5032 = vst.msk [vmem:[#allocation7 + $0x500] sm:$0xff] %vm640_vm1, %v4738_v24  ;;  %v12411_v40 = vld [vmem:[#allocation275_spill] sm:$0xff] }
 0x5cf   :  { %v4197_v51 = vmul.f32 %v3940_v8, %v12394_v16  ;;  %v4739_v21 = vadd.f32 %v12399_v49, %v4193_v35  ;;  %v4740_v12 = vadd.f32 %v12399_v49, %v4194_v29  ;;  %v4741_v59 = vadd.f32 %v12399_v49, %v4195_v22  ;;  %v12413_v29 = vld [vmem:[#allocation280_spill] sm:$0xff]  ;;  %v3955_v16 = vpop.permute.xlu0 %3954 }
 0x5d0   :  { %v4198_v11 = vmul.f32 %v3940_v8, %v12396_v20  ;;  %v4199_v1 = vmul.f32 %v3940_v8, %v12398_v18  ;;  %v12401_v17 = vsub.f32 %v12400_v56, %v8940_v46  ;;  %v4742_v58 = vadd.f32 %v12399_v49, %v4196_v23 }
 0x5d1   :  { %v4743_v52 = vadd.f32 %v12399_v49, %v4197_v51  ;;  %5033 = vst [vmem:[#allocation7 + $0x508] sm:$0xff] %v4739_v21  ;;  %5034 = vst [vmem:[#allocation7 + $0x510] sm:$0xff] %v4740_v12  ;;  %v12403_v47 = vsub.f32 %v12402_v48, %v8940_v46  ;;  %v12405_v60 = vsub.f32 %v12404_v0, %v8940_v46  ;;  %v12422_v12 = vld [vmem:[#allocation278_spill] sm:$0xff]  ;;  %v12428_v0 = vld [vmem:[#allocation116_spill] sm:$0xff] }
 0x5d2   :  { %v4200_v45 = vmul.f32 %v3945_v39, %v12401_v17  ;;  %v4744_v19 = vadd.f32 %v12399_v49, %v4198_v11  ;;  %v4745_v8 = vadd.f32 %v12399_v49, %v4199_v1  ;;  %5035 = vst [vmem:[#allocation7 + $0x518] sm:$0xff] %v4741_v59  ;;  %v12407_v25 = vsub.f32 %v12406_v53, %v8940_v46  ;;  %v12418_v11 = vld [vmem:[#allocation113_spill] sm:$0xff]  ;;  %v12420_v1 = vld [vmem:[#allocation115_spill] sm:$0xff]  ;;  %v3960_v53 = vpop.permute.xlu1 %3959 }
 0x5d3   :  { %v4201_v55 = vmul.f32 %v3945_v39, %v12403_v47  ;;  %v4202_v37 = vmul.f32 %v3945_v39, %v12405_v60  ;;  %v12408_v35 = vsub.f32 %v8107_v4, %v8940_v46  ;;  %5036 = vst [vmem:[#allocation7 + $0x520] sm:$0xff] %v4742_v58  ;;  %5037 = vst [vmem:[#allocation7 + $0x528] sm:$0xff] %v4743_v52  ;;  %v12424_v17 = vld [vmem:[#allocation281_spill] sm:$0xff] }
 0x5d4   :  { %v4203_v36 = vmul.f32 %v3945_v39, %v12407_v25  ;;  %5038 = vst [vmem:[#allocation7 + $0x530] sm:$0xff] %v4744_v19  ;;  %5039 = vst.msk [vmem:[#allocation7 + $0x538] sm:$0xff] %vm640_vm1, %v4745_v8  ;;  %v12410_v27 = vsub.f32 %v12409_v42, %v8940_v46  ;;  %v12412_v24 = vsub.f32 %v12411_v40, %v8940_v46  ;;  %v12427_v8 = vld [vmem:[#allocation277_spill] sm:$0xff]  ;;  %v12434_v40 = vld [vmem:[#allocation119_spill] sm:$0xff] }
 0x5d5   :  { %v4204_v44 = vmul.f32 %v3945_v39, %v12408_v35  ;;  %v4746_v30 = vadd.f32 %v12413_v29, %v4200_v45  ;;  %v12415_v22 = vsub.f32 %v12414_v14, %v8965_v2  ;;  %v4747_v3 = vadd.f32 %v12413_v29, %v4201_v55  ;;  %v12432_v42 = vld [vmem:[#allocation117_spill] sm:$0xff] }
 0x5d6   :  { %v4205_v50 = vmul.f32 %v3945_v39, %v12410_v27  ;;  %v4206_v15 = vmul.f32 %v3945_v39, %v12412_v24  ;;  %v4748_v63 = vadd.f32 %v12413_v29, %v4202_v37  ;;  %v4749_v23 = vadd.f32 %v12413_v29, %v4203_v36  ;;  %v12416_v39 = vld [vmem:[#allocation114_spill] sm:$0xff] }
 0x5d7   :  { %v4207_v4 = vmul.f32 %v3950_v62, %v12415_v22  ;;  %v4750_v32 = vadd.f32 %v12413_v29, %v4204_v44  ;;  %5040 = vst [vmem:[#allocation7 + $0x540] sm:$0xff] %v4746_v30  ;;  %v12417_v31 = vsub.f32 %v12416_v39, %v8965_v2  ;;  %v12419_v61 = vsub.f32 %v12418_v11, %v8965_v2  ;;  %v12438_v22 = vld [vmem:[#allocation285_spill] sm:$0xff]  ;;  %v12443_v39 = vld [vmem:[#allocation120_spill] sm:$0xff] }
 0x5d8   :  { %v4751_v51 = vadd.f32 %v12413_v29, %v4205_v50  ;;  %v4752_v46 = vadd.f32 %v12413_v29, %v4206_v15  ;;  %5041 = vst [vmem:[#allocation7 + $0x548] sm:$0xff] %v4747_v3  ;;  %5042 = vst [vmem:[#allocation7 + $0x550] sm:$0xff] %v4748_v63  ;;  %v12421_v49 = vsub.f32 %v12420_v1, %v8965_v2  ;;  %v12436_v29 = vld [vmem:[#allocation282_spill] sm:$0xff]  ;;  %v12440_v63 = vld [vmem:[#allocation283_spill] sm:$0xff] }
 0x5d9   :  { %v4208_v20 = vmul.f32 %v3950_v62, %v12417_v31  ;;  %v4209_v18 = vmul.f32 %v3950_v62, %v12419_v61  ;;  %5043 = vst [vmem:[#allocation7 + $0x558] sm:$0xff] %v4749_v23  ;;  %5044 = vst [vmem:[#allocation7 + $0x560] sm:$0xff] %v4750_v32  ;;  %v12423_v59 = vsub.f32 %v12422_v12, %v8965_v2 }
 0x5da   :  { %v4210_v21 = vmul.f32 %v3950_v62, %v12421_v49  ;;  %v12425_v45 = vsub.f32 %v12424_v17, %v8965_v2  ;;  %v12426_v52 = vsub.f32 %v11966_v54, %v8965_v2  ;;  %5045 = vst [vmem:[#allocation7 + $0x568] sm:$0xff] %v4751_v51  ;;  %5046 = vst.msk [vmem:[#allocation7 + $0x570] sm:$0xff] %vm640_vm1, %v4752_v46  ;;  %v12442_v51 = vld [vmem:[#allocation286_spill] sm:$0xff]  ;;  %v3965_v49 = vpop.permute.xlu0 %3964 }
 0x5db   :  { %v4211_v56 = vmul.f32 %v3950_v62, %v12423_v59  ;;  %v4753_v48 = vadd.f32 %v12427_v8, %v4207_v4  ;;  %v4754_v47 = vadd.f32 %v12427_v8, %v4208_v20  ;;  %v4755_v55 = vadd.f32 %v12427_v8, %v4209_v18 }
 0x5dc   :  { %v4212_v58 = vmul.f32 %v3950_v62, %v12425_v45  ;;  %v4213_v19 = vmul.f32 %v3950_v62, %v12426_v52  ;;  %v12429_v60 = vsub.f32 %v12428_v0, %v8990_v9  ;;  %v4756_v25 = vadd.f32 %v12427_v8, %v4210_v21  ;;  %v12430_v62 = vld [vmem:[#allocation118_spill] sm:$0xff] }
 0x5dd   :  { %v4757_v36 = vadd.f32 %v12427_v8, %v4211_v56  ;;  %5047 = vst [vmem:[#allocation7 + $0x578] sm:$0xff] %v4753_v48  ;;  %5048 = vst [vmem:[#allocation7 + $0x580] sm:$0xff] %v4754_v47  ;;  %v12431_v35 = vsub.f32 %v12430_v62, %v8990_v9  ;;  %v12433_v27 = vsub.f32 %v12432_v42, %v8990_v9  ;;  %v12447_v56 = vld [vmem:[#allocation121_spill] sm:$0xff] }
 0x5de   :  { %v4214_v37 = vmul.f32 %v3955_v16, %v12429_v60  ;;  %v4758_v2 = vadd.f32 %v12427_v8, %v4212_v58  ;;  %v4759_v54 = vadd.f32 %v12427_v8, %v4213_v19  ;;  %5049 = vst [vmem:[#allocation7 + $0x588] sm:$0xff] %v4755_v55  ;;  %v12435_v24 = vsub.f32 %v12434_v40, %v8990_v9  ;;  %v12449_v58 = vld [vmem:[#allocation123_spill] sm:$0xff]  ;;  %v12453_v55 = vld [vmem:[#allocation289_spill] sm:$0xff] }
 0x5df   :  { %v4215_v44 = vmul.f32 %v3955_v16, %v12431_v35  ;;  %v4216_v50 = vmul.f32 %v3955_v16, %v12433_v27  ;;  %v12437_v30 = vsub.f32 %v12436_v29, %v8990_v9  ;;  %5050 = vst [vmem:[#allocation7 + $0x590] sm:$0xff] %v4756_v25  ;;  %5051 = vst [vmem:[#allocation7 + $0x598] sm:$0xff] %v4757_v36  ;;  %v12451_v8 = vld [vmem:[#allocation287_spill] sm:$0xff] }
 0x5e0   :  { %v4217_v15 = vmul.f32 %v3955_v16, %v12435_v24  ;;  %5052 = vst [vmem:[#allocation7 + $0x5a0] sm:$0xff] %v4758_v2  ;;  %5053 = vst.msk [vmem:[#allocation7 + $0x5a8] sm:$0xff] %vm640_vm1, %v4759_v54  ;;  %v12439_v4 = vsub.f32 %v12438_v22, %v8990_v9  ;;  %v12441_v23 = vsub.f32 %v12440_v63, %v8990_v9  ;;  %v12457_v2 = vld [vmem:[#allocation284_spill] sm:$0xff] }
 0x5e1   :  { %v4218_v14 = vmul.f32 %v3955_v16, %v12437_v30  ;;  %v4760_v46 = vadd.f32 %v12442_v51, %v4214_v37  ;;  %v12444_v31 = vsub.f32 %v12443_v39, %v9015_v28  ;;  %v4761_v11 = vadd.f32 %v12442_v51, %v4215_v44  ;;  %v12455_v37 = vld [vmem:[#allocation288_spill] sm:$0xff]  ;;  %v12468_v39 = vld [vmem:[#allocation294_spill] sm:$0xff] }
 0x5e2   :  { %v4219_v3 = vmul.f32 %v3955_v16, %v12439_v4  ;;  %v4220_v32 = vmul.f32 %v3955_v16, %v12441_v23  ;;  %v4762_v61 = vadd.f32 %v12442_v51, %v4216_v50  ;;  %v4763_v18 = vadd.f32 %v12442_v51, %v4217_v15  ;;  %v12445_v16 = vld [vmem:[#allocation122_spill] sm:$0xff]  ;;  %v12458_v44 = vld [vmem:[#allocation124_spill] sm:$0xff]  ;;  %v3970_v50 = vpop.permute.xlu1 %3969 }
 0x5e3   :  { %v4221_v20 = vmul.f32 %v3960_v53, %v12444_v31  ;;  %v4764_v1 = vadd.f32 %v12442_v51, %v4218_v14  ;;  %5054 = vst [vmem:[#allocation7 + $0x5b0] sm:$0xff] %v4760_v46  ;;  %v12446_v12 = vsub.f32 %v12445_v16, %v9015_v28  ;;  %v12448_v17 = vsub.f32 %v12447_v56, %v9015_v28  ;;  %v12460_v15 = vld [vmem:[#allocation126_spill] sm:$0xff]  ;;  %v12462_v14 = vld [vmem:[#allocation125_spill] sm:$0xff] }
 0x5e4   :  { %v4765_v21 = vadd.f32 %v12442_v51, %v4219_v3  ;;  %v4766_v9 = vadd.f32 %v12442_v51, %v4220_v32  ;;  %5055 = vst [vmem:[#allocation7 + $0x5b8] sm:$0xff] %v4761_v11  ;;  %5056 = vst [vmem:[#allocation7 + $0x5c0] sm:$0xff] %v4762_v61  ;;  %v12450_v52 = vsub.f32 %v12449_v58, %v9015_v28  ;;  %v12464_v3 = vld [vmem:[#allocation127_spill] sm:$0xff]  ;;  %v3975_v58 = vpop.permute.xlu0 %3974 }
 0x5e5   :  { %v4222_v59 = vmul.f32 %v3960_v53, %v12446_v12  ;;  %v4223_v45 = vmul.f32 %v3960_v53, %v12448_v17  ;;  %5057 = vst [vmem:[#allocation7 + $0x5c8] sm:$0xff] %v4763_v18  ;;  %5058 = vst [vmem:[#allocation7 + $0x5d0] sm:$0xff] %v4764_v1  ;;  %v12452_v48 = vsub.f32 %v12451_v8, %v9015_v28  ;;  %v12466_v32 = vld [vmem:[#allocation291_spill] sm:$0xff]  ;;  %v12471_v18 = vld [vmem:[#allocation293_spill] sm:$0xff] }
 0x5e6   :  { %v4224_v19 = vmul.f32 %v3960_v53, %v12450_v52  ;;  %v12454_v0 = vsub.f32 %v12453_v55, %v9015_v28  ;;  %v12456_v25 = vsub.f32 %v12455_v37, %v9015_v28  ;;  %5059 = vst [vmem:[#allocation7 + $0x5d8] sm:$0xff] %v4765_v21  ;;  %5060 = vst.msk [vmem:[#allocation7 + $0x5e0] sm:$0xff] %vm640_vm1, %v4766_v9  ;;  %v12472_v21 = vld [vmem:[#allocation128_spill] sm:$0xff]  ;;  %v12473_v9 = vld [vmem:[#allocation203_spill] sm:$0xff] }
 0x5e7   :  { %v4225_v47 = vmul.f32 %v3960_v53, %v12452_v48  ;;  %v4767_v54 = vadd.f32 %v12457_v2, %v4221_v20  ;;  %v4768_v62 = vadd.f32 %v12457_v2, %v4222_v59  ;;  %v4769_v35 = vadd.f32 %v12457_v2, %v4223_v45  ;;  %v12477_v8 = vld [vmem:[#allocation129_spill] sm:$0xff]  ;;  %v12479_v55 = vld [vmem:[#allocation131_spill] sm:$0xff] }
 0x5e8   :  { %v4226_v60 = vmul.f32 %v3960_v53, %v12454_v0  ;;  %v4227_v36 = vmul.f32 %v3960_v53, %v12456_v25  ;;  %v12459_v42 = vsub.f32 %v12458_v44, %v9040_v6  ;;  %v4770_v40 = vadd.f32 %v12457_v2, %v4224_v19  ;;  %v12481_v37 = vld [vmem:[#allocation295_spill] sm:$0xff] }
 0x5e9   :  { %v4771_v24 = vadd.f32 %v12457_v2, %v4225_v47  ;;  %5061 = vst [vmem:[#allocation7 + $0x5e8] sm:$0xff] %v4767_v54  ;;  %5062 = vst [vmem:[#allocation7 + $0x5f0] sm:$0xff] %v4768_v62  ;;  %v12461_v29 = vsub.f32 %v12460_v15, %v9040_v6  ;;  %v12463_v22 = vsub.f32 %v12462_v14, %v9040_v6 }
 0x5ea   :  { %v4228_v27 = vmul.f32 %v3965_v49, %v12459_v42  ;;  %v4772_v28 = vadd.f32 %v12457_v2, %v4226_v60  ;;  %v4773_v53 = vadd.f32 %v12457_v2, %v4227_v36  ;;  %5063 = vst [vmem:[#allocation7 + $0x5f8] sm:$0xff] %v4769_v35  ;;  %v12465_v63 = vsub.f32 %v12464_v3, %v9040_v6  ;;  %v12483_v2 = vld [vmem:[#allocation298_spill] sm:$0xff]  ;;  %v12485_v35 = vld [vmem:[#allocation296_spill] sm:$0xff] }
 0x5eb   :  { %v4229_v30 = vmul.f32 %v3965_v49, %v12461_v29  ;;  %v4230_v4 = vmul.f32 %v3965_v49, %v12463_v22  ;;  %v12467_v51 = vsub.f32 %v12466_v32, %v9040_v6  ;;  %5064 = vst [vmem:[#allocation7 + $0x600] sm:$0xff] %v4770_v40  ;;  %5065 = vst [vmem:[#allocation7 + $0x608] sm:$0xff] %v4771_v24  ;;  %v12490_v3 = vld [vmem:[#allocation134_spill] sm:$0xff]  ;;  %v12492_v32 = vld [vmem:[#allocation133_spill] sm:$0xff] }
 0x5ec   :  { %v4231_v23 = vmul.f32 %v3965_v49, %v12465_v63  ;;  %5066 = vst [vmem:[#allocation7 + $0x610] sm:$0xff] %v4772_v28  ;;  %5067 = vst.msk [vmem:[#allocation7 + $0x618] sm:$0xff] %vm640_vm1, %v4773_v53  ;;  %v12469_v31 = vsub.f32 %v12468_v39, %v9040_v6  ;;  %v12470_v11 = vsub.f32 %v11983_v57, %v9040_v6  ;;  %v12475_v57 = vld [vmem:[#allocation130_spill] sm:$0xff]  ;;  %v12488_v53 = vld [vmem:[#allocation132_spill] sm:$0xff] }
 0x5ed   :  { %v4232_v46 = vmul.f32 %v3965_v49, %v12467_v51  ;;  %v4774_v1 = vadd.f32 %v12471_v18, %v4228_v27  ;;  %v12474_v16 = vsub.f32 %v12472_v21, %v12473_v9  ;;  %v4775_v59 = vadd.f32 %v12471_v18, %v4229_v30  ;;  %v12487_v27 = vld [vmem:[#allocation290_spill] sm:$0xff]  ;;  %v3980_v30 = vpop.permute.xlu1 %3979  ;;  %v12494_v39 = vld [vmem:[#allocation135_spill] sm:$0xff] }
 0x5ee   :  { %v4233_v20 = vmul.f32 %v3965_v49, %v12469_v31  ;;  %v4234_v61 = vmul.f32 %v3965_v49, %v12470_v11  ;;  %v4776_v56 = vadd.f32 %v12471_v18, %v4230_v4  ;;  %v4777_v17 = vadd.f32 %v12471_v18, %v4231_v23 }
 0x5ef   :  { %v4235_v12 = vmul.f32 %v3970_v50, %v12474_v16  ;;  %v4778_v45 = vadd.f32 %v12471_v18, %v4232_v46  ;;  %5068 = vst [vmem:[#allocation7 + $0x620] sm:$0xff] %v4774_v1  ;;  %v12476_v49 = vsub.f32 %v12475_v57, %v12473_v9  ;;  %v12478_v48 = vsub.f32 %v12477_v8, %v12473_v9  ;;  %v3985_v8 = vpop.permute.xlu0 %3984 }
 0x5f0   :  { %v4779_v52 = vadd.f32 %v12471_v18, %v4233_v20  ;;  %v4780_v6 = vadd.f32 %v12471_v18, %v4234_v61  ;;  %5069 = vst [vmem:[#allocation7 + $0x628] sm:$0xff] %v4775_v59  ;;  %5070 = vst [vmem:[#allocation7 + $0x630] sm:$0xff] %v4776_v56  ;;  %v12480_v0 = vsub.f32 %v12479_v55, %v12473_v9  ;;  %v12497_v18 = vld [vmem:[#allocation302_spill] sm:$0xff]  ;;  %v12501_v59 = vld [vmem:[#allocation299_spill] sm:$0xff] }
 0x5f1   :  { %v4236_v19 = vmul.f32 %v3970_v50, %v12476_v49  ;;  %v4237_v47 = vmul.f32 %v3970_v50, %v12478_v48  ;;  %5071 = vst [vmem:[#allocation7 + $0x638] sm:$0xff] %v4777_v17  ;;  %5072 = vst [vmem:[#allocation7 + $0x640] sm:$0xff] %v4778_v45  ;;  %v12482_v25 = vsub.f32 %v12481_v37, %v12473_v9  ;;  %v12502_v17 = vld [vmem:[#allocation136_spill] sm:$0xff]  ;;  %v12503_v45 = vld [vmem:[#allocation17_spill] sm:$0xff] }
 0x5f2   :  { %v4238_v60 = vmul.f32 %v3970_v50, %v12480_v0  ;;  %v12484_v54 = vsub.f32 %v12483_v2, %v12473_v9  ;;  %v12486_v44 = vsub.f32 %v12485_v35, %v12473_v9  ;;  %5073 = vst [vmem:[#allocation7 + $0x648] sm:$0xff] %v4779_v52  ;;  %5074 = vst.msk [vmem:[#allocation7 + $0x650] sm:$0xff] %vm640_vm1, %v4780_v6  ;;  %v12499_v9 = vld [vmem:[#allocation301_spill] sm:$0xff] }
 0x5f3   :  { %v4239_v36 = vmul.f32 %v3970_v50, %v12482_v25  ;;  %v4781_v40 = vadd.f32 %v12487_v27, %v4235_v12  ;;  %v4782_v24 = vadd.f32 %v12487_v27, %v4236_v19  ;;  %v4783_v28 = vadd.f32 %v12487_v27, %v4237_v47  ;;  %v12507_v0 = vld [vmem:[#allocation137_spill] sm:$0xff]  ;;  %v12509_v25 = vld [vmem:[#allocation139_spill] sm:$0xff] }
 0x5f4   :  { %v4240_v62 = vmul.f32 %v3970_v50, %v12484_v54  ;;  %v4241_v42 = vmul.f32 %v3970_v50, %v12486_v44  ;;  %v12489_v15 = vsub.f32 %v12488_v53, %v9090_v41  ;;  %v4784_v14 = vadd.f32 %v12487_v27, %v4238_v60  ;;  %v12511_v54 = vld [vmem:[#allocation304_spill] sm:$0xff]  ;;  %v12513_v44 = vld [vmem:[#allocation307_spill] sm:$0xff]  ;;  %v12517_v53 = vld [vmem:[#allocation297_spill] sm:$0xff] }
 0x5f5   :  { %v4785_v22 = vadd.f32 %v12487_v27, %v4239_v36  ;;  %5075 = vst [vmem:[#allocation7 + $0x658] sm:$0xff] %v4781_v40  ;;  %5076 = vst [vmem:[#allocation7 + $0x660] sm:$0xff] %v4782_v24  ;;  %v12491_v63 = vsub.f32 %v12490_v3, %v9090_v41  ;;  %v12493_v51 = vsub.f32 %v12492_v32, %v9090_v41  ;;  %v12515_v40 = vld [vmem:[#allocation305_spill] sm:$0xff] }
 0x5f6   :  { %v4242_v29 = vmul.f32 %v3975_v58, %v12489_v15  ;;  %v4786_v50 = vadd.f32 %v12487_v27, %v4240_v62  ;;  %v4787_v4 = vadd.f32 %v12487_v27, %v4241_v42  ;;  %5077 = vst [vmem:[#allocation7 + $0x668] sm:$0xff] %v4783_v28  ;;  %v12495_v31 = vsub.f32 %v12494_v39, %v9090_v41 }
 0x5f7   :  { %v4243_v23 = vmul.f32 %v3975_v58, %v12491_v63  ;;  %v4244_v46 = vmul.f32 %v3975_v58, %v12493_v51  ;;  %v12496_v11 = vsub.f32 %v11995_v34, %v9090_v41  ;;  %5078 = vst [vmem:[#allocation7 + $0x670] sm:$0xff] %v4784_v14  ;;  %5079 = vst [vmem:[#allocation7 + $0x678] sm:$0xff] %v4785_v22  ;;  %v12518_v22 = vld [vmem:[#allocation140_spill] sm:$0xff]  ;;  %v3990_v63 = vpop.permute.xlu1 %3989 }
 0x5f8   :  { %v4245_v20 = vmul.f32 %v3975_v58, %v12495_v31  ;;  %5080 = vst [vmem:[#allocation7 + $0x680] sm:$0xff] %v4786_v50  ;;  %5081 = vst.msk [vmem:[#allocation7 + $0x688] sm:$0xff] %vm640_vm1, %v4787_v4  ;;  %v12498_v1 = vsub.f32 %v12497_v18, %v9090_v41  ;;  %v12500_v16 = vsub.f32 %v12499_v9, %v9090_v41  ;;  %v12519_v50 = vld [vmem:[#allocation30_spill] sm:$0xff]  ;;  %v12525_v18 = vld [vmem:[#allocation143_spill] sm:$0xff] }
 0x5f9   :  { %v4246_v61 = vmul.f32 %v3975_v58, %v12496_v11  ;;  %v4788_v56 = vadd.f32 %v12501_v59, %v4242_v29  ;;  %v12504_v52 = vsub.f32 %v12502_v17, %v12503_v45  ;;  %v4789_v6 = vadd.f32 %v12501_v59, %v4243_v23  ;;  %v12527_v9 = vld [vmem:[#allocation308_spill] sm:$0xff] }
 0x5fa   :  { %v4247_v21 = vmul.f32 %v3975_v58, %v12498_v1  ;;  %v4248_v12 = vmul.f32 %v3975_v58, %v12500_v16  ;;  %v4790_v57 = vadd.f32 %v12501_v59, %v4244_v46  ;;  %v4791_v49 = vadd.f32 %v12501_v59, %v4245_v20  ;;  %v12505_v58 = vld [vmem:[#allocation138_spill] sm:$0xff]  ;;  %v12523_v20 = vld [vmem:[#allocation141_spill] sm:$0xff] }
 0x5fb   :  { %v4249_v34 = vmul.f32 %v3980_v30, %v12504_v52  ;;  %v4792_v19 = vadd.f32 %v12501_v59, %v4246_v61  ;;  %5082 = vst [vmem:[#allocation7 + $0x690] sm:$0xff] %v4788_v56  ;;  %v12506_v47 = vsub.f32 %v12505_v58, %v12503_v45  ;;  %v12508_v60 = vsub.f32 %v12507_v0, %v12503_v45  ;;  %v12521_v46 = vld [vmem:[#allocation142_spill] sm:$0xff]  ;;  %v3995_v0 = vpop.permute.xlu0 %3994 }
 0x5fc   :  { %v4793_v48 = vadd.f32 %v12501_v59, %v4247_v21  ;;  %v4794_v41 = vadd.f32 %v12501_v59, %v4248_v12  ;;  %5083 = vst [vmem:[#allocation7 + $0x698] sm:$0xff] %v4789_v6  ;;  %5084 = vst [vmem:[#allocation7 + $0x6a0] sm:$0xff] %v4790_v57  ;;  %v12510_v36 = vsub.f32 %v12509_v25, %v12503_v45  ;;  %v12529_v59 = vld [vmem:[#allocation311_spill] sm:$0xff]  ;;  %v12533_v6 = vld [vmem:[#allocation306_spill] sm:$0xff] }
 0x5fd   :  { %v4250_v55 = vmul.f32 %v3980_v30, %v12506_v47  ;;  %v4251_v37 = vmul.f32 %v3980_v30, %v12508_v60  ;;  %5085 = vst [vmem:[#allocation7 + $0x6a8] sm:$0xff] %v4791_v49  ;;  %5086 = vst [vmem:[#allocation7 + $0x6b0] sm:$0xff] %v4792_v19  ;;  %v12512_v62 = vsub.f32 %v12511_v54, %v12503_v45  ;;  %v12534_v49 = vld [vmem:[#allocation144_spill] sm:$0xff] }
 0x5fe   :  { %v4252_v2 = vmul.f32 %v3980_v30, %v12510_v36  ;;  %v12514_v42 = vsub.f32 %v12513_v44, %v12503_v45  ;;  %v12516_v24 = vsub.f32 %v12515_v40, %v12503_v45  ;;  %5087 = vst [vmem:[#allocation7 + $0x6b8] sm:$0xff] %v4793_v48  ;;  %5088 = vst.msk [vmem:[#allocation7 + $0x6c0] sm:$0xff] %vm640_vm1, %v4794_v41  ;;  %v12531_v45 = vld [vmem:[#allocation309_spill] sm:$0xff] }
 0x5ff   :  { %v4253_v35 = vmul.f32 %v3980_v30, %v12512_v62  ;;  %v4795_v15 = vadd.f32 %v12517_v53, %v4249_v34  ;;  %v4796_v29 = vadd.f32 %v12517_v53, %v4250_v55  ;;  %v4797_v14 = vadd.f32 %v12517_v53, %v4251_v37 }
 0x600   :  { %v4254_v27 = vmul.f32 %v3980_v30, %v12514_v42  ;;  %v4255_v28 = vmul.f32 %v3980_v30, %v12516_v24  ;;  %v12520_v4 = vsub.f32 %v12518_v22, %v12519_v50  ;;  %v4798_v23 = vadd.f32 %v12517_v53, %v4252_v2  ;;  %v12538_v2 = vld [vmem:[#allocation145_spill] sm:$0xff]  ;;  %v12543_v24 = vld [vmem:[#allocation315_spill] sm:$0xff] }
 0x601   :  { %v4799_v32 = vadd.f32 %v12517_v53, %v4253_v35  ;;  %5089 = vst [vmem:[#allocation7 + $0x6c8] sm:$0xff] %v4795_v15  ;;  %5090 = vst [vmem:[#allocation7 + $0x6d0] sm:$0xff] %v4796_v29  ;;  %v12522_v39 = vsub.f32 %v12521_v46, %v12519_v50  ;;  %v12524_v11 = vsub.f32 %v12523_v20, %v12519_v50  ;;  %v12541_v42 = vld [vmem:[#allocation313_spill] sm:$0xff]  ;;  %v12545_v15 = vld [vmem:[#allocation314_spill] sm:$0xff] }
 0x602   :  { %v4256_v3 = vmul.f32 %v3985_v8, %v12520_v4  ;;  %v4800_v30 = vadd.f32 %v12517_v53, %v4254_v27  ;;  %v4801_v51 = vadd.f32 %v12517_v53, %v4255_v28  ;;  %5091 = vst [vmem:[#allocation7 + $0x6d8] sm:$0xff] %v4797_v14  ;;  %v12526_v1 = vsub.f32 %v12525_v18, %v12519_v50  ;;  %v12547_v22 = vld [vmem:[#allocation303_spill] sm:$0xff] }
 0x603   :  { %v4257_v31 = vmul.f32 %v3985_v8, %v12522_v39  ;;  %v4258_v61 = vmul.f32 %v3985_v8, %v12524_v11  ;;  %v12528_v16 = vsub.f32 %v12527_v9, %v12519_v50  ;;  %5092 = vst [vmem:[#allocation7 + $0x6e0] sm:$0xff] %v4798_v23  ;;  %5093 = vst [vmem:[#allocation7 + $0x6e8] sm:$0xff] %v4799_v32  ;;  %v12550_v39 = vld [vmem:[#allocation149_spill] sm:$0xff]  ;;  %v12552_v11 = vld [vmem:[#allocation20_spill] sm:$0xff] }
 0x604   :  { %v4259_v21 = vmul.f32 %v3985_v8, %v12526_v1  ;;  %5094 = vst [vmem:[#allocation7 + $0x6f0] sm:$0xff] %v4800_v30  ;;  %5095 = vst.msk [vmem:[#allocation7 + $0x6f8] sm:$0xff] %vm640_vm1, %v4801_v51  ;;  %v12530_v56 = vsub.f32 %v12529_v59, %v12519_v50  ;;  %v12532_v52 = vsub.f32 %v12531_v45, %v12519_v50  ;;  %v4000_v30 = vpop.permute.xlu1 %3999  ;;  %v12554_v1 = vld [vmem:[#allocation150_spill] sm:$0xff] }
 0x605   :  { %v4260_v12 = vmul.f32 %v3985_v8, %v12528_v16  ;;  %v4802_v57 = vadd.f32 %v12533_v6, %v4256_v3  ;;  %v12535_v19 = vsub.f32 %v12534_v49, %v9165_v7  ;;  %v4803_v41 = vadd.f32 %v12533_v6, %v4257_v31  ;;  %v12548_v3 = vld [vmem:[#allocation148_spill] sm:$0xff]  ;;  %v12556_v16 = vld [vmem:[#allocation317_spill] sm:$0xff]  ;;  %v12562_v49 = vld [vmem:[#allocation151_spill] sm:$0xff] }
 0x606   :  { %v4261_v17 = vmul.f32 %v3985_v8, %v12530_v56  ;;  %v4262_v34 = vmul.f32 %v3985_v8, %v12532_v52  ;;  %v4804_v58 = vadd.f32 %v12533_v6, %v4258_v61  ;;  %v4805_v47 = vadd.f32 %v12533_v6, %v4259_v21  ;;  %v12536_v8 = vld [vmem:[#allocation146_spill] sm:$0xff]  ;;  %v12558_v56 = vld [vmem:[#allocation320_spill] sm:$0xff] }
 0x607   :  { %v4263_v48 = vmul.f32 %v3990_v63, %v12535_v19  ;;  %v4806_v55 = vadd.f32 %v12533_v6, %v4260_v12  ;;  %5096 = vst [vmem:[#allocation7 + $0x700] sm:$0xff] %v4802_v57  ;;  %v12537_v25 = vsub.f32 %v12536_v8, %v9165_v7  ;;  %v12539_v54 = vsub.f32 %v12538_v2, %v9165_v7 }
 0x608   :  { %v4807_v60 = vadd.f32 %v12533_v6, %v4261_v17  ;;  %v4808_v37 = vadd.f32 %v12533_v6, %v4262_v34  ;;  %5097 = vst [vmem:[#allocation7 + $0x708] sm:$0xff] %v4803_v41  ;;  %5098 = vst [vmem:[#allocation7 + $0x710] sm:$0xff] %v4804_v58  ;;  %v12540_v35 = vsub.f32 %v12015_v10, %v9165_v7  ;;  %v12561_v6 = vld [vmem:[#allocation312_spill] sm:$0xff] }
 0x609   :  { %v4264_v36 = vmul.f32 %v3990_v63, %v12537_v25  ;;  %v4265_v62 = vmul.f32 %v3990_v63, %v12539_v54  ;;  %5099 = vst [vmem:[#allocation7 + $0x718] sm:$0xff] %v4805_v47  ;;  %5100 = vst [vmem:[#allocation7 + $0x720] sm:$0xff] %v4806_v55  ;;  %v12542_v27 = vsub.f32 %v12541_v42, %v9165_v7  ;;  %v12566_v25 = vld [vmem:[#allocation152_spill] sm:$0xff]  ;;  %v12568_v54 = vld [vmem:[#allocation154_spill] sm:$0xff] }
 0x60a   :  { %v4266_v44 = vmul.f32 %v3990_v63, %v12540_v35  ;;  %v12544_v28 = vsub.f32 %v12543_v24, %v9165_v7  ;;  %v12546_v29 = vsub.f32 %v12545_v15, %v9165_v7  ;;  %5101 = vst [vmem:[#allocation7 + $0x728] sm:$0xff] %v4807_v60  ;;  %5102 = vst.msk [vmem:[#allocation7 + $0x730] sm:$0xff] %vm640_vm1, %v4808_v37  ;;  %v4005_v60 = vpop.permute.xlu0 %4004 }
 0x60b   :  { %v4267_v40 = vmul.f32 %v3990_v63, %v12542_v27  ;;  %v4809_v50 = vadd.f32 %v12547_v22, %v4263_v48  ;;  %v4810_v10 = vadd.f32 %v12547_v22, %v4264_v36  ;;  %v4811_v4 = vadd.f32 %v12547_v22, %v4265_v62 }
 0x60c   :  { %v4268_v53 = vmul.f32 %v3990_v63, %v12544_v28  ;;  %v4269_v14 = vmul.f32 %v3990_v63, %v12546_v29  ;;  %v12549_v23 = vsub.f32 %v12548_v3, %v9190_v13  ;;  %v4812_v51 = vadd.f32 %v12547_v22, %v4266_v44  ;;  %v12570_v44 = vld [vmem:[#allocation321_spill] sm:$0xff] }
 0x60d   :  { %v4813_v46 = vadd.f32 %v12547_v22, %v4267_v40  ;;  %5103 = vst [vmem:[#allocation7 + $0x738] sm:$0xff] %v4809_v50  ;;  %5104 = vst [vmem:[#allocation7 + $0x740] sm:$0xff] %v4810_v10  ;;  %v12551_v31 = vsub.f32 %v12550_v39, %v9190_v13  ;;  %v12553_v61 = vsub.f32 %v12552_v11, %v9190_v13  ;;  %v12572_v40 = vld [vmem:[#allocation324_spill] sm:$0xff]  ;;  %v12583_v11 = vld [vmem:[#allocation158_spill] sm:$0xff] }
 0x60e   :  { %v4270_v32 = vmul.f32 %v3995_v0, %v12549_v23  ;;  %v4814_v7 = vadd.f32 %v12547_v22, %v4268_v53  ;;  %v4815_v63 = vadd.f32 %v12547_v22, %v4269_v14  ;;  %5105 = vst [vmem:[#allocation7 + $0x748] sm:$0xff] %v4811_v4  ;;  %v12555_v21 = vsub.f32 %v12554_v1, %v9190_v13  ;;  %v12574_v53 = vld [vmem:[#allocation322_spill] sm:$0xff]  ;;  %v12577_v4 = vld [vmem:[#allocation155_spill] sm:$0xff]  ;;  %v12581_v39 = vld [vmem:[#allocation156_spill] sm:$0xff] }
 0x60f   :  { %v4271_v20 = vmul.f32 %v3995_v0, %v12551_v31  ;;  %v4272_v18 = vmul.f32 %v3995_v0, %v12553_v61  ;;  %v12557_v12 = vsub.f32 %v12556_v16, %v9190_v13  ;;  %5106 = vst [vmem:[#allocation7 + $0x750] sm:$0xff] %v4812_v51  ;;  %5107 = vst [vmem:[#allocation7 + $0x758] sm:$0xff] %v4813_v46  ;;  %v12576_v14 = vld [vmem:[#allocation310_spill] sm:$0xff]  ;;  %v12579_v46 = vld [vmem:[#allocation157_spill] sm:$0xff] }
 0x610   :  { %v4273_v9 = vmul.f32 %v3995_v0, %v12555_v21  ;;  %5108 = vst [vmem:[#allocation7 + $0x760] sm:$0xff] %v4814_v7  ;;  %5109 = vst.msk [vmem:[#allocation7 + $0x768] sm:$0xff] %vm640_vm1, %v4815_v63  ;;  %v12559_v17 = vsub.f32 %v12558_v56, %v9190_v13  ;;  %v12560_v52 = vsub.f32 %v12026_v5, %v9190_v13  ;;  %v12564_v5 = vld [vmem:[#allocation153_spill] sm:$0xff] }
 0x611   :  { %v4274_v59 = vmul.f32 %v3995_v0, %v12557_v12  ;;  %v4816_v57 = vadd.f32 %v12561_v6, %v4270_v32  ;;  %v12563_v19 = vsub.f32 %v12562_v49, %v9215_v26  ;;  %v4817_v41 = vadd.f32 %v12561_v6, %v4271_v20  ;;  %v12587_v12 = vld [vmem:[#allocation327_spill] sm:$0xff] }
 0x612   :  { %v4275_v45 = vmul.f32 %v3995_v0, %v12559_v17  ;;  %v4276_v34 = vmul.f32 %v3995_v0, %v12560_v52  ;;  %v4818_v58 = vadd.f32 %v12561_v6, %v4272_v18  ;;  %v4819_v47 = vadd.f32 %v12561_v6, %v4273_v9  ;;  %v12589_v17 = vld [vmem:[#allocation319_spill] sm:$0xff]  ;;  %v12590_v52 = vld [vmem:[#allocation209_spill] sm:$0xff] }
 0x613   :  { %v4277_v48 = vmul.f32 %v4000_v30, %v12563_v19  ;;  %v4820_v55 = vadd.f32 %v12561_v6, %v4274_v59  ;;  %5110 = vst [vmem:[#allocation7 + $0x770] sm:$0xff] %v4816_v57  ;;  %v12565_v0 = vsub.f32 %v12564_v5, %v9215_v26  ;;  %v12567_v36 = vsub.f32 %v12566_v25, %v9215_v26  ;;  %v12596_v5 = vld [vmem:[#allocation330_spill] sm:$0xff]  ;;  %v12597_v25 = vld [vmem:[#allocation160_spill] sm:$0xff] }
 0x614   :  { %v4821_v37 = vadd.f32 %v12561_v6, %v4275_v45  ;;  %v4822_v13 = vadd.f32 %v12561_v6, %v4276_v34  ;;  %5111 = vst [vmem:[#allocation7 + $0x778] sm:$0xff] %v4817_v41  ;;  %5112 = vst [vmem:[#allocation7 + $0x780] sm:$0xff] %v4818_v58  ;;  %v12569_v62 = vsub.f32 %v12568_v54, %v9215_v26  ;;  %v12591_v34 = vld [vmem:[#allocation163_spill] sm:$0xff]  ;;  %v12593_v58 = vld [vmem:[#allocation164_spill] sm:$0xff] }
 0x615   :  { %v4278_v8 = vmul.f32 %v4000_v30, %v12565_v0  ;;  %v4279_v2 = vmul.f32 %v4000_v30, %v12567_v36  ;;  %5113 = vst [vmem:[#allocation7 + $0x788] sm:$0xff] %v4819_v47  ;;  %5114 = vst [vmem:[#allocation7 + $0x790] sm:$0xff] %v4820_v55  ;;  %v12571_v42 = vsub.f32 %v12570_v44, %v9215_v26  ;;  %v12594_v55 = vld [vmem:[#allocation329_spill] sm:$0xff] }
 0x616   :  { %v4280_v35 = vmul.f32 %v4000_v30, %v12569_v62  ;;  %v12573_v24 = vsub.f32 %v12572_v40, %v9215_v26  ;;  %v12575_v15 = vsub.f32 %v12574_v53, %v9215_v26  ;;  %5115 = vst [vmem:[#allocation7 + $0x798] sm:$0xff] %v4821_v37  ;;  %5116 = vst.msk [vmem:[#allocation7 + $0x7a0] sm:$0xff] %vm640_vm1, %v4822_v13  ;;  %v12595_v37 = vld [vmem:[#allocation331_spill] sm:$0xff]  ;;  %v12599_v40 = vld [vmem:[#allocation316_spill] sm:$0xff] }
 0x617   :  { %v4281_v27 = vmul.f32 %v4000_v30, %v12571_v42  ;;  %v4823_v22 = vadd.f32 %v12576_v14, %v4277_v48  ;;  %v4824_v50 = vadd.f32 %v12576_v14, %v4278_v8  ;;  %v4825_v10 = vadd.f32 %v12576_v14, %v4279_v2  ;;  %v4010_v8 = vpop.permute.xlu1 %4009 }
 0x618   :  { %v4282_v28 = vmul.f32 %v4000_v30, %v12573_v24  ;;  %v4283_v29 = vmul.f32 %v4000_v30, %v12575_v15  ;;  %v12578_v3 = vsub.f32 %v12577_v4, %v9240_v43  ;;  %v4826_v32 = vadd.f32 %v12576_v14, %v4280_v35 }
 0x619   :  { %v4827_v51 = vadd.f32 %v12576_v14, %v4281_v27  ;;  %5117 = vst [vmem:[#allocation7 + $0x7a8] sm:$0xff] %v4823_v22  ;;  %5118 = vst [vmem:[#allocation7 + $0x7b0] sm:$0xff] %v4824_v50  ;;  %v12580_v7 = vsub.f32 %v12579_v46, %v9240_v43  ;;  %v12582_v31 = vsub.f32 %v12581_v39, %v9240_v43  ;;  %v12600_v50 = vld [vmem:[#allocation208_spill] sm:$0xff] }
 0x61a   :  { %v4284_v23 = vmul.f32 %v4005_v60, %v12578_v3  ;;  %v4828_v26 = vadd.f32 %v12576_v14, %v4282_v28  ;;  %v4829_v30 = vadd.f32 %v12576_v14, %v4283_v29  ;;  %5119 = vst [vmem:[#allocation7 + $0x7b8] sm:$0xff] %v4825_v10  ;;  %v12584_v61 = vsub.f32 %v12583_v11, %v9240_v43  ;;  %v12601_v10 = vld [vmem:[#allocation169_spill] sm:$0xff]  ;;  %v12602_v3 = vld [vmem:[#allocation174_spill] sm:$0xff]  ;;  %v12605_v46 = vld [vmem:[#allocation332_spill] sm:$0xff]  ;;  %v4015_v11 = vpop.permute.xlu0 %4014 }
 0x61b   :  { %v4285_v63 = vmul.f32 %v4005_v60, %v12580_v7  ;;  %v4286_v20 = vmul.f32 %v4005_v60, %v12582_v31  ;;  %v12585_v1 = vsub.f32 %v12039_v38, %v9240_v43  ;;  %5120 = vst [vmem:[#allocation7 + $0x7c0] sm:$0xff] %v4826_v32  ;;  %5121 = vst [vmem:[#allocation7 + $0x7c8] sm:$0xff] %v4827_v51  ;;  %v12603_v32 = vld [vmem:[#allocation170_spill] sm:$0xff]  ;;  %v12607_v31 = vld [vmem:[#allocation333_spill] sm:$0xff] }
 0x61c   :  { %v4287_v18 = vmul.f32 %v4005_v60, %v12584_v61  ;;  %5122 = vst [vmem:[#allocation7 + $0x7d0] sm:$0xff] %v4828_v26  ;;  %5123 = vst.msk [vmem:[#allocation7 + $0x7d8] sm:$0xff] %vm640_vm1, %v4829_v30  ;;  %v12586_v9 = vsub.f32 %v12040_v33, %v9240_v43  ;;  %v12588_v59 = vsub.f32 %v12587_v12, %v9240_v43  ;;  %v12592_v43 = vld [vmem:[#allocation161_spill] sm:$0xff]  ;;  %v12604_v26 = vld [vmem:[#allocation175_spill] sm:$0xff] }
 0x61d   :  { %v4288_v21 = vmul.f32 %v4005_v60, %v12585_v1  ;;  %v4830_v45 = vadd.f32 %v12589_v17, %v4284_v23  ;;  %v3788_v6 = vsub.f32 %v12591_v34, %v12590_v52  ;;  %v4831_v38 = vadd.f32 %v12589_v17, %v4285_v63  ;;  %v12606_v63 = vld [vmem:[#allocation334_spill] sm:$0xff] }
 0x61e   :  { %v4289_v16 = vmul.f32 %v4005_v60, %v12586_v9  ;;  %v4290_v56 = vmul.f32 %v4005_v60, %v12588_v59  ;;  %v4832_v57 = vadd.f32 %v12589_v17, %v4286_v20  ;;  %v4833_v49 = vadd.f32 %v12589_v17, %v4287_v18  ;;  %v12608_v59 = vld [vmem:[#allocation325_spill] sm:$0xff] }
 0x61f   :  { %v4834_v19 = vadd.f32 %v12589_v17, %v4288_v21  ;;  %5124 = vst [vmem:[#allocation7 + $0x7e0] sm:$0xff] %v4830_v45  ;;  %v3789_v41 = vsub.f32 %v12592_v43, %v12590_v52  ;;  %v3790_v47 = vsub.f32 %v12593_v58, %v12590_v52  ;;  %5125 = vst [vmem:[#allocation7 + $0x7e8] sm:$0xff] %v4831_v38  ;;  %v12612_v43 = vld [vmem:[#allocation178_spill] sm:$0xff]  ;;  %v12613_v58 = vld [vmem:[#allocation180_spill] sm:$0xff] }
 0x620   :  { %v4835_v33 = vadd.f32 %v12589_v17, %v4289_v16  ;;  %v4836_v48 = vadd.f32 %v12589_v17, %v4290_v56  ;;  %5126 = vst [vmem:[#allocation7 + $0x7f0] sm:$0xff] %v4832_v57  ;;  %5127 = vst [vmem:[#allocation7 + $0x7f8] sm:$0xff] %v4833_v49  ;;  %v3791_v60 = vsub.f32 %v12594_v55, %v12590_v52  ;;  %v12609_v57 = vld [vmem:[#allocation40_spill] sm:$0xff]  ;;  %v12610_v49 = vld [vmem:[#allocation177_spill] sm:$0xff] }
 0x621   :  { %5128 = vst [vmem:[#allocation7 + $0x800] sm:$0xff] %v4834_v19  ;;  %v3792_v13 = vsub.f32 %v12595_v37, %v12590_v52  ;;  %v3793_v0 = vsub.f32 %v12596_v5, %v12590_v52  ;;  %v12598_v36 = vsub.f32 %v12597_v25, %v12590_v52  ;;  %v4292_v54 = vmul.f32 %v4010_v8, %v3788_v6  ;;  %v12614_v55 = vld [vmem:[#allocation335_spill] sm:$0xff]  ;;  %v12615_v37 = vld [vmem:[#allocation337_spill] sm:$0xff]  ;;  %v12616_v5 = vld [vmem:[#allocation336_spill] sm:$0xff] }
 0x622   :  { %5129 = vst [vmem:[#allocation7 + $0x808] sm:$0xff] %v4835_v33  ;;  %5130 = vst.msk [vmem:[#allocation7 + $0x810] sm:$0xff] %vm640_vm1, %v4836_v48  ;;  %v4293_v62 = vmul.f32 %v4010_v8, %v3789_v41  ;;  %v4294_v35 = vmul.f32 %v4010_v8, %v3790_v47  ;;  %v4295_v44 = vmul.f32 %v4010_v8, %v3791_v60  ;;  %v12611_v33 = vld [vmem:[#allocation179_spill] sm:$0xff] }
 0x623   :  { %v4291_v2 = vmul.f32 %v4010_v8, %v12598_v36  ;;  %v4296_v42 = vmul.f32 %v4010_v8, %v3792_v13  ;;  %v4297_v27 = vmul.f32 %v4010_v8, %v3793_v0  ;;  %v4838_v28 = vadd.f32 %v12599_v40, %v4292_v54  ;;  %v4020_v8 = vpop.permute.xlu1 %4019 }
 0x624   :  { %v4839_v53 = vadd.f32 %v12599_v40, %v4293_v62  ;;  %v4840_v15 = vadd.f32 %v12599_v40, %v4294_v35  ;;  %v4841_v29 = vadd.f32 %v12599_v40, %v4295_v44  ;;  %v3794_v4 = vsub.f32 %v12601_v10, %v12600_v50 }
 0x625   :  { %v4837_v24 = vadd.f32 %v12599_v40, %v4291_v2  ;;  %v4842_v14 = vadd.f32 %v12599_v40, %v4296_v42  ;;  %v4843_v22 = vadd.f32 %v12599_v40, %v4297_v27  ;;  %5132 = vst [vmem:[#allocation7 + $0x820] sm:$0xff] %v4838_v28  ;;  %v3795_v23 = vsub.f32 %v12602_v3, %v12600_v50  ;;  %v12617_v42 = vld [vmem:[#allocation323_spill] sm:$0xff] }
 0x626   :  { %5133 = vst [vmem:[#allocation7 + $0x828] sm:$0xff] %v4839_v53  ;;  %5134 = vst [vmem:[#allocation7 + $0x830] sm:$0xff] %v4840_v15  ;;  %v3796_v51 = vsub.f32 %v12603_v32, %v12600_v50  ;;  %v3797_v30 = vsub.f32 %v12604_v26, %v12600_v50  ;;  %v3798_v7 = vsub.f32 %v12605_v46, %v12600_v50 }
 0x627   :  { %5131 = vst [vmem:[#allocation7 + $0x818] sm:$0xff] %v4837_v24  ;;  %5135 = vst [vmem:[#allocation7 + $0x838] sm:$0xff] %v4841_v29  ;;  %v3799_v39 = vsub.f32 %v12606_v63, %v12600_v50  ;;  %v3800_v20 = vsub.f32 %v12607_v31, %v12600_v50  ;;  %v4298_v61 = vmul.f32 %v4015_v11, %v3794_v4  ;;  %v12619_v50 = vld [vmem:[#allocation181_spill] sm:$0xff]  ;;  %v12620_v4 = vld [vmem:[#allocation183_spill] sm:$0xff] }
 0x628   :  { %5136 = vst [vmem:[#allocation7 + $0x840] sm:$0xff] %v4842_v14  ;;  %5137 = vst.msk [vmem:[#allocation7 + $0x848] sm:$0xff] %vm640_vm1, %v4843_v22  ;;  %v4299_v18 = vmul.f32 %v4015_v11, %v3795_v23  ;;  %v4300_v1 = vmul.f32 %v4015_v11, %v3796_v51  ;;  %v4301_v21 = vmul.f32 %v4015_v11, %v3797_v30  ;;  %v4025_v14 = vpop.permute.xlu0 %4024  ;;  %v12618_v22 = vld [vmem:[#allocation214_spill] sm:$0xff]  ;;  %v12622_v51 = vld [vmem:[#allocation184_spill] sm:$0xff] }
 0x629   :  { %v4302_v9 = vmul.f32 %v4015_v11, %v3798_v7  ;;  %v4303_v16 = vmul.f32 %v4015_v11, %v3799_v39  ;;  %v4304_v12 = vmul.f32 %v4015_v11, %v3800_v20  ;;  %v4844_v56 = vadd.f32 %v12608_v59, %v4298_v61  ;;  %v12621_v23 = vld [vmem:[#allocation182_spill] sm:$0xff]  ;;  %v12624_v7 = vld [vmem:[#allocation340_spill] sm:$0xff]  ;;  %v12625_v39 = vld [vmem:[#allocation339_spill] sm:$0xff] }
 0x62a   :  { %v4845_v17 = vadd.f32 %v12608_v59, %v4299_v18  ;;  %v4846_v45 = vadd.f32 %v12608_v59, %v4300_v1  ;;  %v4847_v52 = vadd.f32 %v12608_v59, %v4301_v21  ;;  %v3801_v19 = vsub.f32 %v12610_v49, %v12609_v57  ;;  %v12623_v30 = vld [vmem:[#allocation338_spill] sm:$0xff] }
 0x62b   :  { %v4848_v34 = vadd.f32 %v12608_v59, %v4302_v9  ;;  %v4849_v6 = vadd.f32 %v12608_v59, %v4303_v16  ;;  %v4850_v38 = vadd.f32 %v12608_v59, %v4304_v12  ;;  %5138 = vst [vmem:[#allocation7 + $0x850] sm:$0xff] %v4844_v56  ;;  %v3802_v48 = vsub.f32 %v12611_v33, %v12609_v57 }
 0x62c   :  { %5139 = vst [vmem:[#allocation7 + $0x858] sm:$0xff] %v4845_v17  ;;  %5140 = vst [vmem:[#allocation7 + $0x860] sm:$0xff] %v4846_v45  ;;  %v3803_v41 = vsub.f32 %v12612_v43, %v12609_v57  ;;  %v3804_v47 = vsub.f32 %v12613_v58, %v12609_v57  ;;  %v3805_v60 = vsub.f32 %v12614_v55, %v12609_v57  ;;  %v4571_v16 = vpop.permute.xlu0 %4570 }
 0x62d   :  { %5141 = vst [vmem:[#allocation7 + $0x868] sm:$0xff] %v4847_v52  ;;  %5142 = vst [vmem:[#allocation7 + $0x870] sm:$0xff] %v4848_v34  ;;  %v3806_v13 = vsub.f32 %v12615_v37, %v12609_v57  ;;  %v3807_v0 = vsub.f32 %v12616_v5, %v12609_v57  ;;  %v4305_v25 = vmul.f32 %v4020_v8, %v3801_v19  ;;  %v12627_v57 = vld [vmem:[#allocation185_spill] sm:$0xff]  ;;  %v12628_v19 = vld [vmem:[#allocation187_spill] sm:$0xff] }
 0x62e   :  { %5143 = vst [vmem:[#allocation7 + $0x878] sm:$0xff] %v4849_v6  ;;  %5144 = vst.msk [vmem:[#allocation7 + $0x880] sm:$0xff] %vm640_vm1, %v4850_v38  ;;  %v4306_v36 = vmul.f32 %v4020_v8, %v3802_v48  ;;  %v4307_v2 = vmul.f32 %v4020_v8, %v3803_v41  ;;  %v4308_v54 = vmul.f32 %v4020_v8, %v3804_v47  ;;  %v4030_v6 = vpop.permute.xlu1 %4029  ;;  %v12626_v38 = vld [vmem:[#allocation168_spill] sm:$0xff]  ;;  %v12629_v48 = vld [vmem:[#allocation186_spill] sm:$0xff] }
 0x62f   :  { %v4309_v62 = vmul.f32 %v4020_v8, %v3805_v60  ;;  %v4310_v35 = vmul.f32 %v4020_v8, %v3806_v13  ;;  %v4311_v44 = vmul.f32 %v4020_v8, %v3807_v0  ;;  %v4851_v27 = vadd.f32 %v12617_v42, %v4305_v25  ;;  %v12630_v41 = vld [vmem:[#allocation188_spill] sm:$0xff]  ;;  %v12631_v47 = vld [vmem:[#allocation341_spill] sm:$0xff]  ;;  %v12632_v60 = vld [vmem:[#allocation343_spill] sm:$0xff] }
 0x630   :  { %v4852_v40 = vadd.f32 %v12617_v42, %v4306_v36  ;;  %v4853_v24 = vadd.f32 %v12617_v42, %v4307_v2  ;;  %v4854_v28 = vadd.f32 %v12617_v42, %v4308_v54  ;;  %v3808_v10 = vsub.f32 %v12619_v50, %v12618_v22  ;;  %v12633_v13 = vld [vmem:[#allocation342_spill] sm:$0xff] }
 0x631   :  { %v4855_v53 = vadd.f32 %v12617_v42, %v4309_v62  ;;  %v4856_v15 = vadd.f32 %v12617_v42, %v4310_v35  ;;  %v4857_v29 = vadd.f32 %v12617_v42, %v4311_v44  ;;  %5145 = vst [vmem:[#allocation7 + $0x888] sm:$0xff] %v4851_v27  ;;  %v3809_v3 = vsub.f32 %v12620_v4, %v12618_v22 }
 0x632   :  { %5146 = vst [vmem:[#allocation7 + $0x890] sm:$0xff] %v4852_v40  ;;  %5147 = vst [vmem:[#allocation7 + $0x898] sm:$0xff] %v4853_v24  ;;  %v3810_v32 = vsub.f32 %v12621_v23, %v12618_v22  ;;  %v3811_v26 = vsub.f32 %v12622_v51, %v12618_v22  ;;  %v3812_v46 = vsub.f32 %v12623_v30, %v12618_v22  ;;  %v4576_v35 = vpop.permute.xlu1 %4575 }
 0x633   :  { %5148 = vst [vmem:[#allocation7 + $0x8a0] sm:$0xff] %v4854_v28  ;;  %5149 = vst [vmem:[#allocation7 + $0x8a8] sm:$0xff] %v4855_v53  ;;  %v3813_v63 = vsub.f32 %v12624_v7, %v12618_v22  ;;  %v3814_v31 = vsub.f32 %v12625_v39, %v12618_v22  ;;  %v4312_v20 = vmul.f32 %v4025_v14, %v3808_v10 }
 0x634   :  { %5150 = vst [vmem:[#allocation7 + $0x8b0] sm:$0xff] %v4856_v15  ;;  %5151 = vst.msk [vmem:[#allocation7 + $0x8b8] sm:$0xff] %vm640_vm1, %v4857_v29  ;;  %v4313_v11 = vmul.f32 %v4025_v14, %v3809_v3  ;;  %v4314_v61 = vmul.f32 %v4025_v14, %v3810_v32  ;;  %v4315_v18 = vmul.f32 %v4025_v14, %v3811_v26 }
 0x635   :  { %v4316_v1 = vmul.f32 %v4025_v14, %v3812_v46  ;;  %v4317_v21 = vmul.f32 %v4025_v14, %v3813_v63  ;;  %v4318_v9 = vmul.f32 %v4025_v14, %v3814_v31  ;;  %v4858_v12 = vadd.f32 %v4571_v16, %v4312_v20 }
 0x636   :  { %v4859_v59 = vadd.f32 %v4571_v16, %v4313_v11  ;;  %v4860_v56 = vadd.f32 %v4571_v16, %v4314_v61  ;;  %v4861_v17 = vadd.f32 %v4571_v16, %v4315_v18  ;;  %v3815_v49 = vsub.f32 %v12627_v57, %v12626_v38 }
 0x637   :  { %v4862_v45 = vadd.f32 %v4571_v16, %v4316_v1  ;;  %v4863_v52 = vadd.f32 %v4571_v16, %v4317_v21  ;;  %v4864_v34 = vadd.f32 %v4571_v16, %v4318_v9  ;;  %5152 = vst [vmem:[#allocation7 + $0x8c0] sm:$0xff] %v4858_v12  ;;  %v3816_v33 = vsub.f32 %v12628_v19, %v12626_v38 }
 0x638   :  { %5153 = vst [vmem:[#allocation7 + $0x8c8] sm:$0xff] %v4859_v59  ;;  %5154 = vst [vmem:[#allocation7 + $0x8d0] sm:$0xff] %v4860_v56  ;;  %v3817_v43 = vsub.f32 %v12629_v48, %v12626_v38  ;;  %v3818_v58 = vsub.f32 %v12630_v41, %v12626_v38  ;;  %v3819_v55 = vsub.f32 %v12631_v47, %v12626_v38 }
 0x639   :  { %5155 = vst [vmem:[#allocation7 + $0x8d8] sm:$0xff] %v4861_v17  ;;  %5156 = vst [vmem:[#allocation7 + $0x8e0] sm:$0xff] %v4862_v45  ;;  %v3820_v37 = vsub.f32 %v12632_v60, %v12626_v38  ;;  %v3821_v5 = vsub.f32 %v12633_v13, %v12626_v38  ;;  %v4319_v0 = vmul.f32 %v4030_v6, %v3815_v49 }
 0x63a   :  { %5157 = vst [vmem:[#allocation7 + $0x8e8] sm:$0xff] %v4863_v52  ;;  %5158 = vst.msk [vmem:[#allocation7 + $0x8f0] sm:$0xff] %vm640_vm1, %v4864_v34  ;;  %v4320_v8 = vmul.f32 %v4030_v6, %v3816_v33  ;;  %v4321_v25 = vmul.f32 %v4030_v6, %v3817_v43  ;;  %v4322_v36 = vmul.f32 %v4030_v6, %v3818_v58 }
 0x63b   :  { %v4323_v2 = vmul.f32 %v4030_v6, %v3819_v55  ;;  %v4324_v54 = vmul.f32 %v4030_v6, %v3820_v37  ;;  %v4325_v62 = vmul.f32 %v4030_v6, %v3821_v5  ;;  %v4865_v44 = vadd.f32 %v4576_v35, %v4319_v0 }
 0x63c   :  { %v4866_v42 = vadd.f32 %v4576_v35, %v4320_v8  ;;  %v4867_v27 = vadd.f32 %v4576_v35, %v4321_v25  ;;  %v4868_v40 = vadd.f32 %v4576_v35, %v4322_v36 }
 0x63d   :  { %v4869_v24 = vadd.f32 %v4576_v35, %v4323_v2  ;;  %v4870_v28 = vadd.f32 %v4576_v35, %v4324_v54  ;;  %v4871_v53 = vadd.f32 %v4576_v35, %v4325_v62  ;;  %5159 = vst [vmem:[#allocation7 + $0x8f8] sm:$0xff] %v4865_v44 }
 0x63e   :  { %5160 = vst [vmem:[#allocation7 + $0x900] sm:$0xff] %v4866_v42  ;;  %5161 = vst [vmem:[#allocation7 + $0x908] sm:$0xff] %v4867_v27 }
 0x63f   :  { %5162 = vst [vmem:[#allocation7 + $0x910] sm:$0xff] %v4868_v40  ;;  %5163 = vst [vmem:[#allocation7 + $0x918] sm:$0xff] %v4869_v24 }
 0x640   :  { %5164 = vst [vmem:[#allocation7 + $0x920] sm:$0xff] %v4870_v28  ;;  %5165 = vst.msk [vmem:[#allocation7 + $0x928] sm:$0xff] %vm640_vm1, %v4871_v53 }
 0x641   :  { %5626 = shalt.err (!%p5623_p0)
}
 0x642   :  { %5177 = dma.vmem_to_hbm [thread:$0]  %s5172_s30, 37632, %s10616_s6, [#allocation4], %s5642_s24, %s5642_s24, %s5643_s25  }
 0x643   :  { %5639 = dma.done.wait [#allocation4], 37632  }
 0x644   :  { %5640 = vsyncadd [#allocation4], 4294929664 }
 0x645   :  { %5181 = vsyncpa [#allocation3], 1 }
 0x646   :  { %5182 = vsyncpa [#allocation6], 1 }
 0x647   :  { %5183 = vsyncpa [#allocation4], 1 }

</bundles_post_ra>
